<compile_context>
chip_gen: v5e
topology: v5e:2x2
jax: 0.10.0
libtpu: 0.0.40
codegen_flags: <defaults>
</compile_context>

<pallas_src>
import functools

import numpy as np
import jax
import jax.numpy as jnp
from jax.experimental import pallas as pl
from jax.experimental.pallas import tpu as pltpu


# --------------------------------------------------------------------------- #
# helpers
# --------------------------------------------------------------------------- #
def _round_up(x, m):
    return ((x + m - 1) // m) * m


def _pick_tile(dim, candidates):
    """Largest candidate tile that evenly divides `dim` (dim is pre-padded to 128/8)."""
    for t in candidates:
        if dim % t == 0:
            return t
    return dim


# --------------------------------------------------------------------------- #
# Pallas kernels
# --------------------------------------------------------------------------- #
def _matmul_bias_kernel(x_ref, w_ref, b_ref, o_ref, acc_ref, *, relu_in):
    """One (tm, tn) output tile of  relu?(X) @ W + b, reduced over the K grid axis."""
    @pl.when(pl.program_id(2) == 0)
    def _():
        acc_ref[...] = jnp.zeros_like(acc_ref)

    x = x_ref[...]                                   # bf16 tile
    if relu_in:                                      # fused ReLU of the *input* activation
        x = jnp.maximum(x, 0)
    acc_ref[...] += jnp.dot(x, w_ref[...], preferred_element_type=jnp.float32)

    @pl.when(pl.program_id(2) == pl.num_programs(2) - 1)
    def _():
        o_ref[...] = (acc_ref[...] + b_ref[...]).astype(o_ref.dtype)


def _maxpool_kernel(x_ref, o_ref, *, relu_in):
    """2x2 / stride-2 max pool on a (tm, 2, Wo, 2, C) view, optional fused ReLU."""
    x = x_ref[...]                                   # (tm, 2, Wo, 2, C)
    m = jnp.maximum(x[:, 0], x[:, 1])                # max over row pair   -> (tm, Wo, 2, C)
    m = jnp.max(m, axis=2)                           # max over col pair   -> (tm, Wo, C)
    if relu_in:                                      # relu(max(.)) == max(relu(.))
        m = jnp.maximum(m, 0.0)
    o_ref[...] = m


# --------------------------------------------------------------------------- #
# kernel wrappers
# --------------------------------------------------------------------------- #
def _matmul_bias(patches, w2d, b2d, relu_in):
    """patches: (M, K) bf16 (unpadded); w2d: (Kp, Np) bf16; b2d: (1, Np) f32."""
    M, K = patches.shape
    Kp, Np = w2d.shape

    tm = min(256, _round_up(M, 8))
    Mp = _round_up(M, tm)
    tn = _pick_tile(Np, (256, 128))
    tk = _pick_tile(Kp, (512, 384, 256, 128))

    if (Mp, Kp) != (M, K):
        patches = jnp.pad(patches, ((0, Mp - M), (0, Kp - K)))

    gm, gn, gk = Mp // tm, Np // tn, Kp // tk
    cost = pl.CostEstimate(
        flops=2 * Mp * Np * Kp,
        transcendentals=0,
        bytes_accessed=int(Mp * Kp * 2 * gn + Kp * Np * 2 * gm + Mp * Np * 4))

    return pl.pallas_call(
        functools.partial(_matmul_bias_kernel, relu_in=relu_in),
        out_shape=jax.ShapeDtypeStruct((Mp, Np), jnp.float32),
        grid=(gm, gn, gk),
        in_specs=[
            pl.BlockSpec((tm, tk), lambda i, j, k: (i, k)),
            pl.BlockSpec((tk, tn), lambda i, j, k: (k, j)),
            pl.BlockSpec((1, tn), lambda i, j, k: (0, j)),
        ],
        out_specs=pl.BlockSpec((tm, tn), lambda i, j, k: (i, j)),
        scratch_shapes=[pltpu.VMEM((tm, tn), jnp.float32)],
        compiler_params=pltpu.CompilerParams(
            dimension_semantics=("parallel", "parallel", "arbitrary")),
        cost_estimate=cost,
    )(patches, w2d, b2d)


def conv3x3(x, w2d, b2d, n_out, *, relu_in):
    """3x3, stride 1, pad 1 conv.  x: (B,H,W,Cin) NHWC fp32; w2d: prepped (Kp,Np) bf16."""
    B, H, W, Cin = x.shape
    M = B * H * W
    xb = x.astype(jnp.bfloat16)
    xp = jnp.pad(xb, ((0, 0), (1, 1), (1, 1), (0, 0)))
    # im2col (layout glue, bf16): column order = (ky, kx, cin), matching the prepped weights.
    cols = [xp[:, ky:ky + H, kx:kx + W, :] for ky in range(3) for kx in range(3)]
    patches = jnp.stack(cols, axis=3).reshape(M, 9 * Cin)
    y = _matmul_bias(patches, w2d, b2d, relu_in)
    return y[:M, :n_out].reshape(B, H, W, n_out)


def maxpool2x2(x, *, relu_in):
    """2x2 / stride 2 max pool on NHWC fp32 input via a single lane-dense Pallas kernel."""
    B, H, W, C = x.shape
    Ho, Wo = H // 2, W // 2
    M = B * Ho
    xv = x.reshape(M, 2, Wo, 2, C)                   # free row-major reshape, no extra copies
    tm = min(M, 256)
    out = pl.pallas_call(
        functools.partial(_maxpool_kernel, relu_in=relu_in),
        out_shape=jax.ShapeDtypeStruct((M, Wo, C), x.dtype),
        grid=(pl.cdiv(M, tm),),
        in_specs=[pl.BlockSpec((tm, 2, Wo, 2, C), lambda i: (i, 0, 0, 0, 0))],
        out_specs=pl.BlockSpec((tm, Wo, C), lambda i: (i, 0, 0)),
        compiler_params=pltpu.CompilerParams(dimension_semantics=("parallel",)),
    )(xv)
    return out.reshape(B, Ho, Wo, C)


# --------------------------------------------------------------------------- #
# VGG16 slice model (torchvision vgg16.features layers 0..24)
# --------------------------------------------------------------------------- #
VGG_CONVS = ((0, 3, 64), (2, 64, 64),
             (5, 64, 128), (7, 128, 128),
             (10, 128, 256), (12, 256, 256), (14, 256, 256),
             (17, 256, 512), (19, 512, 512), (21, 512, 512),
             (24, 512, 512))
COUT = {idx: cout for idx, _, cout in VGG_CONVS}


def init_vgg16_params(key):
    # TODO(synk): pretrained torchvision weights are not loadable here; deterministic He init.
    params = {}
    for idx, cin, cout in VGG_CONVS:
        key, wk, bk = jax.random.split(key, 3)
        w = jax.random.normal(wk, (cout, cin, 3, 3), jnp.float32) * jnp.sqrt(2.0 / (cin * 9))
        b = jax.random.normal(bk, (cout,), jnp.float32) * 0.05
        params[idx] = (w, b)
    return params


def prep_conv_params(params):
    """One-time hoisted weight prep: OIHW -> (9*Cin, Cout), pad K/N to 128, cast bf16."""
    prepped = {}
    for idx, (w, b) in params.items():
        cout, cin = int(w.shape[0]), int(w.shape[1])
        K, N = 9 * cin, cout
        Kp, Np = _round_up(K, 128), _round_up(N, 128)
        w2d = jnp.transpose(w, (2, 3, 1, 0)).reshape(K, N)            # (ky,kx,cin,cout)
        w2d = jnp.pad(w2d, ((0, Kp - K), (0, Np - N))).astype(jnp.bfloat16)
        b2d = jnp.pad(b, (0, Np - N)).astype(jnp.float32).reshape(1, Np)
        prepped[idx] = (w2d, b2d)
    return prepped


def vgg16_forward(x_nchw, prepped):
    """VGG16.forward: returns [h_relu1..h_relu5] (conv outputs at features idx 7,14,17,21,24),
    NCHW like PyTorch."""
    x = jnp.transpose(x_nchw, (0, 2, 3, 1)).astype(jnp.float32)       # NCHW -> NHWC

    def conv(t, idx, relu_in):
        w2d, b2d = prepped[idx]
        return conv3x3(t, w2d, b2d, COUT[idx], relu_in=relu_in)

    # slice1: Conv0, ReLU1, Conv2, ReLU3, Pool4, Conv5, ReLU6, Conv7
    a = conv(x, 0, False)
    a = conv(a, 2, True)
    a = maxpool2x2(a, relu_in=True)
    a = conv(a, 5, False)
    h1 = conv(a, 7, True)

    # slice2: ReLU8, Pool9, Conv10, ReLU11, Conv12, ReLU13, Conv14
    a = maxpool2x2(h1, relu_in=True)
    a = conv(a, 10, False)
    a = conv(a, 12, True)
    h2 = conv(a, 14, True)

    # slice3: ReLU15, Pool16, Conv17
    a = maxpool2x2(h2, relu_in=True)
    h3 = conv(a, 17, False)

    # slice4: ReLU18, Conv19, ReLU20, Conv21
    a = conv(h3, 19, True)
    h4 = conv(a, 21, True)

    # slice5: ReLU22, Pool23, Conv24
    a = maxpool2x2(h4, relu_in=True)
    h5 = conv(a, 24, False)

    return [jnp.transpose(h, (0, 3, 1, 2)) for h in (h1, h2, h3, h4, h5)]


# --------------------------------------------------------------------------- #
# Pure-JAX reference (NCHW, same bf16-in / fp32-accumulate numerics as the kernels)
# --------------------------------------------------------------------------- #
def _ref_conv(x, w, b):
    y = jax.lax.conv_general_dilated(
        x.astype(jnp.bfloat16), w.astype(jnp.bfloat16),
        window_strides=(1, 1), padding=((1, 1), (1, 1)),
        dimension_numbers=("NCHW", "OIHW", "NCHW"),
        preferred_element_type=jnp.float32)
    return y + b[None, :, None, None]


def _ref_pool(x):
    B, C, H, W = x.shape
    return x.reshape(B, C, H // 2, 2, W // 2, 2).max(axis=(3, 5))


def ref_forward(x, params):
    relu = lambda t: jnp.maximum(t, 0.0)
    a = _ref_conv(x, *params[0]); a = _ref_conv(relu(a), *params[2]); a = _ref_pool(relu(a))
    a = _ref_conv(a, *params[5]); h1 = _ref_conv(relu(a), *params[7])
    a = _ref_pool(relu(h1)); a = _ref_conv(a, *params[10])
    a = _ref_conv(relu(a), *params[12]); h2 = _ref_conv(relu(a), *params[14])
    a = _ref_pool(relu(h2)); h3 = _ref_conv(a, *params[17])
    a = _ref_conv(relu(h3), *params[19]); h4 = _ref_conv(relu(a), *params[21])
    a = _ref_pool(relu(h4)); h5 = _ref_conv(a, *params[24])
    return [h1, h2, h3, h4, h5]


# --------------------------------------------------------------------------- #
if __name__ == "__main__":
    key = jax.random.PRNGKey(0)
    B, C, H, W = 2, 3, 16, 16                      # VGG16 requires 3 input channels
    key, xk = jax.random.split(key)
    x = jax.random.normal(xk, (B, C, H, W), jnp.float32)
    params = init_vgg16_params(key)
    prepped = prep_conv_params(params)             # hoisted one-time weight prep

    outs = jax.block_until_ready(jax.jit(vgg16_forward)(x, prepped))
    refs = jax.block_until_ready(jax.jit(ref_forward)(x, params))

    expected = [(B, 128, H // 2, W // 2),
                (B, 256, H // 4, W // 4),
                (B, 512, H // 8, W // 8),
                (B, 512, H // 8, W // 8),
                (B, 512, H // 16, W // 16)]
    for o, r, s in zip(outs, refs, expected):
        assert o.shape == s, (o.shape, s)
        assert o.dtype == jnp.float32
        np.testing.assert_allclose(np.asarray(o), np.asarray(r), rtol=3e-2, atol=3e-2)

    print("KERNEL_OK")
</pallas_src>

<mosaic_0001>
module attributes {stable_mosaic.version = 11 : i64} {
  func.func @_matmul_bias_kernel(%arg0: i32, %arg1: i32, %arg2: i32, %arg3: memref<256x128xbf16, #tpu.memory_space<vmem>>, %arg4: memref<128x128xbf16, #tpu.memory_space<vmem>>, %arg5: memref<1x128xf32, #tpu.memory_space<vmem>>, %arg6: memref<256x128xf32, #tpu.memory_space<vmem>>, %arg7: memref<256x128xf32, #tpu.memory_space<vmem>>) attributes {dimension_semantics = [#tpu.dimension_semantics<parallel>, #tpu.dimension_semantics<parallel>, #tpu.dimension_semantics<arbitrary>], iteration_bounds = array<i64: 2, 1, 1>, scalar_prefetch = 0 : i64, scratch_operands = 1 : i64, tpu.core_type = #tpu.core_type<tc>, window_params = [{transform_indices = @transform_0, window_bounds = array<i64: 256, 128>}, {transform_indices = @transform_1, window_bounds = array<i64: 128, 128>}, {transform_indices = @transform_2, window_bounds = array<i64: 1, 128>}, {transform_indices = @transform_3, window_bounds = array<i64: 256, 128>}]} {
    %c0_i32 = arith.constant 0 : i32
    %0 = arith.cmpi eq, %arg2, %c0_i32 : i32
    %1 = arith.extui %0 : i1 to i32
    %c0_i32_0 = arith.constant 0 : i32
    %2 = arith.cmpi ne, %1, %c0_i32_0 : i32
    scf.if %2 {
      %cst_10 = arith.constant 0.000000e+00 : f32
      %12 = vector.broadcast %cst_10 : f32 to vector<256x128xf32>
      %c0_11 = arith.constant 0 : index
      %c0_12 = arith.constant 0 : index
      %13 = vector.load %arg7[%c0_11, %c0_12] : memref<256x128xf32, #tpu.memory_space<vmem>>, vector<256x128xf32>
      tpu.vector_store %arg7[%c0_11, %c0_12], %12 {strides = array<i32>} : memref<256x128xf32, #tpu.memory_space<vmem>>, vector<256x128xf32>,
    } else {
    }
    %c0 = arith.constant 0 : index
    %c0_1 = arith.constant 0 : index
    %3 = vector.load %arg3[%c0, %c0_1] : memref<256x128xbf16, #tpu.memory_space<vmem>>, vector<256x128xbf16>
    %c0_2 = arith.constant 0 : index
    %c0_3 = arith.constant 0 : index
    %4 = vector.load %arg7[%c0_2, %c0_3] : memref<256x128xf32, #tpu.memory_space<vmem>>, vector<256x128xf32>
    %c0_4 = arith.constant 0 : index
    %c0_5 = arith.constant 0 : index
    %5 = vector.load %arg4[%c0_4, %c0_5] : memref<128x128xbf16, #tpu.memory_space<vmem>>, vector<128x128xbf16>
    %cst = arith.constant dense<0.000000e+00> : vector<256x128xf32>
    %6 = tpu.matmul %3, %5, %cst {dimension_numbers = #tpu.dot_dimension_numbers<[1], [0], [0], [1], [0, 0, 1, 1], [], []>} : vector<256x128xbf16>, vector<128x128xbf16>, vector<256x128xf32> -> vector<256x128xf32>
    %7 = arith.addf %4, %6 : vector<256x128xf32>
    %c0_6 = arith.constant 0 : index
    %c0_7 = arith.constant 0 : index
    %8 = vector.load %arg7[%c0_6, %c0_7] : memref<256x128xf32, #tpu.memory_space<vmem>>, vector<256x128xf32>
    tpu.vector_store %arg7[%c0_6, %c0_7], %7 {strides = array<i32>} : memref<256x128xf32, #tpu.memory_space<vmem>>, vector<256x128xf32>,
    %c0_i32_8 = arith.constant 0 : i32
    %9 = arith.cmpi eq, %arg2, %c0_i32_8 : i32
    %10 = arith.extui %9 : i1 to i32
    %c0_i32_9 = arith.constant 0 : i32
    %11 = arith.cmpi ne, %10, %c0_i32_9 : i32
    scf.if %11 {
      %c0_10 = arith.constant 0 : index
      %c0_11 = arith.constant 0 : index
      %12 = vector.load %arg7[%c0_10, %c0_11] : memref<256x128xf32, #tpu.memory_space<vmem>>, vector<256x128xf32>
      %c0_12 = arith.constant 0 : index
      %c0_13 = arith.constant 0 : index
      %13 = vector.load %arg5[%c0_12, %c0_13] : memref<1x128xf32, #tpu.memory_space<vmem>>, vector<1x128xf32>
      %14 = vector.broadcast %13 : vector<1x128xf32> to vector<256x128xf32>
      %15 = arith.addf %12, %14 : vector<256x128xf32>
      %c0_14 = arith.constant 0 : index
      %c0_15 = arith.constant 0 : index
      %16 = vector.load %arg6[%c0_14, %c0_15] : memref<256x128xf32, #tpu.memory_space<vmem>>, vector<256x128xf32>
      tpu.vector_store %arg6[%c0_14, %c0_15], %15 {strides = array<i32>} : memref<256x128xf32, #tpu.memory_space<vmem>>, vector<256x128xf32>,
    } else {
    }
    return
  }
  func.func @transform_0(%arg0: i32, %arg1: i32, %arg2: i32) -> (i32, i32) {
    %c0_i32 = arith.constant 0 : i32
    return %arg0, %arg2 : i32, i32
  }
  func.func @transform_1(%arg0: i32, %arg1: i32, %arg2: i32) -> (i32, i32) {
    %c0_i32 = arith.constant 0 : i32
    return %arg2, %arg1 : i32, i32
  }
  func.func @transform_2(%arg0: i32, %arg1: i32, %arg2: i32) -> (i32, i32) {
    %c0_i32 = arith.constant 0 : i32
    %c0_i32_0 = arith.constant 0 : i32
    return %c0_i32, %arg1 : i32, i32
  }
  func.func @transform_3(%arg0: i32, %arg1: i32, %arg2: i32) -> (i32, i32) {
    %c0_i32 = arith.constant 0 : i32
    return %arg0, %arg1 : i32, i32
  }
}

module attributes {stable_mosaic.version = 11 : i64} {
  func.func @_matmul_bias_kernel(%arg0: i32, %arg1: i32, %arg2: i32, %arg3: memref<256x128xbf16, #tpu.memory_space<vmem>>, %arg4: memref<128x128xbf16, #tpu.memory_space<vmem>>, %arg5: memref<1x128xf32, #tpu.memory_space<vmem>>, %arg6: memref<256x128xf32, #tpu.memory_space<vmem>>, %arg7: memref<256x128xf32, #tpu.memory_space<vmem>>) attributes {dimension_semantics = [#tpu.dimension_semantics<parallel>, #tpu.dimension_semantics<parallel>, #tpu.dimension_semantics<arbitrary>], iteration_bounds = array<i64: 2, 1, 5>, scalar_prefetch = 0 : i64, scratch_operands = 1 : i64, tpu.core_type = #tpu.core_type<tc>, window_params = [{transform_indices = @transform_0, window_bounds = array<i64: 256, 128>}, {transform_indices = @transform_1, window_bounds = array<i64: 128, 128>}, {transform_indices = @transform_2, window_bounds = array<i64: 1, 128>}, {transform_indices = @transform_3, window_bounds = array<i64: 256, 128>}]} {
    %c0_i32 = arith.constant 0 : i32
    %0 = arith.cmpi eq, %arg2, %c0_i32 : i32
    %1 = arith.extui %0 : i1 to i32
    %c0_i32_0 = arith.constant 0 : i32
    %2 = arith.cmpi ne, %1, %c0_i32_0 : i32
    scf.if %2 {
      %cst_10 = arith.constant 0.000000e+00 : f32
      %14 = vector.broadcast %cst_10 : f32 to vector<256x128xf32>
      %c0_11 = arith.constant 0 : index
      %c0_12 = arith.constant 0 : index
      %15 = vector.load %arg7[%c0_11, %c0_12] : memref<256x128xf32, #tpu.memory_space<vmem>>, vector<256x128xf32>
      tpu.vector_store %arg7[%c0_11, %c0_12], %14 {strides = array<i32>} : memref<256x128xf32, #tpu.memory_space<vmem>>, vector<256x128xf32>,
    } else {
    }
    %c0 = arith.constant 0 : index
    %c0_1 = arith.constant 0 : index
    %3 = vector.load %arg3[%c0, %c0_1] : memref<256x128xbf16, #tpu.memory_space<vmem>>, vector<256x128xbf16>
    %cst = arith.constant 0.000000e+00 : bf16
    %4 = vector.broadcast %cst : bf16 to vector<256x128xbf16>
    %5 = arith.maximumf %3, %4 : vector<256x128xbf16>
    %c0_2 = arith.constant 0 : index
    %c0_3 = arith.constant 0 : index
    %6 = vector.load %arg7[%c0_2, %c0_3] : memref<256x128xf32, #tpu.memory_space<vmem>>, vector<256x128xf32>
    %c0_4 = arith.constant 0 : index
    %c0_5 = arith.constant 0 : index
    %7 = vector.load %arg4[%c0_4, %c0_5] : memref<128x128xbf16, #tpu.memory_space<vmem>>, vector<128x128xbf16>
    %cst_6 = arith.constant dense<0.000000e+00> : vector<256x128xf32>
    %8 = tpu.matmul %5, %7, %cst_6 {dimension_numbers = #tpu.dot_dimension_numbers<[1], [0], [0], [1], [0, 0, 1, 1], [], []>} : vector<256x128xbf16>, vector<128x128xbf16>, vector<256x128xf32> -> vector<256x128xf32>
    %9 = arith.addf %6, %8 : vector<256x128xf32>
    %c0_7 = arith.constant 0 : index
    %c0_8 = arith.constant 0 : index
    %10 = vector.load %arg7[%c0_7, %c0_8] : memref<256x128xf32, #tpu.memory_space<vmem>>, vector<256x128xf32>
    tpu.vector_store %arg7[%c0_7, %c0_8], %9 {strides = array<i32>} : memref<256x128xf32, #tpu.memory_space<vmem>>, vector<256x128xf32>,
    %c4_i32 = arith.constant 4 : i32
    %11 = arith.cmpi eq, %arg2, %c4_i32 : i32
    %12 = arith.extui %11 : i1 to i32
    %c0_i32_9 = arith.constant 0 : i32
    %13 = arith.cmpi ne, %12, %c0_i32_9 : i32
    scf.if %13 {
      %c0_10 = arith.constant 0 : index
      %c0_11 = arith.constant 0 : index
      %14 = vector.load %arg7[%c0_10, %c0_11] : memref<256x128xf32, #tpu.memory_space<vmem>>, vector<256x128xf32>
      %c0_12 = arith.constant 0 : index
      %c0_13 = arith.constant 0 : index
      %15 = vector.load %arg5[%c0_12, %c0_13] : memref<1x128xf32, #tpu.memory_space<vmem>>, vector<1x128xf32>
      %16 = vector.broadcast %15 : vector<1x128xf32> to vector<256x128xf32>
      %17 = arith.addf %14, %16 : vector<256x128xf32>
      %c0_14 = arith.constant 0 : index
      %c0_15 = arith.constant 0 : index
      %18 = vector.load %arg6[%c0_14, %c0_15] : memref<256x128xf32, #tpu.memory_space<vmem>>, vector<256x128xf32>
      tpu.vector_store %arg6[%c0_14, %c0_15], %17 {strides = array<i32>} : memref<256x128xf32, #tpu.memory_space<vmem>>, vector<256x128xf32>,
    } else {
    }
    return
  }
  func.func @transform_0(%arg0: i32, %arg1: i32, %arg2: i32) -> (i32, i32) {
    %c0_i32 = arith.constant 0 : i32
    return %arg0, %arg2 : i32, i32
  }
  func.func @transform_1(%arg0: i32, %arg1: i32, %arg2: i32) -> (i32, i32) {
    %c0_i32 = arith.constant 0 : i32
    return %arg2, %arg1 : i32, i32
  }
  func.func @transform_2(%arg0: i32, %arg1: i32, %arg2: i32) -> (i32, i32) {
    %c0_i32 = arith.constant 0 : i32
    %c0_i32_0 = arith.constant 0 : i32
    return %c0_i32, %arg1 : i32, i32
  }
  func.func @transform_3(%arg0: i32, %arg1: i32, %arg2: i32) -> (i32, i32) {
    %c0_i32 = arith.constant 0 : i32
    return %arg0, %arg1 : i32, i32
  }
}

module attributes {stable_mosaic.version = 11 : i64} {
  func.func @_maxpool_kernel(%arg0: i32, %arg1: memref<16x2x8x2x64xf32, #tpu.memory_space<vmem>>, %arg2: memref<16x8x64xf32, #tpu.memory_space<vmem>>) attributes {dimension_semantics = [#tpu.dimension_semantics<parallel>], iteration_bounds = array<i64: 1>, scalar_prefetch = 0 : i64, scratch_operands = 0 : i64, tpu.core_type = #tpu.core_type<tc>, window_params = [{transform_indices = @transform_0, window_bounds = array<i64: 16, 2, 8, 2, 64>}, {transform_indices = @transform_1, window_bounds = array<i64: 16, 8, 64>}]} {
    %c0 = arith.constant 0 : index
    %c0_0 = arith.constant 0 : index
    %c0_1 = arith.constant 0 : index
    %c0_2 = arith.constant 0 : index
    %c0_3 = arith.constant 0 : index
    %0 = vector.load %arg1[%c0, %c0_0, %c0_1, %c0_2, %c0_3] : memref<16x2x8x2x64xf32, #tpu.memory_space<vmem>>, vector<16x2x8x2x64xf32>
    %1 = vector.extract_strided_slice %0 {offsets = [0, 0, 0, 0, 0], sizes = [16, 1, 8, 2, 64], strides = [1, 1, 1, 1, 1]} : vector<16x2x8x2x64xf32> to vector<16x1x8x2x64xf32>
    %2 = vector.shape_cast %1 : vector<16x1x8x2x64xf32> to vector<16x8x2x64xf32>
    %3 = vector.extract_strided_slice %0 {offsets = [0, 1, 0, 0, 0], sizes = [16, 1, 8, 2, 64], strides = [1, 1, 1, 1, 1]} : vector<16x2x8x2x64xf32> to vector<16x1x8x2x64xf32>
    %4 = vector.shape_cast %3 : vector<16x1x8x2x64xf32> to vector<16x8x2x64xf32>
    %5 = arith.maximumf %2, %4 : vector<16x8x2x64xf32>
    %cst = arith.constant dense<0xFF800000> : vector<16x8x64xf32>
    %6 = vector.multi_reduction <maximumf>, %5, %cst [2] : vector<16x8x2x64xf32> to vector<16x8x64xf32>
    %cst_4 = arith.constant 0.000000e+00 : f32
    %7 = vector.broadcast %cst_4 : f32 to vector<16x8x64xf32>
    %8 = arith.maximumf %6, %7 : vector<16x8x64xf32>
    %c0_5 = arith.constant 0 : index
    %c0_6 = arith.constant 0 : index
    %c0_7 = arith.constant 0 : index
    %9 = vector.load %arg2[%c0_5, %c0_6, %c0_7] : memref<16x8x64xf32, #tpu.memory_space<vmem>>, vector<16x8x64xf32>
    tpu.vector_store %arg2[%c0_5, %c0_6, %c0_7], %8 {strides = array<i32>} : memref<16x8x64xf32, #tpu.memory_space<vmem>>, vector<16x8x64xf32>,
    return
  }
  func.func @transform_0(%arg0: i32) -> (i32, i32, i32, i32, i32) {
    %c0_i32 = arith.constant 0 : i32
    %c0_i32_0 = arith.constant 0 : i32
    %c0_i32_1 = arith.constant 0 : i32
    %c0_i32_2 = arith.constant 0 : i32
    %c0_i32_3 = arith.constant 0 : i32
    return %arg0, %c0_i32, %c0_i32_0, %c0_i32_1, %c0_i32_2 : i32, i32, i32, i32, i32
  }
  func.func @transform_1(%arg0: i32) -> (i32, i32, i32) {
    %c0_i32 = arith.constant 0 : i32
    %c0_i32_0 = arith.constant 0 : i32
    %c0_i32_1 = arith.constant 0 : i32
    return %arg0, %c0_i32, %c0_i32_0 : i32, i32, i32
  }
}

module attributes {stable_mosaic.version = 11 : i64} {
  func.func @_matmul_bias_kernel(%arg0: i32, %arg1: i32, %arg2: i32, %arg3: memref<128x128xbf16, #tpu.memory_space<vmem>>, %arg4: memref<128x128xbf16, #tpu.memory_space<vmem>>, %arg5: memref<1x128xf32, #tpu.memory_space<vmem>>, %arg6: memref<128x128xf32, #tpu.memory_space<vmem>>, %arg7: memref<128x128xf32, #tpu.memory_space<vmem>>) attributes {dimension_semantics = [#tpu.dimension_semantics<parallel>, #tpu.dimension_semantics<parallel>, #tpu.dimension_semantics<arbitrary>], iteration_bounds = array<i64: 1, 1, 5>, scalar_prefetch = 0 : i64, scratch_operands = 1 : i64, tpu.core_type = #tpu.core_type<tc>, window_params = [{transform_indices = @transform_0, window_bounds = array<i64: 128, 128>}, {transform_indices = @transform_1, window_bounds = array<i64: 128, 128>}, {transform_indices = @transform_2, window_bounds = array<i64: 1, 128>}, {transform_indices = @transform_3, window_bounds = array<i64: 128, 128>}]} {
    %c0_i32 = arith.constant 0 : i32
    %0 = arith.cmpi eq, %arg2, %c0_i32 : i32
    %1 = arith.extui %0 : i1 to i32
    %c0_i32_0 = arith.constant 0 : i32
    %2 = arith.cmpi ne, %1, %c0_i32_0 : i32
    scf.if %2 {
      %cst_9 = arith.constant 0.000000e+00 : f32
      %12 = vector.broadcast %cst_9 : f32 to vector<128x128xf32>
      %c0_10 = arith.constant 0 : index
      %c0_11 = arith.constant 0 : index
      %13 = vector.load %arg7[%c0_10, %c0_11] : memref<128x128xf32, #tpu.memory_space<vmem>>, vector<128x128xf32>
      tpu.vector_store %arg7[%c0_10, %c0_11], %12 {strides = array<i32>} : memref<128x128xf32, #tpu.memory_space<vmem>>, vector<128x128xf32>,
    } else {
    }
    %c0 = arith.constant 0 : index
    %c0_1 = arith.constant 0 : index
    %3 = vector.load %arg3[%c0, %c0_1] : memref<128x128xbf16, #tpu.memory_space<vmem>>, vector<128x128xbf16>
    %c0_2 = arith.constant 0 : index
    %c0_3 = arith.constant 0 : index
    %4 = vector.load %arg7[%c0_2, %c0_3] : memref<128x128xf32, #tpu.memory_space<vmem>>, vector<128x128xf32>
    %c0_4 = arith.constant 0 : index
    %c0_5 = arith.constant 0 : index
    %5 = vector.load %arg4[%c0_4, %c0_5] : memref<128x128xbf16, #tpu.memory_space<vmem>>, vector<128x128xbf16>
    %cst = arith.constant dense<0.000000e+00> : vector<128x128xf32>
    %6 = tpu.matmul %3, %5, %cst {dimension_numbers = #tpu.dot_dimension_numbers<[1], [0], [0], [1], [0, 0, 1, 1], [], []>} : vector<128x128xbf16>, vector<128x128xbf16>, vector<128x128xf32> -> vector<128x128xf32>
    %7 = arith.addf %4, %6 : vector<128x128xf32>
    %c0_6 = arith.constant 0 : index
    %c0_7 = arith.constant 0 : index
    %8 = vector.load %arg7[%c0_6, %c0_7] : memref<128x128xf32, #tpu.memory_space<vmem>>, vector<128x128xf32>
    tpu.vector_store %arg7[%c0_6, %c0_7], %7 {strides = array<i32>} : memref<128x128xf32, #tpu.memory_space<vmem>>, vector<128x128xf32>,
    %c4_i32 = arith.constant 4 : i32
    %9 = arith.cmpi eq, %arg2, %c4_i32 : i32
    %10 = arith.extui %9 : i1 to i32
    %c0_i32_8 = arith.constant 0 : i32
    %11 = arith.cmpi ne, %10, %c0_i32_8 : i32
    scf.if %11 {
      %c0_9 = arith.constant 0 : index
      %c0_10 = arith.constant 0 : index
      %12 = vector.load %arg7[%c0_9, %c0_10] : memref<128x128xf32, #tpu.memory_space<vmem>>, vector<128x128xf32>
      %c0_11 = arith.constant 0 : index
      %c0_12 = arith.constant 0 : index
      %13 = vector.load %arg5[%c0_11, %c0_12] : memref<1x128xf32, #tpu.memory_space<vmem>>, vector<1x128xf32>
      %14 = vector.broadcast %13 : vector<1x128xf32> to vector<128x128xf32>
      %15 = arith.addf %12, %14 : vector<128x128xf32>
      %c0_13 = arith.constant 0 : index
      %c0_14 = arith.constant 0 : index
      %16 = vector.load %arg6[%c0_13, %c0_14] : memref<128x128xf32, #tpu.memory_space<vmem>>, vector<128x128xf32>
      tpu.vector_store %arg6[%c0_13, %c0_14], %15 {strides = array<i32>} : memref<128x128xf32, #tpu.memory_space<vmem>>, vector<128x128xf32>,
    } else {
    }
    return
  }
  func.func @transform_0(%arg0: i32, %arg1: i32, %arg2: i32) -> (i32, i32) {
    %c0_i32 = arith.constant 0 : i32
    return %arg0, %arg2 : i32, i32
  }
  func.func @transform_1(%arg0: i32, %arg1: i32, %arg2: i32) -> (i32, i32) {
    %c0_i32 = arith.constant 0 : i32
    return %arg2, %arg1 : i32, i32
  }
  func.func @transform_2(%arg0: i32, %arg1: i32, %arg2: i32) -> (i32, i32) {
    %c0_i32 = arith.constant 0 : i32
    %c0_i32_0 = arith.constant 0 : i32
    return %c0_i32, %arg1 : i32, i32
  }
  func.func @transform_3(%arg0: i32, %arg1: i32, %arg2: i32) -> (i32, i32) {
    %c0_i32 = arith.constant 0 : i32
    return %arg0, %arg1 : i32, i32
  }
}

module attributes {stable_mosaic.version = 11 : i64} {
  func.func @_maxpool_kernel(%arg0: i32, %arg1: memref<8x2x4x2x128xf32, #tpu.memory_space<vmem>>, %arg2: memref<8x4x128xf32, #tpu.memory_space<vmem>>) attributes {dimension_semantics = [#tpu.dimension_semantics<parallel>], iteration_bounds = array<i64: 1>, scalar_prefetch = 0 : i64, scratch_operands = 0 : i64, tpu.core_type = #tpu.core_type<tc>, window_params = [{transform_indices = @transform_0, window_bounds = array<i64: 8, 2, 4, 2, 128>}, {transform_indices = @transform_1, window_bounds = array<i64: 8, 4, 128>}]} {
    %c0 = arith.constant 0 : index
    %c0_0 = arith.constant 0 : index
    %c0_1 = arith.constant 0 : index
    %c0_2 = arith.constant 0 : index
    %c0_3 = arith.constant 0 : index
    %0 = vector.load %arg1[%c0, %c0_0, %c0_1, %c0_2, %c0_3] : memref<8x2x4x2x128xf32, #tpu.memory_space<vmem>>, vector<8x2x4x2x128xf32>
    %1 = vector.extract_strided_slice %0 {offsets = [0, 0, 0, 0, 0], sizes = [8, 1, 4, 2, 128], strides = [1, 1, 1, 1, 1]} : vector<8x2x4x2x128xf32> to vector<8x1x4x2x128xf32>
    %2 = vector.shape_cast %1 : vector<8x1x4x2x128xf32> to vector<8x4x2x128xf32>
    %3 = vector.extract_strided_slice %0 {offsets = [0, 1, 0, 0, 0], sizes = [8, 1, 4, 2, 128], strides = [1, 1, 1, 1, 1]} : vector<8x2x4x2x128xf32> to vector<8x1x4x2x128xf32>
    %4 = vector.shape_cast %3 : vector<8x1x4x2x128xf32> to vector<8x4x2x128xf32>
    %5 = arith.maximumf %2, %4 : vector<8x4x2x128xf32>
    %cst = arith.constant dense<0xFF800000> : vector<8x4x128xf32>
    %6 = vector.multi_reduction <maximumf>, %5, %cst [2] : vector<8x4x2x128xf32> to vector<8x4x128xf32>
    %cst_4 = arith.constant 0.000000e+00 : f32
    %7 = vector.broadcast %cst_4 : f32 to vector<8x4x128xf32>
    %8 = arith.maximumf %6, %7 : vector<8x4x128xf32>
    %c0_5 = arith.constant 0 : index
    %c0_6 = arith.constant 0 : index
    %c0_7 = arith.constant 0 : index
    %9 = vector.load %arg2[%c0_5, %c0_6, %c0_7] : memref<8x4x128xf32, #tpu.memory_space<vmem>>, vector<8x4x128xf32>
    tpu.vector_store %arg2[%c0_5, %c0_6, %c0_7], %8 {strides = array<i32>} : memref<8x4x128xf32, #tpu.memory_space<vmem>>, vector<8x4x128xf32>,
    return
  }
  func.func @transform_0(%arg0: i32) -> (i32, i32, i32, i32, i32) {
    %c0_i32 = arith.constant 0 : i32
    %c0_i32_0 = arith.constant 0 : i32
    %c0_i32_1 = arith.constant 0 : i32
    %c0_i32_2 = arith.constant 0 : i32
    %c0_i32_3 = arith.constant 0 : i32
    return %arg0, %c0_i32, %c0_i32_0, %c0_i32_1, %c0_i32_2 : i32, i32, i32, i32, i32
  }
  func.func @transform_1(%arg0: i32) -> (i32, i32, i32) {
    %c0_i32 = arith.constant 0 : i32
    %c0_i32_0 = arith.constant 0 : i32
    %c0_i32_1 = arith.constant 0 : i32
    return %arg0, %c0_i32, %c0_i32_0 : i32, i32, i32
  }
}

module attributes {stable_mosaic.version = 11 : i64} {
  func.func @_matmul_bias_kernel(%arg0: i32, %arg1: i32, %arg2: i32, %arg3: memref<128x384xbf16, #tpu.memory_space<vmem>>, %arg4: memref<384x128xbf16, #tpu.memory_space<vmem>>, %arg5: memref<1x128xf32, #tpu.memory_space<vmem>>, %arg6: memref<128x128xf32, #tpu.memory_space<vmem>>, %arg7: memref<128x128xf32, #tpu.memory_space<vmem>>) attributes {dimension_semantics = [#tpu.dimension_semantics<parallel>, #tpu.dimension_semantics<parallel>, #tpu.dimension_semantics<arbitrary>], iteration_bounds = array<i64: 1, 1, 3>, scalar_prefetch = 0 : i64, scratch_operands = 1 : i64, tpu.core_type = #tpu.core_type<tc>, window_params = [{transform_indices = @transform_0, window_bounds = array<i64: 128, 384>}, {transform_indices = @transform_1, window_bounds = array<i64: 384, 128>}, {transform_indices = @transform_2, window_bounds = array<i64: 1, 128>}, {transform_indices = @transform_3, window_bounds = array<i64: 128, 128>}]} {
    %c0_i32 = arith.constant 0 : i32
    %0 = arith.cmpi eq, %arg2, %c0_i32 : i32
    %1 = arith.extui %0 : i1 to i32
    %c0_i32_0 = arith.constant 0 : i32
    %2 = arith.cmpi ne, %1, %c0_i32_0 : i32
    scf.if %2 {
      %cst_10 = arith.constant 0.000000e+00 : f32
      %14 = vector.broadcast %cst_10 : f32 to vector<128x128xf32>
      %c0_11 = arith.constant 0 : index
      %c0_12 = arith.constant 0 : index
      %15 = vector.load %arg7[%c0_11, %c0_12] : memref<128x128xf32, #tpu.memory_space<vmem>>, vector<128x128xf32>
      tpu.vector_store %arg7[%c0_11, %c0_12], %14 {strides = array<i32>} : memref<128x128xf32, #tpu.memory_space<vmem>>, vector<128x128xf32>,
    } else {
    }
    %c0 = arith.constant 0 : index
    %c0_1 = arith.constant 0 : index
    %3 = vector.load %arg3[%c0, %c0_1] : memref<128x384xbf16, #tpu.memory_space<vmem>>, vector<128x384xbf16>
    %cst = arith.constant 0.000000e+00 : bf16
    %4 = vector.broadcast %cst : bf16 to vector<128x384xbf16>
    %5 = arith.maximumf %3, %4 : vector<128x384xbf16>
    %c0_2 = arith.constant 0 : index
    %c0_3 = arith.constant 0 : index
    %6 = vector.load %arg7[%c0_2, %c0_3] : memref<128x128xf32, #tpu.memory_space<vmem>>, vector<128x128xf32>
    %c0_4 = arith.constant 0 : index
    %c0_5 = arith.constant 0 : index
    %7 = vector.load %arg4[%c0_4, %c0_5] : memref<384x128xbf16, #tpu.memory_space<vmem>>, vector<384x128xbf16>
    %cst_6 = arith.constant dense<0.000000e+00> : vector<128x128xf32>
    %8 = tpu.matmul %5, %7, %cst_6 {dimension_numbers = #tpu.dot_dimension_numbers<[1], [0], [0], [1], [0, 0, 1, 1], [], []>} : vector<128x384xbf16>, vector<384x128xbf16>, vector<128x128xf32> -> vector<128x128xf32>
    %9 = arith.addf %6, %8 : vector<128x128xf32>
    %c0_7 = arith.constant 0 : index
    %c0_8 = arith.constant 0 : index
    %10 = vector.load %arg7[%c0_7, %c0_8] : memref<128x128xf32, #tpu.memory_space<vmem>>, vector<128x128xf32>
    tpu.vector_store %arg7[%c0_7, %c0_8], %9 {strides = array<i32>} : memref<128x128xf32, #tpu.memory_space<vmem>>, vector<128x128xf32>,
    %c2_i32 = arith.constant 2 : i32
    %11 = arith.cmpi eq, %arg2, %c2_i32 : i32
    %12 = arith.extui %11 : i1 to i32
    %c0_i32_9 = arith.constant 0 : i32
    %13 = arith.cmpi ne, %12, %c0_i32_9 : i32
    scf.if %13 {
      %c0_10 = arith.constant 0 : index
      %c0_11 = arith.constant 0 : index
      %14 = vector.load %arg7[%c0_10, %c0_11] : memref<128x128xf32, #tpu.memory_space<vmem>>, vector<128x128xf32>
      %c0_12 = arith.constant 0 : index
      %c0_13 = arith.constant 0 : index
      %15 = vector.load %arg5[%c0_12, %c0_13] : memref<1x128xf32, #tpu.memory_space<vmem>>, vector<1x128xf32>
      %16 = vector.broadcast %15 : vector<1x128xf32> to vector<128x128xf32>
      %17 = arith.addf %14, %16 : vector<128x128xf32>
      %c0_14 = arith.constant 0 : index
      %c0_15 = arith.constant 0 : index
      %18 = vector.load %arg6[%c0_14, %c0_15] : memref<128x128xf32, #tpu.memory_space<vmem>>, vector<128x128xf32>
      tpu.vector_store %arg6[%c0_14, %c0_15], %17 {strides = array<i32>} : memref<128x128xf32, #tpu.memory_space<vmem>>, vector<128x128xf32>,
    } else {
    }
    return
  }
  func.func @transform_0(%arg0: i32, %arg1: i32, %arg2: i32) -> (i32, i32) {
    %c0_i32 = arith.constant 0 : i32
    return %arg0, %arg2 : i32, i32
  }
  func.func @transform_1(%arg0: i32, %arg1: i32, %arg2: i32) -> (i32, i32) {
    %c0_i32 = arith.constant 0 : i32
    return %arg2, %arg1 : i32, i32
  }
  func.func @transform_2(%arg0: i32, %arg1: i32, %arg2: i32) -> (i32, i32) {
    %c0_i32 = arith.constant 0 : i32
    %c0_i32_0 = arith.constant 0 : i32
    return %c0_i32, %arg1 : i32, i32
  }
  func.func @transform_3(%arg0: i32, %arg1: i32, %arg2: i32) -> (i32, i32) {
    %c0_i32 = arith.constant 0 : i32
    return %arg0, %arg1 : i32, i32
  }
}

module attributes {stable_mosaic.version = 11 : i64} {
  func.func @_matmul_bias_kernel(%arg0: i32, %arg1: i32, %arg2: i32, %arg3: memref<32x384xbf16, #tpu.memory_space<vmem>>, %arg4: memref<384x256xbf16, #tpu.memory_space<vmem>>, %arg5: memref<1x256xf32, #tpu.memory_space<vmem>>, %arg6: memref<32x256xf32, #tpu.memory_space<vmem>>, %arg7: memref<32x256xf32, #tpu.memory_space<vmem>>) attributes {dimension_semantics = [#tpu.dimension_semantics<parallel>, #tpu.dimension_semantics<parallel>, #tpu.dimension_semantics<arbitrary>], iteration_bounds = array<i64: 1, 1, 3>, scalar_prefetch = 0 : i64, scratch_operands = 1 : i64, tpu.core_type = #tpu.core_type<tc>, window_params = [{transform_indices = @transform_0, window_bounds = array<i64: 32, 384>}, {transform_indices = @transform_1, window_bounds = array<i64: 384, 256>}, {transform_indices = @transform_2, window_bounds = array<i64: 1, 256>}, {transform_indices = @transform_3, window_bounds = array<i64: 32, 256>}]} {
    %c0_i32 = arith.constant 0 : i32
    %0 = arith.cmpi eq, %arg2, %c0_i32 : i32
    %1 = arith.extui %0 : i1 to i32
    %c0_i32_0 = arith.constant 0 : i32
    %2 = arith.cmpi ne, %1, %c0_i32_0 : i32
    scf.if %2 {
      %cst_9 = arith.constant 0.000000e+00 : f32
      %12 = vector.broadcast %cst_9 : f32 to vector<32x256xf32>
      %c0_10 = arith.constant 0 : index
      %c0_11 = arith.constant 0 : index
      %13 = vector.load %arg7[%c0_10, %c0_11] : memref<32x256xf32, #tpu.memory_space<vmem>>, vector<32x256xf32>
      tpu.vector_store %arg7[%c0_10, %c0_11], %12 {strides = array<i32>} : memref<32x256xf32, #tpu.memory_space<vmem>>, vector<32x256xf32>,
    } else {
    }
    %c0 = arith.constant 0 : index
    %c0_1 = arith.constant 0 : index
    %3 = vector.load %arg3[%c0, %c0_1] : memref<32x384xbf16, #tpu.memory_space<vmem>>, vector<32x384xbf16>
    %c0_2 = arith.constant 0 : index
    %c0_3 = arith.constant 0 : index
    %4 = vector.load %arg7[%c0_2, %c0_3] : memref<32x256xf32, #tpu.memory_space<vmem>>, vector<32x256xf32>
    %c0_4 = arith.constant 0 : index
    %c0_5 = arith.constant 0 : index
    %5 = vector.load %arg4[%c0_4, %c0_5] : memref<384x256xbf16, #tpu.memory_space<vmem>>, vector<384x256xbf16>
    %cst = arith.constant dense<0.000000e+00> : vector<32x256xf32>
    %6 = tpu.matmul %3, %5, %cst {dimension_numbers = #tpu.dot_dimension_numbers<[1], [0], [0], [1], [0, 0, 1, 1], [], []>} : vector<32x384xbf16>, vector<384x256xbf16>, vector<32x256xf32> -> vector<32x256xf32>
    %7 = arith.addf %4, %6 : vector<32x256xf32>
    %c0_6 = arith.constant 0 : index
    %c0_7 = arith.constant 0 : index
    %8 = vector.load %arg7[%c0_6, %c0_7] : memref<32x256xf32, #tpu.memory_space<vmem>>, vector<32x256xf32>
    tpu.vector_store %arg7[%c0_6, %c0_7], %7 {strides = array<i32>} : memref<32x256xf32, #tpu.memory_space<vmem>>, vector<32x256xf32>,
    %c2_i32 = arith.constant 2 : i32
    %9 = arith.cmpi eq, %arg2, %c2_i32 : i32
    %10 = arith.extui %9 : i1 to i32
    %c0_i32_8 = arith.constant 0 : i32
    %11 = arith.cmpi ne, %10, %c0_i32_8 : i32
    scf.if %11 {
      %c0_9 = arith.constant 0 : index
      %c0_10 = arith.constant 0 : index
      %12 = vector.load %arg7[%c0_9, %c0_10] : memref<32x256xf32, #tpu.memory_space<vmem>>, vector<32x256xf32>
      %c0_11 = arith.constant 0 : index
      %c0_12 = arith.constant 0 : index
      %13 = vector.load %arg5[%c0_11, %c0_12] : memref<1x256xf32, #tpu.memory_space<vmem>>, vector<1x256xf32>
      %14 = vector.broadcast %13 : vector<1x256xf32> to vector<32x256xf32>
      %15 = arith.addf %12, %14 : vector<32x256xf32>
      %c0_13 = arith.constant 0 : index
      %c0_14 = arith.constant 0 : index
      %16 = vector.load %arg6[%c0_13, %c0_14] : memref<32x256xf32, #tpu.memory_space<vmem>>, vector<32x256xf32>
      tpu.vector_store %arg6[%c0_13, %c0_14], %15 {strides = array<i32>} : memref<32x256xf32, #tpu.memory_space<vmem>>, vector<32x256xf32>,
    } else {
    }
    return
  }
  func.func @transform_0(%arg0: i32, %arg1: i32, %arg2: i32) -> (i32, i32) {
    %c0_i32 = arith.constant 0 : i32
    return %arg0, %arg2 : i32, i32
  }
  func.func @transform_1(%arg0: i32, %arg1: i32, %arg2: i32) -> (i32, i32) {
    %c0_i32 = arith.constant 0 : i32
    return %arg2, %arg1 : i32, i32
  }
  func.func @transform_2(%arg0: i32, %arg1: i32, %arg2: i32) -> (i32, i32) {
    %c0_i32 = arith.constant 0 : i32
    %c0_i32_0 = arith.constant 0 : i32
    return %c0_i32, %arg1 : i32, i32
  }
  func.func @transform_3(%arg0: i32, %arg1: i32, %arg2: i32) -> (i32, i32) {
    %c0_i32 = arith.constant 0 : i32
    return %arg0, %arg1 : i32, i32
  }
}

module attributes {stable_mosaic.version = 11 : i64} {
  func.func @_matmul_bias_kernel(%arg0: i32, %arg1: i32, %arg2: i32, %arg3: memref<32x384xbf16, #tpu.memory_space<vmem>>, %arg4: memref<384x256xbf16, #tpu.memory_space<vmem>>, %arg5: memref<1x256xf32, #tpu.memory_space<vmem>>, %arg6: memref<32x256xf32, #tpu.memory_space<vmem>>, %arg7: memref<32x256xf32, #tpu.memory_space<vmem>>) attributes {dimension_semantics = [#tpu.dimension_semantics<parallel>, #tpu.dimension_semantics<parallel>, #tpu.dimension_semantics<arbitrary>], iteration_bounds = array<i64: 1, 1, 6>, scalar_prefetch = 0 : i64, scratch_operands = 1 : i64, tpu.core_type = #tpu.core_type<tc>, window_params = [{transform_indices = @transform_0, window_bounds = array<i64: 32, 384>}, {transform_indices = @transform_1, window_bounds = array<i64: 384, 256>}, {transform_indices = @transform_2, window_bounds = array<i64: 1, 256>}, {transform_indices = @transform_3, window_bounds = array<i64: 32, 256>}]} {
    %c0_i32 = arith.constant 0 : i32
    %0 = arith.cmpi eq, %arg2, %c0_i32 : i32
    %1 = arith.extui %0 : i1 to i32
    %c0_i32_0 = arith.constant 0 : i32
    %2 = arith.cmpi ne, %1, %c0_i32_0 : i32
    scf.if %2 {
      %cst_10 = arith.constant 0.000000e+00 : f32
      %14 = vector.broadcast %cst_10 : f32 to vector<32x256xf32>
      %c0_11 = arith.constant 0 : index
      %c0_12 = arith.constant 0 : index
      %15 = vector.load %arg7[%c0_11, %c0_12] : memref<32x256xf32, #tpu.memory_space<vmem>>, vector<32x256xf32>
      tpu.vector_store %arg7[%c0_11, %c0_12], %14 {strides = array<i32>} : memref<32x256xf32, #tpu.memory_space<vmem>>, vector<32x256xf32>,
    } else {
    }
    %c0 = arith.constant 0 : index
    %c0_1 = arith.constant 0 : index
    %3 = vector.load %arg3[%c0, %c0_1] : memref<32x384xbf16, #tpu.memory_space<vmem>>, vector<32x384xbf16>
    %cst = arith.constant 0.000000e+00 : bf16
    %4 = vector.broadcast %cst : bf16 to vector<32x384xbf16>
    %5 = arith.maximumf %3, %4 : vector<32x384xbf16>
    %c0_2 = arith.constant 0 : index
    %c0_3 = arith.constant 0 : index
    %6 = vector.load %arg7[%c0_2, %c0_3] : memref<32x256xf32, #tpu.memory_space<vmem>>, vector<32x256xf32>
    %c0_4 = arith.constant 0 : index
    %c0_5 = arith.constant 0 : index
    %7 = vector.load %arg4[%c0_4, %c0_5] : memref<384x256xbf16, #tpu.memory_space<vmem>>, vector<384x256xbf16>
    %cst_6 = arith.constant dense<0.000000e+00> : vector<32x256xf32>
    %8 = tpu.matmul %5, %7, %cst_6 {dimension_numbers = #tpu.dot_dimension_numbers<[1], [0], [0], [1], [0, 0, 1, 1], [], []>} : vector<32x384xbf16>, vector<384x256xbf16>, vector<32x256xf32> -> vector<32x256xf32>
    %9 = arith.addf %6, %8 : vector<32x256xf32>
    %c0_7 = arith.constant 0 : index
    %c0_8 = arith.constant 0 : index
    %10 = vector.load %arg7[%c0_7, %c0_8] : memref<32x256xf32, #tpu.memory_space<vmem>>, vector<32x256xf32>
    tpu.vector_store %arg7[%c0_7, %c0_8], %9 {strides = array<i32>} : memref<32x256xf32, #tpu.memory_space<vmem>>, vector<32x256xf32>,
    %c5_i32 = arith.constant 5 : i32
    %11 = arith.cmpi eq, %arg2, %c5_i32 : i32
    %12 = arith.extui %11 : i1 to i32
    %c0_i32_9 = arith.constant 0 : i32
    %13 = arith.cmpi ne, %12, %c0_i32_9 : i32
    scf.if %13 {
      %c0_10 = arith.constant 0 : index
      %c0_11 = arith.constant 0 : index
      %14 = vector.load %arg7[%c0_10, %c0_11] : memref<32x256xf32, #tpu.memory_space<vmem>>, vector<32x256xf32>
      %c0_12 = arith.constant 0 : index
      %c0_13 = arith.constant 0 : index
      %15 = vector.load %arg5[%c0_12, %c0_13] : memref<1x256xf32, #tpu.memory_space<vmem>>, vector<1x256xf32>
      %16 = vector.broadcast %15 : vector<1x256xf32> to vector<32x256xf32>
      %17 = arith.addf %14, %16 : vector<32x256xf32>
      %c0_14 = arith.constant 0 : index
      %c0_15 = arith.constant 0 : index
      %18 = vector.load %arg6[%c0_14, %c0_15] : memref<32x256xf32, #tpu.memory_space<vmem>>, vector<32x256xf32>
      tpu.vector_store %arg6[%c0_14, %c0_15], %17 {strides = array<i32>} : memref<32x256xf32, #tpu.memory_space<vmem>>, vector<32x256xf32>,
    } else {
    }
    return
  }
  func.func @transform_0(%arg0: i32, %arg1: i32, %arg2: i32) -> (i32, i32) {
    %c0_i32 = arith.constant 0 : i32
    return %arg0, %arg2 : i32, i32
  }
  func.func @transform_1(%arg0: i32, %arg1: i32, %arg2: i32) -> (i32, i32) {
    %c0_i32 = arith.constant 0 : i32
    return %arg2, %arg1 : i32, i32
  }
  func.func @transform_2(%arg0: i32, %arg1: i32, %arg2: i32) -> (i32, i32) {
    %c0_i32 = arith.constant 0 : i32
    %c0_i32_0 = arith.constant 0 : i32
    return %c0_i32, %arg1 : i32, i32
  }
  func.func @transform_3(%arg0: i32, %arg1: i32, %arg2: i32) -> (i32, i32) {
    %c0_i32 = arith.constant 0 : i32
    return %arg0, %arg1 : i32, i32
  }
}

module attributes {stable_mosaic.version = 11 : i64} {
  func.func @_maxpool_kernel(%arg0: i32, %arg1: memref<4x2x2x2x256xf32, #tpu.memory_space<vmem>>, %arg2: memref<4x2x256xf32, #tpu.memory_space<vmem>>) attributes {dimension_semantics = [#tpu.dimension_semantics<parallel>], iteration_bounds = array<i64: 1>, scalar_prefetch = 0 : i64, scratch_operands = 0 : i64, tpu.core_type = #tpu.core_type<tc>, window_params = [{transform_indices = @transform_0, window_bounds = array<i64: 4, 2, 2, 2, 256>}, {transform_indices = @transform_1, window_bounds = array<i64: 4, 2, 256>}]} {
    %c0 = arith.constant 0 : index
    %c0_0 = arith.constant 0 : index
    %c0_1 = arith.constant 0 : index
    %c0_2 = arith.constant 0 : index
    %c0_3 = arith.constant 0 : index
    %0 = vector.load %arg1[%c0, %c0_0, %c0_1, %c0_2, %c0_3] : memref<4x2x2x2x256xf32, #tpu.memory_space<vmem>>, vector<4x2x2x2x256xf32>
    %1 = vector.extract_strided_slice %0 {offsets = [0, 0, 0, 0, 0], sizes = [4, 1, 2, 2, 256], strides = [1, 1, 1, 1, 1]} : vector<4x2x2x2x256xf32> to vector<4x1x2x2x256xf32>
    %2 = vector.shape_cast %1 : vector<4x1x2x2x256xf32> to vector<4x2x2x256xf32>
    %3 = vector.extract_strided_slice %0 {offsets = [0, 1, 0, 0, 0], sizes = [4, 1, 2, 2, 256], strides = [1, 1, 1, 1, 1]} : vector<4x2x2x2x256xf32> to vector<4x1x2x2x256xf32>
    %4 = vector.shape_cast %3 : vector<4x1x2x2x256xf32> to vector<4x2x2x256xf32>
    %5 = arith.maximumf %2, %4 : vector<4x2x2x256xf32>
    %cst = arith.constant dense<0xFF800000> : vector<4x2x256xf32>
    %6 = vector.multi_reduction <maximumf>, %5, %cst [2] : vector<4x2x2x256xf32> to vector<4x2x256xf32>
    %cst_4 = arith.constant 0.000000e+00 : f32
    %7 = vector.broadcast %cst_4 : f32 to vector<4x2x256xf32>
    %8 = arith.maximumf %6, %7 : vector<4x2x256xf32>
    %c0_5 = arith.constant 0 : index
    %c0_6 = arith.constant 0 : index
    %c0_7 = arith.constant 0 : index
    %9 = vector.load %arg2[%c0_5, %c0_6, %c0_7] : memref<4x2x256xf32, #tpu.memory_space<vmem>>, vector<4x2x256xf32>
    tpu.vector_store %arg2[%c0_5, %c0_6, %c0_7], %8 {strides = array<i32>} : memref<4x2x256xf32, #tpu.memory_space<vmem>>, vector<4x2x256xf32>,
    return
  }
  func.func @transform_0(%arg0: i32) -> (i32, i32, i32, i32, i32) {
    %c0_i32 = arith.constant 0 : i32
    %c0_i32_0 = arith.constant 0 : i32
    %c0_i32_1 = arith.constant 0 : i32
    %c0_i32_2 = arith.constant 0 : i32
    %c0_i32_3 = arith.constant 0 : i32
    return %arg0, %c0_i32, %c0_i32_0, %c0_i32_1, %c0_i32_2 : i32, i32, i32, i32, i32
  }
  func.func @transform_1(%arg0: i32) -> (i32, i32, i32) {
    %c0_i32 = arith.constant 0 : i32
    %c0_i32_0 = arith.constant 0 : i32
    %c0_i32_1 = arith.constant 0 : i32
    return %arg0, %c0_i32, %c0_i32_0 : i32, i32, i32
  }
}

module attributes {stable_mosaic.version = 11 : i64} {
  func.func @_matmul_bias_kernel(%arg0: i32, %arg1: i32, %arg2: i32, %arg3: memref<8x384xbf16, #tpu.memory_space<vmem>>, %arg4: memref<384x256xbf16, #tpu.memory_space<vmem>>, %arg5: memref<1x256xf32, #tpu.memory_space<vmem>>, %arg6: memref<8x256xf32, #tpu.memory_space<vmem>>, %arg7: memref<8x256xf32, #tpu.memory_space<vmem>>) attributes {dimension_semantics = [#tpu.dimension_semantics<parallel>, #tpu.dimension_semantics<parallel>, #tpu.dimension_semantics<arbitrary>], iteration_bounds = array<i64: 1, 2, 6>, scalar_prefetch = 0 : i64, scratch_operands = 1 : i64, tpu.core_type = #tpu.core_type<tc>, window_params = [{transform_indices = @transform_0, window_bounds = array<i64: 8, 384>}, {transform_indices = @transform_1, window_bounds = array<i64: 384, 256>}, {transform_indices = @transform_2, window_bounds = array<i64: 1, 256>}, {transform_indices = @transform_3, window_bounds = array<i64: 8, 256>}]} {
    %c0_i32 = arith.constant 0 : i32
    %0 = arith.cmpi eq, %arg2, %c0_i32 : i32
    %1 = arith.extui %0 : i1 to i32
    %c0_i32_0 = arith.constant 0 : i32
    %2 = arith.cmpi ne, %1, %c0_i32_0 : i32
    scf.if %2 {
      %cst_9 = arith.constant 0.000000e+00 : f32
      %12 = vector.broadcast %cst_9 : f32 to vector<8x256xf32>
      %c0_10 = arith.constant 0 : index
      %c0_11 = arith.constant 0 : index
      %13 = vector.load %arg7[%c0_10, %c0_11] : memref<8x256xf32, #tpu.memory_space<vmem>>, vector<8x256xf32>
      tpu.vector_store %arg7[%c0_10, %c0_11], %12 {strides = array<i32>} : memref<8x256xf32, #tpu.memory_space<vmem>>, vector<8x256xf32>,
    } else {
    }
    %c0 = arith.constant 0 : index
    %c0_1 = arith.constant 0 : index
    %3 = vector.load %arg3[%c0, %c0_1] : memref<8x384xbf16, #tpu.memory_space<vmem>>, vector<8x384xbf16>
    %c0_2 = arith.constant 0 : index
    %c0_3 = arith.constant 0 : index
    %4 = vector.load %arg7[%c0_2, %c0_3] : memref<8x256xf32, #tpu.memory_space<vmem>>, vector<8x256xf32>
    %c0_4 = arith.constant 0 : index
    %c0_5 = arith.constant 0 : index
    %5 = vector.load %arg4[%c0_4, %c0_5] : memref<384x256xbf16, #tpu.memory_space<vmem>>, vector<384x256xbf16>
    %cst = arith.constant dense<0.000000e+00> : vector<8x256xf32>
    %6 = tpu.matmul %3, %5, %cst {dimension_numbers = #tpu.dot_dimension_numbers<[1], [0], [0], [1], [0, 0, 1, 1], [], []>} : vector<8x384xbf16>, vector<384x256xbf16>, vector<8x256xf32> -> vector<8x256xf32>
    %7 = arith.addf %4, %6 : vector<8x256xf32>
    %c0_6 = arith.constant 0 : index
    %c0_7 = arith.constant 0 : index
    %8 = vector.load %arg7[%c0_6, %c0_7] : memref<8x256xf32, #tpu.memory_space<vmem>>, vector<8x256xf32>
    tpu.vector_store %arg7[%c0_6, %c0_7], %7 {strides = array<i32>} : memref<8x256xf32, #tpu.memory_space<vmem>>, vector<8x256xf32>,
    %c5_i32 = arith.constant 5 : i32
    %9 = arith.cmpi eq, %arg2, %c5_i32 : i32
    %10 = arith.extui %9 : i1 to i32
    %c0_i32_8 = arith.constant 0 : i32
    %11 = arith.cmpi ne, %10, %c0_i32_8 : i32
    scf.if %11 {
      %c0_9 = arith.constant 0 : index
      %c0_10 = arith.constant 0 : index
      %12 = vector.load %arg7[%c0_9, %c0_10] : memref<8x256xf32, #tpu.memory_space<vmem>>, vector<8x256xf32>
      %c0_11 = arith.constant 0 : index
      %c0_12 = arith.constant 0 : index
      %13 = vector.load %arg5[%c0_11, %c0_12] : memref<1x256xf32, #tpu.memory_space<vmem>>, vector<1x256xf32>
      %14 = vector.broadcast %13 : vector<1x256xf32> to vector<8x256xf32>
      %15 = arith.addf %12, %14 : vector<8x256xf32>
      %c0_13 = arith.constant 0 : index
      %c0_14 = arith.constant 0 : index
      %16 = vector.load %arg6[%c0_13, %c0_14] : memref<8x256xf32, #tpu.memory_space<vmem>>, vector<8x256xf32>
      tpu.vector_store %arg6[%c0_13, %c0_14], %15 {strides = array<i32>} : memref<8x256xf32, #tpu.memory_space<vmem>>, vector<8x256xf32>,
    } else {
    }
    return
  }
  func.func @transform_0(%arg0: i32, %arg1: i32, %arg2: i32) -> (i32, i32) {
    %c0_i32 = arith.constant 0 : i32
    return %arg0, %arg2 : i32, i32
  }
  func.func @transform_1(%arg0: i32, %arg1: i32, %arg2: i32) -> (i32, i32) {
    %c0_i32 = arith.constant 0 : i32
    return %arg2, %arg1 : i32, i32
  }
  func.func @transform_2(%arg0: i32, %arg1: i32, %arg2: i32) -> (i32, i32) {
    %c0_i32 = arith.constant 0 : i32
    %c0_i32_0 = arith.constant 0 : i32
    return %c0_i32, %arg1 : i32, i32
  }
  func.func @transform_3(%arg0: i32, %arg1: i32, %arg2: i32) -> (i32, i32) {
    %c0_i32 = arith.constant 0 : i32
    return %arg0, %arg1 : i32, i32
  }
}

module attributes {stable_mosaic.version = 11 : i64} {
  func.func @_matmul_bias_kernel(%arg0: i32, %arg1: i32, %arg2: i32, %arg3: memref<8x512xbf16, #tpu.memory_space<vmem>>, %arg4: memref<512x256xbf16, #tpu.memory_space<vmem>>, %arg5: memref<1x256xf32, #tpu.memory_space<vmem>>, %arg6: memref<8x256xf32, #tpu.memory_space<vmem>>, %arg7: memref<8x256xf32, #tpu.memory_space<vmem>>) attributes {dimension_semantics = [#tpu.dimension_semantics<parallel>, #tpu.dimension_semantics<parallel>, #tpu.dimension_semantics<arbitrary>], iteration_bounds = array<i64: 1, 2, 9>, scalar_prefetch = 0 : i64, scratch_operands = 1 : i64, tpu.core_type = #tpu.core_type<tc>, window_params = [{transform_indices = @transform_0, window_bounds = array<i64: 8, 512>}, {transform_indices = @transform_1, window_bounds = array<i64: 512, 256>}, {transform_indices = @transform_2, window_bounds = array<i64: 1, 256>}, {transform_indices = @transform_3, window_bounds = array<i64: 8, 256>}]} {
    %c0_i32 = arith.constant 0 : i32
    %0 = arith.cmpi eq, %arg2, %c0_i32 : i32
    %1 = arith.extui %0 : i1 to i32
    %c0_i32_0 = arith.constant 0 : i32
    %2 = arith.cmpi ne, %1, %c0_i32_0 : i32
    scf.if %2 {
      %cst_10 = arith.constant 0.000000e+00 : f32
      %14 = vector.broadcast %cst_10 : f32 to vector<8x256xf32>
      %c0_11 = arith.constant 0 : index
      %c0_12 = arith.constant 0 : index
      %15 = vector.load %arg7[%c0_11, %c0_12] : memref<8x256xf32, #tpu.memory_space<vmem>>, vector<8x256xf32>
      tpu.vector_store %arg7[%c0_11, %c0_12], %14 {strides = array<i32>} : memref<8x256xf32, #tpu.memory_space<vmem>>, vector<8x256xf32>,
    } else {
    }
    %c0 = arith.constant 0 : index
    %c0_1 = arith.constant 0 : index
    %3 = vector.load %arg3[%c0, %c0_1] : memref<8x512xbf16, #tpu.memory_space<vmem>>, vector<8x512xbf16>
    %cst = arith.constant 0.000000e+00 : bf16
    %4 = vector.broadcast %cst : bf16 to vector<8x512xbf16>
    %5 = arith.maximumf %3, %4 : vector<8x512xbf16>
    %c0_2 = arith.constant 0 : index
    %c0_3 = arith.constant 0 : index
    %6 = vector.load %arg7[%c0_2, %c0_3] : memref<8x256xf32, #tpu.memory_space<vmem>>, vector<8x256xf32>
    %c0_4 = arith.constant 0 : index
    %c0_5 = arith.constant 0 : index
    %7 = vector.load %arg4[%c0_4, %c0_5] : memref<512x256xbf16, #tpu.memory_space<vmem>>, vector<512x256xbf16>
    %cst_6 = arith.constant dense<0.000000e+00> : vector<8x256xf32>
    %8 = tpu.matmul %5, %7, %cst_6 {dimension_numbers = #tpu.dot_dimension_numbers<[1], [0], [0], [1], [0, 0, 1, 1], [], []>} : vector<8x512xbf16>, vector<512x256xbf16>, vector<8x256xf32> -> vector<8x256xf32>
    %9 = arith.addf %6, %8 : vector<8x256xf32>
    %c0_7 = arith.constant 0 : index
    %c0_8 = arith.constant 0 : index
    %10 = vector.load %arg7[%c0_7, %c0_8] : memref<8x256xf32, #tpu.memory_space<vmem>>, vector<8x256xf32>
    tpu.vector_store %arg7[%c0_7, %c0_8], %9 {strides = array<i32>} : memref<8x256xf32, #tpu.memory_space<vmem>>, vector<8x256xf32>,
    %c8_i32 = arith.constant 8 : i32
    %11 = arith.cmpi eq, %arg2, %c8_i32 : i32
    %12 = arith.extui %11 : i1 to i32
    %c0_i32_9 = arith.constant 0 : i32
    %13 = arith.cmpi ne, %12, %c0_i32_9 : i32
    scf.if %13 {
      %c0_10 = arith.constant 0 : index
      %c0_11 = arith.constant 0 : index
      %14 = vector.load %arg7[%c0_10, %c0_11] : memref<8x256xf32, #tpu.memory_space<vmem>>, vector<8x256xf32>
      %c0_12 = arith.constant 0 : index
      %c0_13 = arith.constant 0 : index
      %15 = vector.load %arg5[%c0_12, %c0_13] : memref<1x256xf32, #tpu.memory_space<vmem>>, vector<1x256xf32>
      %16 = vector.broadcast %15 : vector<1x256xf32> to vector<8x256xf32>
      %17 = arith.addf %14, %16 : vector<8x256xf32>
      %c0_14 = arith.constant 0 : index
      %c0_15 = arith.constant 0 : index
      %18 = vector.load %arg6[%c0_14, %c0_15] : memref<8x256xf32, #tpu.memory_space<vmem>>, vector<8x256xf32>
      tpu.vector_store %arg6[%c0_14, %c0_15], %17 {strides = array<i32>} : memref<8x256xf32, #tpu.memory_space<vmem>>, vector<8x256xf32>,
    } else {
    }
    return
  }
  func.func @transform_0(%arg0: i32, %arg1: i32, %arg2: i32) -> (i32, i32) {
    %c0_i32 = arith.constant 0 : i32
    return %arg0, %arg2 : i32, i32
  }
  func.func @transform_1(%arg0: i32, %arg1: i32, %arg2: i32) -> (i32, i32) {
    %c0_i32 = arith.constant 0 : i32
    return %arg2, %arg1 : i32, i32
  }
  func.func @transform_2(%arg0: i32, %arg1: i32, %arg2: i32) -> (i32, i32) {
    %c0_i32 = arith.constant 0 : i32
    %c0_i32_0 = arith.constant 0 : i32
    return %c0_i32, %arg1 : i32, i32
  }
  func.func @transform_3(%arg0: i32, %arg1: i32, %arg2: i32) -> (i32, i32) {
    %c0_i32 = arith.constant 0 : i32
    return %arg0, %arg1 : i32, i32
  }
}

module attributes {stable_mosaic.version = 11 : i64} {
  func.func @_maxpool_kernel(%arg0: i32, %arg1: memref<2x2x1x2x512xf32, #tpu.memory_space<vmem>>, %arg2: memref<2x1x512xf32, #tpu.memory_space<vmem>>) attributes {dimension_semantics = [#tpu.dimension_semantics<parallel>], iteration_bounds = array<i64: 1>, scalar_prefetch = 0 : i64, scratch_operands = 0 : i64, tpu.core_type = #tpu.core_type<tc>, window_params = [{transform_indices = @transform_0, window_bounds = array<i64: 2, 2, 1, 2, 512>}, {transform_indices = @transform_1, window_bounds = array<i64: 2, 1, 512>}]} {
    %c0 = arith.constant 0 : index
    %c0_0 = arith.constant 0 : index
    %c0_1 = arith.constant 0 : index
    %c0_2 = arith.constant 0 : index
    %c0_3 = arith.constant 0 : index
    %0 = vector.load %arg1[%c0, %c0_0, %c0_1, %c0_2, %c0_3] : memref<2x2x1x2x512xf32, #tpu.memory_space<vmem>>, vector<2x2x1x2x512xf32>
    %1 = vector.extract_strided_slice %0 {offsets = [0, 0, 0, 0, 0], sizes = [2, 1, 1, 2, 512], strides = [1, 1, 1, 1, 1]} : vector<2x2x1x2x512xf32> to vector<2x1x1x2x512xf32>
    %2 = vector.shape_cast %1 : vector<2x1x1x2x512xf32> to vector<2x1x2x512xf32>
    %3 = vector.extract_strided_slice %0 {offsets = [0, 1, 0, 0, 0], sizes = [2, 1, 1, 2, 512], strides = [1, 1, 1, 1, 1]} : vector<2x2x1x2x512xf32> to vector<2x1x1x2x512xf32>
    %4 = vector.shape_cast %3 : vector<2x1x1x2x512xf32> to vector<2x1x2x512xf32>
    %5 = arith.maximumf %2, %4 : vector<2x1x2x512xf32>
    %cst = arith.constant dense<0xFF800000> : vector<2x1x512xf32>
    %6 = vector.multi_reduction <maximumf>, %5, %cst [2] : vector<2x1x2x512xf32> to vector<2x1x512xf32>
    %cst_4 = arith.constant 0.000000e+00 : f32
    %7 = vector.broadcast %cst_4 : f32 to vector<2x1x512xf32>
    %8 = arith.maximumf %6, %7 : vector<2x1x512xf32>
    %c0_5 = arith.constant 0 : index
    %c0_6 = arith.constant 0 : index
    %c0_7 = arith.constant 0 : index
    %9 = vector.load %arg2[%c0_5, %c0_6, %c0_7] : memref<2x1x512xf32, #tpu.memory_space<vmem>>, vector<2x1x512xf32>
    tpu.vector_store %arg2[%c0_5, %c0_6, %c0_7], %8 {strides = array<i32>} : memref<2x1x512xf32, #tpu.memory_space<vmem>>, vector<2x1x512xf32>,
    return
  }
  func.func @transform_0(%arg0: i32) -> (i32, i32, i32, i32, i32) {
    %c0_i32 = arith.constant 0 : i32
    %c0_i32_0 = arith.constant 0 : i32
    %c0_i32_1 = arith.constant 0 : i32
    %c0_i32_2 = arith.constant 0 : i32
    %c0_i32_3 = arith.constant 0 : i32
    return %arg0, %c0_i32, %c0_i32_0, %c0_i32_1, %c0_i32_2 : i32, i32, i32, i32, i32
  }
  func.func @transform_1(%arg0: i32) -> (i32, i32, i32) {
    %c0_i32 = arith.constant 0 : i32
    %c0_i32_0 = arith.constant 0 : i32
    %c0_i32_1 = arith.constant 0 : i32
    return %arg0, %c0_i32, %c0_i32_0 : i32, i32, i32
  }
}

module attributes {stable_mosaic.version = 11 : i64} {
  func.func @_matmul_bias_kernel(%arg0: i32, %arg1: i32, %arg2: i32, %arg3: memref<8x512xbf16, #tpu.memory_space<vmem>>, %arg4: memref<512x256xbf16, #tpu.memory_space<vmem>>, %arg5: memref<1x256xf32, #tpu.memory_space<vmem>>, %arg6: memref<8x256xf32, #tpu.memory_space<vmem>>, %arg7: memref<8x256xf32, #tpu.memory_space<vmem>>) attributes {dimension_semantics = [#tpu.dimension_semantics<parallel>, #tpu.dimension_semantics<parallel>, #tpu.dimension_semantics<arbitrary>], iteration_bounds = array<i64: 1, 2, 9>, scalar_prefetch = 0 : i64, scratch_operands = 1 : i64, tpu.core_type = #tpu.core_type<tc>, window_params = [{transform_indices = @transform_0, window_bounds = array<i64: 8, 512>}, {transform_indices = @transform_1, window_bounds = array<i64: 512, 256>}, {transform_indices = @transform_2, window_bounds = array<i64: 1, 256>}, {transform_indices = @transform_3, window_bounds = array<i64: 8, 256>}]} {
    %c0_i32 = arith.constant 0 : i32
    %0 = arith.cmpi eq, %arg2, %c0_i32 : i32
    %1 = arith.extui %0 : i1 to i32
    %c0_i32_0 = arith.constant 0 : i32
    %2 = arith.cmpi ne, %1, %c0_i32_0 : i32
    scf.if %2 {
      %cst_9 = arith.constant 0.000000e+00 : f32
      %12 = vector.broadcast %cst_9 : f32 to vector<8x256xf32>
      %c0_10 = arith.constant 0 : index
      %c0_11 = arith.constant 0 : index
      %13 = vector.load %arg7[%c0_10, %c0_11] : memref<8x256xf32, #tpu.memory_space<vmem>>, vector<8x256xf32>
      tpu.vector_store %arg7[%c0_10, %c0_11], %12 {strides = array<i32>} : memref<8x256xf32, #tpu.memory_space<vmem>>, vector<8x256xf32>,
    } else {
    }
    %c0 = arith.constant 0 : index
    %c0_1 = arith.constant 0 : index
    %3 = vector.load %arg3[%c0, %c0_1] : memref<8x512xbf16, #tpu.memory_space<vmem>>, vector<8x512xbf16>
    %c0_2 = arith.constant 0 : index
    %c0_3 = arith.constant 0 : index
    %4 = vector.load %arg7[%c0_2, %c0_3] : memref<8x256xf32, #tpu.memory_space<vmem>>, vector<8x256xf32>
    %c0_4 = arith.constant 0 : index
    %c0_5 = arith.constant 0 : index
    %5 = vector.load %arg4[%c0_4, %c0_5] : memref<512x256xbf16, #tpu.memory_space<vmem>>, vector<512x256xbf16>
    %cst = arith.constant dense<0.000000e+00> : vector<8x256xf32>
    %6 = tpu.matmul %3, %5, %cst {dimension_numbers = #tpu.dot_dimension_numbers<[1], [0], [0], [1], [0, 0, 1, 1], [], []>} : vector<8x512xbf16>, vector<512x256xbf16>, vector<8x256xf32> -> vector<8x256xf32>
    %7 = arith.addf %4, %6 : vector<8x256xf32>
    %c0_6 = arith.constant 0 : index
    %c0_7 = arith.constant 0 : index
    %8 = vector.load %arg7[%c0_6, %c0_7] : memref<8x256xf32, #tpu.memory_space<vmem>>, vector<8x256xf32>
    tpu.vector_store %arg7[%c0_6, %c0_7], %7 {strides = array<i32>} : memref<8x256xf32, #tpu.memory_space<vmem>>, vector<8x256xf32>,
    %c8_i32 = arith.constant 8 : i32
    %9 = arith.cmpi eq, %arg2, %c8_i32 : i32
    %10 = arith.extui %9 : i1 to i32
    %c0_i32_8 = arith.constant 0 : i32
    %11 = arith.cmpi ne, %10, %c0_i32_8 : i32
    scf.if %11 {
      %c0_9 = arith.constant 0 : index
      %c0_10 = arith.constant 0 : index
      %12 = vector.load %arg7[%c0_9, %c0_10] : memref<8x256xf32, #tpu.memory_space<vmem>>, vector<8x256xf32>
      %c0_11 = arith.constant 0 : index
      %c0_12 = arith.constant 0 : index
      %13 = vector.load %arg5[%c0_11, %c0_12] : memref<1x256xf32, #tpu.memory_space<vmem>>, vector<1x256xf32>
      %14 = vector.broadcast %13 : vector<1x256xf32> to vector<8x256xf32>
      %15 = arith.addf %12, %14 : vector<8x256xf32>
      %c0_13 = arith.constant 0 : index
      %c0_14 = arith.constant 0 : index
      %16 = vector.load %arg6[%c0_13, %c0_14] : memref<8x256xf32, #tpu.memory_space<vmem>>, vector<8x256xf32>
      tpu.vector_store %arg6[%c0_13, %c0_14], %15 {strides = array<i32>} : memref<8x256xf32, #tpu.memory_space<vmem>>, vector<8x256xf32>,
    } else {
    }
    return
  }
  func.func @transform_0(%arg0: i32, %arg1: i32, %arg2: i32) -> (i32, i32) {
    %c0_i32 = arith.constant 0 : i32
    return %arg0, %arg2 : i32, i32
  }
  func.func @transform_1(%arg0: i32, %arg1: i32, %arg2: i32) -> (i32, i32) {
    %c0_i32 = arith.constant 0 : i32
    return %arg2, %arg1 : i32, i32
  }
  func.func @transform_2(%arg0: i32, %arg1: i32, %arg2: i32) -> (i32, i32) {
    %c0_i32 = arith.constant 0 : i32
    %c0_i32_0 = arith.constant 0 : i32
    return %c0_i32, %arg1 : i32, i32
  }
  func.func @transform_3(%arg0: i32, %arg1: i32, %arg2: i32) -> (i32, i32) {
    %c0_i32 = arith.constant 0 : i32
    return %arg0, %arg1 : i32, i32
  }
}

</mosaic_0001>

<bundles_post_ra>
// kernel: vgg16_forward.15
= control target key start
LH: loop header
LB: loop body
LE: loop exit
PB: predicated region body
PF: predicated region fallthrough
CT: control target
= control target key end

     0   :  { %s1112_s12 = smov 0   ;;  %s1114_s13 = smov 0   ;;  %s1265_s0 = inlined_call_operand.vmem [shape: bf16[512,128], index: 0, kind: input, shape index: {}]   ;;  %s1266_s1 = inlined_call_operand.vmem [shape: bf16[128,128], index: 1, kind: input, shape index: {}]   ;;  %s1267_s2 = inlined_call_operand.vmem [shape: f32[1,128], index: 2, kind: input, shape index: {}]   ;;  %s1268_s3 = inlined_call_operand.vmem [shape: f32[512,128], index: 3, kind: output, shape index: {}]  }
   0x1   :  { %s1116_s14 = smov 0  }
   0x2 LB: > { %s32_s15 = sadd.s32 1, %s1086_s13  ;;  %p892_p0 = scmp.ge.s32.totalorder %s1090_s14, 1  ;;  %s1090_s14 = sphi %s1116_s14, %s13_s14   ;;  %s1086_s13 = sphi %s1114_s13, %s1270_s13   ;;  %s1082_s12 = sphi %s1112_s12, %s1269_s12  }
   0x3   : > { %p34_p1 = scmp.ge.s32.totalorder %s32_s15, 2  ;;  %p188_p2 = scmp.lt.s32.totalorder %s1090_s14, 3 }
   0x5   : > { %s1272_s15 = smov (%p34_p1, %s32_s15), 0  ;;  %p189_p3 = pnand %p892_p0, %p188_p2 }
   0x6   : > { %s893_s24 = sshll.u32 (!%p189_p3), %s1082_s12, 5 }
   0x7   : > { %192 = sbr.rel (%p189_p3) target bundleno = 237 (0xed), region = 32  ;;  %p230_p4 = scmp.lt.s32.totalorder (!%p189_p3), %s893_s24, 63 }
   0xc   : > { %v1018_v0 = vld [vmem:[%s1266_s1 + $0x38] sm:$0xff]  ;;  %v1017_v1 = vld [vmem:[%s1266_s1 + $0x30] sm:$0xff]  ;;  %v1016_v2 = vld [vmem:[%s1266_s1 + $0x28] sm:$0xff]  ;;  %s1274_s24 = smov (!%p230_p4, %s893_s24), 63 }
   0xd   : > { %519 = vmatpush.bf16.msra.mxu0 %v1018_v0  ;;  %1019 = vmatpush.bf16.msra.mxu1 %v1018_v0  ;;  %v1015_v3 = vld [vmem:[%s1266_s1 + $0x20] sm:$0xff]  ;;  %v1014_v4 = vld [vmem:[%s1266_s1 + $0x18] sm:$0xff]  ;;  %v1013_v5 = vld [vmem:[%s1266_s1 + $0x10] sm:$0xff]  ;;  %s894_s4 = sshll.u32 %s1274_s24, 2  ;;  %s896_s10 = sshll.u32 %s1274_s24, 3 }
   0xe   : > { %1020 = vmatpush.bf16.msra.mxu2 %v1018_v0  ;;  %1021 = vmatpush.bf16.msra.mxu3 %v1018_v0  ;;  %v1012_v6 = vld [vmem:[%s1266_s1 + $0x8] sm:$0xff]  ;;  %v1011_v7 = vld [vmem:[%s1266_s1] sm:$0xff]  ;;  %s1163_s9 = scalar_lea.vmem %s1265_s0, %s894_s4  ;;  %s1190_s18 = scalar_lea.vmem %s1268_s3, %s896_s10 }
   0xf   : > { %v995_v8 = vld [vmem:[%s1163_s9] sm:$0xff]  ;;  %v996_v12 = vld [vmem:[%s1163_s9 + $0x8] sm:$0xff]  ;;  %v997_v16 = vld [vmem:[%s1163_s9 + $0x10] sm:$0xff] }
  0x10   : > { %v999_v9 = vld [vmem:[%s1163_s9 + $0x20] sm:$0xff]  ;;  %v1000_v13 = vld [vmem:[%s1163_s9 + $0x28] sm:$0xff]  ;;  %v1001_v17 = vld [vmem:[%s1163_s9 + $0x30] sm:$0xff] }
  0x11   : > { %520 = vmatpush.bf16.msra.mxu0 %v1017_v1  ;;  %1022 = vmatpush.bf16.msra.mxu1 %v1017_v1  ;;  %v1003_v10 = vld [vmem:[%s1163_s9 + $0x40] sm:$0xff]  ;;  %v1004_v14 = vld [vmem:[%s1163_s9 + $0x48] sm:$0xff]  ;;  %v1005_v18 = vld [vmem:[%s1163_s9 + $0x50] sm:$0xff] }
  0x12   : > { %1023 = vmatpush.bf16.msra.mxu2 %v1017_v1  ;;  %1024 = vmatpush.bf16.msra.mxu3 %v1017_v1  ;;  %v1007_v11 = vld [vmem:[%s1163_s9 + $0x60] sm:$0xff]  ;;  %v1008_v15 = vld [vmem:[%s1163_s9 + $0x68] sm:$0xff]  ;;  %v1009_v19 = vld [vmem:[%s1163_s9 + $0x70] sm:$0xff] }
  0x13   : > { %v998_v20 = vld [vmem:[%s1163_s9 + $0x18] sm:$0xff]  ;;  %v1185_v24 = vld [vmem:[%s1267_s2] ss:$0 sm:$0xff] }
  0x14   : > { %v1002_v21 = vld [vmem:[%s1163_s9 + $0x38] sm:$0xff] }
  0x15   : > { %521 = vmatpush.bf16.msra.mxu0 %v1016_v2  ;;  %1025 = vmatpush.bf16.msra.mxu1 %v1016_v2  ;;  %v1006_v22 = vld [vmem:[%s1163_s9 + $0x58] sm:$0xff] }
  0x16   : > { %1026 = vmatpush.bf16.msra.mxu2 %v1016_v2  ;;  %1027 = vmatpush.bf16.msra.mxu3 %v1016_v2  ;;  %v1010_v23 = vld [vmem:[%s1163_s9 + $0x78] sm:$0xff] }
  0x19   : > { %522 = vmatpush.bf16.msra.mxu0 %v1015_v3  ;;  %1028 = vmatpush.bf16.msra.mxu1 %v1015_v3 }
  0x1a   : > { %1029 = vmatpush.bf16.msra.mxu2 %v1015_v3  ;;  %1030 = vmatpush.bf16.msra.mxu3 %v1015_v3 }
  0x1d   : > { %523 = vmatpush.bf16.msra.mxu0 %v1014_v4  ;;  %1031 = vmatpush.bf16.msra.mxu1 %v1014_v4 }
  0x1e   : > { %1032 = vmatpush.bf16.msra.mxu2 %v1014_v4  ;;  %1033 = vmatpush.bf16.msra.mxu3 %v1014_v4 }
  0x21   : > { %524 = vmatpush.bf16.msra.mxu0 %v1013_v5  ;;  %1034 = vmatpush.bf16.msra.mxu1 %v1013_v5 }
  0x22   : > { %1035 = vmatpush.bf16.msra.mxu2 %v1013_v5  ;;  %1036 = vmatpush.bf16.msra.mxu3 %v1013_v5 }
  0x25   : > { %525 = vmatpush.bf16.msra.mxu0 %v1012_v6  ;;  %1037 = vmatpush.bf16.msra.mxu1 %v1012_v6 }
  0x26   : > { %1038 = vmatpush.bf16.msra.mxu2 %v1012_v6  ;;  %1039 = vmatpush.bf16.msra.mxu3 %v1012_v6 }
  0x29   : > { %526 = vmatpush.bf16.msra.mxu0 %v1011_v7  ;;  %1040 = vmatpush.bf16.msra.mxu1 %v1011_v7 }
  0x2a   : > { %1041 = vmatpush.bf16.msra.mxu2 %v1011_v7  ;;  %1042 = vmatpush.bf16.msra.mxu3 %v1011_v7 }
  0x2c   : > { %527 = vmatmul.bf16.vlgmr.msra.gmra.mxu0 %v995_v8  ;;  %547 = vmatmul.bf16.vlgmr.msra.gmra.mxu1 %v999_v9 }
  0x2d   : > { %567 = vmatmul.bf16.vlgmr.msra.gmra.mxu2 %v1003_v10  ;;  %587 = vmatmul.bf16.vlgmr.msra.gmra.mxu3 %v1007_v11 }
  0x3c   : > { %532 = vmatmul.bf16.gmra.mxu0 %v996_v12  ;;  %552 = vmatmul.bf16.gmra.mxu1 %v1000_v13 }
  0x3d   : > { %572 = vmatmul.bf16.gmra.mxu2 %v1004_v14  ;;  %592 = vmatmul.bf16.gmra.mxu3 %v1008_v15 }
  0x4c   : > { %537 = vmatmul.bf16.gmra.mxu0 %v997_v16  ;;  %557 = vmatmul.bf16.gmra.mxu1 %v1001_v17 }
  0x4d   : > { %577 = vmatmul.bf16.gmra.mxu2 %v1005_v18  ;;  %597 = vmatmul.bf16.gmra.mxu3 %v1009_v19 }
  0x5c   : > { %542 = vmatmul.bf16.gmra.mxu0 %v998_v20  ;;  %562 = vmatmul.bf16.gmra.mxu1 %v1002_v21 }
  0x5d   : > { %582 = vmatmul.bf16.gmra.mxu2 %v1006_v22  ;;  %602 = vmatmul.bf16.gmra.mxu3 %v1010_v23 }
  0xa9   : > { %v528_v25 = vpop.f32.mrf.mxu0  ;;  %v548_v26 = vpop.f32.mrf.mxu1 }
  0xaa   : > { %v711_v27 = vadd.f32 %v1185_v24, %v528_v25  ;;  %v719_v28 = vadd.f32 %v1185_v24, %v548_v26 }
  0xac   : > { %743 = vst [vmem:[%s1190_s18] sm:$0xff] %v711_v27 }
  0xad   : > { %751 = vst [vmem:[%s1190_s18 + $0x40] sm:$0xff] %v719_v28 }
  0xb0   : > { %v568_v29 = vpop.f32.mrf.mxu2  ;;  %v588_v30 = vpop.f32.mrf.mxu3 }
  0xb1   : > { %v727_v31 = vadd.f32 %v1185_v24, %v568_v29  ;;  %v735_v32 = vadd.f32 %v1185_v24, %v588_v30  ;;  %v530_v33 = vpop.f32.mrf.mxu0  ;;  %v550_v34 = vpop.f32.mrf.mxu1 }
  0xb2   : > { %v712_v35 = vadd.f32 %v1185_v24, %v530_v33  ;;  %v720_v36 = vadd.f32 %v1185_v24, %v550_v34 }
  0xb3   : > { %759 = vst [vmem:[%s1190_s18 + $0x80] sm:$0xff] %v727_v31 }
  0xb4   : > { %767 = vst [vmem:[%s1190_s18 + $0xc0] sm:$0xff] %v735_v32 }
  0xb5   : > { %744 = vst [vmem:[%s1190_s18 + $0x8] sm:$0xff] %v712_v35 }
  0xb6   : > { %752 = vst [vmem:[%s1190_s18 + $0x48] sm:$0xff] %v720_v36 }
  0xb8   : > { %v570_v37 = vpop.f32.mrf.mxu2  ;;  %v590_v38 = vpop.f32.mrf.mxu3 }
  0xb9   : > { %v728_v39 = vadd.f32 %v1185_v24, %v570_v37  ;;  %v736_v40 = vadd.f32 %v1185_v24, %v590_v38  ;;  %v533_v41 = vpop.f32.mrf.mxu0  ;;  %v553_v42 = vpop.f32.mrf.mxu1 }
  0xba   : > { %v713_v43 = vadd.f32 %v1185_v24, %v533_v41  ;;  %v721_v44 = vadd.f32 %v1185_v24, %v553_v42 }
  0xbb   : > { %760 = vst [vmem:[%s1190_s18 + $0x88] sm:$0xff] %v728_v39 }
  0xbc   : > { %768 = vst [vmem:[%s1190_s18 + $0xc8] sm:$0xff] %v736_v40 }
  0xbd   : > { %745 = vst [vmem:[%s1190_s18 + $0x10] sm:$0xff] %v713_v43 }
  0xbe   : > { %753 = vst [vmem:[%s1190_s18 + $0x50] sm:$0xff] %v721_v44 }
  0xc0   : > { %v573_v45 = vpop.f32.mrf.mxu2  ;;  %v593_v46 = vpop.f32.mrf.mxu3 }
  0xc1   : > { %v729_v47 = vadd.f32 %v1185_v24, %v573_v45  ;;  %v737_v48 = vadd.f32 %v1185_v24, %v593_v46  ;;  %v535_v49 = vpop.f32.mrf.mxu0  ;;  %v555_v50 = vpop.f32.mrf.mxu1 }
  0xc2   : > { %v714_v51 = vadd.f32 %v1185_v24, %v535_v49  ;;  %v722_v52 = vadd.f32 %v1185_v24, %v555_v50 }
  0xc3   : > { %761 = vst [vmem:[%s1190_s18 + $0x90] sm:$0xff] %v729_v47 }
  0xc4   : > { %769 = vst [vmem:[%s1190_s18 + $0xd0] sm:$0xff] %v737_v48 }
  0xc5   : > { %746 = vst [vmem:[%s1190_s18 + $0x18] sm:$0xff] %v714_v51 }
  0xc6   : > { %754 = vst [vmem:[%s1190_s18 + $0x58] sm:$0xff] %v722_v52 }
  0xc8   : > { %v575_v53 = vpop.f32.mrf.mxu2  ;;  %v595_v54 = vpop.f32.mrf.mxu3 }
  0xc9   : > { %v730_v55 = vadd.f32 %v1185_v24, %v575_v53  ;;  %v738_v56 = vadd.f32 %v1185_v24, %v595_v54  ;;  %v538_v57 = vpop.f32.mrf.mxu0  ;;  %v558_v58 = vpop.f32.mrf.mxu1 }
  0xca   : > { %v715_v59 = vadd.f32 %v1185_v24, %v538_v57  ;;  %v723_v60 = vadd.f32 %v1185_v24, %v558_v58 }
  0xcb   : > { %762 = vst [vmem:[%s1190_s18 + $0x98] sm:$0xff] %v730_v55 }
  0xcc   : > { %770 = vst [vmem:[%s1190_s18 + $0xd8] sm:$0xff] %v738_v56 }
  0xcd   : > { %747 = vst [vmem:[%s1190_s18 + $0x20] sm:$0xff] %v715_v59 }
  0xce   : > { %755 = vst [vmem:[%s1190_s18 + $0x60] sm:$0xff] %v723_v60 }
  0xd0   : > { %v578_v61 = vpop.f32.mrf.mxu2  ;;  %v598_v62 = vpop.f32.mrf.mxu3 }
  0xd1   : > { %v731_v63 = vadd.f32 %v1185_v24, %v578_v61  ;;  %v739_v0 = vadd.f32 %v1185_v24, %v598_v62  ;;  %v540_v1 = vpop.f32.mrf.mxu0  ;;  %v560_v2 = vpop.f32.mrf.mxu1 }
  0xd2   : > { %v716_v3 = vadd.f32 %v1185_v24, %v540_v1  ;;  %v724_v4 = vadd.f32 %v1185_v24, %v560_v2 }
  0xd3   : > { %763 = vst [vmem:[%s1190_s18 + $0xa0] sm:$0xff] %v731_v63 }
  0xd4   : > { %771 = vst [vmem:[%s1190_s18 + $0xe0] sm:$0xff] %v739_v0 }
  0xd5   : > { %748 = vst [vmem:[%s1190_s18 + $0x28] sm:$0xff] %v716_v3 }
  0xd6   : > { %756 = vst [vmem:[%s1190_s18 + $0x68] sm:$0xff] %v724_v4 }
  0xd8   : > { %v580_v5 = vpop.f32.mrf.mxu2  ;;  %v600_v6 = vpop.f32.mrf.mxu3 }
  0xd9   : > { %v732_v7 = vadd.f32 %v1185_v24, %v580_v5  ;;  %v740_v8 = vadd.f32 %v1185_v24, %v600_v6  ;;  %v543_v9 = vpop.f32.mrf.mxu0  ;;  %v563_v10 = vpop.f32.mrf.mxu1 }
  0xda   : > { %v717_v11 = vadd.f32 %v1185_v24, %v543_v9  ;;  %v725_v12 = vadd.f32 %v1185_v24, %v563_v10 }
  0xdb   : > { %764 = vst [vmem:[%s1190_s18 + $0xa8] sm:$0xff] %v732_v7 }
  0xdc   : > { %772 = vst [vmem:[%s1190_s18 + $0xe8] sm:$0xff] %v740_v8 }
  0xdd   : > { %749 = vst [vmem:[%s1190_s18 + $0x30] sm:$0xff] %v717_v11 }
  0xde   : > { %757 = vst [vmem:[%s1190_s18 + $0x70] sm:$0xff] %v725_v12 }
  0xe0   : > { %v583_v13 = vpop.f32.mrf.mxu2  ;;  %v603_v14 = vpop.f32.mrf.mxu3 }
  0xe1   : > { %v733_v15 = vadd.f32 %v1185_v24, %v583_v13  ;;  %v741_v16 = vadd.f32 %v1185_v24, %v603_v14  ;;  %v545_v17 = vpop.f32.mrf.mxu0  ;;  %v565_v18 = vpop.f32.mrf.mxu1 }
  0xe2   : > { %v718_v19 = vadd.f32 %v1185_v24, %v545_v17  ;;  %v726_v20 = vadd.f32 %v1185_v24, %v565_v18 }
  0xe3   : > { %765 = vst [vmem:[%s1190_s18 + $0xb0] sm:$0xff] %v733_v15 }
  0xe4   : > { %773 = vst [vmem:[%s1190_s18 + $0xf0] sm:$0xff] %v741_v16 }
  0xe5   : > { %750 = vst [vmem:[%s1190_s18 + $0x38] sm:$0xff] %v718_v19 }
  0xe6   : > { %758 = vst [vmem:[%s1190_s18 + $0x78] sm:$0xff] %v726_v20 }
  0xe8   : > { %v585_v21 = vpop.f32.mrf.mxu2  ;;  %v605_v22 = vpop.f32.mrf.mxu3 }
  0xe9   : > { %v734_v23 = vadd.f32 %v1185_v24, %v585_v21  ;;  %v742_v25 = vadd.f32 %v1185_v24, %v605_v22 }
  0xeb   : > { %766 = vst [vmem:[%s1190_s18 + $0xb8] sm:$0xff] %v734_v23 }
  0xec   : > { %774 = vst [vmem:[%s1190_s18 + $0xf8] sm:$0xff] %v742_v25 }
  0xed PF: > { %s13_s14 = sadd.s32 1, %s1090_s14   ;;  %s1269_s12 = smov %s1086_s13 }
  0xee   : > { %p10_p5 = scmp.ge.s32.totalorder %s13_s14, 4   ;;  %s1270_s13 = smov %s1272_s15 }
  0xf0   :  { %12 = sbr.rel (!%p10_p5) target bundleno = 2 (0x2), region = 76 }

// kernel: vgg16_forward.16
= control target key start
LH: loop header
LB: loop body
LE: loop exit
PB: predicated region body
PF: predicated region fallthrough
CT: control target
= control target key end

     0   :  { %s1334_s12 = smov 0   ;;  %s1336_s13 = smov 0   ;;  %s1595_s0 = inlined_call_operand.vmem [shape: bf16[512,640], index: 0, kind: input, shape index: {}]   ;;  %s1596_s1 = inlined_call_operand.vmem [shape: bf16[640,128], index: 1, kind: input, shape index: {}]   ;;  %s1597_s2 = inlined_call_operand.vmem [shape: f32[1,128], index: 2, kind: input, shape index: {}]   ;;  %s1598_s3 = inlined_call_operand.vmem [shape: f32[512,128], index: 3, kind: output, shape index: {}]  }
   0x1   :  { %s1338_s14 = smov 0   ;;  %s1340_s15 = smov 0  }
   0x2   :  { %s1342_s16 = smov 0   ;;  %s1344_s17 = smov 0  }
   0x3   :  { %s1346_s18 = smov 0  }
   0x4 LB: > { %s25_s19 = sadd.s32 1, %s1303_s16  ;;  %s32_s20 = sadd.s32 1, %s1307_s17  ;;  %s1311_s18 = sphi %s1346_s18, %s13_s18   ;;  %s1307_s17 = sphi %s1344_s17, %s1604_s17   ;;  %s1303_s16 = sphi %s1342_s16, %s1603_s16   ;;  %s1299_s15 = sphi %s1340_s15, %s1602_s15   ;;  %s1295_s14 = sphi %s1338_s14, %s1601_s14   ;;  %s1291_s13 = sphi %s1336_s13, %s1600_s13   ;;  %s1287_s12 = sphi %s1334_s12, %s1599_s12  }
   0x5   : > { %p26_p0 = scmp.ge.s32.totalorder %s25_s19, 5  ;;  %p48_p1 = scmp.ne.s32.totalorder %s1291_s13, %s1287_s12 }
   0x6   : > { %p49_p2 = scmp.eq.s32.totalorder %s1311_s18, 0  ;;  %s41_s24 = sadd.s32 1, %s1291_s13 }
   0x7   : > { %s1606_s19 = smov (%p26_p0, %s25_s19), 0  ;;  %s1608_s20 = smov (!%p26_p0, %s32_s20), %s1307_s17 }
   0x8   : > { %p50_p3 = por %p49_p2, %p48_p1  ;;  %p34_p4 = scmp.ge.s32.totalorder %s1608_s20, 2 }
   0x9   : > { %s37_s21 = ssub.s32 %s1303_s16, %s1606_s19  ;;  %p1040_p6 = scmp.ge.s32.totalorder %s1311_s18, 10 }
   0xa   : > { %s1610_s20 = smov (%p34_p4, %s1608_s20), 0 }
   0xb   : > { %s36_s22 = ssub.s32 %s1307_s17, %s1610_s20  ;;  %162 = sbr.rel (%p1040_p6) target bundleno = 55 (0x37), region = 20 }
   0xc   : > { %s38_s23 = sor.u32 %s37_s21, %s36_s22 }
   0xd   : > { %p39_p5 = scmp.eq.s32.totalorder %s38_s23, 0 }
   0xf   : > { %s1385_s25 = scalar_select %p39_p5, %s1291_s13, %s41_s24  }
  0x10   : > { %165 = sbr.rel (!%p50_p3) target bundleno = 55 (0x37), region = 24  ;;  %s167_s26 = sand.u32 (%p50_p3), 1, %s1291_s13  }
  0x11   : > { %s1198_s27 = smul.u32 (%p50_p3), 160, %s1307_s17  ;;  %s1041_s28 = sshll.u32 (%p50_p3), %s167_s26, 7 }
  0x12   : > { %s1399_s7 = scalar_lea.vmem (%p50_p3), [#allocation3], %s1041_s28 }
  0x13   : > { %s172_s29 = sadd.s32 (%p50_p3), %s1303_s16, %s1198_s27 }
  0x14   : > { %s1044_s30 = sshll.u32 (%p50_p3), %s172_s29, 2 }
  0x15   : > { %s1394_s6 = scalar_lea.vmem %s1595_s0, %s1044_s30 }
  0x16   : > { %v191_v0 = vld [vmem:[%s1394_s6] sm:$0xf]  ;;  %v193_v1 = vld [vmem:[%s1394_s6 + $0x14] sm:$0xf]  ;;  %v195_v2 = vld [vmem:[%s1394_s6 + $0x28] sm:$0xf] }
  0x17   : > { %192 = vst [vmem:[%s1399_s7] sm:$0xf] %v191_v0  ;;  %v197_v3 = vld [vmem:[%s1394_s6 + $0x3c] sm:$0xf]  ;;  %v199_v4 = vld [vmem:[%s1394_s6 + $0x50] sm:$0xf] }
  0x18   : > { %194 = vst [vmem:[%s1399_s7 + $0x4] sm:$0xf] %v193_v1  ;;  %v201_v5 = vld [vmem:[%s1394_s6 + $0x64] sm:$0xf]  ;;  %v203_v6 = vld [vmem:[%s1394_s6 + $0x78] sm:$0xf] }
  0x19   : > { %196 = vst [vmem:[%s1399_s7 + $0x8] sm:$0xf] %v195_v2  ;;  %v205_v7 = vld [vmem:[%s1394_s6 + $0x8c] sm:$0xf]  ;;  %v207_v8 = vld [vmem:[%s1394_s6 + $0xa0] sm:$0xf] }
  0x1a   : > { %198 = vst [vmem:[%s1399_s7 + $0xc] sm:$0xf] %v197_v3  ;;  %v209_v9 = vld [vmem:[%s1394_s6 + $0xb4] sm:$0xf]  ;;  %v211_v10 = vld [vmem:[%s1394_s6 + $0xc8] sm:$0xf] }
  0x1b   : > { %200 = vst [vmem:[%s1399_s7 + $0x10] sm:$0xf] %v199_v4  ;;  %v213_v11 = vld [vmem:[%s1394_s6 + $0xdc] sm:$0xf]  ;;  %v215_v12 = vld [vmem:[%s1394_s6 + $0xf0] sm:$0xf] }
  0x1c   : > { %202 = vst [vmem:[%s1399_s7 + $0x14] sm:$0xf] %v201_v5  ;;  %v217_v13 = vld [vmem:[%s1394_s6 + $0x104] sm:$0xf]  ;;  %v219_v14 = vld [vmem:[%s1394_s6 + $0x118] sm:$0xf] }
  0x1d   : > { %204 = vst [vmem:[%s1399_s7 + $0x18] sm:$0xf] %v203_v6  ;;  %v221_v15 = vld [vmem:[%s1394_s6 + $0x12c] sm:$0xf]  ;;  %v223_v16 = vld [vmem:[%s1394_s6 + $0x140] sm:$0xf] }
  0x1e   : > { %206 = vst [vmem:[%s1399_s7 + $0x1c] sm:$0xf] %v205_v7  ;;  %v225_v17 = vld [vmem:[%s1394_s6 + $0x154] sm:$0xf]  ;;  %v227_v18 = vld [vmem:[%s1394_s6 + $0x168] sm:$0xf] }
  0x1f   : > { %208 = vst [vmem:[%s1399_s7 + $0x20] sm:$0xf] %v207_v8  ;;  %v229_v19 = vld [vmem:[%s1394_s6 + $0x17c] sm:$0xf]  ;;  %v231_v20 = vld [vmem:[%s1394_s6 + $0x190] sm:$0xf] }
  0x20   : > { %210 = vst [vmem:[%s1399_s7 + $0x24] sm:$0xf] %v209_v9  ;;  %v233_v21 = vld [vmem:[%s1394_s6 + $0x1a4] sm:$0xf]  ;;  %v235_v22 = vld [vmem:[%s1394_s6 + $0x1b8] sm:$0xf] }
  0x21   : > { %212 = vst [vmem:[%s1399_s7 + $0x28] sm:$0xf] %v211_v10  ;;  %v237_v23 = vld [vmem:[%s1394_s6 + $0x1cc] sm:$0xf]  ;;  %v239_v24 = vld [vmem:[%s1394_s6 + $0x1e0] sm:$0xf] }
  0x22   : > { %214 = vst [vmem:[%s1399_s7 + $0x2c] sm:$0xf] %v213_v11  ;;  %v241_v25 = vld [vmem:[%s1394_s6 + $0x1f4] sm:$0xf]  ;;  %v243_v26 = vld [vmem:[%s1394_s6 + $0x208] sm:$0xf] }
  0x23   : > { %216 = vst [vmem:[%s1399_s7 + $0x30] sm:$0xf] %v215_v12  ;;  %v245_v27 = vld [vmem:[%s1394_s6 + $0x21c] sm:$0xf]  ;;  %v247_v28 = vld [vmem:[%s1394_s6 + $0x230] sm:$0xf] }
  0x24   : > { %218 = vst [vmem:[%s1399_s7 + $0x34] sm:$0xf] %v217_v13  ;;  %v249_v29 = vld [vmem:[%s1394_s6 + $0x244] sm:$0xf]  ;;  %v251_v30 = vld [vmem:[%s1394_s6 + $0x258] sm:$0xf] }
  0x25   : > { %220 = vst [vmem:[%s1399_s7 + $0x38] sm:$0xf] %v219_v14  ;;  %v253_v31 = vld [vmem:[%s1394_s6 + $0x26c] sm:$0xf] }
  0x26   : > { %222 = vst [vmem:[%s1399_s7 + $0x3c] sm:$0xf] %v221_v15 }
  0x27   : > { %224 = vst [vmem:[%s1399_s7 + $0x40] sm:$0xf] %v223_v16 }
  0x28   : > { %226 = vst [vmem:[%s1399_s7 + $0x44] sm:$0xf] %v225_v17 }
  0x29   : > { %228 = vst [vmem:[%s1399_s7 + $0x48] sm:$0xf] %v227_v18 }
  0x2a   : > { %230 = vst [vmem:[%s1399_s7 + $0x4c] sm:$0xf] %v229_v19 }
  0x2b   : > { %232 = vst [vmem:[%s1399_s7 + $0x50] sm:$0xf] %v231_v20 }
  0x2c   : > { %234 = vst [vmem:[%s1399_s7 + $0x54] sm:$0xf] %v233_v21 }
  0x2d   : > { %236 = vst [vmem:[%s1399_s7 + $0x58] sm:$0xf] %v235_v22 }
  0x2e   : > { %238 = vst [vmem:[%s1399_s7 + $0x5c] sm:$0xf] %v237_v23 }
  0x2f   : > { %240 = vst [vmem:[%s1399_s7 + $0x60] sm:$0xf] %v239_v24 }
  0x30   : > { %242 = vst [vmem:[%s1399_s7 + $0x64] sm:$0xf] %v241_v25 }
  0x31   : > { %244 = vst [vmem:[%s1399_s7 + $0x68] sm:$0xf] %v243_v26 }
  0x32   : > { %246 = vst [vmem:[%s1399_s7 + $0x6c] sm:$0xf] %v245_v27 }
  0x33   : > { %248 = vst [vmem:[%s1399_s7 + $0x70] sm:$0xf] %v247_v28 }
  0x34   : > { %250 = vst [vmem:[%s1399_s7 + $0x74] sm:$0xf] %v249_v29 }
  0x35   : > { %252 = vst [vmem:[%s1399_s7 + $0x78] sm:$0xf] %v251_v30 }
  0x36   : > { %254 = vst [vmem:[%s1399_s7 + $0x7c] sm:$0xf] %v253_v31 }
  0x37 PF: > { %p1045_p7 = scmp.ge.s32.totalorder %s1311_s18, 1  ;;  %p353_p8 = scmp.lt.s32.totalorder %s1311_s18, 11 }
  0x39   : > { %p354_p9 = pnand %p1045_p7, %p353_p8 }
  0x3a   : > { %s360_s8 = sand.u32 (!%p354_p9), 1, %s1287_s12   ;;  %s1047_s9 = sshll.u32 (!%p354_p9), %s1295_s14, 4 }
  0x3b   : > { %357 = sbr.rel (%p354_p9) target bundleno = 365 (0x16d), region = 69  ;;  %s1046_s10 = sshll.u32 (!%p354_p9), %s360_s8, 7 }
  0x3c   : > { %p399_p10 = scmp.lt.s32.totalorder (!%p354_p9), %s1047_s9, 79  ;;  %s1049_s11 = sshll.u32 (!%p354_p9), %s1299_s15, 5 }
  0x3d   : > { %p411_p11 = scmp.lt.s32.totalorder (!%p354_p9), %s1049_s11, 63  ;;  %s1477_s12 = scalar_lea.vmem (!%p354_p9), [#allocation3], %s1046_s10 }
  0x3e   : > { %p1051_p12 = scmp.ne.s32.totalorder (!%p354_p9), %s1295_s14, 0 }
  0x40   : > { %s1612_s9 = smov (!%p399_p10, %s1047_s9), 79  ;;  %s1614_s11 = smov (!%p411_p11, %s1049_s11), 63 }
  0x41   : > { %s1048_s21 = sshll.u32 %s1612_s9, 2  ;;  %s1050_s26 = sshll.u32 %s1614_s11, 3 }
  0x42   : > { %s1470_s24 = scalar_lea.vmem %s1596_s1, %s1048_s21  ;;  %s1475_s29 = scalar_lea.vmem %s1598_s3, %s1050_s26 }
  0x43   : > { %422 = sbr.rel (%p1051_p12) target bundleno = 105 (0x69), region = 77 }
  0x48   : > { %v1313_v32 = vmov 0.0  }
  0x49   : > { %423 = vst [vmem:[#allocation2 + $0xb0] sm:$0xff] %v1313_v32 }
  0x4a   : > { %424 = vst [vmem:[#allocation2] sm:$0xff] %v1313_v32 }
  0x4b   : > { %425 = vst [vmem:[#allocation2 + $0xd8] sm:$0xff] %v1313_v32 }
  0x4c   : > { %426 = vst [vmem:[#allocation2 + $0x18] sm:$0xff] %v1313_v32 }
  0x4d   : > { %427 = vst [vmem:[#allocation2 + $0x50] sm:$0xff] %v1313_v32 }
  0x4e   : > { %428 = vst [vmem:[#allocation2 + $0x68] sm:$0xff] %v1313_v32 }
  0x4f   : > { %429 = vst [vmem:[#allocation2 + $0x30] sm:$0xff] %v1313_v32 }
  0x50   : > { %430 = vst [vmem:[#allocation2 + $0x48] sm:$0xff] %v1313_v32 }
  0x51   : > { %431 = vst [vmem:[#allocation2 + $0x80] sm:$0xff] %v1313_v32 }
  0x52   : > { %432 = vst [vmem:[#allocation2 + $0x88] sm:$0xff] %v1313_v32 }
  0x53   : > { %433 = vst [vmem:[#allocation2 + $0xe8] sm:$0xff] %v1313_v32 }
  0x54   : > { %434 = vst [vmem:[#allocation2 + $0xb8] sm:$0xff] %v1313_v32 }
  0x55   : > { %435 = vst [vmem:[#allocation2 + $0x60] sm:$0xff] %v1313_v32 }
  0x56   : > { %436 = vst [vmem:[#allocation2 + $0xf0] sm:$0xff] %v1313_v32 }
  0x57   : > { %437 = vst [vmem:[#allocation2 + $0x8] sm:$0xff] %v1313_v32 }
  0x58   : > { %438 = vst [vmem:[#allocation2 + $0x78] sm:$0xff] %v1313_v32 }
  0x59   : > { %439 = vst [vmem:[#allocation2 + $0x38] sm:$0xff] %v1313_v32 }
  0x5a   : > { %440 = vst [vmem:[#allocation2 + $0x58] sm:$0xff] %v1313_v32 }
  0x5b   : > { %441 = vst [vmem:[#allocation2 + $0x40] sm:$0xff] %v1313_v32 }
  0x5c   : > { %442 = vst [vmem:[#allocation2 + $0xc8] sm:$0xff] %v1313_v32 }
  0x5d   : > { %443 = vst [vmem:[#allocation2 + $0xe0] sm:$0xff] %v1313_v32 }
  0x5e   : > { %444 = vst [vmem:[#allocation2 + $0x90] sm:$0xff] %v1313_v32 }
  0x5f   : > { %445 = vst [vmem:[#allocation2 + $0x70] sm:$0xff] %v1313_v32 }
  0x60   : > { %446 = vst [vmem:[#allocation2 + $0xc0] sm:$0xff] %v1313_v32 }
  0x61   : > { %447 = vst [vmem:[#allocation2 + $0xa8] sm:$0xff] %v1313_v32 }
  0x62   : > { %448 = vst [vmem:[#allocation2 + $0xd0] sm:$0xff] %v1313_v32 }
  0x63   : > { %449 = vst [vmem:[#allocation2 + $0x10] sm:$0xff] %v1313_v32 }
  0x64   : > { %450 = vst [vmem:[#allocation2 + $0x28] sm:$0xff] %v1313_v32 }
  0x65   : > { %451 = vst [vmem:[#allocation2 + $0xa0] sm:$0xff] %v1313_v32 }
  0x66   : > { %452 = vst [vmem:[#allocation2 + $0xf8] sm:$0xff] %v1313_v32 }
  0x67   : > { %453 = vst [vmem:[#allocation2 + $0x20] sm:$0xff] %v1313_v32 }
  0x68   : > { %454 = vst [vmem:[#allocation2 + $0x98] sm:$0xff] %v1313_v32 }
  0x69 PF: > { %v1094_v33 = vld [vmem:[%s1470_s24 + $0x38] sm:$0xff]  ;;  %v1093_v34 = vld [vmem:[%s1470_s24 + $0x30] sm:$0xff]  ;;  %v1092_v35 = vld [vmem:[%s1470_s24 + $0x28] sm:$0xff]  ;;  %p1084_p13 = scmp.ne.s32.totalorder %s1295_s14, 4 }
  0x6a   : > { %663 = vmatpush.bf16.msra.mxu0 %v1094_v33  ;;  %1174 = vmatpush.bf16.msra.mxu1 %v1094_v33  ;;  %v1091_v36 = vld [vmem:[%s1470_s24 + $0x20] sm:$0xff]  ;;  %v1090_v37 = vld [vmem:[%s1470_s24 + $0x18] sm:$0xff]  ;;  %v1089_v38 = vld [vmem:[%s1470_s24 + $0x10] sm:$0xff] }
  0x6b   : > { %1175 = vmatpush.bf16.msra.mxu2 %v1094_v33  ;;  %1176 = vmatpush.bf16.msra.mxu3 %v1094_v33  ;;  %v1096_v39 = vld [vmem:[%s1477_s12] sm:$0xff]   ;;  %v1088_v47 = vld [vmem:[%s1470_s24 + $0x8] sm:$0xff]  ;;  %v1160_v25 = vld [vmem:[%s1477_s12 + $0x10] sm:$0xff]  }
  0x6c   : > { %v1162_v40 = vld [vmem:[%s1477_s12 + $0x20] sm:$0xff]   ;;  %v1097_v43 = vunpack.c.l.bf16 %v1096_v39  ;;  %v1098_v44 = vunpack.c.h.bf16 %v1096_v39  ;;  %v1159_v1 = vld [vmem:[%s1477_s12 + $0x8] sm:$0xff]   ;;  %v1164_v26 = vld [vmem:[%s1477_s12 + $0x30] sm:$0xff]   ;;  %v1105_v29 = vunpack.c.l.bf16 %v1160_v25  ;;  %v1106_v30 = vunpack.c.h.bf16 %v1160_v25 }
  0x6d   : > { %v1166_v41 = vld [vmem:[%s1477_s12 + $0x40] sm:$0xff]   ;;  %v1113_v45 = vunpack.c.l.bf16 %v1162_v40  ;;  %v1114_v46 = vunpack.c.h.bf16 %v1162_v40  ;;  %v1163_v2 = vld [vmem:[%s1477_s12 + $0x28] sm:$0xff]   ;;  %v1101_v5 = vunpack.c.l.bf16 %v1159_v1  ;;  %v1102_v6 = vunpack.c.h.bf16 %v1159_v1  ;;  %v1168_v27 = vld [vmem:[%s1477_s12 + $0x50] sm:$0xff]  }
  0x6e   : > { %664 = vmatpush.bf16.msra.mxu0 %v1093_v34  ;;  %1177 = vmatpush.bf16.msra.mxu1 %v1093_v34  ;;  %v1170_v42 = vld [vmem:[%s1477_s12 + $0x60] sm:$0xff]   ;;  %v1129_v48 = vunpack.c.l.bf16 %v1166_v41  ;;  %v1130_v49 = vunpack.c.h.bf16 %v1166_v41  ;;  %v519_v52 = vmax.f32 %v1097_v43, 0.0  ;;  %v520_v53 = vmax.f32 %v1098_v44, 0.0  ;;  %v1167_v3 = vld [vmem:[%s1477_s12 + $0x48] sm:$0xff]   ;;  %v1172_v28 = vld [vmem:[%s1477_s12 + $0x70] sm:$0xff]  }
  0x6f   : > { %1178 = vmatpush.bf16.msra.mxu2 %v1093_v34  ;;  %1179 = vmatpush.bf16.msra.mxu3 %v1093_v34  ;;  %v1145_v50 = vunpack.c.l.bf16 %v1170_v42  ;;  %v1146_v51 = vunpack.c.h.bf16 %v1170_v42  ;;  %v527_v54 = vmax.f32 %v1113_v45, 0.0  ;;  %v528_v55 = vmax.f32 %v1114_v46, 0.0  ;;  %v1087_v56 = vld [vmem:[%s1470_s24] sm:$0xff]  ;;  %v1171_v4 = vld [vmem:[%s1477_s12 + $0x68] sm:$0xff]  }
  0x70   : > { %v535_v57 = vmax.f32 %v1129_v48, 0.0  ;;  %v536_v58 = vmax.f32 %v1130_v49, 0.0  ;;  %v551_v61 = vpack.c.bf16 %v520_v53, %v519_v52  ;;  %v1117_v7 = vunpack.c.l.bf16 %v1163_v2  ;;  %v1161_v49 = vld [vmem:[%s1477_s12 + $0x18] sm:$0xff]  }
  0x71   : > { %v543_v59 = vmax.f32 %v1145_v50, 0.0  ;;  %v544_v60 = vmax.f32 %v1146_v51, 0.0  ;;  %v555_v62 = vpack.c.bf16 %v528_v55, %v527_v54  ;;  %v1118_v8 = vunpack.c.h.bf16 %v1163_v2  ;;  %v1165_v50 = vld [vmem:[%s1477_s12 + $0x38] sm:$0xff]  }
  0x72   : > { %665 = vmatpush.bf16.msra.mxu0 %v1092_v35  ;;  %1180 = vmatpush.bf16.msra.mxu1 %v1092_v35  ;;  %v559_v63 = vpack.c.bf16 %v536_v58, %v535_v57  ;;  %v1133_v9 = vunpack.c.l.bf16 %v1167_v3  ;;  %v1134_v10 = vunpack.c.h.bf16 %v1167_v3  ;;  %v1149_v11 = vunpack.c.l.bf16 %v1171_v4  ;;  %v1169_v51 = vld [vmem:[%s1477_s12 + $0x58] sm:$0xff]  }
  0x73   : > { %1181 = vmatpush.bf16.msra.mxu2 %v1092_v35  ;;  %1182 = vmatpush.bf16.msra.mxu3 %v1092_v35  ;;  %v563_v0 = vpack.c.bf16 %v544_v60, %v543_v59  ;;  %v1150_v12 = vunpack.c.h.bf16 %v1171_v4  ;;  %v521_v13 = vmax.f32 %v1101_v5, 0.0  ;;  %v522_v14 = vmax.f32 %v1102_v6, 0.0  ;;  %v1173_v52 = vld [vmem:[%s1477_s12 + $0x78] sm:$0xff]  }
  0x74   : > { %v529_v15 = vmax.f32 %v1117_v7, 0.0  ;;  %v530_v16 = vmax.f32 %v1118_v8, 0.0  ;;  %v537_v17 = vmax.f32 %v1133_v9, 0.0  ;;  %v538_v18 = vmax.f32 %v1134_v10, 0.0  ;;  %v567_v9 = vld [vmem:[#allocation2 + $0xb0] sm:$0xff]  ;;  %v575_v10 = vld [vmem:[#allocation2 + $0x80] sm:$0xff] }
  0x75   : > { %v545_v19 = vmax.f32 %v1149_v11, 0.0  ;;  %v546_v20 = vmax.f32 %v1150_v12, 0.0  ;;  %v552_v21 = vpack.c.bf16 %v522_v14, %v521_v13  ;;  %v1121_v31 = vunpack.c.l.bf16 %v1164_v26 }
  0x76   : > { %666 = vmatpush.bf16.msra.mxu0 %v1091_v36  ;;  %1183 = vmatpush.bf16.msra.mxu1 %v1091_v36  ;;  %v556_v22 = vpack.c.bf16 %v530_v16, %v529_v15  ;;  %v560_v23 = vpack.c.bf16 %v538_v18, %v537_v17  ;;  %v1122_v32 = vunpack.c.h.bf16 %v1164_v26  ;;  %v1137_v33 = vunpack.c.l.bf16 %v1168_v27  ;;  %v583_v15 = vld [vmem:[#allocation2 + $0x38] sm:$0xff]  ;;  %v591_v16 = vld [vmem:[#allocation2 + $0xa8] sm:$0xff]  ;;  %v568_v17 = vld [vmem:[#allocation2] sm:$0xff] }
  0x77   : > { %1184 = vmatpush.bf16.msra.mxu2 %v1091_v36  ;;  %1185 = vmatpush.bf16.msra.mxu3 %v1091_v36  ;;  %v564_v24 = vpack.c.bf16 %v546_v20, %v545_v19  ;;  %v1138_v34 = vunpack.c.h.bf16 %v1168_v27  ;;  %v1153_v35 = vunpack.c.l.bf16 %v1172_v28  ;;  %v1154_v36 = vunpack.c.h.bf16 %v1172_v28  ;;  %v576_v18 = vld [vmem:[#allocation2 + $0x88] sm:$0xff]  ;;  %v584_v27 = vld [vmem:[#allocation2 + $0x58] sm:$0xff]  ;;  %v592_v28 = vld [vmem:[#allocation2 + $0xd0] sm:$0xff] }
  0x78   : > { %v531_v39 = vmax.f32 %v1121_v31, 0.0  ;;  %v532_v40 = vmax.f32 %v1122_v32, 0.0  ;;  %v539_v41 = vmax.f32 %v1137_v33, 0.0  ;;  %v1109_v53 = vunpack.c.l.bf16 %v1161_v49 }
  0x79   : > { %v540_v42 = vmax.f32 %v1138_v34, 0.0  ;;  %v547_v43 = vmax.f32 %v1153_v35, 0.0  ;;  %v548_v44 = vmax.f32 %v1154_v36, 0.0  ;;  %v1110_v54 = vunpack.c.h.bf16 %v1161_v49 }
  0x7a   : > { %667 = vmatpush.bf16.msra.mxu0 %v1090_v37  ;;  %1186 = vmatpush.bf16.msra.mxu1 %v1090_v37  ;;  %v557_v46 = vpack.c.bf16 %v532_v40, %v531_v39  ;;  %v1125_v55 = vunpack.c.l.bf16 %v1165_v50  ;;  %v1141_v57 = vunpack.c.l.bf16 %v1169_v51  ;;  %v1142_v58 = vunpack.c.h.bf16 %v1169_v51  ;;  %v585_v39 = vld [vmem:[#allocation2 + $0x40] sm:$0xff]  ;;  %v593_v40 = vld [vmem:[#allocation2 + $0x10] sm:$0xff]  ;;  %v586_v51 = vld [vmem:[#allocation2 + $0xc8] sm:$0xff] }
  0x7b   : > { %1187 = vmatpush.bf16.msra.mxu2 %v1090_v37  ;;  %1188 = vmatpush.bf16.msra.mxu3 %v1090_v37  ;;  %v523_v37 = vmax.f32 %v1105_v29, 0.0  ;;  %v565_v48 = vpack.c.bf16 %v548_v44, %v547_v43  ;;  %v1157_v59 = vunpack.c.l.bf16 %v1173_v52  ;;  %v1158_v60 = vunpack.c.h.bf16 %v1173_v52  ;;  %v569_v29 = vld [vmem:[#allocation2 + $0xd8] sm:$0xff]  ;;  %v594_v52 = vld [vmem:[#allocation2 + $0x28] sm:$0xff] }
  0x7c   : > { %v541_v1 = vmax.f32 %v1141_v57, 0.0  ;;  %v542_v2 = vmax.f32 %v1142_v58, 0.0 }
  0x7d   : > { %v549_v3 = vmax.f32 %v1157_v59, 0.0  ;;  %v550_v4 = vmax.f32 %v1158_v60, 0.0 }
  0x7e   : > { %668 = vmatpush.bf16.msra.mxu0 %v1089_v38  ;;  %1189 = vmatpush.bf16.msra.mxu1 %v1089_v38  ;;  %v562_v7 = vpack.c.bf16 %v542_v2, %v541_v1  ;;  %v572_v1 = vld [vmem:[#allocation2 + $0x68] sm:$0xff]  ;;  %v580_v2 = vld [vmem:[#allocation2 + $0xf0] sm:$0xff] }
  0x7f   : > { %1190 = vmatpush.bf16.msra.mxu2 %v1089_v38  ;;  %1191 = vmatpush.bf16.msra.mxu3 %v1089_v38  ;;  %v524_v38 = vmax.f32 %v1106_v30, 0.0  ;;  %v566_v8 = vpack.c.bf16 %v550_v4, %v549_v3  ;;  %v577_v30 = vld [vmem:[#allocation2 + $0xe8] sm:$0xff] }
  0x81   : > { %v553_v45 = vpack.c.bf16 %v524_v38, %v523_v37 }
  0x82   : > { %669 = vmatpush.bf16.msra.mxu0 %v1088_v47  ;;  %1192 = vmatpush.bf16.msra.mxu1 %v1088_v47 }
  0x83   : > { %1193 = vmatpush.bf16.msra.mxu2 %v1088_v47  ;;  %1194 = vmatpush.bf16.msra.mxu3 %v1088_v47  ;;  %v561_v47 = vpack.c.bf16 %v540_v42, %v539_v41  ;;  %v570_v41 = vld [vmem:[#allocation2 + $0x18] sm:$0xff] }
  0x84   : > { %v578_v42 = vld [vmem:[#allocation2 + $0xb8] sm:$0xff] }
  0x86   : > { %670 = vmatpush.bf16.msra.mxu0 %v1087_v56  ;;  %1195 = vmatpush.bf16.msra.mxu1 %v1087_v56 }
  0x87   : > { %1196 = vmatpush.bf16.msra.mxu2 %v1087_v56  ;;  %1197 = vmatpush.bf16.msra.mxu3 %v1087_v56  ;;  %v1126_v56 = vunpack.c.h.bf16 %v1165_v50 }
  0x89   : > { %671 = vmatmul.bf16.vlgmr.msra.gmra.mxu0 %v551_v61  ;;  %691 = vmatmul.bf16.vlgmr.msra.gmra.mxu1 %v555_v62  ;;  %v525_v61 = vmax.f32 %v1109_v53, 0.0  ;;  %v526_v62 = vmax.f32 %v1110_v54, 0.0  ;;  %v571_v53 = vld [vmem:[#allocation2 + $0x50] sm:$0xff]  ;;  %v579_v54 = vld [vmem:[#allocation2 + $0x60] sm:$0xff] }
  0x8a   : > { %711 = vmatmul.bf16.vlgmr.msra.gmra.mxu2 %v559_v63  ;;  %731 = vmatmul.bf16.vlgmr.msra.gmra.mxu3 %v563_v0  ;;  %v533_v63 = vmax.f32 %v1125_v55, 0.0  ;;  %v534_v0 = vmax.f32 %v1126_v56, 0.0 }
  0x8b   : > { %v554_v5 = vpack.c.bf16 %v526_v62, %v525_v61 }
  0x8c   : > { %v558_v6 = vpack.c.bf16 %v534_v0, %v533_v63  ;;  %v587_v63 = vld [vmem:[#allocation2 + $0xe0] sm:$0xff] }
  0x8d   : > { %v595_v0 = vld [vmem:[#allocation2 + $0xa0] sm:$0xff] }
  0x99   : > { %676 = vmatmul.bf16.gmra.mxu0 %v552_v21  ;;  %696 = vmatmul.bf16.gmra.mxu1 %v556_v22 }
  0x9a   : > { %716 = vmatmul.bf16.gmra.mxu2 %v560_v23  ;;  %736 = vmatmul.bf16.gmra.mxu3 %v564_v24 }
  0xa9   : > { %681 = vmatmul.bf16.gmra.mxu0 %v553_v45  ;;  %701 = vmatmul.bf16.gmra.mxu1 %v557_v46 }
  0xaa   : > { %721 = vmatmul.bf16.gmra.mxu2 %v561_v47  ;;  %741 = vmatmul.bf16.gmra.mxu3 %v565_v48 }
  0xb9   : > { %686 = vmatmul.bf16.gmra.mxu0 %v554_v5  ;;  %706 = vmatmul.bf16.gmra.mxu1 %v558_v6 }
  0xba   : > { %726 = vmatmul.bf16.gmra.mxu2 %v562_v7  ;;  %746 = vmatmul.bf16.gmra.mxu3 %v566_v8 }
 0x106   : > { %v672_v11 = vpop.f32.mrf.mxu0  ;;  %v692_v12 = vpop.f32.mrf.mxu1 }
 0x107   : > { %v752_v13 = vadd.f32 %v672_v11, %v567_v9  ;;  %v760_v14 = vadd.f32 %v692_v12, %v575_v10  ;;  %v588_v11 = vld [vmem:[#allocation2 + $0x90] sm:$0xff]  ;;  %v596_v12 = vld [vmem:[#allocation2 + $0xf8] sm:$0xff] }
 0x109   : > { %784 = vst [vmem:[#allocation2 + $0xb0] sm:$0xff] %v752_v13  ;;  %v573_v13 = vld [vmem:[#allocation2 + $0x30] sm:$0xff] }
 0x10a   : > { %792 = vst [vmem:[#allocation2 + $0x80] sm:$0xff] %v760_v14  ;;  %v581_v14 = vld [vmem:[#allocation2 + $0x8] sm:$0xff] }
 0x10d   : > { %v712_v19 = vpop.f32.mrf.mxu2  ;;  %v732_v20 = vpop.f32.mrf.mxu3 }
 0x10e   : > { %v768_v21 = vadd.f32 %v712_v19, %v583_v15  ;;  %v776_v22 = vadd.f32 %v732_v20, %v591_v16  ;;  %v674_v23 = vpop.f32.mrf.mxu0  ;;  %v694_v24 = vpop.f32.mrf.mxu1 }
 0x10f   : > { %v753_v25 = vadd.f32 %v674_v23, %v568_v17  ;;  %v761_v26 = vadd.f32 %v694_v24, %v576_v18  ;;  %v589_v23 = vld [vmem:[#allocation2 + $0x70] sm:$0xff]  ;;  %v597_v24 = vld [vmem:[#allocation2 + $0x20] sm:$0xff] }
 0x110   : > { %800 = vst [vmem:[#allocation2 + $0x38] sm:$0xff] %v768_v21 }
 0x111   : > { %808 = vst [vmem:[#allocation2 + $0xa8] sm:$0xff] %v776_v22 }
 0x112   : > { %785 = vst [vmem:[#allocation2] sm:$0xff] %v753_v25  ;;  %v574_v25 = vld [vmem:[#allocation2 + $0x48] sm:$0xff] }
 0x113   : > { %793 = vst [vmem:[#allocation2 + $0x88] sm:$0xff] %v761_v26  ;;  %v582_v26 = vld [vmem:[#allocation2 + $0x78] sm:$0xff] }
 0x115   : > { %v714_v31 = vpop.f32.mrf.mxu2  ;;  %v734_v32 = vpop.f32.mrf.mxu3 }
 0x116   : > { %v769_v33 = vadd.f32 %v714_v31, %v584_v27  ;;  %v777_v34 = vadd.f32 %v734_v32, %v592_v28  ;;  %v677_v35 = vpop.f32.mrf.mxu0  ;;  %v697_v36 = vpop.f32.mrf.mxu1 }
 0x117   : > { %v754_v37 = vadd.f32 %v677_v35, %v569_v29  ;;  %v762_v38 = vadd.f32 %v697_v36, %v577_v30  ;;  %v590_v35 = vld [vmem:[#allocation2 + $0xc0] sm:$0xff]  ;;  %v598_v36 = vld [vmem:[#allocation2 + $0x98] sm:$0xff] }
 0x118   : > { %801 = vst [vmem:[#allocation2 + $0x58] sm:$0xff] %v769_v33 }
 0x119   : > { %809 = vst [vmem:[#allocation2 + $0xd0] sm:$0xff] %v777_v34 }
 0x11a   : > { %786 = vst [vmem:[#allocation2 + $0xd8] sm:$0xff] %v754_v37 }
 0x11b   : > { %794 = vst [vmem:[#allocation2 + $0xe8] sm:$0xff] %v762_v38 }
 0x11d   : > { %v717_v43 = vpop.f32.mrf.mxu2  ;;  %v737_v44 = vpop.f32.mrf.mxu3 }
 0x11e   : > { %v770_v45 = vadd.f32 %v717_v43, %v585_v39  ;;  %v778_v46 = vadd.f32 %v737_v44, %v593_v40  ;;  %v679_v47 = vpop.f32.mrf.mxu0  ;;  %v699_v48 = vpop.f32.mrf.mxu1 }
 0x11f   : > { %v755_v49 = vadd.f32 %v679_v47, %v570_v41  ;;  %v763_v50 = vadd.f32 %v699_v48, %v578_v42 }
 0x120   : > { %802 = vst [vmem:[#allocation2 + $0x40] sm:$0xff] %v770_v45 }
 0x121   : > { %810 = vst [vmem:[#allocation2 + $0x10] sm:$0xff] %v778_v46 }
 0x122   : > { %787 = vst [vmem:[#allocation2 + $0x18] sm:$0xff] %v755_v49 }
 0x123   : > { %795 = vst [vmem:[#allocation2 + $0xb8] sm:$0xff] %v763_v50 }
 0x125   : > { %v719_v55 = vpop.f32.mrf.mxu2  ;;  %v739_v56 = vpop.f32.mrf.mxu3 }
 0x126   : > { %v771_v57 = vadd.f32 %v719_v55, %v586_v51  ;;  %v779_v58 = vadd.f32 %v739_v56, %v594_v52  ;;  %v682_v59 = vpop.f32.mrf.mxu0  ;;  %v702_v60 = vpop.f32.mrf.mxu1 }
 0x127   : > { %v756_v61 = vadd.f32 %v682_v59, %v571_v53  ;;  %v764_v62 = vadd.f32 %v702_v60, %v579_v54 }
 0x128   : > { %803 = vst [vmem:[#allocation2 + $0xc8] sm:$0xff] %v771_v57 }
 0x129   : > { %811 = vst [vmem:[#allocation2 + $0x28] sm:$0xff] %v779_v58 }
 0x12a   : > { %788 = vst [vmem:[#allocation2 + $0x50] sm:$0xff] %v756_v61 }
 0x12b   : > { %796 = vst [vmem:[#allocation2 + $0x60] sm:$0xff] %v764_v62 }
 0x12d   : > { %v722_v3 = vpop.f32.mrf.mxu2  ;;  %v742_v4 = vpop.f32.mrf.mxu3 }
 0x12e   : > { %v772_v5 = vadd.f32 %v722_v3, %v587_v63  ;;  %v780_v6 = vadd.f32 %v742_v4, %v595_v0  ;;  %v684_v7 = vpop.f32.mrf.mxu0  ;;  %v704_v8 = vpop.f32.mrf.mxu1 }
 0x12f   : > { %v757_v9 = vadd.f32 %v684_v7, %v572_v1  ;;  %v765_v10 = vadd.f32 %v704_v8, %v580_v2 }
 0x130   : > { %804 = vst [vmem:[#allocation2 + $0xe0] sm:$0xff] %v772_v5 }
 0x131   : > { %812 = vst [vmem:[#allocation2 + $0xa0] sm:$0xff] %v780_v6 }
 0x132   : > { %789 = vst [vmem:[#allocation2 + $0x68] sm:$0xff] %v757_v9 }
 0x133   : > { %797 = vst [vmem:[#allocation2 + $0xf0] sm:$0xff] %v765_v10 }
 0x135   : > { %v724_v15 = vpop.f32.mrf.mxu2  ;;  %v744_v16 = vpop.f32.mrf.mxu3 }
 0x136   : > { %v773_v17 = vadd.f32 %v724_v15, %v588_v11  ;;  %v781_v18 = vadd.f32 %v744_v16, %v596_v12  ;;  %v687_v19 = vpop.f32.mrf.mxu0  ;;  %v707_v20 = vpop.f32.mrf.mxu1 }
 0x137   : > { %v758_v21 = vadd.f32 %v687_v19, %v573_v13  ;;  %v766_v22 = vadd.f32 %v707_v20, %v581_v14 }
 0x138   : > { %805 = vst [vmem:[#allocation2 + $0x90] sm:$0xff] %v773_v17 }
 0x139   : > { %813 = vst [vmem:[#allocation2 + $0xf8] sm:$0xff] %v781_v18 }
 0x13a   : > { %790 = vst [vmem:[#allocation2 + $0x30] sm:$0xff] %v758_v21 }
 0x13b   : > { %798 = vst [vmem:[#allocation2 + $0x8] sm:$0xff] %v766_v22 }
 0x13d   : > { %v727_v27 = vpop.f32.mrf.mxu2  ;;  %v747_v28 = vpop.f32.mrf.mxu3 }
 0x13e   : > { %v774_v29 = vadd.f32 %v727_v27, %v589_v23  ;;  %v782_v30 = vadd.f32 %v747_v28, %v597_v24  ;;  %v689_v31 = vpop.f32.mrf.mxu0  ;;  %v709_v32 = vpop.f32.mrf.mxu1 }
 0x13f   : > { %v759_v33 = vadd.f32 %v689_v31, %v574_v25  ;;  %v767_v34 = vadd.f32 %v709_v32, %v582_v26 }
 0x140   : > { %806 = vst [vmem:[#allocation2 + $0x70] sm:$0xff] %v774_v29 }
 0x141   : > { %814 = vst [vmem:[#allocation2 + $0x20] sm:$0xff] %v782_v30 }
 0x142   : > { %791 = vst [vmem:[#allocation2 + $0x48] sm:$0xff] %v759_v33 }
 0x143   : > { %799 = vst [vmem:[#allocation2 + $0x78] sm:$0xff] %v767_v34 }
 0x145   : > { %v729_v37 = vpop.f32.mrf.mxu2  ;;  %v749_v38 = vpop.f32.mrf.mxu3  ;;  %819 = sbr.rel (%p1084_p13) target bundleno = 365 (0x16d), region = 81 }
 0x146   : > { %v775_v39 = vadd.f32 %v729_v37, %v590_v35  ;;  %v783_v40 = vadd.f32 %v749_v38, %v598_v36 }
 0x148   : > { %807 = vst [vmem:[#allocation2 + $0xc0] sm:$0xff] %v775_v39 }
 0x149   : > { %815 = vst [vmem:[#allocation2 + $0x98] sm:$0xff] %v783_v40 }
 0x14a   : > { %v820_v41 = vld [vmem:[#allocation2 + $0xb0] sm:$0xff]  ;;  %v1508_v42 = vld [vmem:[%s1597_s2] ss:$0 sm:$0xff]  ;;  %v822_v44 = vld [vmem:[#allocation2 + $0xd8] sm:$0xff] }
 0x14b   : > { %v821_v43 = vld [vmem:[#allocation2] sm:$0xff]  ;;  %v823_v45 = vld [vmem:[#allocation2 + $0x18] sm:$0xff]  ;;  %v856_v46 = vadd.f32 %v1508_v42, %v820_v41  ;;  %v858_v48 = vadd.f32 %v1508_v42, %v822_v44  ;;  %v824_v49 = vld [vmem:[#allocation2 + $0x50] sm:$0xff] }
 0x14c   : > { %v857_v47 = vadd.f32 %v1508_v42, %v821_v43  ;;  %v825_v50 = vld [vmem:[#allocation2 + $0x68] sm:$0xff]  ;;  %v859_v51 = vadd.f32 %v1508_v42, %v823_v45  ;;  %v826_v52 = vld [vmem:[#allocation2 + $0x30] sm:$0xff]  ;;  %v860_v53 = vadd.f32 %v1508_v42, %v824_v49  ;;  %v828_v56 = vld [vmem:[#allocation2 + $0x80] sm:$0xff] }
 0x14d   : > { %888 = vst [vmem:[%s1475_s29] sm:$0xff] %v856_v46  ;;  %v827_v54 = vld [vmem:[#allocation2 + $0x48] sm:$0xff]  ;;  %v861_v55 = vadd.f32 %v1508_v42, %v825_v50  ;;  %v862_v57 = vadd.f32 %v1508_v42, %v826_v52  ;;  %v864_v61 = vadd.f32 %v1508_v42, %v828_v56  ;;  %v831_v62 = vld [vmem:[#allocation2 + $0xb8] sm:$0xff]  ;;  %v832_v0 = vld [vmem:[#allocation2 + $0x60] sm:$0xff] }
 0x14e   : > { %889 = vst [vmem:[%s1475_s29 + $0x8] sm:$0xff] %v857_v47  ;;  %v829_v58 = vld [vmem:[#allocation2 + $0x88] sm:$0xff]  ;;  %v863_v59 = vadd.f32 %v1508_v42, %v827_v54  ;;  %v833_v2 = vld [vmem:[#allocation2 + $0xf0] sm:$0xff]  ;;  %v867_v3 = vadd.f32 %v1508_v42, %v831_v62  ;;  %v868_v5 = vadd.f32 %v1508_v42, %v832_v0  ;;  %v835_v6 = vld [vmem:[#allocation2 + $0x78] sm:$0xff] }
 0x14f   : > { %890 = vst [vmem:[%s1475_s29 + $0x10] sm:$0xff] %v858_v48  ;;  %v830_v60 = vld [vmem:[#allocation2 + $0xe8] sm:$0xff]  ;;  %v865_v63 = vadd.f32 %v1508_v42, %v829_v58  ;;  %v869_v7 = vadd.f32 %v1508_v42, %v833_v2  ;;  %v836_v8 = vld [vmem:[#allocation2 + $0x38] sm:$0xff]  ;;  %v871_v11 = vadd.f32 %v1508_v42, %v835_v6  ;;  %v838_v12 = vld [vmem:[#allocation2 + $0x40] sm:$0xff] }
 0x150   : > { %891 = vst [vmem:[%s1475_s29 + $0x18] sm:$0xff] %v859_v51  ;;  %v866_v1 = vadd.f32 %v1508_v42, %v830_v60  ;;  %v834_v4 = vld [vmem:[#allocation2 + $0x8] sm:$0xff]  ;;  %v837_v10 = vld [vmem:[#allocation2 + $0x58] sm:$0xff]  ;;  %v872_v13 = vadd.f32 %v1508_v42, %v836_v8  ;;  %v840_v16 = vld [vmem:[#allocation2 + $0xe0] sm:$0xff]  ;;  %v874_v17 = vadd.f32 %v1508_v42, %v838_v12 }
 0x151   : > { %892 = vst [vmem:[%s1475_s29 + $0x20] sm:$0xff] %v860_v53  ;;  %v870_v9 = vadd.f32 %v1508_v42, %v834_v4  ;;  %v839_v14 = vld [vmem:[#allocation2 + $0xc8] sm:$0xff]  ;;  %v873_v15 = vadd.f32 %v1508_v42, %v837_v10  ;;  %v841_v18 = vld [vmem:[#allocation2 + $0x90] sm:$0xff]  ;;  %v876_v21 = vadd.f32 %v1508_v42, %v840_v16  ;;  %v843_v22 = vld [vmem:[#allocation2 + $0xc0] sm:$0xff] }
 0x152   : > { %893 = vst [vmem:[%s1475_s29 + $0x28] sm:$0xff] %v861_v55  ;;  %v875_v19 = vadd.f32 %v1508_v42, %v839_v14  ;;  %v842_v20 = vld [vmem:[#allocation2 + $0x70] sm:$0xff]  ;;  %v877_v23 = vadd.f32 %v1508_v42, %v841_v18  ;;  %v844_v24 = vld [vmem:[#allocation2 + $0xa8] sm:$0xff]  ;;  %v879_v27 = vadd.f32 %v1508_v42, %v843_v22  ;;  %v848_v32 = vld [vmem:[#allocation2 + $0xa0] sm:$0xff] }
 0x153   : > { %894 = vst [vmem:[%s1475_s29 + $0x30] sm:$0xff] %v862_v57  ;;  %v878_v25 = vadd.f32 %v1508_v42, %v842_v20  ;;  %v845_v26 = vld [vmem:[#allocation2 + $0xd0] sm:$0xff]  ;;  %v880_v29 = vadd.f32 %v1508_v42, %v844_v24  ;;  %v847_v30 = vld [vmem:[#allocation2 + $0x28] sm:$0xff]  ;;  %v849_v34 = vld [vmem:[#allocation2 + $0xf8] sm:$0xff]  ;;  %v884_v37 = vadd.f32 %v1508_v42, %v848_v32 }
 0x154   : > { %895 = vst [vmem:[%s1475_s29 + $0x38] sm:$0xff] %v863_v59  ;;  %v846_v28 = vld [vmem:[#allocation2 + $0x10] sm:$0xff]  ;;  %v881_v31 = vadd.f32 %v1508_v42, %v845_v26  ;;  %v883_v35 = vadd.f32 %v1508_v42, %v847_v30  ;;  %v850_v36 = vld [vmem:[#allocation2 + $0x20] sm:$0xff]  ;;  %v851_v38 = vld [vmem:[#allocation2 + $0x98] sm:$0xff]  ;;  %v885_v39 = vadd.f32 %v1508_v42, %v849_v34 }
 0x155   : > { %896 = vst [vmem:[%s1475_s29 + $0x40] sm:$0xff] %v864_v61  ;;  %v882_v33 = vadd.f32 %v1508_v42, %v846_v28  ;;  %v886_v40 = vadd.f32 %v1508_v42, %v850_v36  ;;  %v887_v41 = vadd.f32 %v1508_v42, %v851_v38 }
 0x156   : > { %897 = vst [vmem:[%s1475_s29 + $0x48] sm:$0xff] %v865_v63 }
 0x157   : > { %898 = vst [vmem:[%s1475_s29 + $0x50] sm:$0xff] %v866_v1 }
 0x158   : > { %899 = vst [vmem:[%s1475_s29 + $0x58] sm:$0xff] %v867_v3 }
 0x159   : > { %900 = vst [vmem:[%s1475_s29 + $0x60] sm:$0xff] %v868_v5 }
 0x15a   : > { %901 = vst [vmem:[%s1475_s29 + $0x68] sm:$0xff] %v869_v7 }
 0x15b   : > { %902 = vst [vmem:[%s1475_s29 + $0x70] sm:$0xff] %v870_v9 }
 0x15c   : > { %903 = vst [vmem:[%s1475_s29 + $0x78] sm:$0xff] %v871_v11 }
 0x15d   : > { %904 = vst [vmem:[%s1475_s29 + $0x80] sm:$0xff] %v872_v13 }
 0x15e   : > { %905 = vst [vmem:[%s1475_s29 + $0x88] sm:$0xff] %v873_v15 }
 0x15f   : > { %906 = vst [vmem:[%s1475_s29 + $0x90] sm:$0xff] %v874_v17 }
 0x160   : > { %907 = vst [vmem:[%s1475_s29 + $0x98] sm:$0xff] %v875_v19 }
 0x161   : > { %908 = vst [vmem:[%s1475_s29 + $0xa0] sm:$0xff] %v876_v21 }
 0x162   : > { %909 = vst [vmem:[%s1475_s29 + $0xa8] sm:$0xff] %v877_v23 }
 0x163   : > { %910 = vst [vmem:[%s1475_s29 + $0xb0] sm:$0xff] %v878_v25 }
 0x164   : > { %911 = vst [vmem:[%s1475_s29 + $0xb8] sm:$0xff] %v879_v27 }
 0x165   : > { %912 = vst [vmem:[%s1475_s29 + $0xc0] sm:$0xff] %v880_v29 }
 0x166   : > { %913 = vst [vmem:[%s1475_s29 + $0xc8] sm:$0xff] %v881_v31 }
 0x167   : > { %914 = vst [vmem:[%s1475_s29 + $0xd0] sm:$0xff] %v882_v33 }
 0x168   : > { %915 = vst [vmem:[%s1475_s29 + $0xd8] sm:$0xff] %v883_v35 }
 0x169   : > { %916 = vst [vmem:[%s1475_s29 + $0xe0] sm:$0xff] %v884_v37 }
 0x16a   : > { %917 = vst [vmem:[%s1475_s29 + $0xe8] sm:$0xff] %v885_v39 }
 0x16b   : > { %918 = vst [vmem:[%s1475_s29 + $0xf0] sm:$0xff] %v886_v40 }
 0x16c   : > { %919 = vst [vmem:[%s1475_s29 + $0xf8] sm:$0xff] %v887_v41 }
 0x16d PF: > { %s13_s18 = sadd.s32 1, %s1311_s18   ;;  %s1599_s12 = smov %s1291_s13 }
 0x16e   : > { %p10_p0 = scmp.ge.s32.totalorder %s13_s18, 12   ;;  %s1600_s13 = smov %s1385_s25 }
 0x16f   : > { %s1601_s14 = smov %s1303_s16  ;;  %s1602_s15 = smov %s1307_s17 }
 0x170   : > { %s1603_s16 = smov %s1606_s19  ;;  %s1604_s17 = smov %s1610_s20 }
 0x171   :  { %12 = sbr.rel (!%p10_p0) target bundleno = 4 (0x4), region = 122 }

// kernel: vgg16_forward.17
= control target key start
LH: loop header
LB: loop body
LE: loop exit
PB: predicated region body
PF: predicated region fallthrough
CT: control target
= control target key end

     0   :  { %vm392_vm0 = vcmask 517120   ;;  %vm1545_vm1 = vcmask 1041409   ;;  %vm1547_vm2 = vcmask 1042434   ;;  %vm1549_vm3 = vcmask 1043459   ;;  %s4555_s0 = inlined_call_operand.vmem [shape: f32[16,2,8,2,64], index: 0, kind: input, shape index: {}]   ;;  %s4556_s1 = inlined_call_operand.vmem [shape: f32[16,8,64], index: 1, kind: output, shape index: {}]  }
   0x1   :  { %v1714_v0 = vld [vmem:[%s4555_s0] sm:$0x3]  ;;  %v1719_v1 = vld [vmem:[%s4555_s0 + $0x2] sm:$0x3]  ;;  %v1724_v2 = vld [vmem:[%s4555_s0 + $0x10] sm:$0x3] }
   0x2   :  { %v1729_v3 = vld [vmem:[%s4555_s0 + $0x12] sm:$0x3]  ;;  %v1734_v4 = vld [vmem:[%s4555_s0 + $0x4] sm:$0x3]  ;;  %v1739_v5 = vld [vmem:[%s4555_s0 + $0x6] sm:$0x3] }
   0x3   :  { %v1744_v6 = vld [vmem:[%s4555_s0 + $0x14] sm:$0x3]  ;;  %v1749_v7 = vld [vmem:[%s4555_s0 + $0x16] sm:$0x3]  ;;  %v1754_v8 = vld [vmem:[%s4555_s0 + $0x20] sm:$0x3] }
   0x4   :  { %4896 = vst [vmem:[#allocation2_spill] sm:$0xff] %v1754_v8  ;;  %v1759_v9 = vld [vmem:[%s4555_s0 + $0x8] sm:$0x3]  ;;  %v1764_v10 = vld [vmem:[%s4555_s0 + $0xa] sm:$0x3]  ;;  %vm1551_vm4 = vcmask 1044484  }
   0x5   :  { %4897 = vst [vmem:[#allocation3_spill] sm:$0xff] %v1764_v10  ;;  %v1769_v11 = vld [vmem:[%s4555_s0 + $0xc] sm:$0x3]  ;;  %v1774_v12 = vld [vmem:[%s4555_s0 + $0xe] sm:$0x3]  ;;  %vm1553_vm5 = vcmask 1045509  }
   0x6   :  { %4898 = vst [vmem:[#allocation4_spill] sm:$0xff] %v1769_v11  ;;  %v1779_v13 = vld [vmem:[%s4555_s0 + $0x18] sm:$0x3]  ;;  %v1784_v14 = vld [vmem:[%s4555_s0 + $0x1a] sm:$0x3]  ;;  %vm1555_vm6 = vcmask 1046534  }
   0x7   :  { %4899 = vst [vmem:[#allocation5_spill] sm:$0xff] %v1774_v12  ;;  %v1789_v15 = vld [vmem:[%s4555_s0 + $0x1c] sm:$0x3]  ;;  %v1794_v16 = vld [vmem:[%s4555_s0 + $0x1e] sm:$0x3]  ;;  %vm1557_vm7 = vcmask 1047559  }
   0x8   :  { %4900 = vst [vmem:[#allocation6_spill] sm:$0xff] %v1784_v14  ;;  %v1799_v17 = vld [vmem:[%s4555_s0 + $0x22] sm:$0x3]  ;;  %v1804_v18 = vld [vmem:[%s4555_s0 + $0x30] sm:$0x3]  ;;  %vm1680_vm8 = vcmask 523264  }
   0x9   :  { %4901 = vst [vmem:[#allocation7_spill] sm:$0xff] %v1789_v15  ;;  %v1809_v19 = vld [vmem:[%s4555_s0 + $0x32] sm:$0x3]  ;;  %v1814_v20 = vld [vmem:[%s4555_s0 + $0x24] sm:$0x3] }
   0xa   :  { %4902 = vst [vmem:[#allocation8_spill] sm:$0xff] %v1794_v16  ;;  %v1819_v21 = vld [vmem:[%s4555_s0 + $0x26] sm:$0x3]  ;;  %v1824_v22 = vld [vmem:[%s4555_s0 + $0x28] sm:$0x3] }
   0xb   :  { %4903 = vst [vmem:[#allocation9_spill] sm:$0xff] %v1799_v17  ;;  %v1829_v23 = vld [vmem:[%s4555_s0 + $0x2a] sm:$0x3]  ;;  %v1834_v24 = vld [vmem:[%s4555_s0 + $0x34] sm:$0x3] }
   0xc   :  { %4904 = vst [vmem:[#allocation10_spill] sm:$0xff] %v1804_v18  ;;  %v1839_v25 = vld [vmem:[%s4555_s0 + $0x36] sm:$0x3]  ;;  %v1844_v26 = vld [vmem:[%s4555_s0 + $0x38] sm:$0x3] }
   0xd   :  { %4905 = vst [vmem:[#allocation11_spill] sm:$0xff] %v1809_v19  ;;  %v1849_v27 = vld [vmem:[%s4555_s0 + $0x3a] sm:$0x3]  ;;  %v1854_v28 = vld [vmem:[%s4555_s0 + $0x2c] sm:$0x3] }
   0xe   :  { %4906 = vst [vmem:[#allocation12_spill] sm:$0xff] %v1814_v20  ;;  %v1859_v29 = vld [vmem:[%s4555_s0 + $0x2e] sm:$0x3]  ;;  %v1864_v30 = vld [vmem:[%s4555_s0 + $0x3c] sm:$0x3] }
   0xf   :  { %4907 = vst [vmem:[#allocation13_spill] sm:$0xff] %v1819_v21  ;;  %v1869_v31 = vld [vmem:[%s4555_s0 + $0x3e] sm:$0x3]  ;;  %v1874_v32 = vld [vmem:[%s4555_s0 + $0x40] sm:$0x3] }
  0x10   :  { %4908 = vst [vmem:[#allocation14_spill] sm:$0xff] %v1824_v22  ;;  %v1879_v33 = vld [vmem:[%s4555_s0 + $0x42] sm:$0x3]  ;;  %v1884_v34 = vld [vmem:[%s4555_s0 + $0x50] sm:$0x3] }
  0x11   :  { %4909 = vst [vmem:[#allocation15_spill] sm:$0xff] %v1829_v23  ;;  %v1889_v35 = vld [vmem:[%s4555_s0 + $0x52] sm:$0x3]  ;;  %v1894_v36 = vld [vmem:[%s4555_s0 + $0x44] sm:$0x3] }
  0x12   :  { %4910 = vst [vmem:[#allocation16_spill] sm:$0xff] %v1834_v24  ;;  %v1899_v37 = vld [vmem:[%s4555_s0 + $0x46] sm:$0x3]  ;;  %v1904_v38 = vld [vmem:[%s4555_s0 + $0x48] sm:$0x3] }
  0x13   :  { %4911 = vst [vmem:[#allocation17_spill] sm:$0xff] %v1839_v25  ;;  %v1909_v39 = vld [vmem:[%s4555_s0 + $0x4a] sm:$0x3]  ;;  %v1914_v40 = vld [vmem:[%s4555_s0 + $0x54] sm:$0x3] }
  0x14   :  { %4912 = vst [vmem:[#allocation18_spill] sm:$0xff] %v1844_v26  ;;  %v1919_v41 = vld [vmem:[%s4555_s0 + $0x56] sm:$0x3]  ;;  %v1924_v42 = vld [vmem:[%s4555_s0 + $0x58] sm:$0x3] }
  0x15   :  { %4913 = vst [vmem:[#allocation19_spill] sm:$0xff] %v1849_v27  ;;  %v1929_v43 = vld [vmem:[%s4555_s0 + $0x5a] sm:$0x3]  ;;  %v1938_v46 = vld [vmem:[%s4555_s0 + $0x4c] sm:$0x3] }
  0x16   :  { %4914 = vst [vmem:[#allocation20_spill] sm:$0xff] %v1854_v28  ;;  %v1943_v47 = vld [vmem:[%s4555_s0 + $0x4e] sm:$0x3]  ;;  %v1948_v48 = vld [vmem:[%s4555_s0 + $0x5c] sm:$0x3] }
  0x17   :  { %4915 = vst [vmem:[#allocation21_spill] sm:$0xff] %v1859_v29  ;;  %v1953_v49 = vld [vmem:[%s4555_s0 + $0x5e] sm:$0x3]  ;;  %v1958_v50 = vld [vmem:[%s4555_s0 + $0x60] sm:$0x3] }
  0x18   :  { %4916 = vst [vmem:[#allocation22_spill] sm:$0xff] %v1864_v30  ;;  %v1963_v51 = vld [vmem:[%s4555_s0 + $0x62] sm:$0x3]  ;;  %v1968_v52 = vld [vmem:[%s4555_s0 + $0x70] sm:$0x3] }
  0x19   :  { %4917 = vst [vmem:[#allocation23_spill] sm:$0xff] %v1869_v31  ;;  %v1973_v53 = vld [vmem:[%s4555_s0 + $0x72] sm:$0x3]  ;;  %v1986_v58 = vld [vmem:[%s4555_s0 + $0x64] sm:$0x3] }
  0x1a   :  { %4918 = vst [vmem:[#allocation24_spill] sm:$0xff] %v1874_v32  ;;  %v1991_v59 = vld [vmem:[%s4555_s0 + $0x66] sm:$0x3]  ;;  %v1996_v60 = vld [vmem:[%s4555_s0 + $0x68] sm:$0x3] }
  0x1b   :  { %4919 = vst [vmem:[#allocation25_spill] sm:$0xff] %v1879_v33  ;;  %v2001_v61 = vld [vmem:[%s4555_s0 + $0x6a] sm:$0x3]  ;;  %v2006_v62 = vld [vmem:[%s4555_s0 + $0x74] sm:$0x3] }
  0x1c   :  { %4920 = vst [vmem:[#allocation26_spill] sm:$0xff] %v1884_v34  ;;  %v2011_v63 = vld [vmem:[%s4555_s0 + $0x76] sm:$0x3]  ;;  %v2016_v57 = vld [vmem:[%s4555_s0 + $0x78] sm:$0x3] }
  0x1d   :  { %4921 = vst [vmem:[#allocation27_spill] sm:$0xff] %v1889_v35  ;;  %v2021_v56 = vld [vmem:[%s4555_s0 + $0x7a] sm:$0x3]  ;;  %v2034_v19 = vld [vmem:[%s4555_s0 + $0x6c] sm:$0x3] }
  0x1e   :  { %4922 = vst [vmem:[#allocation28_spill] sm:$0xff] %v1894_v36  ;;  %v2039_v17 = vld [vmem:[%s4555_s0 + $0x6e] sm:$0x3]  ;;  %v2044_v54 = vld [vmem:[%s4555_s0 + $0x7c] sm:$0x3] }
  0x1f   :  { %4923 = vst [vmem:[#allocation29_spill] sm:$0xff] %v1899_v37  ;;  %v2049_v45 = vld [vmem:[%s4555_s0 + $0x7e] sm:$0x3]  ;;  %v2054_v44 = vld [vmem:[%s4555_s0 + $0x80] sm:$0x3] }
  0x20   :  { %4924 = vst [vmem:[#allocation30_spill] sm:$0xff] %v1904_v38  ;;  %v2059_v55 = vld [vmem:[%s4555_s0 + $0x82] sm:$0x3]  ;;  %v2064_v18 = vld [vmem:[%s4555_s0 + $0x90] sm:$0x3] }
  0x21   :  { %4925 = vst [vmem:[#allocation31_spill] sm:$0xff] %v1909_v39  ;;  %v2069_v8 = vld [vmem:[%s4555_s0 + $0x92] sm:$0x3]  ;;  %v2082_v14 = vld [vmem:[%s4555_s0 + $0x84] sm:$0x3] }
  0x22   :  { %4926 = vst [vmem:[#allocation32_spill] sm:$0xff] %v1914_v40  ;;  %v2087_v10 = vld [vmem:[%s4555_s0 + $0x86] sm:$0x3]  ;;  %v2092_v12 = vld [vmem:[%s4555_s0 + $0x88] sm:$0x3] }
  0x23   :  { %4927 = vst [vmem:[#allocation33_spill] sm:$0xff] %v1919_v41  ;;  %v2097_v15 = vld [vmem:[%s4555_s0 + $0x8a] sm:$0x3]  ;;  %v2102_v11 = vld [vmem:[%s4555_s0 + $0x94] sm:$0x3] }
  0x24   :  { %4928 = vst [vmem:[#allocation34_spill] sm:$0xff] %v1924_v42  ;;  %v2107_v16 = vld [vmem:[%s4555_s0 + $0x96] sm:$0x3]  ;;  %v2112_v27 = vld [vmem:[%s4555_s0 + $0x98] sm:$0x3] }
  0x25   :  { %4929 = vst [vmem:[#allocation35_spill] sm:$0xff] %v1929_v43  ;;  %v2117_v23 = vld [vmem:[%s4555_s0 + $0x9a] sm:$0x3]  ;;  %v2130_v24 = vld [vmem:[%s4555_s0 + $0x8c] sm:$0x3] }
  0x26   :  { %4930 = vst [vmem:[#allocation36_spill] sm:$0xff] %v1938_v46  ;;  %v2135_v20 = vld [vmem:[%s4555_s0 + $0x8e] sm:$0x3]  ;;  %v2140_v22 = vld [vmem:[%s4555_s0 + $0x9c] sm:$0x3] }
  0x27   :  { %4931 = vst [vmem:[#allocation37_spill] sm:$0xff] %v1943_v47  ;;  %v2145_v25 = vld [vmem:[%s4555_s0 + $0x9e] sm:$0x3]  ;;  %v2150_v21 = vld [vmem:[%s4555_s0 + $0xa0] sm:$0x3] }
  0x28   :  { %4932 = vst [vmem:[#allocation38_spill] sm:$0xff] %v1948_v48  ;;  %v2155_v26 = vld [vmem:[%s4555_s0 + $0xa2] sm:$0x3]  ;;  %v2160_v35 = vld [vmem:[%s4555_s0 + $0xb0] sm:$0x3] }
  0x29   :  { %4933 = vst [vmem:[#allocation39_spill] sm:$0xff] %v1953_v49  ;;  %v2165_v33 = vld [vmem:[%s4555_s0 + $0xb2] sm:$0x3]  ;;  %v2178_v30 = vld [vmem:[%s4555_s0 + $0xa4] sm:$0x3] }
  0x2a   :  { %4934 = vst [vmem:[#allocation40_spill] sm:$0xff] %v1958_v50  ;;  %v2183_v28 = vld [vmem:[%s4555_s0 + $0xa6] sm:$0x3]  ;;  %v2188_v32 = vld [vmem:[%s4555_s0 + $0xa8] sm:$0x3] }
  0x2b   :  { %4935 = vst [vmem:[#allocation41_spill] sm:$0xff] %v1963_v51  ;;  %v2193_v31 = vld [vmem:[%s4555_s0 + $0xaa] sm:$0x3]  ;;  %v2198_v29 = vld [vmem:[%s4555_s0 + $0xb4] sm:$0x3] }
  0x2c   :  { %4936 = vst [vmem:[#allocation42_spill] sm:$0xff] %v1968_v52  ;;  %v2203_v34 = vld [vmem:[%s4555_s0 + $0xb6] sm:$0x3]  ;;  %v2208_v43 = vld [vmem:[%s4555_s0 + $0xb8] sm:$0x3] }
  0x2d   :  { %4937 = vst [vmem:[#allocation43_spill] sm:$0xff] %v1973_v53  ;;  %v2213_v39 = vld [vmem:[%s4555_s0 + $0xba] sm:$0x3]  ;;  %v2226_v40 = vld [vmem:[%s4555_s0 + $0xac] sm:$0x3] }
  0x2e   :  { %4938 = vst [vmem:[#allocation44_spill] sm:$0xff] %v1986_v58  ;;  %v2231_v36 = vld [vmem:[%s4555_s0 + $0xae] sm:$0x3]  ;;  %v2236_v38 = vld [vmem:[%s4555_s0 + $0xbc] sm:$0x3] }
  0x2f   :  { %4939 = vst [vmem:[#allocation45_spill] sm:$0xff] %v1991_v59  ;;  %v2241_v41 = vld [vmem:[%s4555_s0 + $0xbe] sm:$0x3]  ;;  %v2246_v37 = vld [vmem:[%s4555_s0 + $0xc0] sm:$0x3] }
  0x30   :  { %4940 = vst [vmem:[#allocation46_spill] sm:$0xff] %v1996_v60  ;;  %v2251_v42 = vld [vmem:[%s4555_s0 + $0xc2] sm:$0x3]  ;;  %v2256_v53 = vld [vmem:[%s4555_s0 + $0xd0] sm:$0x3] }
  0x31   :  { %4941 = vst [vmem:[#allocation47_spill] sm:$0xff] %v2001_v61  ;;  %v2261_v51 = vld [vmem:[%s4555_s0 + $0xd2] sm:$0x3]  ;;  %v2274_v48 = vld [vmem:[%s4555_s0 + $0xc4] sm:$0x3] }
  0x32   :  { %4942 = vst [vmem:[#allocation48_spill] sm:$0xff] %v2006_v62  ;;  %v2279_v46 = vld [vmem:[%s4555_s0 + $0xc6] sm:$0x3]  ;;  %v2284_v50 = vld [vmem:[%s4555_s0 + $0xc8] sm:$0x3] }
  0x33   :  { %4943 = vst [vmem:[#allocation49_spill] sm:$0xff] %v2011_v63  ;;  %v2289_v49 = vld [vmem:[%s4555_s0 + $0xca] sm:$0x3]  ;;  %v2294_v47 = vld [vmem:[%s4555_s0 + $0xd4] sm:$0x3] }
  0x34   :  { %4944 = vst [vmem:[#allocation50_spill] sm:$0xff] %v2016_v57  ;;  %v2299_v52 = vld [vmem:[%s4555_s0 + $0xd6] sm:$0x3]  ;;  %v2309_v61 = vld [vmem:[%s4555_s0 + $0xda] sm:$0x3] }
  0x35   :  { %4945 = vst [vmem:[#allocation51_spill] sm:$0xff] %v2021_v56  ;;  %v2304_v56 = vld [vmem:[%s4555_s0 + $0xd8] sm:$0x3]  ;;  %v2322_v62 = vld [vmem:[%s4555_s0 + $0xcc] sm:$0x3] }
  0x36   :  { %4946 = vst [vmem:[#allocation52_spill] sm:$0xff] %v2034_v19  ;;  %v2327_v58 = vld [vmem:[%s4555_s0 + $0xce] sm:$0x3]  ;;  %v2332_v60 = vld [vmem:[%s4555_s0 + $0xdc] sm:$0x3] }
  0x37   :  { %4947 = vst [vmem:[#allocation53_spill] sm:$0xff] %v2039_v17  ;;  %v2337_v63 = vld [vmem:[%s4555_s0 + $0xde] sm:$0x3]  ;;  %v2342_v59 = vld [vmem:[%s4555_s0 + $0xe0] sm:$0x3] }
  0x38   :  { %4948 = vst [vmem:[#allocation54_spill] sm:$0xff] %v2044_v54  ;;  %v2347_v57 = vld [vmem:[%s4555_s0 + $0xe2] sm:$0x3]  ;;  %v2370_v54 = vld [vmem:[%s4555_s0 + $0xe4] sm:$0x3] }
  0x39   :  { %4949 = vst [vmem:[#allocation55_spill] sm:$0xff] %v2049_v45  ;;  %v2375_v19 = vld [vmem:[%s4555_s0 + $0xe6] sm:$0x3]  ;;  %v2385_v45 = vld [vmem:[%s4555_s0 + $0xea] sm:$0x3] }
  0x3a   :  { %4950 = vst [vmem:[#allocation56_spill] sm:$0xff] %v2054_v44  ;;  %v2380_v44 = vld [vmem:[%s4555_s0 + $0xe8] sm:$0x3]  ;;  %v2390_v17 = vld [vmem:[%s4555_s0 + $0xf4] sm:$0x3] }
  0x3b   :  { %4951 = vst [vmem:[#allocation57_spill] sm:$0xff] %v2059_v55  ;;  %v2357_v55 = vld [vmem:[%s4555_s0 + $0xf2] sm:$0x3] }
  0x3c   :  { %4952 = vst [vmem:[#allocation58_spill] sm:$0xff] %v2064_v18  ;;  %v2395_v18 = vld [vmem:[%s4555_s0 + $0xf6] sm:$0x3] }
  0x3d   :  { %4953 = vst [vmem:[#allocation59_spill] sm:$0xff] %v2069_v8  ;;  %v2352_v8 = vld [vmem:[%s4555_s0 + $0xf0] sm:$0x3] }
  0x3e   :  { %4954 = vst [vmem:[#allocation60_spill] sm:$0xff] %v2082_v14  ;;  %v2423_v14 = vld [vmem:[%s4555_s0 + $0xee] sm:$0x3] }
  0x3f   :  { %4955 = vst [vmem:[#allocation61_spill] sm:$0xff] %v2087_v10  ;;  %v2438_v10 = vld [vmem:[%s4555_s0 + $0x100] sm:$0x3] }
  0x40   :  { %4956 = vst [vmem:[#allocation62_spill] sm:$0xff] %v2092_v12  ;;  %v2428_v12 = vld [vmem:[%s4555_s0 + $0xfc] sm:$0x3] }
  0x41   :  { %4957 = vst [vmem:[#allocation63_spill] sm:$0xff] %v2097_v15  ;;  %v2405_v15 = vld [vmem:[%s4555_s0 + $0xfa] sm:$0x3] }
  0x42   :  { %4958 = vst [vmem:[#allocation64_spill] sm:$0xff] %v2102_v11  ;;  %v2418_v11 = vld [vmem:[%s4555_s0 + $0xec] sm:$0x3] }
  0x43   :  { %4959 = vst [vmem:[#allocation65_spill] sm:$0xff] %v2107_v16  ;;  %v2433_v16 = vld [vmem:[%s4555_s0 + $0xfe] sm:$0x3] }
  0x44   :  { %4960 = vst [vmem:[#allocation66_spill] sm:$0xff] %v2112_v27  ;;  %v2443_v27 = vld [vmem:[%s4555_s0 + $0x102] sm:$0x3] }
  0x45   :  { %4961 = vst [vmem:[#allocation67_spill] sm:$0xff] %v2117_v23  ;;  %v2400_v23 = vld [vmem:[%s4555_s0 + $0xf8] sm:$0x3] }
  0x46   :  { %4962 = vst [vmem:[#allocation68_spill] sm:$0xff] %v2130_v24  ;;  %v2471_v24 = vld [vmem:[%s4555_s0 + $0x106] sm:$0x3] }
  0x47   :  { %4963 = vst [vmem:[#allocation69_spill] sm:$0xff] %v2135_v20  ;;  %v2486_v20 = vld [vmem:[%s4555_s0 + $0x114] sm:$0x3] }
  0x48   :  { %4964 = vst [vmem:[#allocation70_spill] sm:$0xff] %v2140_v22  ;;  %v2466_v22 = vld [vmem:[%s4555_s0 + $0x104] sm:$0x3] }
  0x49   :  { %4965 = vst [vmem:[#allocation71_spill] sm:$0xff] %v2145_v25  ;;  %v2481_v25 = vld [vmem:[%s4555_s0 + $0x10a] sm:$0x3] }
  0x4a   :  { %4966 = vst [vmem:[#allocation72_spill] sm:$0xff] %v2150_v21  ;;  %v2476_v21 = vld [vmem:[%s4555_s0 + $0x108] sm:$0x3] }
  0x4b   :  { %4967 = vst [vmem:[#allocation73_spill] sm:$0xff] %v2155_v26  ;;  %v2453_v26 = vld [vmem:[%s4555_s0 + $0x112] sm:$0x3] }
  0x4c   :  { %4968 = vst [vmem:[#allocation74_spill] sm:$0xff] %v2160_v35  ;;  %v2491_v35 = vld [vmem:[%s4555_s0 + $0x116] sm:$0x3] }
  0x4d   :  { %4969 = vst [vmem:[#allocation75_spill] sm:$0xff] %v2165_v33  ;;  %v2448_v33 = vld [vmem:[%s4555_s0 + $0x110] sm:$0x3] }
  0x4e   :  { %4970 = vst [vmem:[#allocation76_spill] sm:$0xff] %v2178_v30  ;;  %v2519_v30 = vld [vmem:[%s4555_s0 + $0x10e] sm:$0x3] }
  0x4f   :  { %4971 = vst [vmem:[#allocation77_spill] sm:$0xff] %v2183_v28  ;;  %v2534_v28 = vld [vmem:[%s4555_s0 + $0x120] sm:$0x3] }
  0x50   :  { %4972 = vst [vmem:[#allocation78_spill] sm:$0xff] %v2188_v32  ;;  %v2524_v32 = vld [vmem:[%s4555_s0 + $0x11c] sm:$0x3] }
  0x51   :  { %4973 = vst [vmem:[#allocation79_spill] sm:$0xff] %v2193_v31  ;;  %v2501_v31 = vld [vmem:[%s4555_s0 + $0x11a] sm:$0x3] }
  0x52   :  { %4974 = vst [vmem:[#allocation80_spill] sm:$0xff] %v2198_v29  ;;  %v2514_v29 = vld [vmem:[%s4555_s0 + $0x10c] sm:$0x3] }
  0x53   :  { %4975 = vst [vmem:[#allocation81_spill] sm:$0xff] %v2203_v34  ;;  %v2529_v34 = vld [vmem:[%s4555_s0 + $0x11e] sm:$0x3] }
  0x54   :  { %4976 = vst [vmem:[#allocation82_spill] sm:$0xff] %v2208_v43  ;;  %v2539_v43 = vld [vmem:[%s4555_s0 + $0x122] sm:$0x3] }
  0x55   :  { %4977 = vst [vmem:[#allocation83_spill] sm:$0xff] %v2213_v39  ;;  %v2496_v39 = vld [vmem:[%s4555_s0 + $0x118] sm:$0x3] }
  0x56   :  { %4978 = vst [vmem:[#allocation84_spill] sm:$0xff] %v2226_v40  ;;  %v2567_v40 = vld [vmem:[%s4555_s0 + $0x126] sm:$0x3] }
  0x57   :  { %4979 = vst [vmem:[#allocation85_spill] sm:$0xff] %v2231_v36  ;;  %v2582_v36 = vld [vmem:[%s4555_s0 + $0x134] sm:$0x3] }
  0x58   :  { %4980 = vst [vmem:[#allocation86_spill] sm:$0xff] %v2236_v38  ;;  %v2562_v38 = vld [vmem:[%s4555_s0 + $0x124] sm:$0x3] }
  0x59   :  { %4981 = vst [vmem:[#allocation87_spill] sm:$0xff] %v2241_v41  ;;  %v2577_v41 = vld [vmem:[%s4555_s0 + $0x12a] sm:$0x3] }
  0x5a   :  { %4982 = vst [vmem:[#allocation88_spill] sm:$0xff] %v2246_v37  ;;  %v2572_v37 = vld [vmem:[%s4555_s0 + $0x128] sm:$0x3] }
  0x5b   :  { %4983 = vst [vmem:[#allocation89_spill] sm:$0xff] %v2251_v42  ;;  %v2549_v42 = vld [vmem:[%s4555_s0 + $0x132] sm:$0x3] }
  0x5c   :  { %4984 = vst [vmem:[#allocation90_spill] sm:$0xff] %v2256_v53  ;;  %v2587_v53 = vld [vmem:[%s4555_s0 + $0x136] sm:$0x3] }
  0x5d   :  { %4985 = vst [vmem:[#allocation91_spill] sm:$0xff] %v2261_v51  ;;  %v2544_v51 = vld [vmem:[%s4555_s0 + $0x130] sm:$0x3] }
  0x5e   :  { %4986 = vst [vmem:[#allocation92_spill] sm:$0xff] %v2274_v48  ;;  %v2615_v48 = vld [vmem:[%s4555_s0 + $0x12e] sm:$0x3] }
  0x5f   :  { %4987 = vst [vmem:[#allocation93_spill] sm:$0xff] %v2279_v46  ;;  %v2630_v46 = vld [vmem:[%s4555_s0 + $0x140] sm:$0x3] }
  0x60   :  { %4988 = vst [vmem:[#allocation94_spill] sm:$0xff] %v2284_v50  ;;  %v2620_v50 = vld [vmem:[%s4555_s0 + $0x13c] sm:$0x3] }
  0x61   :  { %4989 = vst [vmem:[#allocation95_spill] sm:$0xff] %v2289_v49  ;;  %v2597_v49 = vld [vmem:[%s4555_s0 + $0x13a] sm:$0x3] }
  0x62   :  { %4990 = vst [vmem:[#allocation96_spill] sm:$0xff] %v2294_v47  ;;  %v2610_v47 = vld [vmem:[%s4555_s0 + $0x12c] sm:$0x3] }
  0x63   :  { %4991 = vst [vmem:[#allocation97_spill] sm:$0xff] %v2299_v52  ;;  %v2625_v52 = vld [vmem:[%s4555_s0 + $0x13e] sm:$0x3] }
  0x64   :  { %4992 = vst [vmem:[#allocation98_spill] sm:$0xff] %v2304_v56  ;;  %v2635_v56 = vld [vmem:[%s4555_s0 + $0x142] sm:$0x3] }
  0x65   :  { %4993 = vst [vmem:[#allocation99_spill] sm:$0xff] %v2309_v61  ;;  %v2592_v61 = vld [vmem:[%s4555_s0 + $0x138] sm:$0x3] }
  0x66   :  { %4994 = vst [vmem:[#allocation100_spill] sm:$0xff] %v2322_v62  ;;  %v2663_v62 = vld [vmem:[%s4555_s0 + $0x146] sm:$0x3] }
  0x67   :  { %4995 = vst [vmem:[#allocation101_spill] sm:$0xff] %v2327_v58  ;;  %v2678_v58 = vld [vmem:[%s4555_s0 + $0x154] sm:$0x3] }
  0x68   :  { %4996 = vst [vmem:[#allocation102_spill] sm:$0xff] %v2332_v60  ;;  %v2658_v60 = vld [vmem:[%s4555_s0 + $0x144] sm:$0x3] }
  0x69   :  { %4997 = vst [vmem:[#allocation103_spill] sm:$0xff] %v2337_v63  ;;  %v2673_v63 = vld [vmem:[%s4555_s0 + $0x14a] sm:$0x3] }
  0x6a   :  { %4998 = vst [vmem:[#allocation104_spill] sm:$0xff] %v2342_v59  ;;  %v2668_v59 = vld [vmem:[%s4555_s0 + $0x148] sm:$0x3] }
  0x6b   :  { %4999 = vst [vmem:[#allocation105_spill] sm:$0xff] %v2347_v57  ;;  %v2645_v57 = vld [vmem:[%s4555_s0 + $0x152] sm:$0x3] }
  0x6c   :  { %5000 = vst [vmem:[#allocation106_spill] sm:$0xff] %v2352_v8  ;;  %v2683_v8 = vld [vmem:[%s4555_s0 + $0x156] sm:$0x3] }
  0x6d   :  { %5001 = vst [vmem:[#allocation107_spill] sm:$0xff] %v2357_v55  ;;  %v2640_v55 = vld [vmem:[%s4555_s0 + $0x150] sm:$0x3] }
  0x6e   :  { %5002 = vst [vmem:[#allocation108_spill] sm:$0xff] %v2370_v54  ;;  %v2711_v54 = vld [vmem:[%s4555_s0 + $0x14e] sm:$0x3] }
  0x6f   :  { %5003 = vst [vmem:[#allocation109_spill] sm:$0xff] %v2375_v19  ;;  %v2726_v19 = vld [vmem:[%s4555_s0 + $0x160] sm:$0x3] }
  0x70   :  { %5004 = vst [vmem:[#allocation110_spill] sm:$0xff] %v2380_v44  ;;  %v2716_v44 = vld [vmem:[%s4555_s0 + $0x15c] sm:$0x3] }
  0x71   :  { %5005 = vst [vmem:[#allocation111_spill] sm:$0xff] %v2385_v45  ;;  %v2693_v45 = vld [vmem:[%s4555_s0 + $0x15a] sm:$0x3] }
  0x72   :  { %5006 = vst [vmem:[#allocation112_spill] sm:$0xff] %v2390_v17  ;;  %v2706_v17 = vld [vmem:[%s4555_s0 + $0x14c] sm:$0x3] }
  0x73   :  { %5007 = vst [vmem:[#allocation113_spill] sm:$0xff] %v2395_v18  ;;  %v2721_v18 = vld [vmem:[%s4555_s0 + $0x15e] sm:$0x3] }
  0x74   :  { %5008 = vst [vmem:[#allocation114_spill] sm:$0xff] %v2400_v23  ;;  %v2731_v23 = vld [vmem:[%s4555_s0 + $0x170] sm:$0x3] }
  0x75   :  { %5009 = vst [vmem:[#allocation115_spill] sm:$0xff] %v2405_v15  ;;  %v2688_v15 = vld [vmem:[%s4555_s0 + $0x158] sm:$0x3] }
  0x76   :  { %5010 = vst [vmem:[#allocation116_spill] sm:$0xff] %v2423_v14  ;;  %v2749_v14 = vld [vmem:[%s4555_s0 + $0x164] sm:$0x3] }
  0x77   :  { %5011 = vst [vmem:[#allocation117_spill] sm:$0xff] %v2433_v16  ;;  %v2744_v16 = vld [vmem:[%s4555_s0 + $0x162] sm:$0x3] }
  0x78   :  { %5012 = vst [vmem:[#allocation118_spill] sm:$0xff] %v2438_v10  ;;  %v2764_v10 = vld [vmem:[%s4555_s0 + $0x172] sm:$0x3] }
  0x79   :  { %5013 = vst [vmem:[#allocation119_spill] sm:$0xff] %v2443_v27  ;;  %v2754_v27 = vld [vmem:[%s4555_s0 + $0x166] sm:$0x3] }
  0x7a   :  { %5014 = vst [vmem:[#allocation120_spill] sm:$0xff] %v2448_v33  ;;  %v2759_v33 = vld [vmem:[%s4555_s0 + $0x168] sm:$0x3] }
  0x7b   :  { %5015 = vst [vmem:[#allocation121_spill] sm:$0xff] %v2453_v26  ;;  %v2769_v26 = vld [vmem:[%s4555_s0 + $0x174] sm:$0x3] }
  0x7c   :  { %5016 = vst [vmem:[#allocation122_spill] sm:$0xff] %v2466_v22  ;;  %v2797_v22 = vld [vmem:[%s4555_s0 + $0x16c] sm:$0x3] }
  0x7d   :  { %5017 = vst [vmem:[#allocation123_spill] sm:$0xff] %v2471_v24  ;;  %v2812_v24 = vld [vmem:[%s4555_s0 + $0x17c] sm:$0x3] }
  0x7e   :  { %5018 = vst [vmem:[#allocation124_spill] sm:$0xff] %v2476_v21  ;;  %v2802_v21 = vld [vmem:[%s4555_s0 + $0x16e] sm:$0x3] }
  0x7f   :  { %5019 = vst [vmem:[#allocation125_spill] sm:$0xff] %v2481_v25  ;;  %v2779_v25 = vld [vmem:[%s4555_s0 + $0x178] sm:$0x3] }
  0x80   :  { %5020 = vst [vmem:[#allocation126_spill] sm:$0xff] %v2486_v20  ;;  %v2792_v20 = vld [vmem:[%s4555_s0 + $0x16a] sm:$0x3] }
  0x81   :  { %5021 = vst [vmem:[#allocation127_spill] sm:$0xff] %v2491_v35  ;;  %v2807_v35 = vld [vmem:[%s4555_s0 + $0x17a] sm:$0x3] }
  0x82   :  { %5022 = vst [vmem:[#allocation128_spill] sm:$0xff] %v2496_v39  ;;  %v2817_v39 = vld [vmem:[%s4555_s0 + $0x17e] sm:$0x3] }
  0x83   :  { %5023 = vst [vmem:[#allocation129_spill] sm:$0xff] %v2501_v31  ;;  %v2774_v31 = vld [vmem:[%s4555_s0 + $0x176] sm:$0x3] }
  0x84   :  { %5024 = vst [vmem:[#allocation130_spill] sm:$0xff] %v2519_v30  ;;  %v2835_v30 = vld [vmem:[%s4555_s0 + $0x182] sm:$0x3] }
  0x85   :  { %5025 = vst [vmem:[#allocation131_spill] sm:$0xff] %v2524_v32  ;;  %v2840_v32 = vld [vmem:[%s4555_s0 + $0x190] sm:$0x3] }
  0x86   :  { %5026 = vst [vmem:[#allocation132_spill] sm:$0xff] %v2529_v34  ;;  %v2868_v34 = vld [vmem:[%s4555_s0 + $0x188] sm:$0x3] }
  0x87   :  { %5027 = vst [vmem:[#allocation133_spill] sm:$0xff] %v2534_v28  ;;  %v2883_v28 = vld [vmem:[%s4555_s0 + $0x196] sm:$0x3] }
  0x88   :  { %5028 = vst [vmem:[#allocation134_spill] sm:$0xff] %v2539_v43  ;;  %v2873_v43 = vld [vmem:[%s4555_s0 + $0x18a] sm:$0x3] }
  0x89   :  { %5029 = vst [vmem:[#allocation135_spill] sm:$0xff] %v2544_v51  ;;  %v2845_v51 = vld [vmem:[%s4555_s0 + $0x192] sm:$0x3] }
  0x8a   :  { %5030 = vst [vmem:[#allocation136_spill] sm:$0xff] %v2549_v42  ;;  %v2822_v42 = vld [vmem:[%s4555_s0 + $0x180] sm:$0x3] }
  0x8b   :  { %5031 = vst [vmem:[#allocation137_spill] sm:$0xff] %v2577_v41  ;;  %v2858_v41 = vld [vmem:[%s4555_s0 + $0x184] sm:$0x3] }
  0x8c   :  { %5032 = vst [vmem:[#allocation138_spill] sm:$0xff] %v2592_v61  ;;  %v2863_v61 = vld [vmem:[%s4555_s0 + $0x186] sm:$0x3] }
  0x8d   :  { %5033 = vst [vmem:[#allocation139_spill] sm:$0xff] %v2597_v49  ;;  %v2878_v49 = vld [vmem:[%s4555_s0 + $0x194] sm:$0x3] }
  0x8e   :  { %5034 = vst [vmem:[#allocation140_spill] sm:$0xff] %v2610_v47  ;;  %v2911_v47 = vld [vmem:[%s4555_s0 + $0x18e] sm:$0x3] }
  0x8f   :  { %5035 = vst [vmem:[#allocation141_spill] sm:$0xff] %v2615_v48  ;;  %v2926_v48 = vld [vmem:[%s4555_s0 + $0x1a0] sm:$0x3] }
  0x90   :  { %5036 = vst [vmem:[#allocation142_spill] sm:$0xff] %v2620_v50  ;;  %v2906_v50 = vld [vmem:[%s4555_s0 + $0x18c] sm:$0x3] }
  0x91   :  { %5037 = vst [vmem:[#allocation143_spill] sm:$0xff] %v2625_v52  ;;  %v2921_v52 = vld [vmem:[%s4555_s0 + $0x19e] sm:$0x3] }
  0x92   :  { %5038 = vst [vmem:[#allocation144_spill] sm:$0xff] %v2630_v46  ;;  %v2916_v46 = vld [vmem:[%s4555_s0 + $0x19c] sm:$0x3] }
  0x93   :  { %5039 = vst [vmem:[#allocation145_spill] sm:$0xff] %v2635_v56  ;;  %v2893_v56 = vld [vmem:[%s4555_s0 + $0x19a] sm:$0x3] }
  0x94   :  { %5040 = vst [vmem:[#allocation146_spill] sm:$0xff] %v2640_v55  ;;  %v2947_v55 = vld [vmem:[%s4555_s0 + $0x1b2] sm:$0x3] }
  0x95   :  { %5041 = vst [vmem:[#allocation147_spill] sm:$0xff] %v2645_v57  ;;  %v2888_v57 = vld [vmem:[%s4555_s0 + $0x198] sm:$0x3] }
  0x96   :  { %5042 = vst [vmem:[#allocation148_spill] sm:$0xff] %v2668_v59  ;;  %v2942_v59 = vld [vmem:[%s4555_s0 + $0x1b0] sm:$0x3] }
  0x97   :  { %5043 = vst [vmem:[#allocation149_spill] sm:$0xff] %v2673_v63  ;;  %v2970_v63 = vld [vmem:[%s4555_s0 + $0x1a8] sm:$0x3] }
  0x98   :  { %5044 = vst [vmem:[#allocation150_spill] sm:$0xff] %v2688_v15  ;;  %v2937_v15 = vld [vmem:[%s4555_s0 + $0x1a2] sm:$0x3] }
  0x99   :  { %5045 = vst [vmem:[#allocation151_spill] sm:$0xff] %v2693_v45  ;;  %v2985_v45 = vld [vmem:[%s4555_s0 + $0x1b6] sm:$0x3] }
  0x9a   :  { %5046 = vst [vmem:[#allocation152_spill] sm:$0xff] %v2711_v54  ;;  %v2965_v54 = vld [vmem:[%s4555_s0 + $0x1a6] sm:$0x3] }
  0x9b   :  { %5047 = vst [vmem:[#allocation153_spill] sm:$0xff] %v2721_v18  ;;  %v2960_v18 = vld [vmem:[%s4555_s0 + $0x1a4] sm:$0x3] }
  0x9c   :  { %5048 = vst [vmem:[#allocation154_spill] sm:$0xff] %v2726_v19  ;;  %v2980_v19 = vld [vmem:[%s4555_s0 + $0x1b4] sm:$0x3] }
  0x9d   :  { %5049 = vst [vmem:[#allocation155_spill] sm:$0xff] %v2731_v23  ;;  %v2975_v23 = vld [vmem:[%s4555_s0 + $0x1aa] sm:$0x3] }
  0x9e   :  { %5050 = vst [vmem:[#allocation156_spill] sm:$0xff] %v2744_v16  ;;  %v3013_v16 = vld [vmem:[%s4555_s0 + $0x1ae] sm:$0x3] }
  0x9f   :  { %5051 = vst [vmem:[#allocation157_spill] sm:$0xff] %v2749_v14  ;;  %v3028_v14 = vld [vmem:[%s4555_s0 + $0x1c0] sm:$0x3] }
  0xa0   :  { %5052 = vst [vmem:[#allocation158_spill] sm:$0xff] %v2754_v27  ;;  %v3018_v27 = vld [vmem:[%s4555_s0 + $0x1bc] sm:$0x3] }
  0xa1   :  { %5053 = vst [vmem:[#allocation159_spill] sm:$0xff] %v2759_v33  ;;  %v2995_v33 = vld [vmem:[%s4555_s0 + $0x1ba] sm:$0x3] }
  0xa2   :  { %5054 = vst [vmem:[#allocation160_spill] sm:$0xff] %v2764_v10  ;;  %v3008_v10 = vld [vmem:[%s4555_s0 + $0x1ac] sm:$0x3] }
  0xa3   :  { %5055 = vst [vmem:[#allocation161_spill] sm:$0xff] %v2769_v26  ;;  %v3023_v26 = vld [vmem:[%s4555_s0 + $0x1be] sm:$0x3] }
  0xa4   :  { %5056 = vst [vmem:[#allocation162_spill] sm:$0xff] %v2774_v31  ;;  %v3090_v31 = vld [vmem:[%s4555_s0 + $0x1c6] sm:$0x3] }
  0xa5   :  { %5057 = vst [vmem:[#allocation163_spill] sm:$0xff] %v2779_v25  ;;  %v2990_v25 = vld [vmem:[%s4555_s0 + $0x1b8] sm:$0x3] }
  0xa6   :  { %5058 = vst [vmem:[#allocation164_spill] sm:$0xff] %v2797_v22 }
  0xa7   :  { %5059 = vst [vmem:[#allocation165_spill] sm:$0xff] %v2802_v21 }
  0xa8   :  { %5060 = vst [vmem:[#allocation166_spill] sm:$0xff] %v2807_v35  ;;  %v3047_v35 = vld [vmem:[%s4555_s0 + $0x1c2] sm:$0x3] }
  0xa9   :  { %5061 = vst [vmem:[#allocation167_spill] sm:$0xff] %v2812_v24  ;;  %v5097_v24 = vmax.f32 %v1734_v4, %v1744_v6  ;;  %v5103_v6 = vmax.f32 %v1739_v5, %v1749_v7  ;;  %v3105_v5 = vld [vmem:[%s4555_s0 + $0x1cc] sm:$0x3]  ;;  %v3110_v7 = vld [vmem:[%s4555_s0 + $0x1d6] sm:$0x3] }
  0xaa   :  { %5062 = vst [vmem:[#allocation168_spill] sm:$0xff] %v2817_v39  ;;  %v5096_v39 = vmax.f32 %v1719_v1, %v1729_v3  ;;  %v3057_v1 = vld [vmem:[%s4555_s0 + $0x1d0] sm:$0x3]  ;;  %v3100_v3 = vld [vmem:[%s4555_s0 + $0x1ca] sm:$0x3] }
  0xab   :  { %5063 = vst [vmem:[#allocation169_spill] sm:$0xff] %v2822_v42  ;;  %v407_v22 = vsel %vm392_vm0, %v5097_v24, -inf  ;;  %v3070_v24 = vld [vmem:[%s4555_s0 + $0x1d2] sm:$0x3]  ;;  %v3137_v4 = vld [vmem:[%s4555_s0 + $0x1de] sm:$0x3] }
  0xac   :  { %5064 = vst [vmem:[#allocation170_spill] sm:$0xff] %v2840_v32  ;;  %v5095_v32 = vmax.f32 %v1714_v0, %v1724_v2  ;;  %v400_v21 = vsel %vm392_vm0, %v5096_v39, -inf  ;;  %v3052_v0 = vld [vmem:[%s4555_s0 + $0x1c4] sm:$0x3]  ;;  %v414_v2 = vsel %vm392_vm0, %v5103_v6, -inf }
  0xad   :  { %5065 = vst [vmem:[#allocation171_spill] sm:$0xff] %v2845_v51  ;;  %v3095_v39 = vld [vmem:[%s4555_s0 + $0x1c8] sm:$0x3]  ;;  %v3115_v6 = vld [vmem:[%s4555_s0 + $0x1d8] sm:$0x3] }
  0xae   :  { %5066 = vst [vmem:[#allocation172_spill] sm:$0xff] %v2858_v41  ;;  %v393_v42 = vsel %vm392_vm0, %v5095_v32, -inf  ;;  %v3075_v32 = vld [vmem:[%s4555_s0 + $0x1d4] sm:$0x3] }
  0xaf   :  { %5067 = vst [vmem:[#allocation173_spill] sm:$0xff] %v2863_v61 }
  0xb0   :  { %5068 = vst [vmem:[#allocation174_spill] sm:$0xff] %v2868_v34  ;;  %v3155_v34 = vld [vmem:[%s4555_s0 + $0x1e2] sm:$0x3] }
  0xb1   :  { %5069 = vst [vmem:[#allocation175_spill] sm:$0xff] %v2873_v43  ;;  %v415_v43 = vrot.slane %v414_v2, 4 }
  0xb2   :  { %5070 = vst [vmem:[#allocation176_spill] sm:$0xff] %v2878_v49 }
  0xb3   :  { %5071 = vst [vmem:[#allocation177_spill] sm:$0xff] %v2883_v28 }
  0xb4   :  { %5072 = vst [vmem:[#allocation178_spill] sm:$0xff] %v2888_v57  ;;  %v3150_v57 = vld [vmem:[%s4555_s0 + $0x1e0] sm:$0x3] }
  0xb5   :  { %5073 = vst [vmem:[#allocation179_spill] sm:$0xff] %v2893_v56  ;;  %v5118_v56 = vmax.f32 %v1759_v9, %v1779_v13  ;;  %v3198_v9 = vld [vmem:[%s4555_s0 + $0x1ea] sm:$0x3]  ;;  %v3203_v13 = vld [vmem:[%s4555_s0 + $0x1f2] sm:$0x3] }
  0xb6   :  { %5074 = vst [vmem:[#allocation180_spill] sm:$0xff] %v2906_v50  ;;  %v3132_v50 = vld [vmem:[%s4555_s0 + $0x1dc] sm:$0x3] }
  0xb7   :  { %5075 = vst [vmem:[#allocation181_spill] sm:$0xff] %v2911_v47  ;;  %v3122_v47 = vld [vmem:[%s4555_s0 + $0x1ce] sm:$0x3] }
  0xb8   :  { %5076 = vst [vmem:[#allocation182_spill] sm:$0xff] %v2916_v46  ;;  %v3127_v46 = vld [vmem:[%s4555_s0 + $0x1da] sm:$0x3] }
  0xb9   :  { %5077 = vst [vmem:[#allocation183_spill] sm:$0xff] %v2921_v52  ;;  %v408_v52 = vrot.slane %v407_v22, 4 }
  0xba   :  { %5078 = vst [vmem:[#allocation184_spill] sm:$0xff] %v2926_v48  ;;  %v401_v48 = vrot.slane %v400_v21, 4 }
  0xbb   :  { %5079 = vst [vmem:[#allocation185_spill] sm:$0xff] %v2937_v15  ;;  %v5127_v15 = vld [vmem:[#allocation4_spill] sm:$0xff] }
  0xbc   :  { %5080 = vst [vmem:[#allocation186_spill] sm:$0xff] %v2942_v59  ;;  %v394_v59 = vrot.slane %v393_v42, 4 }
  0xbd   :  { %5081 = vst [vmem:[#allocation187_spill] sm:$0xff] %v2947_v55  ;;  %v3193_v55 = vld [vmem:[%s4555_s0 + $0x1e8] sm:$0x3] }
  0xbe   :  { %5082 = vst [vmem:[#allocation188_spill] sm:$0xff] %v2960_v18 }
  0xbf   :  { %5083 = vst [vmem:[#allocation189_spill] sm:$0xff] %v2965_v54 }
  0xc0   :  { %5084 = vst [vmem:[#allocation190_spill] sm:$0xff] %v2970_v63 }
  0xc1   :  { %5085 = vst [vmem:[#allocation191_spill] sm:$0xff] %v2975_v23  ;;  %v3171_v23 = vld [vmem:[%s4555_s0 + $0x1f0] sm:$0x3] }
  0xc2   :  { %5086 = vst [vmem:[#allocation192_spill] sm:$0xff] %v2980_v19 }
  0xc3   :  { %5087 = vst [vmem:[#allocation193_spill] sm:$0xff] %v2985_v45 }
  0xc4   :  { %5088 = vst [vmem:[#allocation194_spill] sm:$0xff] %v2990_v25  ;;  %v3222_v25 = vld [vmem:[%s4555_s0 + $0x1f6] sm:$0x3] }
  0xc5   :  { %5089 = vst [vmem:[#allocation195_spill] sm:$0xff] %v2995_v33  ;;  %v3166_v33 = vld [vmem:[%s4555_s0 + $0x1e4] sm:$0x3] }
  0xc6   :  { %5090 = vst [vmem:[#allocation196_spill] sm:$0xff] %v3008_v10  ;;  %v3188_v10 = vld [vmem:[%s4555_s0 + $0x1e6] sm:$0x3] }
  0xc7   :  { %5091 = vst [vmem:[#allocation197_spill] sm:$0xff] %v3013_v16 }
  0xc8   :  { %5092 = vst [vmem:[#allocation198_spill] sm:$0xff] %v3018_v27 }
  0xc9   :  { %5093 = vst [vmem:[#allocation199_spill] sm:$0xff] %v3023_v26  ;;  %v5120_v26 = vld [vmem:[#allocation6_spill] sm:$0xff] }
  0xca   :  { %5094 = vst [vmem:[#allocation200_spill] sm:$0xff] %v3028_v14  ;;  %v5119_v14 = vld [vmem:[#allocation3_spill] sm:$0xff] }
  0xcb   :  { %5098 = vst [vmem:[#allocation201_spill] sm:$0xff] %v3047_v35  ;;  %v5121_v16 = vmax.f32 %v5119_v14, %v5120_v26  ;;  %v3208_v14 = vld [vmem:[%s4555_s0 + $0x1f4] sm:$0x3]  ;;  %v402_v26 = vmax.f32 %v400_v21, %v401_v48  ;;  %v3217_v35 = vld [vmem:[%s4555_s0 + $0x1ec] sm:$0x3] }
  0xcc   :  { %5099 = vst [vmem:[#allocation202_spill] sm:$0xff] %v3052_v0  ;;  %v3227_v21 = vld [vmem:[%s4555_s0 + $0x1f8] sm:$0x3]  ;;  %v3254_v48 = vld [vmem:[%s4555_s0 + $0x1ee] sm:$0x3] }
  0xcd   :  { %5100 = vst [vmem:[#allocation203_spill] sm:$0xff] %v3057_v1  ;;  %v421_v1 = vsel %vm392_vm0, %v5118_v56, -inf  ;;  %v428_v27 = vsel %vm392_vm0, %v5121_v16, -inf  ;;  %v395_v16 = vmax.f32 %v393_v42, %v394_v59  ;;  %v409_v56 = vmax.f32 %v407_v22, %v408_v52  ;;  %v3240_v52 = vld [vmem:[%s4555_s0 + $0x1fa] sm:$0x3] }
  0xce   :  { %5101 = vst [vmem:[#allocation204_spill] sm:$0xff] %v3070_v24  ;;  %v3245_v59 = vld [vmem:[%s4555_s0 + $0x1fc] sm:$0x3]  ;;  %v416_v42 = vmax.f32 %v414_v2, %v415_v43  ;;  %v422_v22 = vrot.slane %v421_v1, 4  ;;  %v403_v2 = vrot.slane %v402_v26, 2 }
  0xcf   :  { %5102 = vst [vmem:[#allocation205_spill] sm:$0xff] %v3075_v32  ;;  %v5128_v32 = vld [vmem:[#allocation7_spill] sm:$0xff]  ;;  %v396_v43 = vrot.slane %v395_v16, 2 }
  0xd0   :  { %5104 = vst [vmem:[#allocation206_spill] sm:$0xff] %v3090_v31  ;;  %v5129_v0 = vmax.f32 %v5127_v15, %v5128_v32  ;;  %v3259_v15 = vld [vmem:[%s4555_s0 + $0x1fe] sm:$0x3] }
  0xd1   :  { %5105 = vst [vmem:[#allocation207_spill] sm:$0xff] %v3095_v39 }
  0xd2   :  { %5106 = vst [vmem:[#allocation208_spill] sm:$0xff] %v3100_v3  ;;  %v435_v24 = vsel %vm392_vm0, %v5129_v0, -inf }
  0xd3   :  { %5107 = vst [vmem:[#allocation209_spill] sm:$0xff] %v3105_v5  ;;  %v436_v32 = vrot.slane %v435_v24, 4 }
  0xd4   :  { %5108 = vst [vmem:[#allocation210_spill] sm:$0xff] %v3110_v7 }
  0xd5   :  { %5109 = vst [vmem:[#allocation211_spill] sm:$0xff] %v3115_v6  ;;  %v5144_v6 = vld [vmem:[#allocation11_spill] sm:$0xff] }
  0xd6   :  { %5110 = vst [vmem:[#allocation212_spill] sm:$0xff] %v3122_v47  ;;  %v5138_v47 = vld [vmem:[#allocation8_spill] sm:$0xff] }
  0xd7   :  { %5111 = vst [vmem:[#allocation213_spill] sm:$0xff] %v3127_v46 }
  0xd8   :  { %5112 = vst [vmem:[#allocation214_spill] sm:$0xff] %v3132_v50 }
  0xd9   :  { %5113 = vst [vmem:[#allocation215_spill] sm:$0xff] %v3137_v4  ;;  %v429_v4 = vrot.slane %v428_v27, 4 }
  0xda   :  { %5114 = vst [vmem:[#allocation216_spill] sm:$0xff] %v3150_v57  ;;  %v5137_v57 = vld [vmem:[#allocation5_spill] sm:$0xff] }
  0xdb   :  { %5115 = vst [vmem:[#allocation217_spill] sm:$0xff] %v3155_v34  ;;  %v5139_v5 = vmax.f32 %v5137_v57, %v5138_v47  ;;  %v5140_v47 = vld [vmem:[#allocation2_spill] sm:$0xff]  ;;  %v430_v3 = vmax.f32 %v428_v27, %v429_v4 }
  0xdc   :  { %5116 = vst [vmem:[#allocation218_spill] sm:$0xff] %v3166_v33  ;;  %v417_v33 = vrot.slane %v416_v42, 2  ;;  %v5141_v57 = vld [vmem:[#allocation10_spill] sm:$0xff] }
  0xdd   :  { %5117 = vst [vmem:[#allocation219_spill] sm:$0xff] %v3171_v23  ;;  %v410_v23 = vrot.slane %v409_v56, 2  ;;  %v442_v46 = vsel %vm392_vm0, %v5139_v5, -inf  ;;  %v5142_v5 = vmax.f32 %v5140_v47, %v5141_v57  ;;  %v5149_v47 = vld [vmem:[#allocation13_spill] sm:$0xff]  ;;  %v5152_v4 = vld [vmem:[#allocation14_spill] sm:$0xff] }
  0xde   :  { %5122 = vst [vmem:[#allocation3_spill] sm:$0xff] %v3188_v10  ;;  %v5143_v10 = vld [vmem:[#allocation9_spill] sm:$0xff] }
  0xdf   :  { %5123 = vst [vmem:[#allocation6_spill] sm:$0xff] %v3193_v55  ;;  %v449_v34 = vsel %vm392_vm0, %v5142_v5, -inf  ;;  %v5150_v57 = vld [vmem:[#allocation17_spill] sm:$0xff]  ;;  %v5156_v55 = vld [vmem:[#allocation19_spill] sm:$0xff] }
  0xe0   :  { %5124 = vst [vmem:[#allocation220_spill] sm:$0xff] %v3198_v9  ;;  %v5147_v9 = vld [vmem:[#allocation16_spill] sm:$0xff]  ;;  %v5151_v5 = vmax.f32 %v5149_v47, %v5150_v57 }
  0xe1   :  { %5125 = vst [vmem:[#allocation221_spill] sm:$0xff] %v3203_v13  ;;  %v423_v13 = vmax.f32 %v421_v1, %v422_v22  ;;  %v411_v1 = vmax.f32 %v409_v56, %v410_v23  ;;  %v437_v22 = vmax.f32 %v435_v24, %v436_v32  ;;  %v5158_v23 = vld [vmem:[#allocation20_spill] sm:$0xff]  ;;  %v5159_v24 = vld [vmem:[#allocation22_spill] sm:$0xff]  ;;  %v5161_v32 = vld [vmem:[#allocation21_spill] sm:$0xff] }
  0xe2   :  { %5126 = vst [vmem:[#allocation222_spill] sm:$0xff] %v3208_v14  ;;  %v397_v14 = vmax.f32 %v395_v16, %v396_v43  ;;  %v470_v27 = vsel %vm392_vm0, %v5151_v5, -inf  ;;  %v5160_v56 = vmax.f32 %v5158_v23, %v5159_v24  ;;  %v5162_v43 = vld [vmem:[#allocation23_spill] sm:$0xff]  ;;  %v431_v5 = vrot.slane %v430_v3, 2 }
  0xe3   :  { %5130 = vst [vmem:[#allocation4_spill] sm:$0xff] %v3217_v35  ;;  %v5153_v35 = vld [vmem:[#allocation18_spill] sm:$0xff]  ;;  %v424_v57 = vrot.slane %v423_v13, 2  ;;  %v412_v23 = vrot.slane %v411_v1, 1 }
  0xe4   :  { %5131 = vst [vmem:[#allocation7_spill] sm:$0xff] %v3222_v25  ;;  %v443_v25 = vrot.slane %v442_v46, 4  ;;  %v398_v39 = vrot.slane %v397_v14, 1 }
  0xe5   :  { %5132 = vst [vmem:[#allocation223_spill] sm:$0xff] %v3227_v21  ;;  %v5145_v21 = vmax.f32 %v5143_v10, %v5144_v6  ;;  %v5154_v10 = vmax.f32 %v5152_v4, %v5153_v35  ;;  %v418_v35 = vmax.f32 %v416_v42, %v417_v33 }
  0xe6   :  { %5133 = vst [vmem:[#allocation224_spill] sm:$0xff] %v3240_v52  ;;  %v5146_v52 = vld [vmem:[#allocation12_spill] sm:$0xff]  ;;  %v444_v4 = vmax.f32 %v442_v46, %v443_v25  ;;  %v3311_v46 = vmax.f32 %v397_v14, %v398_v39 }
  0xe7   :  { %5134 = vst [vmem:[#allocation225_spill] sm:$0xff] %v3245_v59  ;;  %v456_v50 = vsel %vm392_vm0, %v5145_v21, -inf  ;;  %v5148_v0 = vmax.f32 %v5146_v52, %v5147_v9  ;;  %v477_v6 = vsel %vm392_vm0, %v5154_v10, -inf  ;;  %v5155_v21 = vld [vmem:[#allocation15_spill] sm:$0xff]  ;;  %v438_v10 = vrot.slane %v437_v22, 2 }
  0xe8   :  { %5135 = vst [vmem:[#allocation226_spill] sm:$0xff] %v3254_v48  ;;  %v450_v48 = vrot.slane %v449_v34, 4  ;;  %v5157_v9 = vmax.f32 %v5155_v21, %v5156_v55  ;;  %v457_v16 = vrot.slane %v456_v50, 4  ;;  %v471_v55 = vrot.slane %v470_v27, 4 }
  0xe9   :  { %5136 = vst [vmem:[#allocation227_spill] sm:$0xff] %v3259_v15  ;;  %v463_v59 = vsel %vm392_vm0, %v5148_v0, -inf  ;;  %v404_v15 = vmax.f32 %v402_v26, %v403_v2  ;;  %v491_v0 = vsel %vm392_vm0, %v5160_v56, -inf  ;;  %v5163_v2 = vmax.f32 %v5161_v32, %v5162_v43 }
  0xea   :  { %v484_v52 = vsel %vm392_vm0, %v5157_v9, -inf  ;;  %v464_v26 = vrot.slane %v463_v59, 4  ;;  %v478_v21 = vrot.slane %v477_v6, 4  ;;  %v492_v31 = vrot.slane %v491_v0, 4 }
  0xeb   :  { %v498_v47 = vsel %vm392_vm0, %v5163_v2, -inf  ;;  %v485_v9 = vrot.slane %v484_v52, 4  ;;  %v405_v7 = vrot.slane %v404_v15, 1  ;;  %v451_v24 = vmax.f32 %v449_v34, %v450_v48  ;;  %v5164_v34 = vld [vmem:[#allocation24_spill] sm:$0xff] }
  0xec   :  { %v499_v63 = vrot.slane %v498_v47, 4  ;;  %v458_v56 = vmax.f32 %v456_v50, %v457_v16  ;;  %v465_v45 = vmax.f32 %v463_v59, %v464_v26  ;;  %v419_v54 = vrot.slane %v418_v35, 1  ;;  %v5165_v50 = vld [vmem:[#allocation26_spill] sm:$0xff] }
  0xed   :  { %v425_v32 = vmax.f32 %v423_v13, %v424_v57  ;;  %v432_v43 = vmax.f32 %v430_v3, %v431_v5  ;;  %v445_v2 = vrot.slane %v444_v4, 2  ;;  %v439_v33 = vmax.f32 %v437_v22, %v438_v10  ;;  %v5173_v10 = vld [vmem:[#allocation28_spill] sm:$0xff] }
  0xee   :  { %v472_v42 = vmax.f32 %v470_v27, %v471_v55  ;;  %v479_v19 = vmax.f32 %v477_v6, %v478_v21  ;;  %v486_v25 = vmax.f32 %v484_v52, %v485_v9  ;;  %v3313_v18 = vmax.f32 %v404_v15, %v405_v7  ;;  %v5169_v15 = vld [vmem:[#allocation25_spill] sm:$0xff]  ;;  %v5174_v55 = vld [vmem:[#allocation32_spill] sm:$0xff] }
  0xef   :  { %v493_v28 = vmax.f32 %v491_v0, %v492_v31  ;;  %v500_v61 = vmax.f32 %v498_v47, %v499_v63  ;;  %v452_v49 = vrot.slane %v451_v24, 2  ;;  %v459_v41 = vrot.slane %v458_v56, 2  ;;  %v5170_v31 = vld [vmem:[#allocation27_spill] sm:$0xff] }
  0xf0   :  { %v466_v51 = vrot.slane %v465_v45, 2  ;;  %v5166_v48 = vmax.f32 %v5164_v34, %v5165_v50  ;;  %v3319_v3 = vmax.f32 %v411_v1, %v412_v23  ;;  %v3321_v59 = vmax.f32 %v418_v35, %v419_v54  ;;  %v5176_v50 = vld [vmem:[#allocation29_spill] sm:$0xff] }
  0xf1   :  { %v426_v22 = vrot.slane %v425_v32, 1  ;;  %v446_v27 = vmax.f32 %v444_v4, %v445_v2  ;;  %v473_v39 = vrot.slane %v472_v42, 2  ;;  %v480_v14 = vrot.slane %v479_v19, 2 }
  0xf2   :  { %v505_v13 = vsel %vm392_vm0, %v5166_v48, -inf  ;;  %5167 = vst [vmem:[#allocation5_spill] sm:$0xff] %v3319_v3  ;;  %v487_v7 = vrot.slane %v486_v25, 2  ;;  %v5171_v63 = vmax.f32 %v5169_v15, %v5170_v31  ;;  %v433_v52 = vrot.slane %v432_v43, 1  ;;  %v5177_v48 = vld [vmem:[#allocation33_spill] sm:$0xff]  ;;  %v5290_v3 = vld [vmem:[#allocation88_spill] sm:$0xff] }
  0xf3   :  { %5168 = vst [vmem:[#allocation8_spill] sm:$0xff] %v3321_v59  ;;  %v494_v16 = vrot.slane %v493_v28, 2  ;;  %v501_v26 = vrot.slane %v500_v61, 2  ;;  %v506_v0 = vrot.slane %v505_v13, 4  ;;  %v440_v47 = vrot.slane %v439_v33, 1 }
  0xf4   :  { %v512_v6 = vsel %vm392_vm0, %v5171_v63, -inf  ;;  %v453_v57 = vmax.f32 %v451_v24, %v452_v49  ;;  %v460_v1 = vmax.f32 %v458_v56, %v459_v41  ;;  %v467_v5 = vmax.f32 %v465_v45, %v466_v51 }
  0xf5   :  { %v3327_v54 = vmax.f32 %v425_v32, %v426_v22  ;;  %v447_v35 = vrot.slane %v446_v27, 1  ;;  %v513_v4 = vrot.slane %v512_v6, 4  ;;  %v5175_v21 = vmax.f32 %v5173_v10, %v5174_v55  ;;  %v5183_v55 = vld [vmem:[#allocation34_spill] sm:$0xff] }
  0xf6   :  { %v474_v23 = vmax.f32 %v472_v42, %v473_v39  ;;  %v481_v2 = vmax.f32 %v479_v19, %v480_v14  ;;  %v488_v34 = vmax.f32 %v486_v25, %v487_v7  ;;  %v5178_v15 = vmax.f32 %v5176_v50, %v5177_v48  ;;  %v5182_v7 = vld [vmem:[#allocation30_spill] sm:$0xff]  ;;  %v5191_v48 = vld [vmem:[#allocation36_spill] sm:$0xff] }
  0xf7   :  { %5172 = vst [vmem:[#allocation2_spill] sm:$0xff] %v3327_v54  ;;  %v519_v9 = vsel %vm392_vm0, %v5175_v21, -inf  ;;  %v3337_v49 = vmax.f32 %v432_v43, %v433_v52  ;;  %v495_v41 = vmax.f32 %v493_v28, %v494_v16  ;;  %v502_v45 = vmax.f32 %v500_v61, %v501_v26  ;;  %v5185_v16 = vld [vmem:[#allocation31_spill] sm:$0xff] }
  0xf8   :  { %v526_v31 = vsel %vm392_vm0, %v5178_v15, -inf  ;;  %v507_v51 = vmax.f32 %v505_v13, %v506_v0  ;;  %v454_v24 = vrot.slane %v453_v57, 1  ;;  %v461_v56 = vrot.slane %v460_v1, 1  ;;  %v5186_v26 = vld [vmem:[#allocation35_spill] sm:$0xff]  ;;  %v5192_v15 = vld [vmem:[#allocation38_spill] sm:$0xff] }
  0xf9   :  { %5179 = vst [vmem:[#allocation10_spill] sm:$0xff] %v3337_v49  ;;  %v468_v32 = vrot.slane %v467_v5, 1  ;;  %v520_v22 = vrot.slane %v519_v9, 4  ;;  %v3339_v63 = vmax.f32 %v439_v33, %v440_v47  ;;  %v3341_v10 = vmax.f32 %v446_v27, %v447_v35 }
  0xfa   :  { %v514_v19 = vmax.f32 %v512_v6, %v513_v4  ;;  %v527_v42 = vrot.slane %v526_v31, 4  ;;  %v475_v25 = vrot.slane %v474_v23, 1  ;;  %v482_v39 = vrot.slane %v481_v2, 1 }
  0xfb   :  { %5180 = vst [vmem:[#allocation9_spill] sm:$0xff] %v3339_v63  ;;  %v489_v14 = vrot.slane %v488_v34, 1  ;;  %v5184_v43 = vmax.f32 %v5182_v7, %v5183_v55  ;;  %v496_v61 = vrot.slane %v495_v41, 1  ;;  %v503_v13 = vrot.slane %v502_v45, 1 }
  0xfc   :  { %5181 = vst [vmem:[#allocation11_spill] sm:$0xff] %v3341_v10  ;;  %v508_v52 = vrot.slane %v507_v51, 2  ;;  %v5187_v0 = vmax.f32 %v5185_v16, %v5186_v26  ;;  %v3351_v27 = vmax.f32 %v453_v57, %v454_v24  ;;  %v3353_v6 = vmax.f32 %v460_v1, %v461_v56  ;;  %v5199_v24 = vld [vmem:[#allocation37_spill] sm:$0xff]  ;;  %v5224_v10 = vld [vmem:[#allocation55_spill] sm:$0xff] }
  0xfd   :  { %v533_v28 = vsel %vm392_vm0, %v5184_v43, -inf  ;;  %v3355_v47 = vmax.f32 %v467_v5, %v468_v32  ;;  %v521_v35 = vmax.f32 %v519_v9, %v520_v22  ;;  %v515_v4 = vrot.slane %v514_v19, 2 }
  0xfe   :  { %v540_v33 = vsel %vm392_vm0, %v5187_v0, -inf  ;;  %5188 = vst [vmem:[#allocation12_spill] sm:$0xff] %v3351_v27  ;;  %v528_v21 = vmax.f32 %v526_v31, %v527_v42  ;;  %v534_v50 = vrot.slane %v533_v28, 4  ;;  %v5193_v7 = vmax.f32 %v5191_v48, %v5192_v15  ;;  %v5200_v31 = vld [vmem:[#allocation39_spill] sm:$0xff]  ;;  %v5202_v0 = vld [vmem:[#allocation40_spill] sm:$0xff]  ;;  %v5223_v27 = vld [vmem:[#allocation53_spill] sm:$0xff] }
  0xff   :  { %5189 = vst [vmem:[#allocation16_spill] sm:$0xff] %v3353_v6  ;;  %v3361_v43 = vmax.f32 %v474_v23, %v475_v25  ;;  %v3363_v16 = vmax.f32 %v481_v2, %v482_v39  ;;  %v3365_v26 = vmax.f32 %v488_v34, %v489_v14  ;;  %v541_v57 = vrot.slane %v540_v33, 4  ;;  %v5203_v23 = vld [vmem:[#allocation42_spill] sm:$0xff]  ;;  %v5205_v34 = vld [vmem:[#allocation41_spill] sm:$0xff]  ;;  %v5206_v39 = vld [vmem:[#allocation43_spill] sm:$0xff] }
 0x100   :  { %5190 = vst [vmem:[#allocation13_spill] sm:$0xff] %v3355_v47  ;;  %v547_v55 = vsel %vm392_vm0, %v5193_v7, -inf  ;;  %v3367_v1 = vmax.f32 %v495_v41, %v496_v61  ;;  %v3369_v5 = vmax.f32 %v502_v45, %v503_v13  ;;  %v509_v9 = vmax.f32 %v507_v51, %v508_v52  ;;  %v5208_v13 = vld [vmem:[#allocation44_spill] sm:$0xff] }
 0x101   :  { %5194 = vst [vmem:[#allocation17_spill] sm:$0xff] %v3361_v43  ;;  %v5201_v56 = vmax.f32 %v5199_v24, %v5200_v31  ;;  %v522_v22 = vrot.slane %v521_v35, 2  ;;  %v548_v42 = vrot.slane %v547_v55, 4  ;;  %v5204_v25 = vmax.f32 %v5202_v0, %v5203_v23  ;;  %v5209_v52 = vld [vmem:[#allocation48_spill] sm:$0xff]  ;;  %v5211_v31 = vld [vmem:[#allocation45_spill] sm:$0xff] }
 0x102   :  { %5195 = vst [vmem:[#allocation14_spill] sm:$0xff] %v3363_v16  ;;  %v5207_v14 = vmax.f32 %v5205_v34, %v5206_v39  ;;  %v516_v45 = vmax.f32 %v514_v19, %v515_v4  ;;  %v529_v61 = vrot.slane %v528_v21, 2  ;;  %v535_v51 = vmax.f32 %v533_v28, %v534_v50  ;;  %v5217_v28 = vld [vmem:[#allocation47_spill] sm:$0xff] }
 0x103   :  { %5196 = vst [vmem:[#allocation18_spill] sm:$0xff] %v3365_v26  ;;  %v554_v32 = vsel %vm392_vm0, %v5201_v56, -inf  ;;  %v561_v2 = vsel %vm392_vm0, %v5204_v25, -inf  ;;  %v5210_v48 = vmax.f32 %v5208_v13, %v5209_v52  ;;  %v542_v7 = vmax.f32 %v540_v33, %v541_v57  ;;  %v5212_v56 = vld [vmem:[#allocation49_spill] sm:$0xff]  ;;  %v5214_v25 = vld [vmem:[#allocation46_spill] sm:$0xff]  ;;  %v5218_v50 = vld [vmem:[#allocation51_spill] sm:$0xff] }
 0x104   :  { %5197 = vst [vmem:[#allocation15_spill] sm:$0xff] %v3367_v1  ;;  %v568_v41 = vsel %vm392_vm0, %v5207_v14, -inf  ;;  %v555_v24 = vrot.slane %v554_v32, 4  ;;  %v5213_v0 = vmax.f32 %v5211_v31, %v5212_v56  ;;  %v562_v19 = vrot.slane %v561_v2, 4  ;;  %v5220_v52 = vld [vmem:[#allocation52_spill] sm:$0xff]  ;;  %v5221_v33 = vld [vmem:[#allocation54_spill] sm:$0xff] }
 0x105   :  { %5198 = vst [vmem:[#allocation19_spill] sm:$0xff] %v3369_v5  ;;  %v575_v15 = vsel %vm392_vm0, %v5210_v48, -inf  ;;  %v5215_v5 = vld [vmem:[#allocation50_spill] sm:$0xff]  ;;  %v569_v4 = vrot.slane %v568_v41, 4  ;;  %v5219_v14 = vmax.f32 %v5217_v28, %v5218_v50  ;;  %v5222_v57 = vmax.f32 %v5220_v52, %v5221_v33 }
 0x106   :  { %v582_v23 = vsel %vm392_vm0, %v5213_v0, -inf  ;;  %v5216_v34 = vmax.f32 %v5214_v25, %v5215_v5  ;;  %v510_v31 = vrot.slane %v509_v9, 1  ;;  %v523_v56 = vmax.f32 %v521_v35, %v522_v22 }
 0x107   :  { %v596_v13 = vsel %vm392_vm0, %v5219_v14, -inf  ;;  %v603_v48 = vsel %vm392_vm0, %v5222_v57, -inf  ;;  %v549_v0 = vmax.f32 %v547_v55, %v548_v42  ;;  %v576_v1 = vrot.slane %v575_v15, 4 }
 0x108   :  { %v589_v39 = vsel %vm392_vm0, %v5216_v34, -inf  ;;  %v517_v26 = vrot.slane %v516_v45, 1  ;;  %v536_v5 = vrot.slane %v535_v51, 2  ;;  %v583_v25 = vrot.slane %v582_v23, 4 }
 0x109   :  { %v590_v34 = vrot.slane %v589_v39, 4  ;;  %v530_v16 = vmax.f32 %v528_v21, %v529_v61  ;;  %v543_v43 = vrot.slane %v542_v7, 2  ;;  %v597_v47 = vrot.slane %v596_v13, 4 }
 0x10a   :  { %v604_v6 = vrot.slane %v603_v48, 4  ;;  %v556_v28 = vmax.f32 %v554_v32, %v555_v24  ;;  %v563_v50 = vmax.f32 %v561_v2, %v562_v19  ;;  %v570_v14 = vmax.f32 %v568_v41, %v569_v4  ;;  %v5228_v2 = vld [vmem:[#allocation56_spill] sm:$0xff]  ;;  %v5229_v41 = vld [vmem:[#allocation58_spill] sm:$0xff] }
 0x10b   :  { %v5225_v52 = vmax.f32 %v5223_v27, %v5224_v10  ;;  %v3407_v57 = vmax.f32 %v509_v9, %v510_v31  ;;  %v524_v35 = vrot.slane %v523_v56, 1  ;;  %v550_v55 = vrot.slane %v549_v0, 2 }
 0x10c   :  { %v577_v22 = vmax.f32 %v575_v15, %v576_v1  ;;  %v3409_v42 = vmax.f32 %v516_v45, %v517_v26  ;;  %v537_v63 = vmax.f32 %v535_v51, %v536_v5  ;;  %v584_v21 = vmax.f32 %v582_v23, %v583_v25 }
 0x10d   :  { %v610_v33 = vsel %vm392_vm0, %v5225_v52, -inf  ;;  %5226 = vst [vmem:[#allocation20_spill] sm:$0xff] %v3407_v57  ;;  %v591_v61 = vmax.f32 %v589_v39, %v590_v34  ;;  %v598_v49 = vmax.f32 %v596_v13, %v597_v47  ;;  %v605_v54 = vmax.f32 %v603_v48, %v604_v6  ;;  %v5232_v47 = vld [vmem:[#allocation57_spill] sm:$0xff]  ;;  %v5233_v6 = vld [vmem:[#allocation59_spill] sm:$0xff] }
 0x10e   :  { %5227 = vst [vmem:[#allocation22_spill] sm:$0xff] %v3409_v42  ;;  %v611_v32 = vrot.slane %v610_v33, 4  ;;  %v5230_v24 = vmax.f32 %v5228_v2, %v5229_v41  ;;  %v544_v27 = vmax.f32 %v542_v7, %v543_v43  ;;  %v557_v19 = vrot.slane %v556_v28, 2  ;;  %v5236_v42 = vld [vmem:[#allocation60_spill] sm:$0xff] }
 0x10f   :  { %v564_v9 = vrot.slane %v563_v50, 2  ;;  %v571_v4 = vrot.slane %v570_v14, 2  ;;  %v3415_v31 = vmax.f32 %v523_v56, %v524_v35  ;;  %v531_v1 = vrot.slane %v530_v16, 1 }
 0x110   :  { %v617_v10 = vsel %vm392_vm0, %v5230_v24, -inf  ;;  %v551_v26 = vmax.f32 %v549_v0, %v550_v55  ;;  %v578_v45 = vrot.slane %v577_v22, 2  ;;  %v585_v51 = vrot.slane %v584_v21, 2 }
 0x111   :  { %5231 = vst [vmem:[#allocation21_spill] sm:$0xff] %v3415_v31  ;;  %v592_v15 = vrot.slane %v591_v61, 2  ;;  %v618_v23 = vrot.slane %v617_v10, 4  ;;  %v5234_v39 = vmax.f32 %v5232_v47, %v5233_v6  ;;  %v538_v48 = vrot.slane %v537_v63, 1  ;;  %v5237_v47 = vld [vmem:[#allocation64_spill] sm:$0xff] }
 0x112   :  { %v599_v5 = vrot.slane %v598_v49, 2  ;;  %v606_v25 = vrot.slane %v605_v54, 2  ;;  %v612_v43 = vmax.f32 %v610_v33, %v611_v32  ;;  %v545_v7 = vrot.slane %v544_v27, 1 }
 0x113   :  { %v624_v13 = vsel %vm392_vm0, %v5234_v39, -inf  ;;  %v558_v34 = vmax.f32 %v556_v28, %v557_v19  ;;  %v565_v52 = vmax.f32 %v563_v50, %v564_v9  ;;  %v572_v56 = vmax.f32 %v570_v14, %v571_v4 }
 0x114   :  { %v3421_v35 = vmax.f32 %v530_v16, %v531_v1  ;;  %v552_v0 = vrot.slane %v551_v26, 1  ;;  %v579_v55 = vmax.f32 %v577_v22, %v578_v45  ;;  %v625_v2 = vrot.slane %v624_v13, 4 }
 0x115   :  { %v586_v41 = vmax.f32 %v584_v21, %v585_v51  ;;  %v593_v24 = vmax.f32 %v591_v61, %v592_v15  ;;  %v619_v31 = vmax.f32 %v617_v10, %v618_v23  ;;  %v5238_v6 = vmax.f32 %v5236_v42, %v5237_v47  ;;  %v5241_v61 = vld [vmem:[#allocation61_spill] sm:$0xff]  ;;  %v5245_v15 = vld [vmem:[#allocation62_spill] sm:$0xff] }
 0x116   :  { %5235 = vst [vmem:[#allocation23_spill] sm:$0xff] %v3421_v35  ;;  %v3427_v57 = vmax.f32 %v537_v63, %v538_v48  ;;  %v600_v33 = vmax.f32 %v598_v49, %v599_v5  ;;  %v607_v32 = vmax.f32 %v605_v54, %v606_v25  ;;  %v613_v28 = vrot.slane %v612_v43, 2  ;;  %v5242_v10 = vld [vmem:[#allocation65_spill] sm:$0xff]  ;;  %v5246_v23 = vld [vmem:[#allocation66_spill] sm:$0xff] }
 0x117   :  { %v631_v39 = vsel %vm392_vm0, %v5238_v6, -inf  ;;  %v3429_v50 = vmax.f32 %v544_v27, %v545_v7  ;;  %v559_v16 = vrot.slane %v558_v34, 1  ;;  %v566_v14 = vrot.slane %v565_v52, 1  ;;  %v5252_v6 = vld [vmem:[#allocation63_spill] sm:$0xff] }
 0x118   :  { %5239 = vst [vmem:[#allocation24_spill] sm:$0xff] %v3427_v57  ;;  %v573_v19 = vrot.slane %v572_v56, 1  ;;  %v580_v22 = vrot.slane %v579_v55, 1  ;;  %v626_v9 = vmax.f32 %v624_v13, %v625_v2  ;;  %v632_v21 = vrot.slane %v631_v39, 4 }
 0x119   :  { %5240 = vst [vmem:[#allocation26_spill] sm:$0xff] %v3429_v50  ;;  %v5243_v4 = vmax.f32 %v5241_v61, %v5242_v10  ;;  %v3435_v1 = vmax.f32 %v551_v26, %v552_v0  ;;  %v587_v63 = vrot.slane %v586_v41, 1  ;;  %v594_v45 = vrot.slane %v593_v24, 1  ;;  %v5253_v61 = vld [vmem:[#allocation67_spill] sm:$0xff] }
 0x11a   :  { %v620_v49 = vrot.slane %v619_v31, 2  ;;  %v601_v54 = vrot.slane %v600_v33, 1  ;;  %v608_v51 = vrot.slane %v607_v32, 1  ;;  %v614_v27 = vmax.f32 %v612_v43, %v613_v28 }
 0x11b   :  { %v638_v42 = vsel %vm392_vm0, %v5243_v4, -inf  ;;  %5244 = vst [vmem:[#allocation25_spill] sm:$0xff] %v3435_v1  ;;  %v5247_v48 = vmax.f32 %v5245_v15, %v5246_v23  ;;  %v3441_v13 = vmax.f32 %v558_v34, %v559_v16  ;;  %v3443_v25 = vmax.f32 %v565_v52, %v566_v14  ;;  %v5262_v23 = vld [vmem:[#allocation69_spill] sm:$0xff] }
 0x11c   :  { %v3445_v7 = vmax.f32 %v572_v56, %v573_v19  ;;  %v639_v2 = vrot.slane %v638_v42, 4  ;;  %v3447_v26 = vmax.f32 %v579_v55, %v580_v22  ;;  %v627_v0 = vrot.slane %v626_v9, 2  ;;  %v5259_v55 = vld [vmem:[#allocation68_spill] sm:$0xff]  ;;  %v5260_v19 = vld [vmem:[#allocation70_spill] sm:$0xff] }
 0x11d   :  { %v645_v5 = vsel %vm392_vm0, %v5247_v48, -inf  ;;  %5248 = vst [vmem:[#allocation27_spill] sm:$0xff] %v3441_v13  ;;  %v633_v47 = vmax.f32 %v631_v39, %v632_v21  ;;  %v5254_v10 = vmax.f32 %v5252_v6, %v5253_v61  ;;  %v3453_v28 = vmax.f32 %v586_v41, %v587_v63  ;;  %v5263_v48 = vld [vmem:[#allocation71_spill] sm:$0xff]  ;;  %v5265_v63 = vld [vmem:[#allocation72_spill] sm:$0xff] }
 0x11e   :  { %5249 = vst [vmem:[#allocation28_spill] sm:$0xff] %v3443_v25  ;;  %v3455_v4 = vmax.f32 %v593_v24, %v594_v45  ;;  %v621_v34 = vmax.f32 %v619_v31, %v620_v49  ;;  %v646_v16 = vrot.slane %v645_v5, 4  ;;  %v3457_v52 = vmax.f32 %v600_v33, %v601_v54  ;;  %v5266_v31 = vld [vmem:[#allocation74_spill] sm:$0xff]  ;;  %v5268_v54 = vld [vmem:[#allocation73_spill] sm:$0xff] }
 0x11f   :  { %5250 = vst [vmem:[#allocation32_spill] sm:$0xff] %v3445_v7  ;;  %v652_v43 = vsel %vm392_vm0, %v5254_v10, -inf  ;;  %v3459_v56 = vmax.f32 %v607_v32, %v608_v51  ;;  %v615_v14 = vrot.slane %v614_v27, 1  ;;  %v5261_v22 = vmax.f32 %v5259_v55, %v5260_v19  ;;  %v5269_v51 = vld [vmem:[#allocation75_spill] sm:$0xff]  ;;  %v5271_v10 = vld [vmem:[#allocation76_spill] sm:$0xff] }
 0x120   :  { %5251 = vst [vmem:[#allocation29_spill] sm:$0xff] %v3447_v26  ;;  %v640_v21 = vmax.f32 %v638_v42, %v639_v2  ;;  %v653_v15 = vrot.slane %v652_v43, 4  ;;  %v5264_v41 = vmax.f32 %v5262_v23, %v5263_v48  ;;  %v5267_v45 = vmax.f32 %v5265_v63, %v5266_v31  ;;  %v5272_v42 = vld [vmem:[#allocation80_spill] sm:$0xff]  ;;  %v5274_v48 = vld [vmem:[#allocation77_spill] sm:$0xff] }
 0x121   :  { %5255 = vst [vmem:[#allocation33_spill] sm:$0xff] %v3453_v28  ;;  %v659_v39 = vsel %vm392_vm0, %v5261_v22, -inf  ;;  %v628_v32 = vmax.f32 %v626_v9, %v627_v0  ;;  %v634_v49 = vrot.slane %v633_v47, 2  ;;  %v5270_v6 = vmax.f32 %v5268_v54, %v5269_v51  ;;  %v5284_v28 = vld [vmem:[#allocation86_spill] sm:$0xff] }
 0x122   :  { %5256 = vst [vmem:[#allocation30_spill] sm:$0xff] %v3455_v4  ;;  %v666_v24 = vsel %vm392_vm0, %v5264_v41, -inf  ;;  %v673_v33 = vsel %vm392_vm0, %v5267_v45, -inf  ;;  %v5273_v2 = vmax.f32 %v5271_v10, %v5272_v42  ;;  %v622_v19 = vrot.slane %v621_v34, 1  ;;  %v5275_v41 = vld [vmem:[#allocation81_spill] sm:$0xff]  ;;  %v5277_v45 = vld [vmem:[#allocation78_spill] sm:$0xff] }
 0x123   :  { %5257 = vst [vmem:[#allocation34_spill] sm:$0xff] %v3457_v52  ;;  %v680_v61 = vsel %vm392_vm0, %v5270_v6, -inf  ;;  %v647_v22 = vmax.f32 %v645_v5, %v646_v16  ;;  %v660_v23 = vrot.slane %v659_v39, 4  ;;  %v5276_v63 = vmax.f32 %v5274_v48, %v5275_v41  ;;  %v5280_v6 = vld [vmem:[#allocation79_spill] sm:$0xff]  ;;  %v5283_v4 = vld [vmem:[#allocation84_spill] sm:$0xff] }
 0x124   :  { %5258 = vst [vmem:[#allocation31_spill] sm:$0xff] %v3459_v56  ;;  %v687_v55 = vsel %vm392_vm0, %v5273_v2, -inf  ;;  %v667_v9 = vrot.slane %v666_v24, 4  ;;  %v674_v0 = vrot.slane %v673_v33, 4  ;;  %v5278_v56 = vld [vmem:[#allocation82_spill] sm:$0xff]  ;;  %v5281_v52 = vld [vmem:[#allocation83_spill] sm:$0xff]  ;;  %v5285_v48 = vmax.f32 %v5283_v4, %v5284_v28 }
 0x125   :  { %v694_v31 = vsel %vm392_vm0, %v5276_v63, -inf  ;;  %v5279_v54 = vmax.f32 %v5277_v45, %v5278_v56  ;;  %v5282_v10 = vmax.f32 %v5280_v6, %v5281_v52  ;;  %v641_v2 = vrot.slane %v640_v21, 2 }
 0x126   :  { %v681_v5 = vrot.slane %v680_v61, 4  ;;  %v688_v16 = vrot.slane %v687_v55, 4  ;;  %v715_v41 = vsel %vm392_vm0, %v5285_v48, -inf  ;;  %v3497_v63 = vmax.f32 %v614_v27, %v615_v14  ;;  %v5287_v14 = vld [vmem:[#allocation85_spill] sm:$0xff] }
 0x127   :  { %v701_v51 = vsel %vm392_vm0, %v5279_v54, -inf  ;;  %v708_v42 = vsel %vm392_vm0, %v5282_v10, -inf  ;;  %v635_v26 = vmax.f32 %v633_v47, %v634_v49  ;;  %v654_v7 = vmax.f32 %v652_v43, %v653_v15  ;;  %v5288_v47 = vld [vmem:[#allocation87_spill] sm:$0xff] }
 0x128   :  { %5286 = vst [vmem:[#allocation35_spill] sm:$0xff] %v3497_v63  ;;  %v695_v56 = vrot.slane %v694_v31, 4  ;;  %v629_v45 = vrot.slane %v628_v32, 1  ;;  %v702_v54 = vrot.slane %v701_v51, 4  ;;  %v709_v25 = vrot.slane %v708_v42, 4 }
 0x129   :  { %v716_v13 = vrot.slane %v715_v41, 4  ;;  %v648_v52 = vrot.slane %v647_v22, 2  ;;  %v661_v6 = vmax.f32 %v659_v39, %v660_v23  ;;  %v668_v10 = vmax.f32 %v666_v24, %v667_v9  ;;  %v5291_v39 = vld [vmem:[#allocation90_spill] sm:$0xff] }
 0x12a   :  { %v675_v1 = vmax.f32 %v673_v33, %v674_v0  ;;  %v3499_v50 = vmax.f32 %v621_v34, %v622_v19  ;;  %v642_v57 = vmax.f32 %v640_v21, %v641_v2  ;;  %v682_v35 = vmax.f32 %v680_v61, %v681_v5 }
 0x12b   :  { %v689_v28 = vmax.f32 %v687_v55, %v688_v16  ;;  %v636_v4 = vrot.slane %v635_v26, 1  ;;  %v655_v48 = vrot.slane %v654_v7, 2  ;;  %v696_v27 = vmax.f32 %v694_v31, %v695_v56 }
 0x12c   :  { %v5289_v43 = vmax.f32 %v5287_v14, %v5288_v47  ;;  %v703_v49 = vmax.f32 %v701_v51, %v702_v54  ;;  %v710_v63 = vmax.f32 %v708_v42, %v709_v25  ;;  %v717_v59 = vmax.f32 %v715_v41, %v716_v13  ;;  %v5296_v14 = vld [vmem:[#allocation91_spill] sm:$0xff] }
 0x12d   :  { %v5292_v24 = vmax.f32 %v5290_v3, %v5291_v39  ;;  %v649_v33 = vmax.f32 %v647_v22, %v648_v52  ;;  %v662_v21 = vrot.slane %v661_v6, 2  ;;  %v669_v61 = vrot.slane %v668_v10, 2 }
 0x12e   :  { %v722_v15 = vsel %vm392_vm0, %v5289_v43, -inf  ;;  %v676_v55 = vrot.slane %v675_v1, 2  ;;  %v3509_v19 = vmax.f32 %v628_v32, %v629_v45  ;;  %v683_v23 = vrot.slane %v682_v35, 2  ;;  %v5295_v45 = vld [vmem:[#allocation89_spill] sm:$0xff] }
 0x12f   :  { %v729_v34 = vsel %vm392_vm0, %v5292_v24, -inf  ;;  %v690_v31 = vrot.slane %v689_v28, 2  ;;  %v723_v9 = vrot.slane %v722_v15, 4  ;;  %v643_v0 = vrot.slane %v642_v57, 1 }
 0x130   :  { %5293 = vst [vmem:[#allocation36_spill] sm:$0xff] %v3509_v19  ;;  %v656_v2 = vmax.f32 %v654_v7, %v655_v48  ;;  %v697_v5 = vrot.slane %v696_v27, 2  ;;  %v730_v51 = vrot.slane %v729_v34, 4  ;;  %v3511_v25 = vmax.f32 %v635_v26, %v636_v4  ;;  %v5299_v19 = vld [vmem:[#allocation92_spill] sm:$0xff] }
 0x131   :  { %v704_v13 = vrot.slane %v703_v49, 2  ;;  %v711_v42 = vrot.slane %v710_v63, 2  ;;  %v718_v3 = vrot.slane %v717_v59, 2  ;;  %v650_v16 = vrot.slane %v649_v33, 1 }
 0x132   :  { %5294 = vst [vmem:[#allocation38_spill] sm:$0xff] %v3511_v25  ;;  %v663_v41 = vmax.f32 %v661_v6, %v662_v21  ;;  %v670_v22 = vmax.f32 %v668_v10, %v669_v61  ;;  %v677_v56 = vmax.f32 %v675_v1, %v676_v55  ;;  %v684_v54 = vmax.f32 %v682_v35, %v683_v23  ;;  %v5300_v6 = vld [vmem:[#allocation96_spill] sm:$0xff] }
 0x133   :  { %v691_v52 = vmax.f32 %v689_v28, %v690_v31  ;;  %v724_v32 = vmax.f32 %v722_v15, %v723_v9  ;;  %v5297_v47 = vmax.f32 %v5295_v45, %v5296_v14  ;;  %v3517_v7 = vmax.f32 %v642_v57, %v643_v0  ;;  %v5305_v0 = vld [vmem:[#allocation97_spill] sm:$0xff]  ;;  %v5312_v14 = vld [vmem:[#allocation94_spill] sm:$0xff] }
 0x134   :  { %v657_v48 = vrot.slane %v656_v2, 1  ;;  %v698_v26 = vmax.f32 %v696_v27, %v697_v5  ;;  %v731_v4 = vmax.f32 %v729_v34, %v730_v51  ;;  %v705_v39 = vmax.f32 %v703_v49, %v704_v13 }
 0x135   :  { %v736_v43 = vsel %vm392_vm0, %v5297_v47, -inf  ;;  %5298 = vst [vmem:[#allocation37_spill] sm:$0xff] %v3517_v7  ;;  %v712_v24 = vmax.f32 %v710_v63, %v711_v42  ;;  %v719_v25 = vmax.f32 %v717_v59, %v718_v3  ;;  %v5301_v10 = vmax.f32 %v5299_v19, %v5300_v6  ;;  %v5304_v19 = vld [vmem:[#allocation93_spill] sm:$0xff]  ;;  %v5313_v47 = vld [vmem:[#allocation98_spill] sm:$0xff] }
 0x136   :  { %v664_v1 = vrot.slane %v663_v41, 1  ;;  %v671_v28 = vrot.slane %v670_v22, 1  ;;  %v678_v15 = vrot.slane %v677_v56, 1  ;;  %v737_v21 = vrot.slane %v736_v43, 4 }
 0x137   :  { %v743_v35 = vsel %vm392_vm0, %v5301_v10, -inf  ;;  %v3523_v61 = vmax.f32 %v649_v33, %v650_v16  ;;  %v685_v55 = vrot.slane %v684_v54, 1  ;;  %v692_v57 = vrot.slane %v691_v52, 1 }
 0x138   :  { %v725_v23 = vrot.slane %v724_v32, 2  ;;  %v3525_v31 = vmax.f32 %v656_v2, %v657_v48  ;;  %v699_v27 = vrot.slane %v698_v26, 1  ;;  %v732_v49 = vrot.slane %v731_v4, 2 }
 0x139   :  { %5302 = vst [vmem:[#allocation39_spill] sm:$0xff] %v3523_v61  ;;  %v744_v63 = vrot.slane %v743_v35, 4  ;;  %v706_v59 = vrot.slane %v705_v39, 1  ;;  %v713_v34 = vrot.slane %v712_v24, 1  ;;  %v720_v9 = vrot.slane %v719_v25, 1 }
 0x13a   :  { %5303 = vst [vmem:[#allocation40_spill] sm:$0xff] %v3525_v31  ;;  %v5306_v5 = vmax.f32 %v5304_v19, %v5305_v0  ;;  %v3531_v13 = vmax.f32 %v663_v41, %v664_v1  ;;  %v3533_v33 = vmax.f32 %v670_v22, %v671_v28  ;;  %v3535_v42 = vmax.f32 %v677_v56, %v678_v15  ;;  %v5315_v41 = vld [vmem:[#allocation95_spill] sm:$0xff] }
 0x13b   :  { %v738_v3 = vmax.f32 %v736_v43, %v737_v21  ;;  %v3537_v2 = vmax.f32 %v684_v54, %v685_v55  ;;  %v3539_v16 = vmax.f32 %v691_v52, %v692_v57  ;;  %v726_v45 = vmax.f32 %v724_v32, %v725_v23  ;;  %v5316_v1 = vld [vmem:[#allocation99_spill] sm:$0xff]  ;;  %v5322_v21 = vld [vmem:[#allocation100_spill] sm:$0xff]  ;;  %v5323_v55 = vld [vmem:[#allocation102_spill] sm:$0xff] }
 0x13c   :  { %v750_v51 = vsel %vm392_vm0, %v5306_v5, -inf  ;;  %5307 = vst [vmem:[#allocation42_spill] sm:$0xff] %v3531_v13  ;;  %v5314_v48 = vmax.f32 %v5312_v14, %v5313_v47  ;;  %v733_v10 = vmax.f32 %v731_v4, %v732_v49  ;;  %v745_v19 = vmax.f32 %v743_v35, %v744_v63  ;;  %v5325_v57 = vld [vmem:[#allocation101_spill] sm:$0xff]  ;;  %v5326_v23 = vld [vmem:[#allocation103_spill] sm:$0xff] }
 0x13d   :  { %5308 = vst [vmem:[#allocation41_spill] sm:$0xff] %v3533_v33  ;;  %v751_v0 = vrot.slane %v750_v51, 4  ;;  %v5317_v22 = vmax.f32 %v5315_v41, %v5316_v1  ;;  %v3549_v28 = vmax.f32 %v698_v26, %v699_v27  ;;  %v3551_v54 = vmax.f32 %v705_v39, %v706_v59  ;;  %v5328_v39 = vld [vmem:[#allocation104_spill] sm:$0xff]  ;;  %v5329_v59 = vld [vmem:[#allocation106_spill] sm:$0xff] }
 0x13e   :  { %5309 = vst [vmem:[#allocation43_spill] sm:$0xff] %v3535_v42  ;;  %v757_v6 = vsel %vm392_vm0, %v5314_v48, -inf  ;;  %v3553_v52 = vmax.f32 %v712_v24, %v713_v34  ;;  %v3555_v32 = vmax.f32 %v719_v25, %v720_v9  ;;  %v739_v43 = vrot.slane %v738_v3, 2  ;;  %v5331_v34 = vld [vmem:[#allocation105_spill] sm:$0xff]  ;;  %v5332_v9 = vld [vmem:[#allocation107_spill] sm:$0xff]  ;;  %v5334_v1 = vld [vmem:[#allocation108_spill] sm:$0xff] }
 0x13f   :  { %5310 = vst [vmem:[#allocation44_spill] sm:$0xff] %v3537_v2  ;;  %v764_v56 = vsel %vm392_vm0, %v5317_v22, -inf  ;;  %v758_v15 = vrot.slane %v757_v6, 4  ;;  %v5324_v4 = vmax.f32 %v5322_v21, %v5323_v55  ;;  %v5327_v49 = vmax.f32 %v5325_v57, %v5326_v23  ;;  %v5335_v22 = vld [vmem:[#allocation112_spill] sm:$0xff]  ;;  %v5337_v23 = vld [vmem:[#allocation109_spill] sm:$0xff] }
 0x140   :  { %5311 = vst [vmem:[#allocation48_spill] sm:$0xff] %v3539_v16  ;;  %v727_v26 = vrot.slane %v726_v45, 1  ;;  %v765_v27 = vrot.slane %v764_v56, 4  ;;  %v5330_v24 = vmax.f32 %v5328_v39, %v5329_v59  ;;  %v5333_v5 = vmax.f32 %v5331_v34, %v5332_v9 }
 0x141   :  { %5318 = vst [vmem:[#allocation45_spill] sm:$0xff] %v3549_v28  ;;  %v771_v35 = vsel %vm392_vm0, %v5324_v4, -inf  ;;  %v778_v63 = vsel %vm392_vm0, %v5327_v49, -inf  ;;  %v734_v47 = vrot.slane %v733_v10, 1  ;;  %v746_v48 = vrot.slane %v745_v19, 2  ;;  %v5338_v49 = vld [vmem:[#allocation113_spill] sm:$0xff] }
 0x142   :  { %5319 = vst [vmem:[#allocation49_spill] sm:$0xff] %v3551_v54  ;;  %v785_v25 = vsel %vm392_vm0, %v5330_v24, -inf  ;;  %v792_v14 = vsel %vm392_vm0, %v5333_v5, -inf  ;;  %v752_v41 = vmax.f32 %v750_v51, %v751_v0  ;;  %v5336_v21 = vmax.f32 %v5334_v1, %v5335_v22  ;;  %v5340_v24 = vld [vmem:[#allocation110_spill] sm:$0xff]  ;;  %v5343_v22 = vld [vmem:[#allocation111_spill] sm:$0xff] }
 0x143   :  { %5320 = vst [vmem:[#allocation46_spill] sm:$0xff] %v3553_v52  ;;  %v772_v4 = vrot.slane %v771_v35, 4  ;;  %v779_v57 = vrot.slane %v778_v63, 4  ;;  %v5339_v39 = vmax.f32 %v5337_v23, %v5338_v49  ;;  %v740_v5 = vmax.f32 %v738_v3, %v739_v43 }
 0x144   :  { %5321 = vst [vmem:[#allocation50_spill] sm:$0xff] %v3555_v32  ;;  %v799_v55 = vsel %vm392_vm0, %v5336_v21, -inf  ;;  %v5341_v32 = vld [vmem:[#allocation114_spill] sm:$0xff]  ;;  %v759_v52 = vmax.f32 %v757_v6, %v758_v15  ;;  %v786_v51 = vrot.slane %v785_v25, 4  ;;  %v793_v0 = vrot.slane %v792_v14, 4  ;;  %v5344_v21 = vld [vmem:[#allocation115_spill] sm:$0xff] }
 0x145   :  { %v806_v59 = vsel %vm392_vm0, %v5339_v39, -inf  ;;  %v5342_v34 = vmax.f32 %v5340_v24, %v5341_v32  ;;  %v766_v54 = vmax.f32 %v764_v56, %v765_v27  ;;  %v800_v1 = vrot.slane %v799_v55, 4 }
 0x146   :  { %v5345_v28 = vmax.f32 %v5343_v22, %v5344_v21  ;;  %v5346_v23 = vmax.f32 %v2418_v11, %v2428_v12  ;;  %v3593_v39 = vmax.f32 %v726_v45, %v727_v26  ;;  %v753_v32 = vrot.slane %v752_v41, 2  ;;  %v5349_v26 = vld [vmem:[#allocation116_spill] sm:$0xff] }
 0x147   :  { %v813_v9 = vsel %vm392_vm0, %v5342_v34, -inf  ;;  %v807_v24 = vrot.slane %v806_v59, 4  ;;  %v747_v6 = vmax.f32 %v745_v19, %v746_v48  ;;  %v773_v43 = vmax.f32 %v771_v35, %v772_v4 }
 0x148   :  { %v820_v16 = vsel %vm392_vm0, %v5345_v28, -inf  ;;  %v827_v49 = vsel %vm392_vm0, %v5346_v23, -inf  ;;  %5347 = vst [vmem:[#allocation47_spill] sm:$0xff] %v3593_v39  ;;  %v814_v3 = vrot.slane %v813_v9, 4  ;;  %v780_v15 = vmax.f32 %v778_v63, %v779_v57  ;;  %v5350_v39 = vld [vmem:[#allocation117_spill] sm:$0xff] }
 0x149   :  { %v821_v56 = vrot.slane %v820_v16, 4  ;;  %v3595_v27 = vmax.f32 %v733_v10, %v734_v47  ;;  %v787_v34 = vmax.f32 %v785_v25, %v786_v51  ;;  %v794_v22 = vmax.f32 %v792_v14, %v793_v0  ;;  %v5352_v10 = vld [vmem:[#allocation118_spill] sm:$0xff]  ;;  %v5353_v47 = vld [vmem:[#allocation120_spill] sm:$0xff] }
 0x14a   :  { %v828_v21 = vrot.slane %v827_v49, 4  ;;  %v741_v28 = vrot.slane %v740_v5, 1  ;;  %v760_v2 = vrot.slane %v759_v52, 2  ;;  %v767_v42 = vrot.slane %v766_v54, 2 }
 0x14b   :  { %5348 = vst [vmem:[#allocation51_spill] sm:$0xff] %v3595_v27  ;;  %v801_v11 = vmax.f32 %v799_v55, %v800_v1  ;;  %v754_v12 = vmax.f32 %v752_v41, %v753_v32  ;;  %v808_v23 = vmax.f32 %v806_v59, %v807_v24  ;;  %v815_v45 = vmax.f32 %v813_v9, %v814_v3 }
 0x14c   :  { %v5351_v33 = vmax.f32 %v5349_v26, %v5350_v39  ;;  %v774_v35 = vrot.slane %v773_v43, 2  ;;  %v781_v63 = vrot.slane %v780_v15, 2  ;;  %v822_v48 = vmax.f32 %v820_v16, %v821_v56 }
 0x14d   :  { %v5354_v25 = vmax.f32 %v5352_v10, %v5353_v47  ;;  %v748_v4 = vrot.slane %v747_v6, 1  ;;  %v788_v57 = vrot.slane %v787_v34, 2  ;;  %v795_v51 = vrot.slane %v794_v22, 2 }
 0x14e   :  { %v834_v19 = vsel %vm392_vm0, %v5351_v33, -inf  ;;  %v829_v55 = vmax.f32 %v827_v49, %v828_v21  ;;  %v761_v41 = vmax.f32 %v759_v52, %v760_v2  ;;  %v768_v59 = vmax.f32 %v766_v54, %v767_v42  ;;  %v5356_v21 = vld [vmem:[#allocation119_spill] sm:$0xff] }
 0x14f   :  { %v841_v14 = vsel %vm392_vm0, %v5354_v25, -inf  ;;  %v802_v9 = vrot.slane %v801_v11, 2  ;;  %v835_v0 = vrot.slane %v834_v19, 4  ;;  %v3605_v1 = vmax.f32 %v740_v5, %v741_v28  ;;  %v5357_v28 = vld [vmem:[#allocation121_spill] sm:$0xff] }
 0x150   :  { %v809_v39 = vrot.slane %v808_v23, 2  ;;  %v816_v33 = vrot.slane %v815_v45, 2  ;;  %v842_v32 = vrot.slane %v841_v14, 4  ;;  %v755_v24 = vrot.slane %v754_v12, 1 }
 0x151   :  { %5355 = vst [vmem:[#allocation52_spill] sm:$0xff] %v3605_v1  ;;  %v775_v16 = vmax.f32 %v773_v43, %v774_v35  ;;  %v782_v3 = vmax.f32 %v780_v15, %v781_v63  ;;  %v823_v56 = vrot.slane %v822_v48, 2  ;;  %v3607_v26 = vmax.f32 %v747_v6, %v748_v4  ;;  %v5360_v4 = vld [vmem:[#allocation122_spill] sm:$0xff] }
 0x152   :  { %v789_v10 = vmax.f32 %v787_v34, %v788_v57  ;;  %v796_v47 = vmax.f32 %v794_v22, %v795_v51  ;;  %v830_v25 = vrot.slane %v829_v55, 2  ;;  %v762_v27 = vrot.slane %v761_v41, 1  ;;  %v5361_v57 = vld [vmem:[#allocation126_spill] sm:$0xff]  ;;  %v5640_v31 = vld [vmem:[#allocation51_spill] sm:$0xff] }
 0x153   :  { %v769_v49 = vrot.slane %v768_v59, 1  ;;  %v803_v2 = vmax.f32 %v801_v11, %v802_v9  ;;  %v836_v42 = vmax.f32 %v834_v19, %v835_v0  ;;  %v810_v54 = vmax.f32 %v808_v23, %v809_v39 }
 0x154   :  { %v817_v52 = vmax.f32 %v815_v45, %v816_v33  ;;  %v843_v5 = vmax.f32 %v841_v14, %v842_v32  ;;  %v5358_v1 = vmax.f32 %v5356_v21, %v5357_v28  ;;  %v3613_v43 = vmax.f32 %v754_v12, %v755_v24  ;;  %v5372_v28 = vld [vmem:[#allocation124_spill] sm:$0xff] }
 0x155   :  { %v776_v15 = vrot.slane %v775_v16, 1  ;;  %v783_v6 = vrot.slane %v782_v3, 1  ;;  %v824_v35 = vmax.f32 %v822_v48, %v823_v56  ;;  %v790_v34 = vrot.slane %v789_v10, 1 }
 0x156   :  { %v848_v13 = vsel %vm392_vm0, %v5358_v1, -inf  ;;  %5359 = vst [vmem:[#allocation54_spill] sm:$0xff] %v3613_v43  ;;  %v797_v22 = vrot.slane %v796_v47, 1  ;;  %v831_v63 = vmax.f32 %v829_v55, %v830_v25  ;;  %v5362_v11 = vmax.f32 %v5360_v4, %v5361_v57  ;;  %v5373_v4 = vld [vmem:[#allocation128_spill] sm:$0xff] }
 0x157   :  { %v3619_v45 = vmax.f32 %v761_v41, %v762_v27  ;;  %v3621_v19 = vmax.f32 %v768_v59, %v769_v49  ;;  %v837_v14 = vrot.slane %v836_v42, 2  ;;  %v849_v51 = vrot.slane %v848_v13, 4  ;;  %v5369_v41 = vld [vmem:[#allocation123_spill] sm:$0xff] }
 0x158   :  { %v855_v23 = vsel %vm392_vm0, %v5362_v11, -inf  ;;  %v804_v9 = vrot.slane %v803_v2, 1  ;;  %v811_v12 = vrot.slane %v810_v54, 1  ;;  %v818_v0 = vrot.slane %v817_v52, 1  ;;  %v5370_v59 = vld [vmem:[#allocation127_spill] sm:$0xff] }
 0x159   :  { %5363 = vst [vmem:[#allocation53_spill] sm:$0xff] %v3619_v45  ;;  %v844_v1 = vrot.slane %v843_v5, 2  ;;  %v3623_v39 = vmax.f32 %v775_v16, %v776_v15  ;;  %v3625_v48 = vmax.f32 %v782_v3, %v783_v6  ;;  %v825_v55 = vrot.slane %v824_v35, 1  ;;  %v5375_v15 = vld [vmem:[#allocation125_spill] sm:$0xff] }
 0x15a   :  { %5364 = vst [vmem:[#allocation55_spill] sm:$0xff] %v3621_v19  ;;  %v856_v33 = vrot.slane %v855_v23, 4  ;;  %v3627_v32 = vmax.f32 %v789_v10, %v790_v34  ;;  %v3629_v24 = vmax.f32 %v796_v47, %v797_v22  ;;  %v832_v27 = vrot.slane %v831_v63, 1  ;;  %v5376_v6 = vld [vmem:[#allocation129_spill] sm:$0xff] }
 0x15b   :  { %5365 = vst [vmem:[#allocation56_spill] sm:$0xff] %v3623_v39  ;;  %v5371_v56 = vmax.f32 %v5369_v41, %v5370_v59  ;;  %v838_v49 = vmax.f32 %v836_v42, %v837_v14  ;;  %v850_v21 = vmax.f32 %v848_v13, %v849_v51  ;;  %v5374_v16 = vmax.f32 %v5372_v28, %v5373_v4  ;;  %v5382_v14 = vld [vmem:[#allocation131_spill] sm:$0xff]  ;;  %v5384_v4 = vld [vmem:[#allocation130_spill] sm:$0xff] }
 0x15c   :  { %5366 = vst [vmem:[#allocation58_spill] sm:$0xff] %v3625_v48  ;;  %v5377_v57 = vmax.f32 %v5375_v15, %v5376_v6  ;;  %v3643_v47 = vmax.f32 %v803_v2, %v804_v9  ;;  %v3645_v34 = vmax.f32 %v810_v54, %v811_v12  ;;  %v3647_v22 = vmax.f32 %v817_v52, %v818_v0  ;;  %v5387_v9 = vld [vmem:[#allocation133_spill] sm:$0xff]  ;;  %v5388_v52 = vld [vmem:[#allocation135_spill] sm:$0xff] }
 0x15d   :  { %5367 = vst [vmem:[#allocation57_spill] sm:$0xff] %v3627_v32  ;;  %v862_v25 = vsel %vm392_vm0, %v5371_v56, -inf  ;;  %v869_v3 = vsel %vm392_vm0, %v5374_v16, -inf  ;;  %v845_v11 = vmax.f32 %v843_v5, %v844_v1  ;;  %v3649_v41 = vmax.f32 %v824_v35, %v825_v55  ;;  %v5385_v16 = vld [vmem:[#allocation132_spill] sm:$0xff]  ;;  %v5391_v1 = vld [vmem:[#allocation134_spill] sm:$0xff] }
 0x15e   :  { %5368 = vst [vmem:[#allocation59_spill] sm:$0xff] %v3629_v24  ;;  %v876_v10 = vsel %vm392_vm0, %v5377_v57, -inf  ;;  %v857_v13 = vmax.f32 %v855_v23, %v856_v33  ;;  %v863_v42 = vrot.slane %v862_v25, 4  ;;  %v5383_v51 = vmax.f32 %v2514_v29, %v5382_v14  ;;  %v5392_v29 = vld [vmem:[#allocation136_spill] sm:$0xff] }
 0x15f   :  { %5378 = vst [vmem:[#allocation60_spill] sm:$0xff] %v3643_v47  ;;  %v870_v56 = vrot.slane %v869_v3, 4  ;;  %v877_v28 = vrot.slane %v876_v10, 4  ;;  %v5386_v2 = vmax.f32 %v5384_v4, %v5385_v16  ;;  %v5389_v12 = vmax.f32 %v5387_v9, %v5388_v52 }
 0x160   :  { %5379 = vst [vmem:[#allocation64_spill] sm:$0xff] %v3645_v34  ;;  %v883_v59 = vsel %vm392_vm0, %v5383_v51, -inf  ;;  %v3663_v35 = vmax.f32 %v831_v63, %v832_v27  ;;  %v839_v23 = vrot.slane %v838_v49, 1  ;;  %v851_v0 = vrot.slane %v850_v21, 2 }
 0x161   :  { %5380 = vst [vmem:[#allocation61_spill] sm:$0xff] %v3647_v22  ;;  %v890_v54 = vsel %vm392_vm0, %v5386_v2, -inf  ;;  %v897_v5 = vsel %vm392_vm0, %v5389_v12, -inf  ;;  %v5393_v55 = vmax.f32 %v5391_v1, %v5392_v29  ;;  %v846_v15 = vrot.slane %v845_v11, 1  ;;  %v5396_v2 = vld [vmem:[#allocation138_spill] sm:$0xff] }
 0x162   :  { %5381 = vst [vmem:[#allocation65_spill] sm:$0xff] %v3649_v41  ;;  %v884_v6 = vrot.slane %v883_v59, 4  ;;  %v5394_v57 = vmax.f32 %v2562_v38, %v2582_v36  ;;  %v5395_v51 = vmax.f32 %v2567_v40, %v2587_v53  ;;  %v864_v27 = vmax.f32 %v862_v25, %v863_v42  ;;  %v5401_v53 = vld [vmem:[#allocation140_spill] sm:$0xff]  ;;  %v5402_v25 = vld [vmem:[#allocation142_spill] sm:$0xff] }
 0x163   :  { %5390 = vst [vmem:[#allocation62_spill] sm:$0xff] %v3663_v35  ;;  %v904_v33 = vsel %vm392_vm0, %v5393_v55, -inf  ;;  %v891_v4 = vrot.slane %v890_v54, 4  ;;  %v898_v16 = vrot.slane %v897_v5, 4  ;;  %v5397_v9 = vmax.f32 %v2572_v37, %v5396_v2  ;;  %v5399_v35 = vld [vmem:[#allocation139_spill] sm:$0xff] }
 0x164   :  { %v911_v14 = vsel %vm392_vm0, %v5394_v57, -inf  ;;  %v918_v63 = vsel %vm392_vm0, %v5395_v51, -inf  ;;  %v858_v12 = vrot.slane %v857_v13, 2  ;;  %v871_v1 = vmax.f32 %v869_v3, %v870_v56  ;;  %v5398_v57 = vld [vmem:[#allocation137_spill] sm:$0xff] }
 0x165   :  { %v925_v52 = vsel %vm392_vm0, %v5397_v9, -inf  ;;  %v878_v29 = vmax.f32 %v876_v10, %v877_v28  ;;  %v905_v55 = vrot.slane %v904_v33, 4  ;;  %v912_v36 = vrot.slane %v911_v14, 4  ;;  %v5643_v7 = vld [vmem:[#allocation59_spill] sm:$0xff] }
 0x166   :  { %v919_v38 = vrot.slane %v918_v63, 4  ;;  %v5400_v41 = vmax.f32 %v5398_v57, %v5399_v35  ;;  %v5403_v42 = vmax.f32 %v5401_v53, %v5402_v25  ;;  %v3689_v22 = vmax.f32 %v838_v49, %v839_v23  ;;  %v5406_v23 = vld [vmem:[#allocation141_spill] sm:$0xff] }
 0x167   :  { %v852_v37 = vmax.f32 %v850_v21, %v851_v0  ;;  %v885_v2 = vmax.f32 %v883_v59, %v884_v6  ;;  %v926_v9 = vrot.slane %v925_v52, 4  ;;  %v865_v3 = vrot.slane %v864_v27, 2  ;;  %v5407_v21 = vld [vmem:[#allocation143_spill] sm:$0xff] }
 0x168   :  { %v932_v40 = vsel %vm392_vm0, %v5400_v41, -inf  ;;  %v939_v51 = vsel %vm392_vm0, %v5403_v42, -inf  ;;  %5404 = vst [vmem:[#allocation66_spill] sm:$0xff] %v3689_v22  ;;  %v892_v10 = vmax.f32 %v890_v54, %v891_v4  ;;  %v899_v56 = vmax.f32 %v897_v5, %v898_v16  ;;  %v5409_v16 = vld [vmem:[#allocation144_spill] sm:$0xff] }
 0x169   :  { %v933_v28 = vrot.slane %v932_v40, 4  ;;  %v3691_v34 = vmax.f32 %v845_v11, %v846_v15  ;;  %v872_v47 = vrot.slane %v871_v1, 2  ;;  %v906_v35 = vmax.f32 %v904_v33, %v905_v55 }
 0x16a   :  { %v940_v57 = vrot.slane %v939_v51, 4  ;;  %v859_v41 = vmax.f32 %v857_v13, %v858_v12  ;;  %v879_v24 = vrot.slane %v878_v29, 2  ;;  %v913_v32 = vmax.f32 %v911_v14, %v912_v36  ;;  %v5410_v13 = vld [vmem:[#allocation146_spill] sm:$0xff] }
 0x16b   :  { %5405 = vst [vmem:[#allocation63_spill] sm:$0xff] %v3691_v34  ;;  %v920_v53 = vmax.f32 %v918_v63, %v919_v38  ;;  %v886_v25 = vrot.slane %v885_v2, 2  ;;  %v927_v42 = vmax.f32 %v925_v52, %v926_v9  ;;  %v934_v49 = vmax.f32 %v932_v40, %v933_v28 }
 0x16c   :  { %v5408_v59 = vmax.f32 %v5406_v23, %v5407_v21  ;;  %v853_v54 = vrot.slane %v852_v37, 1  ;;  %v866_v5 = vmax.f32 %v864_v27, %v865_v3  ;;  %v893_v6 = vrot.slane %v892_v10, 2 }
 0x16d   :  { %v900_v11 = vrot.slane %v899_v56, 2  ;;  %v873_v15 = vmax.f32 %v871_v1, %v872_v47  ;;  %v907_v4 = vrot.slane %v906_v35, 2  ;;  %v941_v33 = vmax.f32 %v939_v51, %v940_v57 }
 0x16e   :  { %v946_v0 = vsel %vm392_vm0, %v5408_v59, -inf  ;;  %v5411_v12 = vmax.f32 %v5409_v16, %v5410_v13  ;;  %v860_v63 = vrot.slane %v859_v41, 1  ;;  %v914_v52 = vrot.slane %v913_v32, 2 }
 0x16f   :  { %v921_v55 = vrot.slane %v920_v53, 2  ;;  %v947_v36 = vrot.slane %v946_v0, 4  ;;  %v880_v38 = vmax.f32 %v878_v29, %v879_v24  ;;  %v887_v40 = vmax.f32 %v885_v2, %v886_v25 }
 0x170   :  { %v953_v14 = vsel %vm392_vm0, %v5411_v12, -inf  ;;  %v928_v9 = vrot.slane %v927_v42, 2  ;;  %v935_v28 = vrot.slane %v934_v49, 2  ;;  %v3701_v23 = vmax.f32 %v852_v37, %v853_v54  ;;  %v5413_v54 = vld [vmem:[#allocation145_spill] sm:$0xff] }
 0x171   :  { %v894_v27 = vmax.f32 %v892_v10, %v893_v6  ;;  %v901_v3 = vmax.f32 %v899_v56, %v900_v11  ;;  %v954_v47 = vrot.slane %v953_v14, 4  ;;  %v867_v1 = vrot.slane %v866_v5, 1  ;;  %v5414_v10 = vld [vmem:[#allocation147_spill] sm:$0xff] }
 0x172   :  { %v874_v51 = vrot.slane %v873_v15, 1  ;;  %v908_v57 = vmax.f32 %v906_v35, %v907_v4  ;;  %v942_v21 = vrot.slane %v941_v33, 2  ;;  %v3703_v59 = vmax.f32 %v859_v41, %v860_v63  ;;  %v5650_v19 = vld [vmem:[#allocation63_spill] sm:$0xff] }
 0x173   :  { %v915_v16 = vmax.f32 %v913_v32, %v914_v52  ;;  %v922_v13 = vmax.f32 %v920_v53, %v921_v55  ;;  %v948_v12 = vmax.f32 %v946_v0, %v947_v36  ;;  %v881_v34 = vrot.slane %v880_v38, 1 }
 0x174   :  { %5412 = vst [vmem:[#allocation67_spill] sm:$0xff] %v3703_v59  ;;  %v888_v22 = vrot.slane %v887_v40, 1  ;;  %v929_v24 = vmax.f32 %v927_v42, %v928_v9  ;;  %v936_v29 = vmax.f32 %v934_v49, %v935_v28  ;;  %v895_v2 = vrot.slane %v894_v27, 1 }
 0x175   :  { %v902_v25 = vrot.slane %v901_v3, 1  ;;  %v955_v37 = vmax.f32 %v953_v14, %v954_v47  ;;  %v5415_v56 = vmax.f32 %v5413_v54, %v5414_v10  ;;  %v3709_v11 = vmax.f32 %v866_v5, %v867_v1  ;;  %v5436_v10 = vld [vmem:[#allocation152_spill] sm:$0xff] }
 0x176   :  { %v3711_v35 = vmax.f32 %v873_v15, %v874_v51  ;;  %v909_v41 = vrot.slane %v908_v57, 1  ;;  %v943_v32 = vmax.f32 %v941_v33, %v942_v21  ;;  %v916_v53 = vrot.slane %v915_v16, 1 }
 0x177   :  { %v960_v6 = vsel %vm392_vm0, %v5415_v56, -inf  ;;  %5416 = vst [vmem:[#allocation68_spill] sm:$0xff] %v3709_v11  ;;  %v923_v0 = vrot.slane %v922_v13, 1  ;;  %v949_v4 = vrot.slane %v948_v12, 2  ;;  %v5418_v42 = vmax.f32 %v2658_v60, %v2678_v58  ;;  %v5437_v56 = vld [vmem:[#allocation153_spill] sm:$0xff] }
 0x178   :  { %5417 = vst [vmem:[#allocation70_spill] sm:$0xff] %v3711_v35  ;;  %v3717_v14 = vmax.f32 %v880_v38, %v881_v34  ;;  %v930_v63 = vrot.slane %v929_v24, 1  ;;  %v937_v52 = vrot.slane %v936_v29, 1  ;;  %v961_v55 = vrot.slane %v960_v6, 4 }
 0x179   :  { %v967_v49 = vsel %vm392_vm0, %v5418_v42, -inf  ;;  %v3719_v36 = vmax.f32 %v887_v40, %v888_v22  ;;  %v3721_v5 = vmax.f32 %v894_v27, %v895_v2  ;;  %v3723_v15 = vmax.f32 %v901_v3, %v902_v25  ;;  %v5427_v40 = vld [vmem:[#allocation148_spill] sm:$0xff]  ;;  %v5428_v27 = vld [vmem:[#allocation150_spill] sm:$0xff]  ;;  %v5432_v2 = vld [vmem:[#allocation149_spill] sm:$0xff] }
 0x17a   :  { %5419 = vst [vmem:[#allocation69_spill] sm:$0xff] %v3717_v14  ;;  %v956_v33 = vrot.slane %v955_v37, 2  ;;  %v3725_v9 = vmax.f32 %v908_v57, %v909_v41  ;;  %v944_v28 = vrot.slane %v943_v32, 1  ;;  %v968_v47 = vrot.slane %v967_v49, 4  ;;  %v5433_v25 = vld [vmem:[#allocation151_spill] sm:$0xff] }
 0x17b   :  { %5420 = vst [vmem:[#allocation71_spill] sm:$0xff] %v3719_v36  ;;  %v5424_v58 = vmax.f32 %v2663_v62, %v2683_v8  ;;  %v3731_v34 = vmax.f32 %v915_v16, %v916_v53  ;;  %v3733_v38 = vmax.f32 %v922_v13, %v923_v0  ;;  %v950_v22 = vmax.f32 %v948_v12, %v949_v4  ;;  %v5440_v0 = vld [vmem:[#allocation154_spill] sm:$0xff]  ;;  %v5441_v4 = vld [vmem:[#allocation155_spill] sm:$0xff] }
 0x17c   :  { %5421 = vst [vmem:[#allocation72_spill] sm:$0xff] %v3721_v5  ;;  %v5429_v1 = vmax.f32 %v5427_v40, %v5428_v27  ;;  %v3739_v51 = vmax.f32 %v929_v24, %v930_v63  ;;  %v3741_v57 = vmax.f32 %v936_v29, %v937_v52  ;;  %v962_v21 = vmax.f32 %v960_v6, %v961_v55  ;;  %v5443_v55 = vld [vmem:[#allocation156_spill] sm:$0xff]  ;;  %v5447_v40 = vld [vmem:[#allocation161_spill] sm:$0xff] }
 0x17d   :  { %5422 = vst [vmem:[#allocation74_spill] sm:$0xff] %v3723_v15  ;;  %v974_v60 = vsel %vm392_vm0, %v5424_v58, -inf  ;;  %v5434_v8 = vmax.f32 %v5432_v2, %v5433_v25  ;;  %v957_v16 = vmax.f32 %v955_v37, %v956_v33  ;;  %v5435_v13 = vmax.f32 %v2706_v17, %v2716_v44  ;;  %v5444_v17 = vld [vmem:[#allocation160_spill] sm:$0xff]  ;;  %v5446_v58 = vld [vmem:[#allocation157_spill] sm:$0xff] }
 0x17e   :  { %5423 = vst [vmem:[#allocation73_spill] sm:$0xff] %v3725_v9  ;;  %v981_v3 = vsel %vm392_vm0, %v5429_v1, -inf  ;;  %v975_v54 = vrot.slane %v974_v60, 4  ;;  %v5438_v41 = vmax.f32 %v5436_v10, %v5437_v56  ;;  %v3755_v29 = vmax.f32 %v943_v32, %v944_v28  ;;  %v5450_v1 = vld [vmem:[#allocation162_spill] sm:$0xff] }
 0x17f   :  { %5425 = vst [vmem:[#allocation75_spill] sm:$0xff] %v3731_v34  ;;  %v988_v62 = vsel %vm392_vm0, %v5434_v8, -inf  ;;  %v995_v12 = vsel %vm392_vm0, %v5435_v13, -inf  ;;  %v969_v6 = vmax.f32 %v967_v49, %v968_v47  ;;  %v982_v53 = vrot.slane %v981_v3, 4  ;;  %v5449_v47 = vld [vmem:[#allocation158_spill] sm:$0xff]  ;;  %v5452_v8 = vld [vmem:[#allocation159_spill] sm:$0xff] }
 0x180   :  { %5426 = vst [vmem:[#allocation76_spill] sm:$0xff] %v3733_v38  ;;  %v1002_v24 = vsel %vm392_vm0, %v5438_v41, -inf  ;;  %v5442_v42 = vmax.f32 %v5440_v0, %v5441_v4  ;;  %v951_v63 = vrot.slane %v950_v22, 1  ;;  %v989_v52 = vrot.slane %v988_v62, 4  ;;  %v5453_v13 = vld [vmem:[#allocation163_spill] sm:$0xff] }
 0x181   :  { %5430 = vst [vmem:[#allocation80_spill] sm:$0xff] %v3739_v51  ;;  %v5445_v44 = vmax.f32 %v5443_v55, %v5444_v17  ;;  %v5448_v27 = vmax.f32 %v5446_v58, %v5447_v40  ;;  %v996_v28 = vrot.slane %v995_v12, 4  ;;  %v1003_v49 = vrot.slane %v1002_v24, 4 }
 0x182   :  { %5431 = vst [vmem:[#allocation77_spill] sm:$0xff] %v3741_v57  ;;  %v1009_v37 = vsel %vm392_vm0, %v5442_v42, -inf  ;;  %v5451_v2 = vmax.f32 %v5449_v47, %v5450_v1  ;;  %v5454_v10 = vmax.f32 %v5452_v8, %v5453_v13  ;;  %v958_v41 = vrot.slane %v957_v16, 1  ;;  %v5458_v57 = vld [vmem:[#allocation167_spill] sm:$0xff] }
 0x183   :  { %5439 = vst [vmem:[#allocation81_spill] sm:$0xff] %v3755_v29  ;;  %v1016_v33 = vsel %vm392_vm0, %v5445_v44, -inf  ;;  %v1023_v32 = vsel %vm392_vm0, %v5448_v27, -inf  ;;  %v963_v0 = vrot.slane %v962_v21, 2  ;;  %v976_v4 = vmax.f32 %v974_v60, %v975_v54  ;;  %v5455_v29 = vld [vmem:[#allocation166_spill] sm:$0xff] }
 0x184   :  { %v1030_v25 = vsel %vm392_vm0, %v5451_v2, -inf  ;;  %v1037_v56 = vsel %vm392_vm0, %v5454_v10, -inf  ;;  %v1010_v42 = vrot.slane %v1009_v37, 4  ;;  %v970_v55 = vrot.slane %v969_v6, 2  ;;  %v5457_v2 = vld [vmem:[#allocation164_spill] sm:$0xff] }
 0x185   :  { %v983_v17 = vmax.f32 %v981_v3, %v982_v53  ;;  %v1017_v44 = vrot.slane %v1016_v33, 4  ;;  %v1024_v58 = vrot.slane %v1023_v32, 4  ;;  %v1031_v40 = vrot.slane %v1030_v25, 4 }
 0x186   :  { %v1038_v27 = vrot.slane %v1037_v56, 4  ;;  %v5456_v47 = vmax.f32 %v2792_v20, %v5455_v29  ;;  %v5459_v8 = vmax.f32 %v5457_v2, %v5458_v57  ;;  %v3785_v10 = vmax.f32 %v950_v22, %v951_v63  ;;  %v5462_v63 = vld [vmem:[#allocation165_spill] sm:$0xff] }
 0x187   :  { %v990_v60 = vmax.f32 %v988_v62, %v989_v52  ;;  %v997_v54 = vmax.f32 %v995_v12, %v996_v28  ;;  %v1004_v51 = vmax.f32 %v1002_v24, %v1003_v49  ;;  %v977_v3 = vrot.slane %v976_v4, 2  ;;  %v5463_v62 = vld [vmem:[#allocation168_spill] sm:$0xff] }
 0x188   :  { %v1044_v1 = vsel %vm392_vm0, %v5456_v47, -inf  ;;  %v1051_v13 = vsel %vm392_vm0, %v5459_v8, -inf  ;;  %5460 = vst [vmem:[#allocation78_spill] sm:$0xff] %v3785_v10  ;;  %v1011_v53 = vmax.f32 %v1009_v37, %v1010_v42  ;;  %v964_v9 = vmax.f32 %v962_v21, %v963_v0  ;;  %v5466_v0 = vld [vmem:[#allocation170_spill] sm:$0xff] }
 0x189   :  { %v1045_v38 = vrot.slane %v1044_v1, 4  ;;  %v1052_v34 = vrot.slane %v1051_v13, 4  ;;  %v984_v15 = vrot.slane %v983_v17, 2  ;;  %v1018_v5 = vmax.f32 %v1016_v33, %v1017_v44 }
 0x18a   :  { %v1025_v20 = vmax.f32 %v1023_v32, %v1024_v58  ;;  %v3787_v29 = vmax.f32 %v957_v16, %v958_v41  ;;  %v971_v47 = vmax.f32 %v969_v6, %v970_v55  ;;  %v1032_v36 = vmax.f32 %v1030_v25, %v1031_v40 }
 0x18b   :  { %v1039_v57 = vmax.f32 %v1037_v56, %v1038_v27  ;;  %v991_v2 = vrot.slane %v990_v60, 2  ;;  %v998_v8 = vrot.slane %v997_v54, 2  ;;  %v1005_v22 = vrot.slane %v1004_v51, 2  ;;  %v5465_v56 = vld [vmem:[#allocation169_spill] sm:$0xff] }
 0x18c   :  { %5461 = vst [vmem:[#allocation82_spill] sm:$0xff] %v3787_v29  ;;  %v5464_v12 = vmax.f32 %v5462_v63, %v5463_v62  ;;  %v978_v37 = vmax.f32 %v976_v4, %v977_v3  ;;  %v1012_v52 = vrot.slane %v1011_v53, 2  ;;  %v1046_v28 = vmax.f32 %v1044_v1, %v1045_v38 }
 0x18d   :  { %v1053_v21 = vmax.f32 %v1051_v13, %v1052_v34  ;;  %v965_v49 = vrot.slane %v964_v9, 1  ;;  %v985_v33 = vmax.f32 %v983_v17, %v984_v15  ;;  %v1019_v32 = vrot.slane %v1018_v5, 2 }
 0x18e   :  { %v1058_v24 = vsel %vm392_vm0, %v5464_v12, -inf  ;;  %v1026_v16 = vrot.slane %v1025_v20, 2  ;;  %v1033_v41 = vrot.slane %v1032_v36, 2  ;;  %v1040_v6 = vrot.slane %v1039_v57, 2 }
 0x18f   :  { %v1059_v25 = vrot.slane %v1058_v24, 4  ;;  %v5467_v42 = vmax.f32 %v5465_v56, %v5466_v0  ;;  %v972_v44 = vrot.slane %v971_v47, 1  ;;  %v992_v58 = vmax.f32 %v990_v60, %v991_v2 }
 0x190   :  { %v999_v40 = vmax.f32 %v997_v54, %v998_v8  ;;  %v1006_v27 = vmax.f32 %v1004_v51, %v1005_v22  ;;  %v979_v4 = vrot.slane %v978_v37, 1  ;;  %v1013_v3 = vmax.f32 %v1011_v53, %v1012_v52 }
 0x191   :  { %v1065_v55 = vsel %vm392_vm0, %v5467_v42, -inf  ;;  %v1047_v38 = vrot.slane %v1046_v28, 2  ;;  %v1054_v34 = vrot.slane %v1053_v21, 2  ;;  %v3797_v1 = vmax.f32 %v964_v9, %v965_v49 }
 0x192   :  { %v1020_v15 = vmax.f32 %v1018_v5, %v1019_v32  ;;  %v1027_v17 = vmax.f32 %v1025_v20, %v1026_v16  ;;  %v1066_v13 = vrot.slane %v1065_v55, 4  ;;  %v986_v63 = vrot.slane %v985_v33, 1  ;;  %v5471_v5 = vld [vmem:[#allocation171_spill] sm:$0xff] }
 0x193   :  { %5468 = vst [vmem:[#allocation79_spill] sm:$0xff] %v3797_v1  ;;  %v1034_v62 = vmax.f32 %v1032_v36, %v1033_v41  ;;  %v1041_v12 = vmax.f32 %v1039_v57, %v1040_v6  ;;  %v1060_v29 = vmax.f32 %v1058_v24, %v1059_v25  ;;  %v3799_v56 = vmax.f32 %v971_v47, %v972_v44 }
 0x194   :  { %v993_v0 = vrot.slane %v992_v58, 1  ;;  %v1000_v42 = vrot.slane %v999_v40, 1  ;;  %v1007_v60 = vrot.slane %v1006_v27, 1  ;;  %v3801_v54 = vmax.f32 %v978_v37, %v979_v4 }
 0x195   :  { %5469 = vst [vmem:[#allocation83_spill] sm:$0xff] %v3799_v56  ;;  %v1014_v51 = vrot.slane %v1013_v3, 1  ;;  %v1048_v53 = vmax.f32 %v1046_v28, %v1047_v38  ;;  %v1055_v2 = vmax.f32 %v1053_v21, %v1054_v34  ;;  %v1021_v8 = vrot.slane %v1020_v15, 1  ;;  %v5477_v28 = vld [vmem:[#allocation172_spill] sm:$0xff] }
 0x196   :  { %5470 = vst [vmem:[#allocation84_spill] sm:$0xff] %v3801_v54  ;;  %v1028_v9 = vrot.slane %v1027_v17, 1  ;;  %v1067_v22 = vmax.f32 %v1065_v55, %v1066_v13  ;;  %v5472_v20 = vmax.f32 %v2835_v30, %v5471_v5  ;;  %v3807_v57 = vmax.f32 %v985_v33, %v986_v63  ;;  %v5478_v21 = vld [vmem:[#allocation176_spill] sm:$0xff]  ;;  %v5480_v55 = vld [vmem:[#allocation173_spill] sm:$0xff]  ;;  %v5489_v5 = vld [vmem:[#allocation178_spill] sm:$0xff] }
 0x197   :  { %v1035_v47 = vrot.slane %v1034_v62, 1  ;;  %v1042_v24 = vrot.slane %v1041_v12, 1  ;;  %v1061_v52 = vrot.slane %v1060_v29, 2  ;;  %v3809_v49 = vmax.f32 %v992_v58, %v993_v0  ;;  %v5481_v33 = vld [vmem:[#allocation177_spill] sm:$0xff] }
 0x198   :  { %v1072_v36 = vsel %vm392_vm0, %v5472_v20, -inf  ;;  %5473 = vst [vmem:[#allocation86_spill] sm:$0xff] %v3807_v57  ;;  %v3811_v37 = vmax.f32 %v999_v40, %v1000_v42  ;;  %v3813_v32 = vmax.f32 %v1006_v27, %v1007_v60  ;;  %v5479_v16 = vmax.f32 %v5477_v28, %v5478_v21  ;;  %v5488_v60 = vld [vmem:[#allocation174_spill] sm:$0xff]  ;;  %v5491_v21 = vld [vmem:[#allocation175_spill] sm:$0xff] }
 0x199   :  { %5474 = vst [vmem:[#allocation85_spill] sm:$0xff] %v3809_v49  ;;  %v1049_v6 = vrot.slane %v1048_v53, 1  ;;  %v1056_v30 = vrot.slane %v1055_v2, 1  ;;  %v1073_v25 = vrot.slane %v1072_v36, 4  ;;  %v5482_v44 = vmax.f32 %v5480_v55, %v5481_v33 }
 0x19a   :  { %5475 = vst [vmem:[#allocation87_spill] sm:$0xff] %v3811_v37  ;;  %v1079_v41 = vsel %vm392_vm0, %v5479_v16, -inf  ;;  %v3823_v38 = vmax.f32 %v1013_v3, %v1014_v51  ;;  %v3825_v58 = vmax.f32 %v1020_v15, %v1021_v8  ;;  %v3827_v40 = vmax.f32 %v1027_v17, %v1028_v9  ;;  %v5492_v3 = vld [vmem:[#allocation179_spill] sm:$0xff]  ;;  %v5494_v17 = vld [vmem:[#allocation180_spill] sm:$0xff]  ;;  %v5495_v8 = vld [vmem:[#allocation182_spill] sm:$0xff] }
 0x19b   :  { %5476 = vst [vmem:[#allocation88_spill] sm:$0xff] %v3813_v32  ;;  %v1086_v4 = vsel %vm392_vm0, %v5482_v44, -inf  ;;  %v1068_v27 = vrot.slane %v1067_v22, 2  ;;  %v3829_v34 = vmax.f32 %v1034_v62, %v1035_v47  ;;  %v3831_v13 = vmax.f32 %v1041_v12, %v1042_v24  ;;  %v5499_v24 = vld [vmem:[#allocation181_spill] sm:$0xff]  ;;  %v5502_v44 = vld [vmem:[#allocation184_spill] sm:$0xff]  ;;  %v5663_v39 = vld [vmem:[#allocation79_spill] sm:$0xff] }
 0x19c   :  { %5483 = vst [vmem:[#allocation90_spill] sm:$0xff] %v3823_v38  ;;  %v1062_v63 = vmax.f32 %v1060_v29, %v1061_v52  ;;  %v1080_v0 = vrot.slane %v1079_v41, 4  ;;  %v1087_v42 = vrot.slane %v1086_v4, 4  ;;  %v5490_v20 = vmax.f32 %v5488_v60, %v5489_v5  ;;  %v5500_v52 = vld [vmem:[#allocation183_spill] sm:$0xff]  ;;  %v5503_v60 = vld [vmem:[#allocation186_spill] sm:$0xff] }
 0x19d   :  { %5484 = vst [vmem:[#allocation89_spill] sm:$0xff] %v3825_v58  ;;  %v5493_v51 = vmax.f32 %v5491_v21, %v5492_v3  ;;  %v5496_v9 = vmax.f32 %v5494_v17, %v5495_v8  ;;  %v3845_v12 = vmax.f32 %v1048_v53, %v1049_v6  ;;  %v3847_v29 = vmax.f32 %v1055_v2, %v1056_v30  ;;  %v5505_v21 = vld [vmem:[#allocation185_spill] sm:$0xff]  ;;  %v5506_v3 = vld [vmem:[#allocation187_spill] sm:$0xff]  ;;  %v5508_v6 = vld [vmem:[#allocation188_spill] sm:$0xff] }
 0x19e   :  { %5485 = vst [vmem:[#allocation91_spill] sm:$0xff] %v3827_v40  ;;  %v1093_v28 = vsel %vm392_vm0, %v5490_v20, -inf  ;;  %v1074_v47 = vmax.f32 %v1072_v36, %v1073_v25  ;;  %v5501_v16 = vmax.f32 %v5499_v24, %v5500_v52  ;;  %v1069_v33 = vmax.f32 %v1067_v22, %v1068_v27  ;;  %v5509_v2 = vld [vmem:[#allocation192_spill] sm:$0xff]  ;;  %v5511_v24 = vld [vmem:[#allocation189_spill] sm:$0xff]  ;;  %v5521_v58 = vld [vmem:[#allocation198_spill] sm:$0xff] }
 0x19f   :  { %5486 = vst [vmem:[#allocation92_spill] sm:$0xff] %v3829_v34  ;;  %v1100_v15 = vsel %vm392_vm0, %v5493_v51, -inf  ;;  %v1107_v62 = vsel %vm392_vm0, %v5496_v9, -inf  ;;  %v5504_v5 = vmax.f32 %v5502_v44, %v5503_v60  ;;  %v5507_v51 = vmax.f32 %v5505_v21, %v5506_v3  ;;  %v5512_v52 = vld [vmem:[#allocation193_spill] sm:$0xff]  ;;  %v5514_v60 = vld [vmem:[#allocation190_spill] sm:$0xff]  ;;  %v5517_v34 = vld [vmem:[#allocation191_spill] sm:$0xff] }
 0x1a0   :  { %5487 = vst [vmem:[#allocation96_spill] sm:$0xff] %v3831_v13  ;;  %v1114_v55 = vsel %vm392_vm0, %v5501_v16, -inf  ;;  %v5510_v30 = vmax.f32 %v5508_v6, %v5509_v2  ;;  %v1081_v25 = vmax.f32 %v1079_v41, %v1080_v0  ;;  %v1094_v17 = vrot.slane %v1093_v28, 4  ;;  %v5666_v43 = vld [vmem:[#allocation86_spill] sm:$0xff] }
 0x1a1   :  { %5497 = vst [vmem:[#allocation93_spill] sm:$0xff] %v3845_v12  ;;  %v1121_v20 = vsel %vm392_vm0, %v5504_v5, -inf  ;;  %v1128_v53 = vsel %vm392_vm0, %v5507_v51, -inf  ;;  %v1101_v8 = vrot.slane %v1100_v15, 4  ;;  %v1108_v9 = vrot.slane %v1107_v62, 4  ;;  %v5515_v5 = vld [vmem:[#allocation194_spill] sm:$0xff] }
 0x1a2   :  { %5498 = vst [vmem:[#allocation97_spill] sm:$0xff] %v3847_v29  ;;  %v1135_v36 = vsel %vm392_vm0, %v5510_v30, -inf  ;;  %v1088_v22 = vmax.f32 %v1086_v4, %v1087_v42  ;;  %v1115_v27 = vrot.slane %v1114_v55, 4  ;;  %v5513_v16 = vmax.f32 %v5511_v24, %v5512_v52  ;;  %v5518_v24 = vld [vmem:[#allocation195_spill] sm:$0xff] }
 0x1a3   :  { %v5516_v21 = vmax.f32 %v5514_v60, %v5515_v5  ;;  %v1063_v51 = vrot.slane %v1062_v63, 1  ;;  %v1122_v6 = vrot.slane %v1121_v20, 4  ;;  %v1129_v2 = vrot.slane %v1128_v53, 4  ;;  %v5670_v59 = vld [vmem:[#allocation90_spill] sm:$0xff] }
 0x1a4   :  { %v1142_v44 = vsel %vm392_vm0, %v5513_v16, -inf  ;;  %v1136_v30 = vrot.slane %v1135_v36, 4  ;;  %v1070_v41 = vrot.slane %v1069_v33, 1  ;;  %v1075_v0 = vrot.slane %v1074_v47, 2  ;;  %v5671_v11 = vld [vmem:[#allocation89_spill] sm:$0xff] }
 0x1a5   :  { %v1149_v3 = vsel %vm392_vm0, %v5516_v21, -inf  ;;  %v1143_v29 = vrot.slane %v1142_v44, 4  ;;  %v1095_v4 = vmax.f32 %v1093_v28, %v1094_v17  ;;  %v1102_v42 = vmax.f32 %v1100_v15, %v1101_v8  ;;  %v5520_v21 = vld [vmem:[#allocation196_spill] sm:$0xff]  ;;  %v5672_v35 = vld [vmem:[#allocation91_spill] sm:$0xff] }
 0x1a6   :  { %v1150_v12 = vrot.slane %v1149_v3, 4  ;;  %v1109_v13 = vmax.f32 %v1107_v62, %v1108_v9  ;;  %v5519_v52 = vmax.f32 %v5517_v34, %v5518_v24  ;;  %v1082_v40 = vrot.slane %v1081_v25, 2  ;;  %v5673_v48 = vld [vmem:[#allocation92_spill] sm:$0xff] }
 0x1a7   :  { %v1089_v60 = vrot.slane %v1088_v22, 2  ;;  %v1116_v5 = vmax.f32 %v1114_v55, %v1115_v27  ;;  %v5522_v38 = vmax.f32 %v5520_v21, %v5521_v58  ;;  %v3881_v37 = vmax.f32 %v1062_v63, %v1063_v51  ;;  %v5525_v51 = vld [vmem:[#allocation197_spill] sm:$0xff] }
 0x1a8   :  { %v1156_v16 = vsel %vm392_vm0, %v5519_v52, -inf  ;;  %v1123_v49 = vmax.f32 %v1121_v20, %v1122_v6  ;;  %v1130_v57 = vmax.f32 %v1128_v53, %v1129_v2  ;;  %v1137_v28 = vmax.f32 %v1135_v36, %v1136_v30  ;;  %v5526_v20 = vld [vmem:[#allocation199_spill] sm:$0xff] }
 0x1a9   :  { %v1163_v32 = vsel %vm392_vm0, %v5522_v38, -inf  ;;  %5523 = vst [vmem:[#allocation94_spill] sm:$0xff] %v3881_v37  ;;  %v1076_v15 = vmax.f32 %v1074_v47, %v1075_v0  ;;  %v1144_v62 = vmax.f32 %v1142_v44, %v1143_v29  ;;  %v1151_v17 = vmax.f32 %v1149_v3, %v1150_v12  ;;  %v5529_v37 = vld [vmem:[#allocation203_spill] sm:$0xff] }
 0x1aa   :  { %v1157_v8 = vrot.slane %v1156_v16, 4  ;;  %v1096_v34 = vrot.slane %v1095_v4, 2  ;;  %v1103_v9 = vrot.slane %v1102_v42, 2  ;;  %v1110_v24 = vrot.slane %v1109_v13, 2 }
 0x1ab   :  { %v1164_v52 = vrot.slane %v1163_v32, 4  ;;  %v3883_v54 = vmax.f32 %v1069_v33, %v1070_v41  ;;  %v1083_v55 = vmax.f32 %v1081_v25, %v1082_v40  ;;  %v1090_v27 = vmax.f32 %v1088_v22, %v1089_v60 }
 0x1ac   :  { %v1117_v58 = vrot.slane %v1116_v5, 2  ;;  %v1124_v21 = vrot.slane %v1123_v49, 2  ;;  %v1131_v38 = vrot.slane %v1130_v57, 2  ;;  %v1138_v63 = vrot.slane %v1137_v28, 2 }
 0x1ad   :  { %5524 = vst [vmem:[#allocation98_spill] sm:$0xff] %v3883_v54  ;;  %v5527_v53 = vmax.f32 %v5525_v51, %v5526_v20  ;;  %v1077_v29 = vrot.slane %v1076_v15, 1  ;;  %v1145_v12 = vrot.slane %v1144_v62, 2  ;;  %v1152_v36 = vrot.slane %v1151_v17, 2  ;;  %v5528_v54 = vld [vmem:[#allocation200_spill] sm:$0xff] }
 0x1ae   :  { %v1158_v44 = vmax.f32 %v1156_v16, %v1157_v8  ;;  %v1097_v3 = vmax.f32 %v1095_v4, %v1096_v34  ;;  %v1104_v6 = vmax.f32 %v1102_v42, %v1103_v9  ;;  %v1111_v2 = vmax.f32 %v1109_v13, %v1110_v24 }
 0x1af   :  { %v1170_v47 = vsel %vm392_vm0, %v5527_v53, -inf  ;;  %v1165_v33 = vmax.f32 %v1163_v32, %v1164_v52  ;;  %v1084_v30 = vrot.slane %v1083_v55, 1  ;;  %v1091_v40 = vrot.slane %v1090_v27, 1 }
 0x1b0   :  { %v1118_v25 = vmax.f32 %v1116_v5, %v1117_v58  ;;  %v1171_v22 = vrot.slane %v1170_v47, 4  ;;  %v1125_v41 = vmax.f32 %v1123_v49, %v1124_v21  ;;  %v1132_v0 = vmax.f32 %v1130_v57, %v1131_v38 }
 0x1b1   :  { %v1139_v60 = vmax.f32 %v1137_v28, %v1138_v63  ;;  %v5530_v51 = vmax.f32 %v5528_v54, %v5529_v37  ;;  %v3893_v53 = vmax.f32 %v1076_v15, %v1077_v29  ;;  %v1146_v56 = vmax.f32 %v1144_v62, %v1145_v12  ;;  %v5534_v62 = vld [vmem:[#allocation201_spill] sm:$0xff] }
 0x1b2   :  { %v1153_v16 = vmax.f32 %v1151_v17, %v1152_v36  ;;  %v1159_v4 = vrot.slane %v1158_v44, 2  ;;  %v1098_v42 = vrot.slane %v1097_v3, 1  ;;  %v1105_v13 = vrot.slane %v1104_v6, 1  ;;  %v5535_v17 = vld [vmem:[#allocation204_spill] sm:$0xff]  ;;  %v5541_v36 = vld [vmem:[#allocation202_spill] sm:$0xff] }
 0x1b3   :  { %v1177_v20 = vsel %vm392_vm0, %v5530_v51, -inf  ;;  %5531 = vst [vmem:[#allocation95_spill] sm:$0xff] %v3893_v53  ;;  %v1112_v32 = vrot.slane %v1111_v2, 1  ;;  %v1166_v8 = vrot.slane %v1165_v33, 2  ;;  %v3895_v34 = vmax.f32 %v1083_v55, %v1084_v30  ;;  %v5542_v30 = vld [vmem:[#allocation205_spill] sm:$0xff] }
 0x1b4   :  { %v1119_v5 = vrot.slane %v1118_v25, 1  ;;  %v1172_v49 = vmax.f32 %v1170_v47, %v1171_v22  ;;  %v1178_v57 = vrot.slane %v1177_v20, 4  ;;  %v3897_v28 = vmax.f32 %v1090_v27, %v1091_v40 }
 0x1b5   :  { %5532 = vst [vmem:[#allocation99_spill] sm:$0xff] %v3895_v34  ;;  %v1126_v9 = vrot.slane %v1125_v41, 1  ;;  %v1133_v54 = vrot.slane %v1132_v0, 1  ;;  %v1140_v37 = vrot.slane %v1139_v60, 1  ;;  %v1147_v24 = vrot.slane %v1146_v56, 1 }
 0x1b6   :  { %5533 = vst [vmem:[#allocation100_spill] sm:$0xff] %v3897_v28  ;;  %v1154_v15 = vrot.slane %v1153_v16, 1  ;;  %v1160_v52 = vmax.f32 %v1158_v44, %v1159_v4  ;;  %v5536_v58 = vmax.f32 %v5534_v62, %v5535_v17  ;;  %v3903_v38 = vmax.f32 %v1097_v3, %v1098_v42  ;;  %v5550_v42 = vld [vmem:[#allocation210_spill] sm:$0xff] }
 0x1b7   :  { %v3905_v55 = vmax.f32 %v1104_v6, %v1105_v13  ;;  %v3907_v63 = vmax.f32 %v1111_v2, %v1112_v32  ;;  %v1167_v47 = vmax.f32 %v1165_v33, %v1166_v8  ;;  %v3909_v27 = vmax.f32 %v1118_v25, %v1119_v5  ;;  %v5549_v25 = vld [vmem:[#allocation206_spill] sm:$0xff]  ;;  %v5552_v5 = vld [vmem:[#allocation207_spill] sm:$0xff] }
 0x1b8   :  { %v1184_v21 = vsel %vm392_vm0, %v5536_v58, -inf  ;;  %5537 = vst [vmem:[#allocation102_spill] sm:$0xff] %v3903_v38  ;;  %v1173_v29 = vrot.slane %v1172_v49, 2  ;;  %v1179_v12 = vmax.f32 %v1177_v20, %v1178_v57  ;;  %v5543_v40 = vmax.f32 %v5541_v36, %v5542_v30  ;;  %v5561_v58 = vld [vmem:[#allocation212_spill] sm:$0xff]  ;;  %v5562_v36 = vld [vmem:[#allocation215_spill] sm:$0xff] }
 0x1b9   :  { %5538 = vst [vmem:[#allocation101_spill] sm:$0xff] %v3905_v55  ;;  %v3915_v22 = vmax.f32 %v1125_v41, %v1126_v9  ;;  %v3917_v51 = vmax.f32 %v1132_v0, %v1133_v54  ;;  %v3919_v3 = vmax.f32 %v1139_v60, %v1140_v37  ;;  %v1185_v6 = vrot.slane %v1184_v21, 4  ;;  %v5553_v41 = vld [vmem:[#allocation211_spill] sm:$0xff]  ;;  %v5555_v60 = vld [vmem:[#allocation208_spill] sm:$0xff]  ;;  %v5556_v9 = vld [vmem:[#allocation213_spill] sm:$0xff] }
 0x1ba   :  { %5539 = vst [vmem:[#allocation103_spill] sm:$0xff] %v3907_v63  ;;  %v1191_v44 = vsel %vm392_vm0, %v5543_v40, -inf  ;;  %v3921_v4 = vmax.f32 %v1146_v56, %v1147_v24  ;;  %v3923_v2 = vmax.f32 %v1153_v16, %v1154_v15  ;;  %v1161_v33 = vrot.slane %v1160_v52, 1  ;;  %v5558_v24 = vld [vmem:[#allocation209_spill] sm:$0xff]  ;;  %v5559_v15 = vld [vmem:[#allocation214_spill] sm:$0xff]  ;;  %v5582_v63 = vld [vmem:[#allocation224_spill] sm:$0xff] }
 0x1bb   :  { %5540 = vst [vmem:[#allocation104_spill] sm:$0xff] %v3909_v27  ;;  %v5551_v20 = vmax.f32 %v5549_v25, %v5550_v42  ;;  %v1168_v32 = vrot.slane %v1167_v47, 1  ;;  %v1192_v8 = vrot.slane %v1191_v44, 4  ;;  %v5554_v57 = vmax.f32 %v5552_v5, %v5553_v41  ;;  %v5565_v5 = vld [vmem:[#allocation219_spill] sm:$0xff]  ;;  %v5581_v27 = vld [vmem:[#allocation220_spill] sm:$0xff]  ;;  %v5585_v55 = vld [vmem:[#allocation225_spill] sm:$0xff] }
 0x1bc   :  { %5544 = vst [vmem:[#allocation106_spill] sm:$0xff] %v3915_v22  ;;  %v5557_v54 = vmax.f32 %v5555_v60, %v5556_v9  ;;  %v1174_v16 = vmax.f32 %v1172_v49, %v1173_v29  ;;  %v1180_v37 = vrot.slane %v1179_v12, 2  ;;  %v5560_v62 = vmax.f32 %v5558_v24, %v5559_v15  ;;  %v5567_v60 = vld [vmem:[#allocation217_spill] sm:$0xff]  ;;  %v5686_v45 = vld [vmem:[#allocation99_spill] sm:$0xff] }
 0x1bd   :  { %5545 = vst [vmem:[#allocation105_spill] sm:$0xff] %v3917_v51  ;;  %v1198_v13 = vsel %vm392_vm0, %v5551_v20, -inf  ;;  %v1205_v0 = vsel %vm392_vm0, %v5554_v57, -inf  ;;  %v5563_v30 = vmax.f32 %v5561_v58, %v5562_v36  ;;  %v1186_v25 = vmax.f32 %v1184_v21, %v1185_v6  ;;  %v5564_v20 = vld [vmem:[#allocation216_spill] sm:$0xff]  ;;  %v5568_v49 = vld [vmem:[#allocation221_spill] sm:$0xff]  ;;  %v5572_v58 = vld [vmem:[#allocation222_spill] sm:$0xff] }
 0x1be   :  { %5546 = vst [vmem:[#allocation107_spill] sm:$0xff] %v3919_v3  ;;  %v1212_v56 = vsel %vm392_vm0, %v5557_v54, -inf  ;;  %v1219_v17 = vsel %vm392_vm0, %v5560_v62, -inf  ;;  %v1199_v42 = vrot.slane %v1198_v13, 4  ;;  %v5566_v41 = vmax.f32 %v5564_v20, %v5565_v5  ;;  %v5571_v62 = vld [vmem:[#allocation218_spill] sm:$0xff]  ;;  %v5689_v61 = vld [vmem:[#allocation100_spill] sm:$0xff] }
 0x1bf   :  { %5547 = vst [vmem:[#allocation108_spill] sm:$0xff] %v3921_v4  ;;  %v1226_v40 = vsel %vm392_vm0, %v5563_v30, -inf  ;;  %v5569_v29 = vmax.f32 %v5567_v60, %v5568_v49  ;;  %v3953_v54 = vmax.f32 %v1160_v52, %v1161_v33  ;;  %v1206_v24 = vrot.slane %v1205_v0, 4  ;;  %v5575_v4 = vld [vmem:[#allocation3_spill] sm:$0xff]  ;;  %v5578_v33 = vld [vmem:[#allocation6_spill] sm:$0xff] }
 0x1c0   :  { %5548 = vst [vmem:[#allocation112_spill] sm:$0xff] %v3923_v2  ;;  %v1233_v57 = vsel %vm392_vm0, %v5566_v41, -inf  ;;  %v1213_v15 = vrot.slane %v1212_v56, 4  ;;  %v5573_v36 = vmax.f32 %v5571_v62, %v5572_v58  ;;  %v3959_v6 = vmax.f32 %v1167_v47, %v1168_v32  ;;  %v5576_v60 = vld [vmem:[#allocation7_spill] sm:$0xff] }
 0x1c1   :  { %v1240_v9 = vsel %vm392_vm0, %v5569_v29, -inf  ;;  %5570 = vst [vmem:[#allocation109_spill] sm:$0xff] %v3953_v54  ;;  %v1193_v30 = vmax.f32 %v1191_v44, %v1192_v8  ;;  %v1220_v20 = vrot.slane %v1219_v17, 4  ;;  %v1227_v5 = vrot.slane %v1226_v40, 4  ;;  %v5579_v29 = vld [vmem:[#allocation223_spill] sm:$0xff] }
 0x1c2   :  { %v1247_v21 = vsel %vm392_vm0, %v5573_v36, -inf  ;;  %5574 = vst [vmem:[#allocation113_spill] sm:$0xff] %v3959_v6  ;;  %v1234_v41 = vrot.slane %v1233_v57, 4  ;;  %v1241_v2 = vrot.slane %v1240_v9, 4  ;;  %v5577_v49 = vmax.f32 %v5575_v4, %v5576_v60 }
 0x1c3   :  { %v5580_v54 = vmax.f32 %v5578_v33, %v5579_v29  ;;  %v1175_v62 = vrot.slane %v1174_v16, 1  ;;  %v1181_v58 = vmax.f32 %v1179_v12, %v1180_v37  ;;  %v1200_v36 = vmax.f32 %v1198_v13, %v1199_v42 }
 0x1c4   :  { %v1254_v52 = vsel %vm392_vm0, %v5577_v49, -inf  ;;  %v1248_v47 = vrot.slane %v1247_v21, 4  ;;  %v1207_v32 = vmax.f32 %v1205_v0, %v1206_v24  ;;  %v1214_v44 = vmax.f32 %v1212_v56, %v1213_v15  ;;  %v5584_v49 = vld [vmem:[#allocation4_spill] sm:$0xff]  ;;  %v5587_v24 = vld [vmem:[#allocation226_spill] sm:$0xff] }
 0x1c5   :  { %v1261_v3 = vsel %vm392_vm0, %v5580_v54, -inf  ;;  %v1255_v8 = vrot.slane %v1254_v52, 4  ;;  %v1221_v51 = vmax.f32 %v1219_v17, %v1220_v20  ;;  %v1228_v22 = vmax.f32 %v1226_v40, %v1227_v5  ;;  %v5588_v17 = vld [vmem:[#allocation227_spill] sm:$0xff] }
 0x1c6   :  { %v1262_v6 = vrot.slane %v1261_v3, 4  ;;  %v5583_v4 = vmax.f32 %v5581_v27, %v5582_v63  ;;  %v5586_v33 = vmax.f32 %v5584_v49, %v5585_v55  ;;  %v1187_v29 = vrot.slane %v1186_v25, 2 }
 0x1c7   :  { %v1194_v12 = vrot.slane %v1193_v30, 2  ;;  %v1235_v13 = vmax.f32 %v1233_v57, %v1234_v41  ;;  %v1242_v37 = vmax.f32 %v1240_v9, %v1241_v2  ;;  %v1249_v0 = vmax.f32 %v1247_v21, %v1248_v47 }
 0x1c8   :  { %v1268_v60 = vsel %vm392_vm0, %v5583_v4, -inf  ;;  %v1275_v54 = vsel %vm392_vm0, %v5586_v33, -inf  ;;  %v5589_v40 = vmax.f32 %v5587_v24, %v5588_v17  ;;  %v1201_v63 = vrot.slane %v1200_v36, 2 }
 0x1c9   :  { %v1269_v56 = vrot.slane %v1268_v60, 4  ;;  %v1276_v42 = vrot.slane %v1275_v54, 4  ;;  %v1208_v27 = vrot.slane %v1207_v32, 2  ;;  %v1256_v20 = vmax.f32 %v1254_v52, %v1255_v8 }
 0x1ca   :  { %v1282_v15 = vsel %vm392_vm0, %v5589_v40, -inf  ;;  %v1263_v5 = vmax.f32 %v1261_v3, %v1262_v6  ;;  %v1215_v4 = vrot.slane %v1214_v44, 2  ;;  %v1222_v55 = vrot.slane %v1221_v51, 2 }
 0x1cb   :  { %v1229_v49 = vrot.slane %v1228_v22, 2  ;;  %v1283_v33 = vrot.slane %v1282_v15, 4  ;;  %v3981_v38 = vmax.f32 %v1174_v16, %v1175_v62  ;;  %v1236_v57 = vrot.slane %v1235_v13, 2 }
 0x1cc   :  { %v1243_v2 = vrot.slane %v1242_v37, 2  ;;  %v1270_v9 = vmax.f32 %v1268_v60, %v1269_v56  ;;  %v1188_v21 = vmax.f32 %v1186_v25, %v1187_v29  ;;  %v1195_v41 = vmax.f32 %v1193_v30, %v1194_v12 }
 0x1cd   :  { %5590 = vst [vmem:[#allocation110_spill] sm:$0xff] %v3981_v38  ;;  %v1250_v47 = vrot.slane %v1249_v0, 2  ;;  %v1277_v28 = vmax.f32 %v1275_v54, %v1276_v42  ;;  %v1202_v24 = vmax.f32 %v1200_v36, %v1201_v63  ;;  %v1257_v17 = vrot.slane %v1256_v20, 2 }
 0x1ce   :  { %v1264_v40 = vrot.slane %v1263_v5, 2  ;;  %v1284_v34 = vmax.f32 %v1282_v15, %v1283_v33  ;;  %v1209_v53 = vmax.f32 %v1207_v32, %v1208_v27  ;;  %v1216_v52 = vmax.f32 %v1214_v44, %v1215_v4 }
 0x1cf   :  { %v1223_v3 = vmax.f32 %v1221_v51, %v1222_v55  ;;  %v1230_v6 = vmax.f32 %v1228_v22, %v1229_v49  ;;  %v1182_v8 = vrot.slane %v1181_v58, 1  ;;  %v1237_v1 = vmax.f32 %v1235_v13, %v1236_v57 }
 0x1d0   :  { %v1244_v10 = vmax.f32 %v1242_v37, %v1243_v2  ;;  %v1271_v16 = vrot.slane %v1270_v9, 2  ;;  %v1189_v62 = vrot.slane %v1188_v21, 1  ;;  %v1196_v38 = vrot.slane %v1195_v41, 1 }
 0x1d1   :  { %v1251_v14 = vmax.f32 %v1249_v0, %v1250_v47  ;;  %v1278_v60 = vrot.slane %v1277_v28, 2  ;;  %v1203_v25 = vrot.slane %v1202_v24, 1  ;;  %v1258_v30 = vmax.f32 %v1256_v20, %v1257_v17  ;;  %v5596_v17 = vld [vmem:[#allocation8_spill] sm:$0xff] }
 0x1d2   :  { %v1265_v29 = vmax.f32 %v1263_v5, %v1264_v40  ;;  %v1285_v54 = vrot.slane %v1284_v34, 2  ;;  %v1210_v36 = vrot.slane %v1209_v53, 1  ;;  %v1217_v12 = vrot.slane %v1216_v52, 1  ;;  %v5597_v40 = vld [vmem:[#allocation2_spill] sm:$0xff] }
 0x1d3   :  { %v1224_v56 = vrot.slane %v1223_v3, 1  ;;  %v1231_v42 = vrot.slane %v1230_v6, 1  ;;  %v3983_v32 = vmax.f32 %v1181_v58, %v1182_v8  ;;  %v1238_v51 = vrot.slane %v1237_v1, 1  ;;  %v5633_v8 = vld [vmem:[#allocation44_spill] sm:$0xff] }
 0x1d4   :  { %v1245_v22 = vrot.slane %v1244_v10, 1  ;;  %v1272_v44 = vmax.f32 %v1270_v9, %v1271_v16  ;;  %v3985_v13 = vmax.f32 %v1188_v21, %v1189_v62  ;;  %v3987_v37 = vmax.f32 %v1195_v41, %v1196_v38  ;;  %v5727_v21 = vld [vmem:[#allocation37_spill] sm:$0xff] }
 0x1d5   :  { %v1252_v15 = vrot.slane %v1251_v14, 1  ;;  %v1279_v0 = vmax.f32 %v1277_v28, %v1278_v60  ;;  %v3989_v63 = vmax.f32 %v1202_v24, %v1203_v25  ;;  %v1259_v27 = vrot.slane %v1258_v30, 1  ;;  %v5602_v60 = vld [vmem:[#allocation12_spill] sm:$0xff] }
 0x1d6   :  { %v1266_v20 = vrot.slane %v1265_v29, 1  ;;  %v1286_v5 = vmax.f32 %v1284_v34, %v1285_v54  ;;  %v3991_v4 = vmax.f32 %v1209_v53, %v1210_v36  ;;  %v3993_v55 = vmax.f32 %v1216_v52, %v1217_v12  ;;  %v5593_v53 = vld [vmem:[#allocation5_spill] sm:$0xff]  ;;  %v5598_v52 = vld [vmem:[#allocation10_spill] sm:$0xff]  ;;  %v5603_v54 = vld [vmem:[#allocation16_spill] sm:$0xff] }
 0x1d7   :  { %v3995_v58 = vmax.f32 %v1223_v3, %v1224_v56  ;;  %v3997_v49 = vmax.f32 %v1230_v6, %v1231_v42  ;;  %v3999_v33 = vmax.f32 %v1237_v1, %v1238_v51  ;;  %v4001_v57 = vmax.f32 %v1244_v10, %v1245_v22  ;;  %v5604_v36 = vld [vmem:[#allocation13_spill] sm:$0xff]  ;;  %v5607_v51 = vld [vmem:[#allocation14_spill] sm:$0xff]  ;;  %v5612_v3 = vld [vmem:[#allocation20_spill] sm:$0xff] }
 0x1d8   :  { %v1273_v38 = vrot.slane %v1272_v44, 1  ;;  %v4004_v2 = vmax.f32 %v1251_v14, %v1252_v15  ;;  %v1280_v9 = vrot.slane %v1279_v0, 1  ;;  %v4008_v41 = vmax.f32 %v1258_v30, %v1259_v27  ;;  %v5606_v56 = vld [vmem:[#allocation17_spill] sm:$0xff]  ;;  %v5613_v1 = vld [vmem:[#allocation22_spill] sm:$0xff]  ;;  %v5616_v25 = vld [vmem:[#allocation24_spill] sm:$0xff] }
 0x1d9   :  { %5591 = vst [vmem:[#allocation114_spill] sm:$0xff] %v3995_v58  ;;  %v4010_v47 = vmax.f32 %v1265_v29, %v1266_v20  ;;  %v1287_v24 = vrot.slane %v1286_v5, 1  ;;  %v5614_v30 = vld [vmem:[#allocation21_spill] sm:$0xff]  ;;  %v5628_v28 = vld [vmem:[#allocation36_spill] sm:$0xff]  ;;  %v5632_v14 = vld [vmem:[#allocation43_spill] sm:$0xff]  ;;  %v5676_v16 = vmax.f32 %v3311_v46, 0.0 }
 0x1da   :  { %5592 = vst [vmem:[#allocation111_spill] sm:$0xff] %v3997_v49  ;;  %v4017_v62 = vmax.f32 %v1272_v44, %v1273_v38  ;;  %v4022_v12 = vmax.f32 %v1279_v0, %v1280_v9  ;;  %v5615_v0 = vld [vmem:[#allocation23_spill] sm:$0xff]  ;;  %v5621_v49 = vld [vmem:[#allocation32_spill] sm:$0xff]  ;;  %v5623_v58 = vld [vmem:[#allocation33_spill] sm:$0xff]  ;;  %v5677_v38 = vmax.f32 %v3313_v18, 0.0  ;;  %v5680_v42 = vmax.f32 %v5602_v60, 0.0 }
 0x1db   :  { %5594 = vst [vmem:[#allocation115_spill] sm:$0xff] %v4008_v41  ;;  %v4027_v20 = vmax.f32 %v1286_v5, %v1287_v24  ;;  %v5624_v44 = vld [vmem:[#allocation30_spill] sm:$0xff]  ;;  %v5641_v6 = vld [vmem:[#allocation52_spill] sm:$0xff]  ;;  %v5681_v22 = vmax.f32 %v5603_v54, 0.0  ;;  %v5682_v15 = vmax.f32 %v5612_v3, 0.0  ;;  %v5683_v34 = vmax.f32 %v5613_v1, 0.0 }
 0x1dc   :  { %5595 = vst [vmem:[#allocation116_spill] sm:$0xff] %v4010_v47  ;;  %v5629_v5 = vld [vmem:[#allocation38_spill] sm:$0xff]  ;;  %v5642_v47 = vld [vmem:[#allocation57_spill] sm:$0xff]  ;;  %v1546_v10 = vsel %vm1545_vm1, %v5677_v38, %v5676_v16  ;;  %v5685_v16 = vld [vmem:[#allocation95_spill] sm:$0xff]  ;;  %v5688_v60 = vmax.f32 %v5621_v49, 0.0  ;;  %v5691_v1 = vmax.f32 %v5593_v53, 0.0 }
 0x1dd   :  { %5601 = vst [vmem:[#allocation117_spill] sm:$0xff] %v4017_v62  ;;  %v5634_v62 = vld [vmem:[#allocation48_spill] sm:$0xff]  ;;  %v1559_v41 = vsel %vm1545_vm1, %v5681_v22, %v5680_v42  ;;  %v1566_v46 = vsel %vm1545_vm1, %v5683_v34, %v5682_v15  ;;  %v5684_v18 = vld [vmem:[#allocation98_spill] sm:$0xff]  ;;  %v5692_v15 = vld [vmem:[#allocation101_spill] sm:$0xff]  ;;  %v5694_v29 = vmax.f32 %v5604_v36, 0.0  ;;  %v5695_v49 = vmax.f32 %v5614_v30, 0.0 }
 0x1de   :  { %5605 = vst [vmem:[#allocation118_spill] sm:$0xff] %v4022_v12  ;;  %v5622_v12 = vld [vmem:[#allocation29_spill] sm:$0xff]  ;;  %v1548_v34 = vsel %vm1547_vm2, %v5691_v1, %v1546_v10  ;;  %v5697_v3 = vld [vmem:[#allocation106_spill] sm:$0xff]  ;;  %v5700_v24 = vld [vmem:[#allocation107_spill] sm:$0xff]  ;;  %v5705_v22 = vmax.f32 %v5606_v56, 0.0  ;;  %v1401_v36 = vmax.f32 %v3983_v32, 0.0 }
 0x1df   :  { %5609 = vst [vmem:[#allocation120_spill] sm:$0xff] %v4027_v20  ;;  %v5620_v20 = vld [vmem:[#allocation28_spill] sm:$0xff]  ;;  %v5698_v53 = vld [vmem:[#allocation105_spill] sm:$0xff]  ;;  %v5699_v10 = vmax.f32 %v5622_v12, 0.0  ;;  %v5706_v12 = vmax.f32 %v5615_v0, 0.0  ;;  %v5710_v42 = vmax.f32 %v5628_v28, 0.0 }
 0x1e0   :  { %v5687_v9 = vmax.f32 %v5620_v20, 0.0  ;;  %v1560_v20 = vsel %vm1547_vm2, %v5694_v29, %v1559_v41  ;;  %v5701_v38 = vld [vmem:[#allocation108_spill] sm:$0xff]  ;;  %v5702_v41 = vmax.f32 %v5596_v17, 0.0  ;;  %v5708_v17 = vmax.f32 %v5623_v58, 0.0 }
 0x1e1   :  { %v5703_v29 = vld [vmem:[#allocation112_spill] sm:$0xff]  ;;  %v1561_v27 = vsel %vm1549_vm3, %v5705_v22, %v1560_v20  ;;  %v1402_v22 = vmax.f32 %v3985_v13, 0.0  ;;  %v1403_v0 = vmax.f32 %v3987_v37, 0.0  ;;  %v5711_v20 = vmax.f32 %v5597_v40, 0.0 }
 0x1e2   :  { %v1573_v54 = vsel %vm1545_vm1, %v5688_v60, %v5687_v9  ;;  %v1567_v9 = vsel %vm1547_vm2, %v5695_v49, %v1566_v46  ;;  %v5696_v60 = vld [vmem:[#allocation104_spill] sm:$0xff]  ;;  %v1550_v30 = vsel %vm1549_vm3, %v5702_v41, %v1548_v34  ;;  %v1397_v46 = vmax.f32 %v5703_v29, 0.0  ;;  %v5704_v49 = vld [vmem:[#allocation109_spill] sm:$0xff] }
 0x1e3   :  { %v1574_v1 = vsel %vm1547_vm2, %v5699_v10, %v1573_v54  ;;  %v1568_v54 = vsel %vm1549_vm3, %v5706_v12, %v1567_v9  ;;  %v5707_v10 = vld [vmem:[#allocation113_spill] sm:$0xff]  ;;  %v5709_v41 = vmax.f32 %v3499_v50, 0.0  ;;  %v1552_v9 = vsel %vm1551_vm4, %v5711_v20, %v1550_v30 }
 0x1e4   :  { %v1575_v34 = vsel %vm1549_vm3, %v5708_v17, %v1574_v1  ;;  %v1404_v32 = vmax.f32 %v3989_v63, 0.0  ;;  %v1405_v58 = vmax.f32 %v3991_v4, 0.0  ;;  %v5712_v1 = vmax.f32 %v5607_v51, 0.0  ;;  %v5828_v63 = vld [vmem:[#allocation41_spill] sm:$0xff] }
 0x1e5   :  { %v1580_v56 = vsel %vm1545_vm1, %v5710_v42, %v5709_v41  ;;  %v5713_v28 = vmax.f32 %v5616_v25, 0.0  ;;  %v1406_v13 = vmax.f32 %v3993_v55, 0.0  ;;  %v1409_v12 = vmax.f32 %v3999_v33, 0.0 }
 0x1e6   :  { %v1562_v50 = vsel %vm1551_vm4, %v5712_v1, %v1561_v27  ;;  %v5714_v40 = vmax.f32 %v5624_v44, 0.0  ;;  %v5715_v17 = vmax.f32 %v5629_v5, 0.0  ;;  %v1410_v51 = vmax.f32 %v4001_v57, 0.0  ;;  %v5720_v5 = vld [vmem:[#allocation18_spill] sm:$0xff] }
 0x1e7   :  { %v1569_v42 = vsel %vm1551_vm4, %v5713_v28, %v1568_v54  ;;  %v5716_v27 = vmax.f32 %v5598_v52, 0.0  ;;  %v5717_v54 = vmax.f32 %v5632_v14, 0.0  ;;  %v5718_v20 = vmax.f32 %v5633_v8, 0.0  ;;  %v5722_v57 = vld [vmem:[#allocation26_spill] sm:$0xff] }
 0x1e8   :  { %v1576_v30 = vsel %vm1551_vm4, %v5714_v40, %v1575_v34  ;;  %v1581_v41 = vsel %vm1547_vm2, %v5715_v17, %v1580_v56  ;;  %v1411_v44 = vmax.f32 %v4004_v2, 0.0  ;;  %v5719_v34 = vld [vmem:[#allocation115_spill] sm:$0xff]  ;;  %v5721_v28 = vmax.f32 %v5720_v5, 0.0 }
 0x1e9   :  { %v1554_v25 = vsel %vm1553_vm5, %v5716_v27, %v1552_v9  ;;  %v1587_v33 = vsel %vm1545_vm1, %v5718_v20, %v5717_v54  ;;  %v1412_v1 = vmax.f32 %v5719_v34, 0.0  ;;  %v5723_v40 = vmax.f32 %v5722_v57, 0.0  ;;  %v5724_v9 = vld [vmem:[#allocation116_spill] sm:$0xff]  ;;  %v5725_v27 = vld [vmem:[#allocation34_spill] sm:$0xff] }
 0x1ea   :  { %v1563_v56 = vsel %vm1553_vm5, %v5721_v28, %v1562_v50  ;;  %v1413_v17 = vmax.f32 %v5724_v9, 0.0  ;;  %v5726_v14 = vmax.f32 %v5725_v27, 0.0  ;;  %v5728_v54 = vmax.f32 %v5727_v21, 0.0  ;;  %v5731_v28 = vld [vmem:[#allocation9_spill] sm:$0xff] }
 0x1eb   :  { %v1570_v52 = vsel %vm1553_vm5, %v5723_v40, %v1569_v42  ;;  %v5729_v20 = vmax.f32 %v5640_v31, 0.0  ;;  %v5730_v5 = vmax.f32 %v5641_v6, 0.0  ;;  %v5732_v57 = vmax.f32 %v5731_v28, 0.0  ;;  %v5736_v31 = vld [vmem:[#allocation117_spill] sm:$0xff]  ;;  %v5737_v6 = vld [vmem:[#allocation15_spill] sm:$0xff] }
 0x1ec   :  { %v1577_v8 = vsel %vm1553_vm5, %v5726_v14, %v1576_v30  ;;  %v1582_v2 = vsel %vm1549_vm3, %v5728_v54, %v1581_v41  ;;  %v5733_v40 = vmax.f32 %v5634_v62, 0.0  ;;  %v5734_v30 = vmax.f32 %v5642_v47, 0.0  ;;  %v5752_v14 = vld [vmem:[#allocation11_spill] sm:$0xff] }
 0x1ed   :  { %v1594_v50 = vsel %vm1545_vm1, %v5730_v5, %v5729_v20  ;;  %v1556_v42 = vsel %vm1555_vm6, %v5732_v57, %v1554_v25  ;;  %v5735_v21 = vmax.f32 %v5643_v7, 0.0  ;;  %v5738_v54 = vmax.f32 %v5737_v6, 0.0  ;;  %v5739_v5 = vld [vmem:[#allocation25_spill] sm:$0xff]  ;;  %v5743_v57 = vld [vmem:[#allocation31_spill] sm:$0xff] }
 0x1ee   :  { %v1588_v27 = vsel %vm1547_vm2, %v5733_v40, %v1587_v33  ;;  %v5740_v28 = vmax.f32 %v5739_v5, 0.0  ;;  %v5741_v62 = vmax.f32 %v5650_v19, 0.0  ;;  %v5742_v33 = vmax.f32 %v3701_v23, 0.0  ;;  %v5748_v5 = vld [vmem:[#allocation74_spill] sm:$0xff] }
 0x1ef   :  { %v1601_v41 = vsel %vm1545_vm1, %v5735_v21, %v5734_v30  ;;  %v1564_v20 = vsel %vm1555_vm6, %v5738_v54, %v1563_v56  ;;  %v5744_v7 = vmax.f32 %v5743_v57, 0.0  ;;  %v5745_v30 = vld [vmem:[#allocation39_spill] sm:$0xff]  ;;  %v5747_v56 = vmax.f32 %v3607_v26, 0.0  ;;  %v5754_v57 = vld [vmem:[#allocation45_spill] sm:$0xff] }
 0x1f0   :  { %v1571_v25 = vsel %vm1555_vm6, %v5740_v28, %v1570_v52  ;;  %v1608_v47 = vsel %vm1545_vm1, %v5742_v33, %v5741_v62  ;;  %v5746_v21 = vmax.f32 %v5745_v30, 0.0  ;;  %v5749_v52 = vmax.f32 %v5748_v5, 0.0  ;;  %v5750_v28 = vld [vmem:[#allocation73_spill] sm:$0xff]  ;;  %v5756_v30 = vld [vmem:[#allocation60_spill] sm:$0xff] }
 0x1f1   :  { %v1578_v40 = vsel %vm1555_vm6, %v5744_v7, %v1577_v8  ;;  %v1595_v54 = vsel %vm1547_vm2, %v5747_v56, %v1594_v50  ;;  %v5751_v19 = vmax.f32 %v5750_v28, 0.0  ;;  %v5753_v62 = vmax.f32 %v5752_v14, 0.0  ;;  %v5761_v28 = vld [vmem:[#allocation19_spill] sm:$0xff] }
 0x1f2   :  { %v1583_v6 = vsel %vm1551_vm4, %v5746_v21, %v1582_v2  ;;  %v5755_v8 = vmax.f32 %v5754_v57, 0.0  ;;  %v5757_v2 = vmax.f32 %v5756_v30, 0.0  ;;  %v5758_v21 = vld [vmem:[#allocation82_spill] sm:$0xff]  ;;  %v5760_v56 = vmax.f32 %v5663_v39, 0.0  ;;  %v5765_v57 = vld [vmem:[#allocation67_spill] sm:$0xff] }
 0x1f3   :  { %v1615_v23 = vsel %vm1545_vm1, %v5751_v19, %v5749_v52  ;;  %v1558_v33 = vsel %vm1557_vm7, %v5753_v62, %v1556_v42  ;;  %v5759_v50 = vmax.f32 %v5758_v21, 0.0  ;;  %v5762_v52 = vmax.f32 %v5761_v28, 0.0  ;;  %v5763_v19 = vld [vmem:[#allocation27_spill] sm:$0xff] }
 0x1f4   :  { %v1589_v7 = vsel %vm1549_vm3, %v5755_v8, %v1588_v27  ;;  %v1602_v26 = vsel %vm1547_vm2, %v5757_v2, %v1601_v41  ;;  %v5764_v42 = vmax.f32 %v5763_v19, 0.0  ;;  %v5766_v27 = vmax.f32 %v5765_v57, 0.0  ;;  %v5769_v2 = vld [vmem:[#allocation35_spill] sm:$0xff]  ;;  %v5777_v57 = vld [vmem:[#allocation49_spill] sm:$0xff]  ;;  %1681 = vst.msk [vmem:[%s4556_s1] sm:$0xff] %vm1680_vm8, %v1558_v33 }
 0x1f5   :  { %v1622_v5 = vsel %vm1545_vm1, %v5760_v56, %v5759_v50  ;;  %v1565_v14 = vsel %vm1557_vm7, %v5762_v52, %v1564_v20  ;;  %v5767_v41 = vmax.f32 %v5670_v59, 0.0  ;;  %v5768_v30 = vmax.f32 %v5671_v11, 0.0  ;;  %v5771_v56 = vld [vmem:[#allocation40_spill] sm:$0xff]  ;;  %v5773_v52 = vld [vmem:[#allocation54_spill] sm:$0xff] }
 0x1f6   :  { %v1572_v62 = vsel %vm1557_vm7, %v5764_v42, %v1571_v25  ;;  %v1609_v8 = vsel %vm1547_vm2, %v5766_v27, %v1608_v47  ;;  %v5770_v21 = vmax.f32 %v5769_v2, 0.0  ;;  %v5772_v20 = vmax.f32 %v5771_v56, 0.0  ;;  %v5775_v42 = vld [vmem:[#allocation75_spill] sm:$0xff]  ;;  %1682 = vst.msk [vmem:[%s4556_s1 + $0x8] sm:$0xff] %vm1680_vm8, %v1565_v14 }
 0x1f7   :  { %v1629_v39 = vsel %vm1545_vm1, %v5768_v30, %v5767_v41  ;;  %v5774_v25 = vmax.f32 %v5773_v52, 0.0  ;;  %v5776_v47 = vmax.f32 %v5775_v42, 0.0  ;;  %v5778_v11 = vmax.f32 %v5777_v57, 0.0  ;;  %v5779_v41 = vld [vmem:[#allocation64_spill] sm:$0xff]  ;;  %v5781_v2 = vld [vmem:[#allocation83_spill] sm:$0xff]  ;;  %v5790_v57 = vld [vmem:[#allocation53_spill] sm:$0xff] }
 0x1f8   :  { %v1579_v50 = vsel %vm1557_vm7, %v5770_v21, %v1578_v40  ;;  %v1584_v28 = vsel %vm1553_vm5, %v5772_v20, %v1583_v6  ;;  %v5780_v30 = vmax.f32 %v5779_v41, 0.0  ;;  %v5782_v21 = vmax.f32 %v5781_v2, 0.0  ;;  %v5785_v52 = vld [vmem:[#allocation68_spill] sm:$0xff]  ;;  %v5795_v2 = vld [vmem:[#allocation46_spill] sm:$0xff]  ;;  %1683 = vst.msk [vmem:[%s4556_s1 + $0x10] sm:$0xff] %vm1680_vm8, %v1572_v62 }
 0x1f9   :  { %v1596_v19 = vsel %vm1549_vm3, %v5774_v25, %v1595_v54  ;;  %v1616_v59 = vsel %vm1547_vm2, %v5776_v47, %v1615_v23  ;;  %v1590_v27 = vsel %vm1551_vm4, %v5778_v11, %v1589_v7  ;;  %v5783_v56 = vmax.f32 %v5684_v18, 0.0  ;;  %v5792_v41 = vld [vmem:[#allocation76_spill] sm:$0xff]  ;;  %1684 = vst.msk [vmem:[%s4556_s1 + $0x18] sm:$0xff] %vm1680_vm8, %v1579_v50 }
 0x1fa   :  { %v1603_v40 = vsel %vm1549_vm3, %v5780_v30, %v1602_v26  ;;  %v1623_v6 = vsel %vm1547_vm2, %v5782_v21, %v1622_v5  ;;  %v5784_v54 = vmax.f32 %v5685_v16, 0.0  ;;  %v5786_v23 = vmax.f32 %v5785_v52, 0.0 }
 0x1fb   :  { %v5787_v7 = vmax.f32 %v5672_v35, 0.0  ;;  %v5788_v26 = vmax.f32 %v5697_v3, 0.0  ;;  %v5789_v47 = vmax.f32 %v5698_v53, 0.0  ;;  %v1650_v18 = vsel %vm1545_vm1, %v1402_v22, %v1401_v36 }
 0x1fc   :  { %v1636_v20 = vsel %vm1545_vm1, %v5784_v54, %v5783_v56  ;;  %v1610_v25 = vsel %vm1549_vm3, %v5786_v23, %v1609_v8  ;;  %v5791_v16 = vmax.f32 %v5790_v57, 0.0  ;;  %v5793_v30 = vmax.f32 %v5792_v41, 0.0  ;;  %v5797_v56 = vld [vmem:[#allocation61_spill] sm:$0xff]  ;;  %v5799_v54 = vld [vmem:[#allocation84_spill] sm:$0xff]  ;;  %v5802_v23 = vld [vmem:[#allocation42_spill] sm:$0xff] }
 0x1fd   :  { %v1630_v42 = vsel %vm1547_vm2, %v5787_v7, %v1629_v39  ;;  %v1643_v5 = vsel %vm1545_vm1, %v5789_v47, %v5788_v26  ;;  %v5794_v35 = vmax.f32 %v5686_v45, 0.0  ;;  %v1657_v3 = vsel %vm1545_vm1, %v1410_v51, %v1409_v12  ;;  %v5804_v51 = vld [vmem:[#allocation70_spill] sm:$0xff]  ;;  %v5807_v47 = vld [vmem:[#allocation55_spill] sm:$0xff]  ;;  %v5809_v57 = vld [vmem:[#allocation80_spill] sm:$0xff] }
 0x1fe   :  { %v1597_v11 = vsel %vm1551_vm4, %v5791_v16, %v1596_v19  ;;  %v1617_v8 = vsel %vm1549_vm3, %v5793_v30, %v1616_v59  ;;  %v5796_v53 = vmax.f32 %v5795_v2, 0.0  ;;  %v5798_v36 = vmax.f32 %v5797_v56, 0.0  ;;  %v5812_v30 = vld [vmem:[#allocation50_spill] sm:$0xff] }
 0x1ff   :  { %v1637_v39 = vsel %vm1547_vm2, %v5794_v35, %v1636_v20  ;;  %v5800_v19 = vmax.f32 %v5799_v54, 0.0  ;;  %v5801_v59 = vmax.f32 %v5700_v24, 0.0  ;;  %v5803_v20 = vmax.f32 %v5802_v23, 0.0  ;;  %v5814_v35 = vld [vmem:[#allocation65_spill] sm:$0xff] }
 0x200   :  { %v1591_v21 = vsel %vm1553_vm5, %v5796_v53, %v1590_v27  ;;  %v1604_v22 = vsel %vm1551_vm4, %v5798_v36, %v1603_v40  ;;  %v5805_v7 = vmax.f32 %v5804_v51, 0.0  ;;  %v5806_v26 = vmax.f32 %v5673_v48, 0.0  ;;  %v5818_v53 = vld [vmem:[#allocation69_spill] sm:$0xff] }
 0x201   :  { %v1624_v52 = vsel %vm1549_vm3, %v5800_v19, %v1623_v6  ;;  %v1644_v45 = vsel %vm1547_vm2, %v5801_v59, %v1643_v5  ;;  %v1585_v12 = vsel %vm1555_vm6, %v5803_v20, %v1584_v28  ;;  %v1651_v6 = vsel %vm1547_vm2, %v1403_v0, %v1650_v18  ;;  %v5826_v59 = vld [vmem:[#allocation102_spill] sm:$0xff] }
 0x202   :  { %v1611_v27 = vsel %vm1551_vm4, %v5805_v7, %v1610_v25  ;;  %v1631_v40 = vsel %vm1549_vm3, %v5806_v26, %v1630_v42  ;;  %v5808_v24 = vmax.f32 %v5807_v47, 0.0  ;;  %v5810_v16 = vmax.f32 %v5809_v57, 0.0  ;;  %v5830_v7 = vld [vmem:[#allocation62_spill] sm:$0xff] }
 0x203   :  { %v5811_v41 = vmax.f32 %v5689_v61, 0.0  ;;  %v1658_v48 = vsel %vm1547_vm2, %v1411_v44, %v1657_v3  ;;  %v5813_v42 = vmax.f32 %v5812_v30, 0.0  ;;  %v5815_v0 = vmax.f32 %v5814_v35, 0.0  ;;  %v5820_v3 = vld [vmem:[#allocation96_spill] sm:$0xff] }
 0x204   :  { %v1598_v5 = vsel %vm1553_vm5, %v5808_v24, %v1597_v11  ;;  %v1618_v28 = vsel %vm1551_vm4, %v5810_v16, %v1617_v8  ;;  %v5816_v11 = vmax.f32 %v5666_v43, 0.0  ;;  %v5817_v8 = vmax.f32 %v5701_v38, 0.0  ;;  %v5822_v43 = vld [vmem:[#allocation56_spill] sm:$0xff]  ;;  %v5824_v38 = vld [vmem:[#allocation77_spill] sm:$0xff]  ;;  %v5836_v24 = vld [vmem:[#allocation71_spill] sm:$0xff] }
 0x205   :  { %v1638_v25 = vsel %vm1549_vm3, %v5811_v41, %v1637_v39  ;;  %v1592_v37 = vsel %vm1555_vm6, %v5813_v42, %v1591_v21  ;;  %v1605_v18 = vsel %vm1553_vm5, %v5815_v0, %v1604_v22  ;;  %v5819_v39 = vmax.f32 %v5818_v53, 0.0  ;;  %v5838_v16 = vld [vmem:[#allocation93_spill] sm:$0xff]  ;;  %v5846_v0 = vld [vmem:[#allocation66_spill] sm:$0xff]  ;;  %v5852_v53 = vld [vmem:[#allocation72_spill] sm:$0xff] }
 0x206   :  { %v1625_v2 = vsel %vm1551_vm4, %v5816_v11, %v1624_v52  ;;  %v1645_v61 = vsel %vm1549_vm3, %v5817_v8, %v1644_v45  ;;  %v5821_v56 = vmax.f32 %v5820_v3, 0.0  ;;  %v1652_v36 = vsel %vm1549_vm3, %v1404_v32, %v1651_v6  ;;  %v5854_v3 = vld [vmem:[#allocation97_spill] sm:$0xff] }
 0x207   :  { %v1612_v44 = vsel %vm1553_vm5, %v5819_v39, %v1611_v27  ;;  %v5823_v22 = vmax.f32 %v5822_v43, 0.0  ;;  %v5825_v19 = vmax.f32 %v5824_v38, 0.0  ;;  %v5827_v45 = vmax.f32 %v5826_v59, 0.0 }
 0x208   :  { %v1632_v21 = vsel %vm1551_vm4, %v5821_v56, %v1631_v40  ;;  %v1659_v20 = vsel %vm1549_vm3, %v1412_v1, %v1658_v48  ;;  %v5829_v32 = vmax.f32 %v5828_v63, 0.0  ;;  %v5831_v27 = vmax.f32 %v5830_v7, 0.0  ;;  %v5832_v40 = vld [vmem:[#allocation85_spill] sm:$0xff]  ;;  %v5834_v1 = vld [vmem:[#allocation47_spill] sm:$0xff] }
 0x209   :  { %v1599_v54 = vsel %vm1555_vm6, %v5823_v22, %v1598_v5  ;;  %v1619_v52 = vsel %vm1553_vm5, %v5825_v19, %v1618_v28  ;;  %v1639_v23 = vsel %vm1551_vm4, %v5827_v45, %v1638_v25  ;;  %v5833_v6 = vmax.f32 %v5832_v40, 0.0  ;;  %v5842_v48 = vld [vmem:[#allocation81_spill] sm:$0xff]  ;;  %v5857_v22 = vld [vmem:[#allocation78_spill] sm:$0xff]  ;;  %v5859_v19 = vld [vmem:[#allocation103_spill] sm:$0xff] }
 0x20a   :  { %v1586_v51 = vsel %vm1557_vm7, %v5829_v32, %v1585_v12  ;;  %v1606_v26 = vsel %vm1555_vm6, %v5831_v27, %v1605_v18  ;;  %v1646_v34 = vsel %vm1551_vm4, %v1397_v46, %v1645_v61  ;;  %v5835_v33 = vmax.f32 %v5834_v1, 0.0  ;;  %v5840_v46 = vld [vmem:[#allocation58_spill] sm:$0xff] }
 0x20b   :  { %v1626_v47 = vsel %vm1553_vm5, %v5833_v6, %v1625_v2  ;;  %v5837_v5 = vmax.f32 %v5836_v24, 0.0  ;;  %v5839_v28 = vmax.f32 %v5838_v16, 0.0  ;;  %v1653_v29 = vsel %vm1551_vm4, %v1405_v58, %v1652_v36  ;;  %v5845_v58 = vld [vmem:[#allocation114_spill] sm:$0xff]  ;;  %v5848_v2 = vld [vmem:[#allocation87_spill] sm:$0xff]  ;;  %1685 = vst.msk [vmem:[%s4556_s1 + $0x20] sm:$0xff] %vm1680_vm8, %v1586_v51 }
 0x20c   :  { %v1593_v12 = vsel %vm1557_vm7, %v5835_v33, %v1592_v37  ;;  %v5841_v14 = vmax.f32 %v5840_v46, 0.0  ;;  %v5843_v30 = vmax.f32 %v5842_v48, 0.0  ;;  %v5844_v37 = vmax.f32 %v5692_v15, 0.0  ;;  %v5856_v36 = vld [vmem:[#allocation110_spill] sm:$0xff] }
 0x20d   :  { %v1613_v57 = vsel %vm1555_vm6, %v5837_v5, %v1612_v44  ;;  %v1633_v41 = vsel %vm1553_vm5, %v5839_v28, %v1632_v21  ;;  %v1660_v4 = vsel %vm1551_vm4, %v1413_v17, %v1659_v20  ;;  %v1407_v62 = vmax.f32 %v5845_v58, 0.0  ;;  %v5851_v17 = vld [vmem:[#allocation118_spill] sm:$0xff]  ;;  %1686 = vst.msk [vmem:[%s4556_s1 + $0x28] sm:$0xff] %vm1680_vm8, %v1593_v12  ;;  %v5863_v20 = vld [vmem:[#allocation88_spill] sm:$0xff] }
 0x20e   :  { %v1600_v25 = vsel %vm1557_vm7, %v5841_v14, %v1599_v54  ;;  %v1620_v42 = vsel %vm1555_vm6, %v5843_v30, %v1619_v52  ;;  %v1640_v35 = vsel %vm1553_vm5, %v5844_v37, %v1639_v23  ;;  %v5847_v18 = vmax.f32 %v5846_v0, 0.0 }
 0x20f   :  { %v5849_v8 = vmax.f32 %v5848_v2, 0.0  ;;  %v5850_v61 = vmax.f32 %v5704_v49, 0.0  ;;  %v1415_v50 = vmax.f32 %v5851_v17, 0.0  ;;  %v5853_v39 = vmax.f32 %v5852_v53, 0.0  ;;  %1687 = vst.msk [vmem:[%s4556_s1 + $0x30] sm:$0xff] %vm1680_vm8, %v1600_v25 }
 0x210   :  { %v1607_v11 = vsel %vm1557_vm7, %v5847_v18, %v1606_v26  ;;  %v5855_v56 = vmax.f32 %v5854_v3, 0.0  ;;  %v1654_v49 = vsel %vm1553_vm5, %v1406_v13, %v1653_v29  ;;  %v1400_v43 = vmax.f32 %v5856_v36, 0.0  ;;  %v5862_v13 = vld [vmem:[#allocation111_spill] sm:$0xff]  ;;  %v5867_v26 = vld [vmem:[#allocation94_spill] sm:$0xff] }
 0x211   :  { %v1627_v15 = vsel %vm1555_vm6, %v5849_v8, %v1626_v47  ;;  %v1647_v9 = vsel %vm1553_vm5, %v5850_v61, %v1646_v34  ;;  %v1614_v44 = vsel %vm1557_vm7, %v5853_v39, %v1613_v57  ;;  %v5858_v54 = vmax.f32 %v5857_v22, 0.0  ;;  %1688 = vst.msk [vmem:[%s4556_s1 + $0x38] sm:$0xff] %vm1680_vm8, %v1607_v11 }
 0x212   :  { %v1634_v21 = vsel %vm1555_vm6, %v5855_v56, %v1633_v41  ;;  %v5860_v52 = vmax.f32 %v5859_v19, 0.0  ;;  %v5861_v45 = vmax.f32 %v5736_v31, 0.0  ;;  %v1408_v23 = vmax.f32 %v5862_v13, 0.0  ;;  %v5866_v31 = vld [vmem:[#allocation120_spill] sm:$0xff]  ;;  %1689 = vst.msk [vmem:[%s4556_s1 + $0x40] sm:$0xff] %vm1680_vm8, %v1614_v44 }
 0x213   :  { %v1621_v38 = vsel %vm1557_vm7, %v5858_v54, %v1620_v42  ;;  %v5864_v63 = vmax.f32 %v5863_v20, 0.0  ;;  %v5865_v51 = vmax.f32 %v5707_v10, 0.0  ;;  %v1416_v27 = vmax.f32 %v5866_v31, 0.0 }
 0x214   :  { %v1641_v59 = vsel %vm1555_vm6, %v5860_v52, %v1640_v35  ;;  %v1661_v55 = vsel %vm1553_vm5, %v5861_v45, %v1660_v4  ;;  %v5868_v40 = vmax.f32 %v5867_v26, 0.0  ;;  %v1655_v47 = vsel %vm1555_vm6, %v1407_v62, %v1654_v49  ;;  %1690 = vst.msk [vmem:[%s4556_s1 + $0x48] sm:$0xff] %vm1680_vm8, %v1621_v38 }
 0x215   :  { %v1628_v32 = vsel %vm1557_vm7, %v5864_v63, %v1627_v15  ;;  %v1648_v7 = vsel %vm1555_vm6, %v5865_v51, %v1647_v9  ;;  %v5869_v10 = vmax.f32 %v5696_v60, 0.0  ;;  %v1662_v1 = vsel %vm1555_vm6, %v1415_v50, %v1661_v55 }
 0x216   :  { %v1635_v6 = vsel %vm1557_vm7, %v5868_v40, %v1634_v21  ;;  %v1649_v33 = vsel %vm1557_vm7, %v1400_v43, %v1648_v7  ;;  %1691 = vst.msk [vmem:[%s4556_s1 + $0x50] sm:$0xff] %vm1680_vm8, %v1628_v32  ;;  %v1656_v12 = vsel %vm1557_vm7, %v1408_v23, %v1655_v47  ;;  %v1663_v60 = vsel %vm1557_vm7, %v1416_v27, %v1662_v1 }
 0x217   :  { %v1642_v34 = vsel %vm1557_vm7, %v5869_v10, %v1641_v59  ;;  %1692 = vst.msk [vmem:[%s4556_s1 + $0x58] sm:$0xff] %vm1680_vm8, %v1635_v6 }
 0x218   :  { %1693 = vst.msk [vmem:[%s4556_s1 + $0x60] sm:$0xff] %vm1680_vm8, %v1642_v34 }
 0x219   :  { %1694 = vst.msk [vmem:[%s4556_s1 + $0x68] sm:$0xff] %vm1680_vm8, %v1649_v33 }
 0x21a   :  { %1695 = vst.msk [vmem:[%s4556_s1 + $0x70] sm:$0xff] %vm1680_vm8, %v1656_v12 }
 0x21b   :  { %1696 = vst.msk [vmem:[%s4556_s1 + $0x78] sm:$0xff] %vm1680_vm8, %v1663_v60 }

// kernel: vgg16_forward.18
= control target key start
LH: loop header
LB: loop body
LE: loop exit
PB: predicated region body
PF: predicated region fallthrough
CT: control target
= control target key end

     0   :  { %s989_s12 = smov 0   ;;  %s991_s13 = smov 0   ;;  %s1145_s0 = inlined_call_operand.vmem [shape: bf16[128,640], index: 0, kind: input, shape index: {}]   ;;  %s1146_s1 = inlined_call_operand.vmem [shape: bf16[640,128], index: 1, kind: input, shape index: {}]   ;;  %s1147_s2 = inlined_call_operand.vmem [shape: f32[1,128], index: 2, kind: input, shape index: {}]   ;;  %s1148_s3 = inlined_call_operand.vmem [shape: f32[128,128], index: 3, kind: output, shape index: {}]  }
   0x1   :  { %s993_s14 = smov 0   ;;  %s995_s15 = smov 0  }
   0x2   :  { %s997_s16 = smov 0  }
   0x3 LB: > { %s25_s17 = sadd.s32 1, %s962_s15  ;;  %p48_p1 = scmp.ne.s32.totalorder %s954_s13, %s950_s12  ;;  %s966_s16 = sphi %s997_s16, %s13_s16   ;;  %s962_s15 = sphi %s995_s15, %s1152_s15   ;;  %s958_s14 = sphi %s993_s14, %s1151_s14   ;;  %s954_s13 = sphi %s991_s13, %s1150_s13   ;;  %s950_s12 = sphi %s989_s12, %s1149_s12  }
   0x4   : > { %p26_p0 = scmp.ge.s32.totalorder %s25_s17, 5  ;;  %p49_p2 = scmp.eq.s32.totalorder %s966_s16, 0 }
   0x5   : > { %s41_s19 = sadd.s32 1, %s954_s13  ;;  %p769_p5 = scmp.ge.s32.totalorder %s966_s16, 5 }
   0x6   : > { %s1154_s17 = smov (%p26_p0, %s25_s17), 0  ;;  %p50_p3 = por %p49_p2, %p48_p1 }
   0x7   : > { %s37_s18 = ssub.s32 %s962_s15, %s1154_s17  ;;  %162 = sbr.rel (%p769_p5) target bundleno = 32 (0x20), region = 20 }
   0x8   : > { %p39_p4 = scmp.eq.s32.totalorder %s37_s18, 0 }
   0xa   : > { %s1024_s20 = scalar_select %p39_p4, %s954_s13, %s41_s19  }
   0xc   : > { %165 = sbr.rel (!%p50_p3) target bundleno = 32 (0x20), region = 24  ;;  %s167_s21 = sand.u32 (%p50_p3), 1, %s954_s13  }
   0xd   : > { %s771_s22 = sshll.u32 (%p50_p3), %s962_s15, 2  ;;  %s770_s23 = sshll.u32 (%p50_p3), %s167_s21, 6 }
   0xe   : > { %s1032_s26 = scalar_lea.vmem (%p50_p3), %s1145_s0, %s771_s22  ;;  %s169_s27 = scalar_lea.vmem (%p50_p3), [#allocation3], %s770_s23 }
   0xf   : > { %v191_v0 = vld [vmem:[%s1032_s26] sm:$0xf] (%p50_p3)  ;;  %v193_v1 = vld [vmem:[%s1032_s26 + $0x14] sm:$0xf] (%p50_p3)  ;;  %v195_v2 = vld [vmem:[%s1032_s26 + $0x28] sm:$0xf] (%p50_p3) }
  0x10   : > { %192 = vst [vmem:[%s169_s27] sm:$0xf] (%p50_p3), %v191_v0  ;;  %v197_v3 = vld [vmem:[%s1032_s26 + $0x3c] sm:$0xf] (%p50_p3)  ;;  %v199_v4 = vld [vmem:[%s1032_s26 + $0x50] sm:$0xf] (%p50_p3) }
  0x11   : > { %194 = vst [vmem:[%s169_s27 + $0x4] sm:$0xf] %v193_v1  ;;  %v201_v5 = vld [vmem:[%s1032_s26 + $0x64] sm:$0xf]  ;;  %v203_v6 = vld [vmem:[%s1032_s26 + $0x78] sm:$0xf] }
  0x12   : > { %196 = vst [vmem:[%s169_s27 + $0x8] sm:$0xf] %v195_v2  ;;  %v205_v7 = vld [vmem:[%s1032_s26 + $0x8c] sm:$0xf]  ;;  %v207_v8 = vld [vmem:[%s1032_s26 + $0xa0] sm:$0xf] }
  0x13   : > { %198 = vst [vmem:[%s169_s27 + $0xc] sm:$0xf] %v197_v3  ;;  %v209_v9 = vld [vmem:[%s1032_s26 + $0xb4] sm:$0xf]  ;;  %v211_v10 = vld [vmem:[%s1032_s26 + $0xc8] sm:$0xf] }
  0x14   : > { %200 = vst [vmem:[%s169_s27 + $0x10] sm:$0xf] %v199_v4  ;;  %v213_v11 = vld [vmem:[%s1032_s26 + $0xdc] sm:$0xf]  ;;  %v215_v12 = vld [vmem:[%s1032_s26 + $0xf0] sm:$0xf] }
  0x15   : > { %202 = vst [vmem:[%s169_s27 + $0x14] sm:$0xf] %v201_v5  ;;  %v217_v13 = vld [vmem:[%s1032_s26 + $0x104] sm:$0xf]  ;;  %v219_v14 = vld [vmem:[%s1032_s26 + $0x118] sm:$0xf] }
  0x16   : > { %204 = vst [vmem:[%s169_s27 + $0x18] sm:$0xf] %v203_v6  ;;  %v221_v15 = vld [vmem:[%s1032_s26 + $0x12c] sm:$0xf] }
  0x17   : > { %206 = vst [vmem:[%s169_s27 + $0x1c] sm:$0xf] %v205_v7 }
  0x18   : > { %208 = vst [vmem:[%s169_s27 + $0x20] sm:$0xf] %v207_v8 }
  0x19   : > { %210 = vst [vmem:[%s169_s27 + $0x24] sm:$0xf] %v209_v9 }
  0x1a   : > { %212 = vst [vmem:[%s169_s27 + $0x28] sm:$0xf] %v211_v10 }
  0x1b   : > { %214 = vst [vmem:[%s169_s27 + $0x2c] sm:$0xf] %v213_v11 }
  0x1c   : > { %216 = vst [vmem:[%s169_s27 + $0x30] sm:$0xf] %v215_v12 }
  0x1d   : > { %218 = vst [vmem:[%s169_s27 + $0x34] sm:$0xf] %v217_v13 }
  0x1e   : > { %220 = vst [vmem:[%s169_s27 + $0x38] sm:$0xf] %v219_v14 }
  0x1f   : > { %222 = vst [vmem:[%s169_s27 + $0x3c] sm:$0xf] %v221_v15 }
  0x20 PF: > { %p772_p6 = scmp.ge.s32.totalorder %s966_s16, 1  ;;  %p289_p7 = scmp.lt.s32.totalorder %s966_s16, 6 }
  0x22   : > { %p290_p8 = pnand %p772_p6, %p289_p7 }
  0x23   : > { %s296_s28 = sand.u32 (!%p290_p8), 1, %s950_s12   ;;  %s774_s29 = sshll.u32 (!%p290_p8), %s958_s14, 4 }
  0x24   : > { %293 = sbr.rel (%p290_p8) target bundleno = 275 (0x113), region = 69  ;;  %s773_s30 = sshll.u32 (!%p290_p8), %s296_s28, 6 }
  0x25   : > { %p335_p9 = scmp.lt.s32.totalorder (!%p290_p8), %s774_s29, 79  ;;  %s1059_s8 = scalar_lea.vmem (!%p290_p8), [#allocation3], %s773_s30 }
  0x26   : > { %p776_p10 = scmp.ne.s32.totalorder (!%p290_p8), %s958_s14, 0 }
  0x29   : > { %s1156_s29 = smov (!%p335_p9, %s774_s29), 79  ;;  %358 = sbr.rel (%p776_p10) target bundleno = 63 (0x3f), region = 77 }
  0x2a   : > { %s775_s4 = sshll.u32 %s1156_s29, 2 }
  0x2b   : > { %s1057_s7 = scalar_lea.vmem %s1146_s1, %s775_s4 }
  0x2e   : > { %v968_v16 = vmov 0.0  }
  0x2f   : > { %359 = vst [vmem:[#allocation2 + $0x30] sm:$0xff] %v968_v16 }
  0x30   : > { %360 = vst [vmem:[#allocation2] sm:$0xff] %v968_v16 }
  0x31   : > { %361 = vst [vmem:[#allocation2 + $0x58] sm:$0xff] %v968_v16 }
  0x32   : > { %362 = vst [vmem:[#allocation2 + $0x18] sm:$0xff] %v968_v16 }
  0x33   : > { %363 = vst [vmem:[#allocation2 + $0x50] sm:$0xff] %v968_v16 }
  0x34   : > { %364 = vst [vmem:[#allocation2 + $0x68] sm:$0xff] %v968_v16 }
  0x35   : > { %365 = vst [vmem:[#allocation2 + $0x8] sm:$0xff] %v968_v16 }
  0x36   : > { %366 = vst [vmem:[#allocation2 + $0x48] sm:$0xff] %v968_v16 }
  0x37   : > { %367 = vst [vmem:[#allocation2 + $0x40] sm:$0xff] %v968_v16 }
  0x38   : > { %368 = vst [vmem:[#allocation2 + $0x20] sm:$0xff] %v968_v16 }
  0x39   : > { %369 = vst [vmem:[#allocation2 + $0x10] sm:$0xff] %v968_v16 }
  0x3a   : > { %370 = vst [vmem:[#allocation2 + $0x38] sm:$0xff] %v968_v16 }
  0x3b   : > { %371 = vst [vmem:[#allocation2 + $0x60] sm:$0xff] %v968_v16 }
  0x3c   : > { %372 = vst [vmem:[#allocation2 + $0x70] sm:$0xff] %v968_v16 }
  0x3d   : > { %373 = vst [vmem:[#allocation2 + $0x78] sm:$0xff] %v968_v16 }
  0x3e   : > { %374 = vst [vmem:[#allocation2 + $0x28] sm:$0xff] %v968_v16 }
  0x3f PF: > { %v861_v17 = vld [vmem:[%s1057_s7 + $0x38] sm:$0xff]  ;;  %v860_v18 = vld [vmem:[%s1057_s7 + $0x30] sm:$0xff]  ;;  %v859_v19 = vld [vmem:[%s1057_s7 + $0x28] sm:$0xff]  ;;  %p841_p11 = scmp.ne.s32.totalorder %s958_s14, 4 }
  0x40   : > { %519 = vmatpush.bf16.msra.mxu0 %v861_v17  ;;  %862 = vmatpush.bf16.msra.mxu1 %v861_v17  ;;  %v858_v20 = vld [vmem:[%s1057_s7 + $0x20] sm:$0xff]  ;;  %v857_v21 = vld [vmem:[%s1057_s7 + $0x18] sm:$0xff]  ;;  %v856_v22 = vld [vmem:[%s1057_s7 + $0x10] sm:$0xff] }
  0x41   : > { %863 = vmatpush.bf16.msra.mxu2 %v861_v17  ;;  %864 = vmatpush.bf16.msra.mxu3 %v861_v17  ;;  %v855_v23 = vld [vmem:[%s1057_s7 + $0x8] sm:$0xff]  ;;  %v854_v24 = vld [vmem:[%s1057_s7] sm:$0xff]  ;;  %v848_v26 = vld [vmem:[%s1059_s8 + $0x10] sm:$0xff] }
  0x42   : > { %v846_v25 = vld [vmem:[%s1059_s8] sm:$0xff]  ;;  %v852_v28 = vld [vmem:[%s1059_s8 + $0x30] sm:$0xff]  ;;  %v847_v29 = vld [vmem:[%s1059_s8 + $0x8] sm:$0xff] }
  0x43   : > { %v850_v27 = vld [vmem:[%s1059_s8 + $0x20] sm:$0xff]  ;;  %v849_v30 = vld [vmem:[%s1059_s8 + $0x18] sm:$0xff]  ;;  %v851_v31 = vld [vmem:[%s1059_s8 + $0x28] sm:$0xff] }
  0x44   : > { %520 = vmatpush.bf16.msra.mxu0 %v860_v18  ;;  %865 = vmatpush.bf16.msra.mxu1 %v860_v18  ;;  %v853_v32 = vld [vmem:[%s1059_s8 + $0x38] sm:$0xff]  ;;  %v391_v33 = vld [vmem:[#allocation2 + $0x30] sm:$0xff]  ;;  %v399_v39 = vld [vmem:[#allocation2 + $0x40] sm:$0xff] }
  0x45   : > { %866 = vmatpush.bf16.msra.mxu2 %v860_v18  ;;  %867 = vmatpush.bf16.msra.mxu3 %v860_v18  ;;  %v395_v34 = vld [vmem:[#allocation2 + $0x50] sm:$0xff]  ;;  %v403_v40 = vld [vmem:[#allocation2 + $0x60] sm:$0xff]  ;;  %v396_v42 = vld [vmem:[#allocation2 + $0x68] sm:$0xff] }
  0x46   : > { %v392_v41 = vld [vmem:[#allocation2] sm:$0xff]  ;;  %v404_v52 = vld [vmem:[#allocation2 + $0x70] sm:$0xff]  ;;  %v393_v53 = vld [vmem:[#allocation2 + $0x58] sm:$0xff] }
  0x47   : > { %v400_v51 = vld [vmem:[#allocation2 + $0x20] sm:$0xff]  ;;  %v397_v54 = vld [vmem:[#allocation2 + $0x8] sm:$0xff]  ;;  %v401_v63 = vld [vmem:[#allocation2 + $0x10] sm:$0xff] }
  0x48   : > { %521 = vmatpush.bf16.msra.mxu0 %v859_v19  ;;  %868 = vmatpush.bf16.msra.mxu1 %v859_v19  ;;  %v405_v0 = vld [vmem:[#allocation2 + $0x78] sm:$0xff]  ;;  %v398_v2 = vld [vmem:[#allocation2 + $0x48] sm:$0xff] }
  0x49   : > { %869 = vmatpush.bf16.msra.mxu2 %v859_v19  ;;  %870 = vmatpush.bf16.msra.mxu3 %v859_v19  ;;  %v394_v1 = vld [vmem:[#allocation2 + $0x18] sm:$0xff]  ;;  %v406_v12 = vld [vmem:[#allocation2 + $0x28] sm:$0xff] }
  0x4a   : > { %v402_v11 = vld [vmem:[#allocation2 + $0x38] sm:$0xff] }
  0x4c   : > { %522 = vmatpush.bf16.msra.mxu0 %v858_v20  ;;  %871 = vmatpush.bf16.msra.mxu1 %v858_v20 }
  0x4d   : > { %872 = vmatpush.bf16.msra.mxu2 %v858_v20  ;;  %873 = vmatpush.bf16.msra.mxu3 %v858_v20 }
  0x50   : > { %523 = vmatpush.bf16.msra.mxu0 %v857_v21  ;;  %874 = vmatpush.bf16.msra.mxu1 %v857_v21 }
  0x51   : > { %875 = vmatpush.bf16.msra.mxu2 %v857_v21  ;;  %876 = vmatpush.bf16.msra.mxu3 %v857_v21 }
  0x54   : > { %524 = vmatpush.bf16.msra.mxu0 %v856_v22  ;;  %877 = vmatpush.bf16.msra.mxu1 %v856_v22 }
  0x55   : > { %878 = vmatpush.bf16.msra.mxu2 %v856_v22  ;;  %879 = vmatpush.bf16.msra.mxu3 %v856_v22 }
  0x58   : > { %525 = vmatpush.bf16.msra.mxu0 %v855_v23  ;;  %880 = vmatpush.bf16.msra.mxu1 %v855_v23 }
  0x59   : > { %881 = vmatpush.bf16.msra.mxu2 %v855_v23  ;;  %882 = vmatpush.bf16.msra.mxu3 %v855_v23 }
  0x5c   : > { %526 = vmatpush.bf16.msra.mxu0 %v854_v24  ;;  %883 = vmatpush.bf16.msra.mxu1 %v854_v24 }
  0x5d   : > { %884 = vmatpush.bf16.msra.mxu2 %v854_v24  ;;  %885 = vmatpush.bf16.msra.mxu3 %v854_v24 }
  0x5f   : > { %527 = vmatmul.bf16.vlgmr.msra.gmra.mxu0 %v846_v25  ;;  %537 = vmatmul.bf16.vlgmr.msra.gmra.mxu1 %v848_v26 }
  0x60   : > { %547 = vmatmul.bf16.vlgmr.msra.gmra.mxu2 %v850_v27  ;;  %557 = vmatmul.bf16.vlgmr.msra.gmra.mxu3 %v852_v28 }
  0x6f   : > { %532 = vmatmul.bf16.gmra.mxu0 %v847_v29  ;;  %542 = vmatmul.bf16.gmra.mxu1 %v849_v30 }
  0x70   : > { %552 = vmatmul.bf16.gmra.mxu2 %v851_v31  ;;  %562 = vmatmul.bf16.gmra.mxu3 %v853_v32 }
  0xdc   : > { %v528_v35 = vpop.f32.mrf.mxu0  ;;  %v538_v36 = vpop.f32.mrf.mxu1 }
  0xdd   : > { %v568_v37 = vadd.f32 %v528_v35, %v391_v33  ;;  %v572_v38 = vadd.f32 %v538_v36, %v395_v34 }
  0xdf   : > { %584 = vst [vmem:[#allocation2 + $0x30] sm:$0xff] %v568_v37 }
  0xe0   : > { %588 = vst [vmem:[#allocation2 + $0x50] sm:$0xff] %v572_v38 }
  0xe3   : > { %v548_v43 = vpop.f32.mrf.mxu2  ;;  %v558_v44 = vpop.f32.mrf.mxu3 }
  0xe4   : > { %v576_v45 = vadd.f32 %v548_v43, %v399_v39  ;;  %v580_v46 = vadd.f32 %v558_v44, %v403_v40  ;;  %v530_v47 = vpop.f32.mrf.mxu0  ;;  %v540_v48 = vpop.f32.mrf.mxu1 }
  0xe5   : > { %v569_v49 = vadd.f32 %v530_v47, %v392_v41  ;;  %v573_v50 = vadd.f32 %v540_v48, %v396_v42 }
  0xe6   : > { %592 = vst [vmem:[#allocation2 + $0x40] sm:$0xff] %v576_v45 }
  0xe7   : > { %596 = vst [vmem:[#allocation2 + $0x60] sm:$0xff] %v580_v46 }
  0xe8   : > { %585 = vst [vmem:[#allocation2] sm:$0xff] %v569_v49 }
  0xe9   : > { %589 = vst [vmem:[#allocation2 + $0x68] sm:$0xff] %v573_v50 }
  0xeb   : > { %v550_v55 = vpop.f32.mrf.mxu2  ;;  %v560_v56 = vpop.f32.mrf.mxu3 }
  0xec   : > { %v577_v57 = vadd.f32 %v550_v55, %v400_v51  ;;  %v581_v58 = vadd.f32 %v560_v56, %v404_v52  ;;  %v533_v59 = vpop.f32.mrf.mxu0  ;;  %v543_v60 = vpop.f32.mrf.mxu1 }
  0xed   : > { %v570_v61 = vadd.f32 %v533_v59, %v393_v53  ;;  %v574_v62 = vadd.f32 %v543_v60, %v397_v54 }
  0xee   : > { %593 = vst [vmem:[#allocation2 + $0x20] sm:$0xff] %v577_v57 }
  0xef   : > { %597 = vst [vmem:[#allocation2 + $0x70] sm:$0xff] %v581_v58 }
  0xf0   : > { %586 = vst [vmem:[#allocation2 + $0x58] sm:$0xff] %v570_v61 }
  0xf1   : > { %590 = vst [vmem:[#allocation2 + $0x8] sm:$0xff] %v574_v62 }
  0xf3   : > { %v553_v3 = vpop.f32.mrf.mxu2  ;;  %v563_v4 = vpop.f32.mrf.mxu3 }
  0xf4   : > { %v578_v5 = vadd.f32 %v553_v3, %v401_v63  ;;  %v582_v6 = vadd.f32 %v563_v4, %v405_v0  ;;  %v535_v7 = vpop.f32.mrf.mxu0  ;;  %v545_v8 = vpop.f32.mrf.mxu1 }
  0xf5   : > { %v571_v9 = vadd.f32 %v535_v7, %v394_v1  ;;  %v575_v10 = vadd.f32 %v545_v8, %v398_v2 }
  0xf6   : > { %594 = vst [vmem:[#allocation2 + $0x10] sm:$0xff] %v578_v5 }
  0xf7   : > { %598 = vst [vmem:[#allocation2 + $0x78] sm:$0xff] %v582_v6 }
  0xf8   : > { %587 = vst [vmem:[#allocation2 + $0x18] sm:$0xff] %v571_v9 }
  0xf9   : > { %591 = vst [vmem:[#allocation2 + $0x48] sm:$0xff] %v575_v10 }
  0xfb   : > { %v555_v13 = vpop.f32.mrf.mxu2  ;;  %v565_v14 = vpop.f32.mrf.mxu3  ;;  %603 = sbr.rel (%p841_p11) target bundleno = 275 (0x113), region = 81 }
  0xfc   : > { %v579_v15 = vadd.f32 %v555_v13, %v402_v11  ;;  %v583_v16 = vadd.f32 %v565_v14, %v406_v12 }
  0xfe   : > { %595 = vst [vmem:[#allocation2 + $0x38] sm:$0xff] %v579_v15 }
  0xff   : > { %599 = vst [vmem:[#allocation2 + $0x28] sm:$0xff] %v583_v16 }
 0x100   : > { %v604_v17 = vld [vmem:[#allocation2 + $0x30] sm:$0xff]  ;;  %v927_v18 = vld [vmem:[%s1147_s2] ss:$0 sm:$0xff]  ;;  %v606_v20 = vld [vmem:[#allocation2 + $0x58] sm:$0xff] }
 0x101   : > { %v605_v19 = vld [vmem:[#allocation2] sm:$0xff]  ;;  %v607_v21 = vld [vmem:[#allocation2 + $0x18] sm:$0xff]  ;;  %v624_v22 = vadd.f32 %v927_v18, %v604_v17  ;;  %v626_v24 = vadd.f32 %v927_v18, %v606_v20  ;;  %v608_v25 = vld [vmem:[#allocation2 + $0x50] sm:$0xff] }
 0x102   : > { %v625_v23 = vadd.f32 %v927_v18, %v605_v19  ;;  %v609_v26 = vld [vmem:[#allocation2 + $0x68] sm:$0xff]  ;;  %v627_v27 = vadd.f32 %v927_v18, %v607_v21  ;;  %v628_v29 = vadd.f32 %v927_v18, %v608_v25  ;;  %v612_v32 = vld [vmem:[#allocation2 + $0x40] sm:$0xff]  ;;  %v614_v36 = vld [vmem:[#allocation2 + $0x10] sm:$0xff] }
 0x103   : > { %v610_v28 = vld [vmem:[#allocation2 + $0x8] sm:$0xff]  ;;  %640 = vst [vmem:[%s1148_s3] sm:$0xff] %v624_v22  ;;  %v629_v31 = vadd.f32 %v927_v18, %v609_v26  ;;  %v613_v34 = vld [vmem:[#allocation2 + $0x20] sm:$0xff]  ;;  %v632_v37 = vadd.f32 %v927_v18, %v612_v32  ;;  %v634_v41 = vadd.f32 %v927_v18, %v614_v36  ;;  %v617_v42 = vld [vmem:[#allocation2 + $0x70] sm:$0xff] }
 0x104   : > { %v611_v30 = vld [vmem:[#allocation2 + $0x48] sm:$0xff]  ;;  %641 = vst [vmem:[%s1148_s3 + $0x8] sm:$0xff] %v625_v23  ;;  %v630_v33 = vadd.f32 %v927_v18, %v610_v28  ;;  %v633_v39 = vadd.f32 %v927_v18, %v613_v34  ;;  %v616_v40 = vld [vmem:[#allocation2 + $0x60] sm:$0xff]  ;;  %v618_v44 = vld [vmem:[#allocation2 + $0x78] sm:$0xff]  ;;  %v637_v47 = vadd.f32 %v927_v18, %v617_v42 }
 0x105   : > { %642 = vst [vmem:[%s1148_s3 + $0x10] sm:$0xff] %v626_v24  ;;  %v631_v35 = vadd.f32 %v927_v18, %v611_v30  ;;  %v615_v38 = vld [vmem:[#allocation2 + $0x38] sm:$0xff]  ;;  %v636_v45 = vadd.f32 %v927_v18, %v616_v40  ;;  %v638_v48 = vadd.f32 %v927_v18, %v618_v44 }
 0x106   : > { %643 = vst [vmem:[%s1148_s3 + $0x18] sm:$0xff] %v627_v27  ;;  %v635_v43 = vadd.f32 %v927_v18, %v615_v38  ;;  %v619_v46 = vld [vmem:[#allocation2 + $0x28] sm:$0xff] }
 0x107   : > { %644 = vst [vmem:[%s1148_s3 + $0x20] sm:$0xff] %v628_v29  ;;  %v639_v49 = vadd.f32 %v927_v18, %v619_v46 }
 0x108   : > { %645 = vst [vmem:[%s1148_s3 + $0x28] sm:$0xff] %v629_v31 }
 0x109   : > { %646 = vst [vmem:[%s1148_s3 + $0x30] sm:$0xff] %v630_v33 }
 0x10a   : > { %647 = vst [vmem:[%s1148_s3 + $0x38] sm:$0xff] %v631_v35 }
 0x10b   : > { %648 = vst [vmem:[%s1148_s3 + $0x40] sm:$0xff] %v632_v37 }
 0x10c   : > { %649 = vst [vmem:[%s1148_s3 + $0x48] sm:$0xff] %v633_v39 }
 0x10d   : > { %650 = vst [vmem:[%s1148_s3 + $0x50] sm:$0xff] %v634_v41 }
 0x10e   : > { %651 = vst [vmem:[%s1148_s3 + $0x58] sm:$0xff] %v635_v43 }
 0x10f   : > { %652 = vst [vmem:[%s1148_s3 + $0x60] sm:$0xff] %v636_v45 }
 0x110   : > { %653 = vst [vmem:[%s1148_s3 + $0x68] sm:$0xff] %v637_v47 }
 0x111   : > { %654 = vst [vmem:[%s1148_s3 + $0x70] sm:$0xff] %v638_v48 }
 0x112   : > { %655 = vst [vmem:[%s1148_s3 + $0x78] sm:$0xff] %v639_v49 }
 0x113 PF: > { %s13_s16 = sadd.s32 1, %s966_s16   ;;  %s1149_s12 = smov %s954_s13 }
 0x114   : > { %p10_p12 = scmp.ge.s32.totalorder %s13_s16, 7   ;;  %s1150_s13 = smov %s1024_s20 }
 0x115   : > { %s1151_s14 = smov %s962_s15  ;;  %s1152_s15 = smov %s1154_s17 }
 0x116   :  { %12 = sbr.rel (!%p10_p12) target bundleno = 3 (0x3), region = 122 }

// kernel: vgg16_forward.20
= control target key start
LH: loop header
LB: loop body
LE: loop exit
PB: predicated region body
PF: predicated region fallthrough
CT: control target
= control target key end

     0   :  { %vm104_vm0 = vcmask 1041408   ;;  %vm393_vm1 = vcmask 1041409   ;;  %vm395_vm2 = vcmask 1042434   ;;  %vm397_vm3 = vcmask 1043459   ;;  %s722_s0 = inlined_call_operand.vmem [shape: f32[8,2,4,2,128], index: 0, kind: input, shape index: {}]   ;;  %s723_s1 = inlined_call_operand.vmem [shape: f32[8,4,128], index: 1, kind: output, shape index: {}]  }
   0x1   :  { %v8_v0 = vld [vmem:[%s722_s0] sm:$0x3]  ;;  %v9_v1 = vld [vmem:[%s722_s0 + $0x2] sm:$0x3]  ;;  %v10_v2 = vld [vmem:[%s722_s0 + $0x4] sm:$0x3] }
   0x2   :  { %v11_v3 = vld [vmem:[%s722_s0 + $0x6] sm:$0x3]  ;;  %v12_v4 = vld [vmem:[%s722_s0 + $0x8] sm:$0x3]  ;;  %v13_v5 = vld [vmem:[%s722_s0 + $0xa] sm:$0x3] }
   0x3   :  { %v14_v6 = vld [vmem:[%s722_s0 + $0xc] sm:$0x3]  ;;  %v15_v7 = vld [vmem:[%s722_s0 + $0xe] sm:$0x3]  ;;  %v72_v8 = vmax.f32 %v8_v0, %v12_v4  ;;  %v73_v9 = vmax.f32 %v9_v1, %v13_v5  ;;  %v16_v10 = vld [vmem:[%s722_s0 + $0x10] sm:$0x3] }
   0x4   :  { %v74_v11 = vmax.f32 %v10_v2, %v14_v6  ;;  %v75_v12 = vmax.f32 %v11_v3, %v15_v7  ;;  %v17_v13 = vld [vmem:[%s722_s0 + $0x12] sm:$0x3]  ;;  %v18_v14 = vld [vmem:[%s722_s0 + $0x14] sm:$0x3]  ;;  %v19_v15 = vld [vmem:[%s722_s0 + $0x16] sm:$0x3] }
   0x5   :  { %v105_v16 = vsel %vm104_vm0, %v72_v8, -inf  ;;  %v112_v17 = vsel %vm104_vm0, %v73_v9, -inf  ;;  %v20_v18 = vld [vmem:[%s722_s0 + $0x18] sm:$0x3]  ;;  %v21_v19 = vld [vmem:[%s722_s0 + $0x1a] sm:$0x3] }
   0x6   :  { %v106_v20 = vrot.slane %v105_v16, 4  ;;  %v113_v21 = vrot.slane %v112_v17, 4  ;;  %v119_v22 = vsel %vm104_vm0, %v74_v11, -inf  ;;  %v126_v23 = vsel %vm104_vm0, %v75_v12, -inf  ;;  %v22_v24 = vld [vmem:[%s722_s0 + $0x1c] sm:$0x3] }
   0x7   :  { %v120_v25 = vrot.slane %v119_v22, 4  ;;  %v127_v26 = vrot.slane %v126_v23, 4  ;;  %v23_v27 = vld [vmem:[%s722_s0 + $0x1e] sm:$0x3]  ;;  %v76_v28 = vmax.f32 %v16_v10, %v20_v18  ;;  %v77_v29 = vmax.f32 %v17_v13, %v21_v19  ;;  %v24_v2 = vld [vmem:[%s722_s0 + $0x20] sm:$0x3] }
   0x8   :  { %v107_v30 = vmax.f32 %v105_v16, %v106_v20  ;;  %v114_v31 = vmax.f32 %v112_v17, %v113_v21  ;;  %v78_v32 = vmax.f32 %v18_v14, %v22_v24  ;;  %v79_v33 = vmax.f32 %v19_v15, %v23_v27  ;;  %v25_v7 = vld [vmem:[%s722_s0 + $0x22] sm:$0x3]  ;;  %v28_v8 = vld [vmem:[%s722_s0 + $0x28] sm:$0x3]  ;;  %v29_v13 = vld [vmem:[%s722_s0 + $0x2a] sm:$0x3] }
   0x9   :  { %v121_v34 = vmax.f32 %v119_v22, %v120_v25  ;;  %v128_v35 = vmax.f32 %v126_v23, %v127_v26  ;;  %v133_v36 = vsel %vm104_vm0, %v76_v28, -inf  ;;  %v140_v37 = vsel %vm104_vm0, %v77_v29, -inf  ;;  %v26_v18 = vld [vmem:[%s722_s0 + $0x24] sm:$0x3]  ;;  %v30_v19 = vld [vmem:[%s722_s0 + $0x2c] sm:$0x3] }
   0xa   :  { %v108_v38 = vrot.slane %v107_v30, 2  ;;  %v115_v39 = vrot.slane %v114_v31, 2  ;;  %v134_v40 = vrot.slane %v133_v36, 4  ;;  %v141_v41 = vrot.slane %v140_v37, 4  ;;  %v27_v23 = vld [vmem:[%s722_s0 + $0x26] sm:$0x3] }
   0xb   :  { %v122_v42 = vrot.slane %v121_v34, 2  ;;  %v129_v43 = vrot.slane %v128_v35, 2  ;;  %v147_v44 = vsel %vm104_vm0, %v78_v32, -inf  ;;  %v154_v45 = vsel %vm104_vm0, %v79_v33, -inf  ;;  %v31_v24 = vld [vmem:[%s722_s0 + $0x2e] sm:$0x3] }
   0xc   :  { %v109_v46 = vmax.f32 %v107_v30, %v108_v38  ;;  %v116_v47 = vmax.f32 %v114_v31, %v115_v39  ;;  %v135_v48 = vmax.f32 %v133_v36, %v134_v40  ;;  %v142_v49 = vmax.f32 %v140_v37, %v141_v41  ;;  %v34_v40 = vld [vmem:[%s722_s0 + $0x34] sm:$0x3]  ;;  %v35_v41 = vld [vmem:[%s722_s0 + $0x36] sm:$0x3] }
   0xd   :  { %v123_v50 = vmax.f32 %v121_v34, %v122_v42  ;;  %v130_v51 = vmax.f32 %v128_v35, %v129_v43  ;;  %v148_v52 = vrot.slane %v147_v44, 4  ;;  %v155_v53 = vrot.slane %v154_v45, 4  ;;  %v32_v34 = vld [vmem:[%s722_s0 + $0x30] sm:$0x3]  ;;  %v33_v35 = vld [vmem:[%s722_s0 + $0x32] sm:$0x3] }
   0xe   :  { %v110_v54 = vrot.slane %v109_v46, 1  ;;  %v117_v55 = vrot.slane %v116_v47, 1  ;;  %v136_v56 = vrot.slane %v135_v48, 2  ;;  %v143_v57 = vrot.slane %v142_v49, 2  ;;  %v36_v42 = vld [vmem:[%s722_s0 + $0x38] sm:$0x3] }
   0xf   :  { %v124_v58 = vrot.slane %v123_v50, 1  ;;  %v131_v59 = vrot.slane %v130_v51, 1  ;;  %v149_v60 = vmax.f32 %v147_v44, %v148_v52  ;;  %v156_v61 = vmax.f32 %v154_v45, %v155_v53  ;;  %v37_v43 = vld [vmem:[%s722_s0 + $0x3a] sm:$0x3]  ;;  %v39_v53 = vld [vmem:[%s722_s0 + $0x3e] sm:$0x3] }
  0x10   :  { %v111_v62 = vmax.f32 %v109_v46, %v110_v54  ;;  %v118_v63 = vmax.f32 %v116_v47, %v117_v55  ;;  %v137_v0 = vmax.f32 %v135_v48, %v136_v56  ;;  %v144_v1 = vmax.f32 %v142_v49, %v143_v57  ;;  %v38_v48 = vld [vmem:[%s722_s0 + $0x3c] sm:$0x3] }
  0x11   :  { %v125_v3 = vmax.f32 %v123_v50, %v124_v58  ;;  %v132_v4 = vmax.f32 %v130_v51, %v131_v59  ;;  %v150_v5 = vrot.slane %v149_v60, 2  ;;  %v157_v6 = vrot.slane %v156_v61, 2 }
  0x12   :  { %v329_v9 = vmax.f32 %v111_v62, 0.0  ;;  %v330_v10 = vmax.f32 %v118_v63, 0.0  ;;  %v138_v11 = vrot.slane %v137_v0, 1  ;;  %v145_v12 = vrot.slane %v144_v1, 1 }
  0x13   :  { %v331_v14 = vmax.f32 %v125_v3, 0.0  ;;  %v332_v15 = vmax.f32 %v132_v4, 0.0  ;;  %v151_v16 = vmax.f32 %v149_v60, %v150_v5  ;;  %v158_v17 = vmax.f32 %v156_v61, %v157_v6 }
  0x14   :  { %v394_v20 = vsel %vm393_vm1, %v330_v10, %v329_v9  ;;  %v139_v21 = vmax.f32 %v137_v0, %v138_v11  ;;  %v146_v22 = vmax.f32 %v144_v1, %v145_v12  ;;  %v80_v25 = vmax.f32 %v24_v2, %v28_v8 }
  0x15   :  { %v396_v26 = vsel %vm395_vm2, %v331_v14, %v394_v20  ;;  %v152_v27 = vrot.slane %v151_v16, 1  ;;  %v159_v28 = vrot.slane %v158_v17, 1  ;;  %v81_v29 = vmax.f32 %v25_v7, %v29_v13 }
  0x16   :  { %v398_v30 = vsel %vm397_vm3, %v332_v15, %v396_v26  ;;  %v333_v31 = vmax.f32 %v139_v21, 0.0  ;;  %v334_v32 = vmax.f32 %v146_v22, 0.0  ;;  %v82_v33 = vmax.f32 %v26_v18, %v30_v19 }
  0x17   :  { %428 = vst [vmem:[%s723_s1] sm:$0xf] %v398_v30  ;;  %v153_v36 = vmax.f32 %v151_v16, %v152_v27  ;;  %v160_v37 = vmax.f32 %v158_v17, %v159_v28  ;;  %v83_v38 = vmax.f32 %v27_v23, %v31_v24  ;;  %v161_v39 = vsel %vm104_vm0, %v80_v25, -inf  ;;  %v40_v30 = vld [vmem:[%s722_s0 + $0x40] sm:$0x3] }
  0x18   :  { %v399_v44 = vsel %vm393_vm1, %v334_v32, %v333_v31  ;;  %v162_v45 = vrot.slane %v161_v39, 4  ;;  %v168_v46 = vsel %vm104_vm0, %v81_v29, -inf  ;;  %v175_v47 = vsel %vm104_vm0, %v82_v33, -inf  ;;  %v44_v31 = vld [vmem:[%s722_s0 + $0x48] sm:$0x3] }
  0x19   :  { %v335_v49 = vmax.f32 %v153_v36, 0.0  ;;  %v336_v50 = vmax.f32 %v160_v37, 0.0  ;;  %v169_v51 = vrot.slane %v168_v46, 4  ;;  %v176_v52 = vrot.slane %v175_v47, 4  ;;  %v41_v36 = vld [vmem:[%s722_s0 + $0x42] sm:$0x3] }
  0x1a   :  { %v163_v54 = vmax.f32 %v161_v39, %v162_v45  ;;  %v182_v55 = vsel %vm104_vm0, %v83_v38, -inf  ;;  %v84_v56 = vmax.f32 %v32_v34, %v36_v42  ;;  %v85_v57 = vmax.f32 %v33_v35, %v37_v43  ;;  %v45_v37 = vld [vmem:[%s722_s0 + $0x4a] sm:$0x3]  ;;  %v42_v42 = vld [vmem:[%s722_s0 + $0x44] sm:$0x3] }
  0x1b   :  { %v400_v58 = vsel %vm395_vm2, %v335_v49, %v399_v44  ;;  %v170_v59 = vmax.f32 %v168_v46, %v169_v51  ;;  %v177_v60 = vmax.f32 %v175_v47, %v176_v52  ;;  %v183_v61 = vrot.slane %v182_v55, 4  ;;  %v43_v43 = vld [vmem:[%s722_s0 + $0x46] sm:$0x3]  ;;  %v46_v47 = vld [vmem:[%s722_s0 + $0x4c] sm:$0x3] }
  0x1c   :  { %v401_v62 = vsel %vm397_vm3, %v336_v50, %v400_v58  ;;  %v164_v63 = vrot.slane %v163_v54, 2  ;;  %v86_v0 = vmax.f32 %v34_v40, %v38_v48  ;;  %v87_v1 = vmax.f32 %v35_v41, %v39_v53  ;;  %v47_v48 = vld [vmem:[%s722_s0 + $0x4e] sm:$0x3] }
  0x1d   :  { %429 = vst [vmem:[%s723_s1 + $0x4] sm:$0xf] %v401_v62  ;;  %v171_v2 = vrot.slane %v170_v59, 2  ;;  %v178_v3 = vrot.slane %v177_v60, 2  ;;  %v184_v4 = vmax.f32 %v182_v55, %v183_v61  ;;  %v189_v5 = vsel %vm104_vm0, %v84_v56, -inf }
  0x1e   :  { %v165_v6 = vmax.f32 %v163_v54, %v164_v63  ;;  %v190_v7 = vrot.slane %v189_v5, 4  ;;  %v196_v8 = vsel %vm104_vm0, %v85_v57, -inf  ;;  %v203_v9 = vsel %vm104_vm0, %v86_v0, -inf  ;;  %v48_v62 = vld [vmem:[%s722_s0 + $0x50] sm:$0x3] }
  0x1f   :  { %v172_v10 = vmax.f32 %v170_v59, %v171_v2  ;;  %v179_v11 = vmax.f32 %v177_v60, %v178_v3  ;;  %v185_v12 = vrot.slane %v184_v4, 2  ;;  %v197_v13 = vrot.slane %v196_v8, 4  ;;  %v52_v63 = vld [vmem:[%s722_s0 + $0x58] sm:$0x3] }
  0x20   :  { %v166_v14 = vrot.slane %v165_v6, 1  ;;  %v191_v15 = vmax.f32 %v189_v5, %v190_v7  ;;  %v204_v16 = vrot.slane %v203_v9, 4  ;;  %v210_v17 = vsel %vm104_vm0, %v87_v1, -inf  ;;  %v50_v5 = vld [vmem:[%s722_s0 + $0x54] sm:$0x3] }
  0x21   :  { %v173_v18 = vrot.slane %v172_v10, 1  ;;  %v180_v19 = vrot.slane %v179_v11, 1  ;;  %v186_v20 = vmax.f32 %v184_v4, %v185_v12  ;;  %v198_v21 = vmax.f32 %v196_v8, %v197_v13  ;;  %v49_v4 = vld [vmem:[%s722_s0 + $0x52] sm:$0x3] }
  0x22   :  { %v167_v22 = vmax.f32 %v165_v6, %v166_v14  ;;  %v192_v23 = vrot.slane %v191_v15, 2  ;;  %v205_v24 = vmax.f32 %v203_v9, %v204_v16  ;;  %v211_v25 = vrot.slane %v210_v17, 4 }
  0x23   :  { %v174_v26 = vmax.f32 %v172_v10, %v173_v18  ;;  %v181_v27 = vmax.f32 %v179_v11, %v180_v19  ;;  %v187_v28 = vrot.slane %v186_v20, 1  ;;  %v199_v29 = vrot.slane %v198_v21, 2  ;;  %v53_v10 = vld [vmem:[%s722_s0 + $0x5a] sm:$0x3]  ;;  %v51_v19 = vld [vmem:[%s722_s0 + $0x56] sm:$0x3] }
  0x24   :  { %v337_v32 = vmax.f32 %v167_v22, 0.0  ;;  %v193_v33 = vmax.f32 %v191_v15, %v192_v23  ;;  %v206_v34 = vrot.slane %v205_v24, 2  ;;  %v212_v35 = vmax.f32 %v210_v17, %v211_v25  ;;  %v54_v15 = vld [vmem:[%s722_s0 + $0x5c] sm:$0x3] }
  0x25   :  { %v188_v38 = vmax.f32 %v186_v20, %v187_v28  ;;  %v338_v39 = vmax.f32 %v174_v26, 0.0  ;;  %v339_v40 = vmax.f32 %v181_v27, 0.0  ;;  %v200_v41 = vmax.f32 %v198_v21, %v199_v29  ;;  %v55_v20 = vld [vmem:[%s722_s0 + $0x5e] sm:$0x3] }
  0x26   :  { %v194_v44 = vrot.slane %v193_v33, 1  ;;  %v207_v45 = vmax.f32 %v205_v24, %v206_v34  ;;  %v213_v46 = vrot.slane %v212_v35, 2  ;;  %v88_v49 = vmax.f32 %v40_v30, %v44_v31 }
  0x27   :  { %v340_v50 = vmax.f32 %v188_v38, 0.0  ;;  %v402_v51 = vsel %vm393_vm1, %v338_v39, %v337_v32  ;;  %v201_v52 = vrot.slane %v200_v41, 1  ;;  %v89_v53 = vmax.f32 %v41_v36, %v45_v37 }
  0x28   :  { %v403_v54 = vsel %vm395_vm2, %v339_v40, %v402_v51  ;;  %v195_v55 = vmax.f32 %v193_v33, %v194_v44  ;;  %v208_v56 = vrot.slane %v207_v45, 1  ;;  %v214_v57 = vmax.f32 %v212_v35, %v213_v46 }
  0x29   :  { %v404_v58 = vsel %vm397_vm3, %v340_v50, %v403_v54  ;;  %v202_v59 = vmax.f32 %v200_v41, %v201_v52  ;;  %v90_v60 = vmax.f32 %v42_v42, %v46_v47  ;;  %v91_v61 = vmax.f32 %v43_v43, %v47_v48 }
  0x2a   :  { %430 = vst [vmem:[%s723_s1 + $0x8] sm:$0xf] %v404_v58  ;;  %v209_v0 = vmax.f32 %v207_v45, %v208_v56  ;;  %v215_v1 = vrot.slane %v214_v57, 1  ;;  %v341_v2 = vmax.f32 %v195_v55, 0.0  ;;  %v217_v3 = vsel %vm104_vm0, %v88_v49, -inf }
  0x2b   :  { %v342_v6 = vmax.f32 %v202_v59, 0.0  ;;  %v218_v7 = vrot.slane %v217_v3, 4  ;;  %v224_v8 = vsel %vm104_vm0, %v89_v53, -inf  ;;  %v231_v9 = vsel %vm104_vm0, %v90_v60, -inf  ;;  %v56_v58 = vld [vmem:[%s722_s0 + $0x60] sm:$0x3] }
  0x2c   :  { %v216_v11 = vmax.f32 %v214_v57, %v215_v1  ;;  %v343_v12 = vmax.f32 %v209_v0, 0.0  ;;  %v225_v13 = vrot.slane %v224_v8, 4  ;;  %v232_v14 = vrot.slane %v231_v9, 4  ;;  %v60_v59 = vld [vmem:[%s722_s0 + $0x68] sm:$0x3] }
  0x2d   :  { %v405_v16 = vsel %vm393_vm1, %v342_v6, %v341_v2  ;;  %v219_v17 = vmax.f32 %v217_v3, %v218_v7  ;;  %v238_v18 = vsel %vm104_vm0, %v91_v61, -inf  ;;  %v92_v21 = vmax.f32 %v48_v62, %v52_v63  ;;  %v57_v0 = vld [vmem:[%s722_s0 + $0x62] sm:$0x3]  ;;  %v61_v1 = vld [vmem:[%s722_s0 + $0x6a] sm:$0x3] }
  0x2e   :  { %v344_v22 = vmax.f32 %v216_v11, 0.0  ;;  %v406_v23 = vsel %vm395_vm2, %v343_v12, %v405_v16  ;;  %v226_v24 = vmax.f32 %v224_v8, %v225_v13  ;;  %v233_v25 = vmax.f32 %v231_v9, %v232_v14  ;;  %v58_v6 = vld [vmem:[%s722_s0 + $0x64] sm:$0x3]  ;;  %v59_v7 = vld [vmem:[%s722_s0 + $0x66] sm:$0x3] }
  0x2f   :  { %v220_v26 = vrot.slane %v219_v17, 2  ;;  %v239_v27 = vrot.slane %v238_v18, 4  ;;  %v93_v28 = vmax.f32 %v49_v4, %v53_v10  ;;  %v94_v29 = vmax.f32 %v50_v5, %v54_v15  ;;  %v62_v11 = vld [vmem:[%s722_s0 + $0x6c] sm:$0x3]  ;;  %v63_v12 = vld [vmem:[%s722_s0 + $0x6e] sm:$0x3] }
  0x30   :  { %v407_v30 = vsel %vm397_vm3, %v344_v22, %v406_v23  ;;  %v227_v31 = vrot.slane %v226_v24, 2  ;;  %v234_v32 = vrot.slane %v233_v25, 2  ;;  %v95_v33 = vmax.f32 %v51_v19, %v55_v20 }
  0x31   :  { %431 = vst [vmem:[%s723_s1 + $0xc] sm:$0xf] %v407_v30  ;;  %v221_v34 = vmax.f32 %v219_v17, %v220_v26  ;;  %v240_v35 = vmax.f32 %v238_v18, %v239_v27  ;;  %v245_v36 = vsel %vm104_vm0, %v92_v21, -inf  ;;  %v252_v37 = vsel %vm104_vm0, %v93_v28, -inf  ;;  %v64_v30 = vld [vmem:[%s722_s0 + $0x70] sm:$0x3] }
  0x32   :  { %v228_v38 = vmax.f32 %v226_v24, %v227_v31  ;;  %v235_v39 = vmax.f32 %v233_v25, %v234_v32  ;;  %v246_v40 = vrot.slane %v245_v36, 4  ;;  %v253_v41 = vrot.slane %v252_v37, 4  ;;  %v65_v31 = vld [vmem:[%s722_s0 + $0x72] sm:$0x3] }
  0x33   :  { %v222_v42 = vrot.slane %v221_v34, 1  ;;  %v241_v43 = vrot.slane %v240_v35, 2  ;;  %v259_v44 = vsel %vm104_vm0, %v94_v29, -inf  ;;  %v266_v45 = vsel %vm104_vm0, %v95_v33, -inf }
  0x34   :  { %v229_v46 = vrot.slane %v228_v38, 1  ;;  %v236_v47 = vrot.slane %v235_v39, 1  ;;  %v247_v48 = vmax.f32 %v245_v36, %v246_v40  ;;  %v254_v49 = vmax.f32 %v252_v37, %v253_v41  ;;  %v66_v36 = vld [vmem:[%s722_s0 + $0x74] sm:$0x3]  ;;  %v68_v41 = vld [vmem:[%s722_s0 + $0x78] sm:$0x3] }
  0x35   :  { %v223_v50 = vmax.f32 %v221_v34, %v222_v42  ;;  %v242_v51 = vmax.f32 %v240_v35, %v241_v43  ;;  %v260_v52 = vrot.slane %v259_v44, 4  ;;  %v267_v53 = vrot.slane %v266_v45, 4  ;;  %v69_v42 = vld [vmem:[%s722_s0 + $0x7a] sm:$0x3] }
  0x36   :  { %v230_v54 = vmax.f32 %v228_v38, %v229_v46  ;;  %v237_v55 = vmax.f32 %v235_v39, %v236_v47  ;;  %v248_v56 = vrot.slane %v247_v48, 2  ;;  %v255_v57 = vrot.slane %v254_v49, 2  ;;  %v67_v47 = vld [vmem:[%s722_s0 + $0x76] sm:$0x3] }
  0x37   :  { %v243_v60 = vrot.slane %v242_v51, 1  ;;  %v345_v61 = vmax.f32 %v223_v50, 0.0  ;;  %v261_v62 = vmax.f32 %v259_v44, %v260_v52  ;;  %v268_v63 = vmax.f32 %v266_v45, %v267_v53  ;;  %v71_v53 = vld [vmem:[%s722_s0 + $0x7e] sm:$0x3] }
  0x38   :  { %v346_v2 = vmax.f32 %v230_v54, 0.0  ;;  %v347_v3 = vmax.f32 %v237_v55, 0.0  ;;  %v249_v4 = vmax.f32 %v247_v48, %v248_v56  ;;  %v256_v5 = vmax.f32 %v254_v49, %v255_v57  ;;  %v70_v48 = vld [vmem:[%s722_s0 + $0x7c] sm:$0x3] }
  0x39   :  { %v244_v8 = vmax.f32 %v242_v51, %v243_v60  ;;  %v262_v9 = vrot.slane %v261_v62, 2  ;;  %v269_v10 = vrot.slane %v268_v63, 2  ;;  %v96_v13 = vmax.f32 %v56_v58, %v60_v59 }
  0x3a   :  { %v408_v14 = vsel %vm393_vm1, %v346_v2, %v345_v61  ;;  %v250_v15 = vrot.slane %v249_v4, 1  ;;  %v257_v16 = vrot.slane %v256_v5, 1  ;;  %v97_v17 = vmax.f32 %v57_v0, %v61_v1 }
  0x3b   :  { %v348_v18 = vmax.f32 %v244_v8, 0.0  ;;  %v409_v19 = vsel %vm395_vm2, %v347_v3, %v408_v14  ;;  %v263_v20 = vmax.f32 %v261_v62, %v262_v9  ;;  %v270_v21 = vmax.f32 %v268_v63, %v269_v10 }
  0x3c   :  { %v251_v22 = vmax.f32 %v249_v4, %v250_v15  ;;  %v258_v23 = vmax.f32 %v256_v5, %v257_v16  ;;  %v98_v24 = vmax.f32 %v58_v6, %v62_v11  ;;  %v99_v25 = vmax.f32 %v59_v7, %v63_v12 }
  0x3d   :  { %v410_v26 = vsel %vm397_vm3, %v348_v18, %v409_v19  ;;  %v264_v27 = vrot.slane %v263_v20, 1  ;;  %v271_v28 = vrot.slane %v270_v21, 1  ;;  %v273_v29 = vsel %vm104_vm0, %v96_v13, -inf }
  0x3e   :  { %432 = vst [vmem:[%s723_s1 + $0x10] sm:$0xf] %v410_v26  ;;  %v349_v32 = vmax.f32 %v251_v22, 0.0  ;;  %v350_v33 = vmax.f32 %v258_v23, 0.0  ;;  %v274_v34 = vrot.slane %v273_v29, 4  ;;  %v280_v35 = vsel %vm104_vm0, %v97_v17, -inf }
  0x3f   :  { %v265_v37 = vmax.f32 %v263_v20, %v264_v27  ;;  %v272_v38 = vmax.f32 %v270_v21, %v271_v28  ;;  %v281_v39 = vrot.slane %v280_v35, 4  ;;  %v287_v40 = vsel %vm104_vm0, %v98_v24, -inf }
  0x40   :  { %v411_v43 = vsel %vm393_vm1, %v350_v33, %v349_v32  ;;  %v275_v44 = vmax.f32 %v273_v29, %v274_v34  ;;  %v288_v45 = vrot.slane %v287_v40, 4  ;;  %v294_v46 = vsel %vm104_vm0, %v99_v25, -inf }
  0x41   :  { %v351_v49 = vmax.f32 %v265_v37, 0.0  ;;  %v352_v50 = vmax.f32 %v272_v38, 0.0  ;;  %v282_v51 = vmax.f32 %v280_v35, %v281_v39  ;;  %v295_v52 = vrot.slane %v294_v46, 4 }
  0x42   :  { %v276_v54 = vrot.slane %v275_v44, 2  ;;  %v289_v55 = vmax.f32 %v287_v40, %v288_v45  ;;  %v100_v56 = vmax.f32 %v64_v30, %v68_v41  ;;  %v101_v57 = vmax.f32 %v65_v31, %v69_v42 }
  0x43   :  { %v412_v58 = vsel %vm395_vm2, %v351_v49, %v411_v43  ;;  %v283_v59 = vrot.slane %v282_v51, 2  ;;  %v296_v60 = vmax.f32 %v294_v46, %v295_v52  ;;  %v102_v61 = vmax.f32 %v66_v36, %v70_v48 }
  0x44   :  { %v413_v62 = vsel %vm397_vm3, %v352_v50, %v412_v58  ;;  %v277_v63 = vmax.f32 %v275_v44, %v276_v54  ;;  %v290_v0 = vrot.slane %v289_v55, 2  ;;  %v103_v1 = vmax.f32 %v67_v47, %v71_v53 }
  0x45   :  { %433 = vst [vmem:[%s723_s1 + $0x14] sm:$0xf] %v413_v62  ;;  %v284_v2 = vmax.f32 %v282_v51, %v283_v59  ;;  %v297_v3 = vrot.slane %v296_v60, 2  ;;  %v301_v4 = vsel %vm104_vm0, %v100_v56, -inf  ;;  %v308_v5 = vsel %vm104_vm0, %v101_v57, -inf }
  0x46   :  { %v278_v6 = vrot.slane %v277_v63, 1  ;;  %v291_v7 = vmax.f32 %v289_v55, %v290_v0  ;;  %v302_v8 = vrot.slane %v301_v4, 4  ;;  %v309_v9 = vrot.slane %v308_v5, 4 }
  0x47   :  { %v285_v10 = vrot.slane %v284_v2, 1  ;;  %v298_v11 = vmax.f32 %v296_v60, %v297_v3  ;;  %v315_v12 = vsel %vm104_vm0, %v102_v61, -inf  ;;  %v322_v13 = vsel %vm104_vm0, %v103_v1, -inf }
  0x48   :  { %v279_v14 = vmax.f32 %v277_v63, %v278_v6  ;;  %v292_v15 = vrot.slane %v291_v7, 1  ;;  %v303_v16 = vmax.f32 %v301_v4, %v302_v8  ;;  %v310_v17 = vmax.f32 %v308_v5, %v309_v9 }
  0x49   :  { %v286_v18 = vmax.f32 %v284_v2, %v285_v10  ;;  %v299_v19 = vrot.slane %v298_v11, 1  ;;  %v316_v20 = vrot.slane %v315_v12, 4  ;;  %v323_v21 = vrot.slane %v322_v13, 4 }
  0x4a   :  { %v293_v22 = vmax.f32 %v291_v7, %v292_v15  ;;  %v353_v23 = vmax.f32 %v279_v14, 0.0  ;;  %v304_v24 = vrot.slane %v303_v16, 2  ;;  %v311_v25 = vrot.slane %v310_v17, 2 }
  0x4b   :  { %v300_v26 = vmax.f32 %v298_v11, %v299_v19  ;;  %v354_v27 = vmax.f32 %v286_v18, 0.0  ;;  %v317_v28 = vmax.f32 %v315_v12, %v316_v20  ;;  %v324_v29 = vmax.f32 %v322_v13, %v323_v21 }
  0x4c   :  { %v355_v30 = vmax.f32 %v293_v22, 0.0  ;;  %v305_v31 = vmax.f32 %v303_v16, %v304_v24  ;;  %v312_v32 = vmax.f32 %v310_v17, %v311_v25 }
  0x4d   :  { %v356_v33 = vmax.f32 %v300_v26, 0.0  ;;  %v414_v34 = vsel %vm393_vm1, %v354_v27, %v353_v23  ;;  %v318_v35 = vrot.slane %v317_v28, 2  ;;  %v325_v36 = vrot.slane %v324_v29, 2 }
  0x4e   :  { %v415_v37 = vsel %vm395_vm2, %v355_v30, %v414_v34  ;;  %v306_v38 = vrot.slane %v305_v31, 1  ;;  %v313_v39 = vrot.slane %v312_v32, 1 }
  0x4f   :  { %v416_v40 = vsel %vm397_vm3, %v356_v33, %v415_v37  ;;  %v319_v41 = vmax.f32 %v317_v28, %v318_v35  ;;  %v326_v42 = vmax.f32 %v324_v29, %v325_v36 }
  0x50   :  { %434 = vst [vmem:[%s723_s1 + $0x18] sm:$0xf] %v416_v40  ;;  %v307_v43 = vmax.f32 %v305_v31, %v306_v38  ;;  %v314_v44 = vmax.f32 %v312_v32, %v313_v39 }
  0x51   :  { %v320_v45 = vrot.slane %v319_v41, 1  ;;  %v327_v46 = vrot.slane %v326_v42, 1 }
  0x52   :  { %v357_v47 = vmax.f32 %v307_v43, 0.0  ;;  %v358_v48 = vmax.f32 %v314_v44, 0.0 }
  0x53   :  { %v321_v49 = vmax.f32 %v319_v41, %v320_v45  ;;  %v328_v50 = vmax.f32 %v326_v42, %v327_v46 }
  0x54   :  { %v417_v51 = vsel %vm393_vm1, %v358_v48, %v357_v47 }
  0x55   :  { %v359_v52 = vmax.f32 %v321_v49, 0.0  ;;  %v360_v53 = vmax.f32 %v328_v50, 0.0 }
  0x57   :  { %v418_v54 = vsel %vm395_vm2, %v359_v52, %v417_v51 }
  0x58   :  { %v419_v55 = vsel %vm397_vm3, %v360_v53, %v418_v54 }
  0x59   :  { %435 = vst [vmem:[%s723_s1 + $0x1c] sm:$0xf] %v419_v55 }

// kernel: vgg16_forward.19
= control target key start
LH: loop header
LB: loop body
LE: loop exit
PB: predicated region body
PF: predicated region fallthrough
CT: control target
= control target key end

     0   :  { %s1370_s12 = smov 0   ;;  %s1372_s13 = smov 0   ;;  %s1708_s0 = inlined_call_operand.vmem [shape: bf16[128,1152], index: 0, kind: input, shape index: {}]   ;;  %s1709_s1 = inlined_call_operand.vmem [shape: bf16[1152,128], index: 1, kind: input, shape index: {}]   ;;  %s1710_s2 = inlined_call_operand.vmem [shape: f32[1,128], index: 2, kind: input, shape index: {}]   ;;  %s1711_s3 = inlined_call_operand.vmem [shape: f32[128,128], index: 3, kind: output, shape index: {}]  }
   0x1   :  { %s1374_s14 = smov 0   ;;  %s1376_s15 = smov 0  }
   0x2   :  { %s1378_s16 = smov 0  }
   0x3 LB: > { %s25_s17 = sadd.s32 1, %s1343_s15  ;;  %p48_p1 = scmp.ne.s32.totalorder %s1335_s13, %s1331_s12  ;;  %s1347_s16 = sphi %s1378_s16, %s13_s16   ;;  %s1343_s15 = sphi %s1376_s15, %s1715_s15   ;;  %s1339_s14 = sphi %s1374_s14, %s1714_s14   ;;  %s1335_s13 = sphi %s1372_s13, %s1713_s13   ;;  %s1331_s12 = sphi %s1370_s12, %s1712_s12  }
   0x4   : > { %p26_p0 = scmp.ge.s32.totalorder %s25_s17, 3  ;;  %p49_p2 = scmp.eq.s32.totalorder %s1347_s16, 0 }
   0x5   : > { %s41_s19 = sadd.s32 1, %s1335_s13  ;;  %p1078_p5 = scmp.ge.s32.totalorder %s1347_s16, 3 }
   0x6   : > { %s1717_s17 = smov (%p26_p0, %s25_s17), 0  ;;  %p50_p3 = por %p49_p2, %p48_p1 }
   0x7   : > { %s37_s18 = ssub.s32 %s1343_s15, %s1717_s17  ;;  %162 = sbr.rel (%p1078_p5) target bundleno = 49 (0x31), region = 20 }
   0x8   : > { %p39_p4 = scmp.eq.s32.totalorder %s37_s18, 0 }
   0xa   : > { %s1405_s20 = scalar_select %p39_p4, %s1335_s13, %s41_s19  }
   0xc   : > { %165 = sbr.rel (!%p50_p3) target bundleno = 49 (0x31), region = 24  ;;  %s167_s21 = sand.u32 (%p50_p3), 1, %s1335_s13  }
   0xd   : > { %s1216_s22 = smul.u32 (%p50_p3), 12, %s1343_s15 }
   0xe   : > { %s1265_s23 = smul.u32 (%p50_p3), 192, %s167_s21 }
   0xf   : > { %s1413_s26 = scalar_lea.vmem (%p50_p3), %s1708_s0, %s1216_s22 }
  0x10   : > { %v190_v0 = vld [vmem:[%s1413_s26] sm:$0xff] (%p50_p3)  ;;  %v194_v2 = vld [vmem:[%s1413_s26 + $0x48] sm:$0xff] (%p50_p3)  ;;  %s1418_s27 = scalar_lea.vmem (%p50_p3), [#allocation3], %s1265_s23  ;;  %v198_v4 = vld [vmem:[%s1413_s26 + $0x90] sm:$0xff] (%p50_p3) }
  0x11   : > { %v192_v1 = vld [vmem:[%s1413_s26 + $0x24] sm:$0xff]  ;;  %191 = vst [vmem:[%s1418_s27] sm:$0xff] %v190_v0  ;;  %v196_v3 = vld [vmem:[%s1413_s26 + $0x6c] sm:$0xff]  ;;  %v200_v5 = vld [vmem:[%s1413_s26 + $0xb4] sm:$0xff] }
  0x12   : > { %193 = vst [vmem:[%s1418_s27 + $0xc] sm:$0xff] %v192_v1  ;;  %v202_v6 = vld [vmem:[%s1413_s26 + $0xd8] sm:$0xff]  ;;  %v206_v8 = vld [vmem:[%s1413_s26 + $0x120] sm:$0xff]  ;;  %v210_v10 = vld [vmem:[%s1413_s26 + $0x168] sm:$0xff] }
  0x13   : > { %195 = vst [vmem:[%s1418_s27 + $0x18] sm:$0xff] %v194_v2  ;;  %v204_v7 = vld [vmem:[%s1413_s26 + $0xfc] sm:$0xff]  ;;  %v208_v9 = vld [vmem:[%s1413_s26 + $0x144] sm:$0xff]  ;;  %v212_v11 = vld [vmem:[%s1413_s26 + $0x18c] sm:$0xff] }
  0x14   : > { %197 = vst [vmem:[%s1418_s27 + $0x24] sm:$0xff] %v196_v3  ;;  %v214_v12 = vld [vmem:[%s1413_s26 + $0x1b0] sm:$0xff]  ;;  %v218_v14 = vld [vmem:[%s1413_s26 + $0x1f8] sm:$0xff]  ;;  %v1080_v16 = vld [vmem:[%s1413_s26 + $0x8] sm:$0xf] }
  0x15   : > { %199 = vst [vmem:[%s1418_s27 + $0x30] sm:$0xff] %v198_v4  ;;  %v216_v13 = vld [vmem:[%s1413_s26 + $0x1d4] sm:$0xff]  ;;  %v220_v15 = vld [vmem:[%s1413_s26 + $0x21c] sm:$0xff]  ;;  %v1082_v17 = vld [vmem:[%s1413_s26 + $0x2c] sm:$0xf] }
  0x16   : > { %201 = vst [vmem:[%s1418_s27 + $0x3c] sm:$0xff] %v200_v5  ;;  %v1084_v18 = vld [vmem:[%s1413_s26 + $0x50] sm:$0xf]  ;;  %v1086_v19 = vld [vmem:[%s1413_s26 + $0x74] sm:$0xf] }
  0x17   : > { %203 = vst [vmem:[%s1418_s27 + $0x48] sm:$0xff] %v202_v6  ;;  %v1088_v20 = vld [vmem:[%s1413_s26 + $0x98] sm:$0xf]  ;;  %v1090_v21 = vld [vmem:[%s1413_s26 + $0xbc] sm:$0xf] }
  0x18   : > { %205 = vst [vmem:[%s1418_s27 + $0x54] sm:$0xff] %v204_v7  ;;  %v1092_v22 = vld [vmem:[%s1413_s26 + $0xe0] sm:$0xf]  ;;  %v1094_v23 = vld [vmem:[%s1413_s26 + $0x104] sm:$0xf] }
  0x19   : > { %207 = vst [vmem:[%s1418_s27 + $0x60] sm:$0xff] %v206_v8  ;;  %v1096_v24 = vld [vmem:[%s1413_s26 + $0x128] sm:$0xf]  ;;  %v1098_v25 = vld [vmem:[%s1413_s26 + $0x14c] sm:$0xf] }
  0x1a   : > { %209 = vst [vmem:[%s1418_s27 + $0x6c] sm:$0xff] %v208_v9  ;;  %v1100_v26 = vld [vmem:[%s1413_s26 + $0x170] sm:$0xf]  ;;  %v1102_v27 = vld [vmem:[%s1413_s26 + $0x194] sm:$0xf] }
  0x1b   : > { %211 = vst [vmem:[%s1418_s27 + $0x78] sm:$0xff] %v210_v10  ;;  %v1104_v28 = vld [vmem:[%s1413_s26 + $0x1b8] sm:$0xf]  ;;  %v1106_v29 = vld [vmem:[%s1413_s26 + $0x1dc] sm:$0xf] }
  0x1c   : > { %213 = vst [vmem:[%s1418_s27 + $0x84] sm:$0xff] %v212_v11  ;;  %v1108_v30 = vld [vmem:[%s1413_s26 + $0x200] sm:$0xf]  ;;  %v1110_v31 = vld [vmem:[%s1413_s26 + $0x224] sm:$0xf] }
  0x1d   : > { %215 = vst [vmem:[%s1418_s27 + $0x90] sm:$0xff] %v214_v12 }
  0x1e   : > { %217 = vst [vmem:[%s1418_s27 + $0x9c] sm:$0xff] %v216_v13 }
  0x1f   : > { %219 = vst [vmem:[%s1418_s27 + $0xa8] sm:$0xff] %v218_v14 }
  0x20   : > { %221 = vst [vmem:[%s1418_s27 + $0xb4] sm:$0xff] %v220_v15 }
  0x21   : > { %1081 = vst [vmem:[%s1418_s27 + $0x8] sm:$0xf] %v1080_v16 }
  0x22   : > { %1083 = vst [vmem:[%s1418_s27 + $0x14] sm:$0xf] %v1082_v17 }
  0x23   : > { %1085 = vst [vmem:[%s1418_s27 + $0x20] sm:$0xf] %v1084_v18 }
  0x24   : > { %1087 = vst [vmem:[%s1418_s27 + $0x2c] sm:$0xf] %v1086_v19 }
  0x25   : > { %1089 = vst [vmem:[%s1418_s27 + $0x38] sm:$0xf] %v1088_v20 }
  0x26   : > { %1091 = vst [vmem:[%s1418_s27 + $0x44] sm:$0xf] %v1090_v21 }
  0x27   : > { %1093 = vst [vmem:[%s1418_s27 + $0x50] sm:$0xf] %v1092_v22 }
  0x28   : > { %1095 = vst [vmem:[%s1418_s27 + $0x5c] sm:$0xf] %v1094_v23 }
  0x29   : > { %1097 = vst [vmem:[%s1418_s27 + $0x68] sm:$0xf] %v1096_v24 }
  0x2a   : > { %1099 = vst [vmem:[%s1418_s27 + $0x74] sm:$0xf] %v1098_v25 }
  0x2b   : > { %1101 = vst [vmem:[%s1418_s27 + $0x80] sm:$0xf] %v1100_v26 }
  0x2c   : > { %1103 = vst [vmem:[%s1418_s27 + $0x8c] sm:$0xf] %v1102_v27 }
  0x2d   : > { %1105 = vst [vmem:[%s1418_s27 + $0x98] sm:$0xf] %v1104_v28 }
  0x2e   : > { %1107 = vst [vmem:[%s1418_s27 + $0xa4] sm:$0xf] %v1106_v29 }
  0x2f   : > { %1109 = vst [vmem:[%s1418_s27 + $0xb0] sm:$0xf] %v1108_v30 }
  0x30   : > { %1111 = vst [vmem:[%s1418_s27 + $0xbc] sm:$0xf] %v1110_v31 }
  0x31 PF: > { %p1112_p6 = scmp.ge.s32.totalorder %s1347_s16, 1  ;;  %p278_p7 = scmp.lt.s32.totalorder %s1347_s16, 4 }
  0x33   : > { %p279_p8 = pnand %p1112_p6, %p278_p7 }
  0x34   : > { %s285_s28 = sand.u32 (!%p279_p8), 1, %s1331_s12   ;;  %s324_s29 = smul.u32 (!%p279_p8), 48, %s1339_s14 }
  0x35   : > { %282 = sbr.rel (%p279_p8) target bundleno = 358 (0x166), region = 54  ;;  %p1114_p10 = scmp.ne.s32.totalorder (!%p279_p8), %s1339_s14, 0 }
  0x36   : > { %s1266_s30 = smul.u32 (!%p279_p8), 192, %s285_s28  ;;  %p325_p9 = scmp.lt.s32.totalorder (!%p279_p8), %s324_s29, 143 }
  0x38   : > { %s1490_s8 = scalar_lea.vmem (!%p279_p8), [#allocation3], %s1266_s30 }
  0x3a   : > { %s1719_s29 = smov (!%p325_p9, %s324_s29), 143  ;;  %348 = sbr.rel (%p1114_p10) target bundleno = 80 (0x50), region = 62 }
  0x3b   : > { %s1113_s4 = sshll.u32 %s1719_s29, 2 }
  0x3c   : > { %s1488_s7 = scalar_lea.vmem %s1709_s1, %s1113_s4 }
  0x3f   : > { %v1349_v32 = vmov 0.0  }
  0x40   : > { %349 = vst [vmem:[#allocation2 + $0x30] sm:$0xff] %v1349_v32 }
  0x41   : > { %350 = vst [vmem:[#allocation2] sm:$0xff] %v1349_v32 }
  0x42   : > { %351 = vst [vmem:[#allocation2 + $0x58] sm:$0xff] %v1349_v32 }
  0x43   : > { %352 = vst [vmem:[#allocation2 + $0x18] sm:$0xff] %v1349_v32 }
  0x44   : > { %353 = vst [vmem:[#allocation2 + $0x50] sm:$0xff] %v1349_v32 }
  0x45   : > { %354 = vst [vmem:[#allocation2 + $0x68] sm:$0xff] %v1349_v32 }
  0x46   : > { %355 = vst [vmem:[#allocation2 + $0x8] sm:$0xff] %v1349_v32 }
  0x47   : > { %356 = vst [vmem:[#allocation2 + $0x48] sm:$0xff] %v1349_v32 }
  0x48   : > { %357 = vst [vmem:[#allocation2 + $0x40] sm:$0xff] %v1349_v32 }
  0x49   : > { %358 = vst [vmem:[#allocation2 + $0x20] sm:$0xff] %v1349_v32 }
  0x4a   : > { %359 = vst [vmem:[#allocation2 + $0x10] sm:$0xff] %v1349_v32 }
  0x4b   : > { %360 = vst [vmem:[#allocation2 + $0x38] sm:$0xff] %v1349_v32 }
  0x4c   : > { %361 = vst [vmem:[#allocation2 + $0x60] sm:$0xff] %v1349_v32 }
  0x4d   : > { %362 = vst [vmem:[#allocation2 + $0x70] sm:$0xff] %v1349_v32 }
  0x4e   : > { %363 = vst [vmem:[#allocation2 + $0x78] sm:$0xff] %v1349_v32 }
  0x4f   : > { %364 = vst [vmem:[#allocation2 + $0x28] sm:$0xff] %v1349_v32 }
  0x50 PF: > { %v1224_v33 = vld [vmem:[%s1488_s7 + $0x38] sm:$0xff]  ;;  %v1223_v36 = vld [vmem:[%s1488_s7 + $0x30] sm:$0xff]  ;;  %v1222_v39 = vld [vmem:[%s1488_s7 + $0x28] sm:$0xff]  ;;  %p1211_p11 = scmp.ne.s32.totalorder %s1339_s14, 2 }
  0x51   : > { %v1495_v34 = vld [vmem:[%s1488_s7 + $0x78] sm:$0xff]  ;;  %725 = vmatpush.bf16.msra.mxu0 %v1224_v33  ;;  %1241 = vmatpush.bf16.msra.mxu3 %v1224_v33  ;;  %v1504_v37 = vld [vmem:[%s1488_s7 + $0x70] sm:$0xff]  ;;  %v1513_v40 = vld [vmem:[%s1488_s7 + $0x68] sm:$0xff] }
  0x52   : > { %v1498_v35 = vld [vmem:[%s1488_s7 + $0xb8] sm:$0xff]  ;;  %774 = vmatpush.bf16.msra.mxu1 %v1495_v34  ;;  %v1507_v38 = vld [vmem:[%s1488_s7 + $0xb0] sm:$0xff]  ;;  %v1516_v41 = vld [vmem:[%s1488_s7 + $0xa8] sm:$0xff] }
  0x53   : > { %823 = vmatpush.bf16.msra.mxu2 %v1498_v35  ;;  %v1221_v42 = vld [vmem:[%s1488_s7 + $0x20] sm:$0xff]  ;;  %v1220_v45 = vld [vmem:[%s1488_s7 + $0x18] sm:$0xff]  ;;  %v1219_v48 = vld [vmem:[%s1488_s7 + $0x10] sm:$0xff] }
  0x54   : > { %v1522_v43 = vld [vmem:[%s1488_s7 + $0x60] sm:$0xff]  ;;  %v1531_v46 = vld [vmem:[%s1488_s7 + $0x58] sm:$0xff]  ;;  %v1538_v49 = vld [vmem:[%s1488_s7 + $0x50] sm:$0xff] }
  0x55   : > { %726 = vmatpush.bf16.msra.mxu0 %v1223_v36  ;;  %1242 = vmatpush.bf16.msra.mxu3 %v1223_v36  ;;  %v1525_v44 = vld [vmem:[%s1488_s7 + $0xa0] sm:$0xff]  ;;  %v1534_v47 = vld [vmem:[%s1488_s7 + $0x98] sm:$0xff]  ;;  %v367_v51 = vld [vmem:[%s1490_s8 + $0xc] sm:$0xff] }
  0x56   : > { %775 = vmatpush.bf16.msra.mxu1 %v1504_v37  ;;  %v365_v50 = vld [vmem:[%s1490_s8] sm:$0xff]  ;;  %v1543_v52 = vld [vmem:[%s1490_s8 + $0x90] sm:$0xff]  ;;  %v366_v55 = vld [vmem:[%s1490_s8 + $0x8] sm:$0xf]  ;;  %v400_v58 = vunpack.c.l.bf16 %v367_v51  ;;  %v401_v63 = vunpack.c.h.bf16 %v367_v51 }
  0x57   : > { %824 = vmatpush.bf16.msra.mxu2 %v1507_v38  ;;  %v1546_v53 = vld [vmem:[%s1490_s8 + $0x9c] sm:$0xff]  ;;  %v1551_v54 = vld [vmem:[%s1488_s7 + $0x90] sm:$0xff]  ;;  %v397_v57 = vunpack.c.l.bf16 %v365_v50  ;;  %v433_v59 = vunpack.c.l.bf16 %v1543_v52  ;;  %v1218_v61 = vld [vmem:[%s1488_s7 + $0x8] sm:$0xff]  ;;  %v398_v62 = vunpack.c.h.bf16 %v365_v50  ;;  %v399_v0 = vunpack.c.l.bf16 %v366_v55 }
  0x58   : > { %v368_v56 = vld [vmem:[%s1490_s8 + $0x14] sm:$0xf]  ;;  %v436_v60 = vunpack.c.l.bf16 %v1546_v53  ;;  %v1561_v2 = vld [vmem:[%s1488_s7 + $0x48] sm:$0xff]  ;;  %v448_v5 = vmax.f32 %v400_v58, 0.0  ;;  %v1217_v8 = vld [vmem:[%s1488_s7] sm:$0xff]  ;;  %v449_v10 = vmax.f32 %v401_v63, 0.0 }
  0x59   : > { %727 = vmatpush.bf16.msra.mxu0 %v1222_v39  ;;  %1243 = vmatpush.bf16.msra.mxu3 %v1222_v39  ;;  %v402_v1 = vunpack.c.l.bf16 %v368_v56  ;;  %v1564_v3 = vld [vmem:[%s1488_s7 + $0x88] sm:$0xff]  ;;  %v445_v4 = vmax.f32 %v397_v57, 0.0  ;;  %v481_v6 = vmax.f32 %v433_v59, 0.0  ;;  %v446_v9 = vmax.f32 %v398_v62, 0.0  ;;  %v1570_v13 = vld [vmem:[%s1488_s7 + $0x40] sm:$0xff]  ;;  %v369_v19 = vld [vmem:[%s1490_s8 + $0x18] sm:$0xff] }
  0x5a   : > { %776 = vmatpush.bf16.msra.mxu1 %v1513_v40  ;;  %v484_v7 = vmax.f32 %v436_v60, 0.0  ;;  %v447_v11 = vmax.f32 %v399_v0, 0.0  ;;  %v1573_v14 = vld [vmem:[%s1488_s7 + $0x80] sm:$0xff]  ;;  %v1581_v21 = vld [vmem:[%s1490_s8 + $0xa8] sm:$0xff]  ;;  %v1584_v22 = vld [vmem:[%s1490_s8 + $0xb4] sm:$0xff]  ;;  %v403_v25 = vunpack.c.l.bf16 %v369_v19  ;;  %v404_v29 = vunpack.c.h.bf16 %v369_v19 }
  0x5b   : > { %825 = vmatpush.bf16.msra.mxu2 %v1516_v41  ;;  %v450_v12 = vmax.f32 %v402_v1, 0.0  ;;  %v493_v15 = vpack.c.bf16 %v448_v5, %v445_v4  ;;  %v494_v17 = vpack.c.bf16 %v449_v10, %v446_v9  ;;  %v371_v20 = vld [vmem:[%s1490_s8 + $0x24] sm:$0xff]  ;;  %v370_v23 = vld [vmem:[%s1490_s8 + $0x20] sm:$0xf]  ;;  %v372_v24 = vld [vmem:[%s1490_s8 + $0x2c] sm:$0xf]  ;;  %v439_v27 = vunpack.c.l.bf16 %v1581_v21 }
  0x5c   : > { %v511_v16 = vpack.c.bf16 %v484_v7, %v481_v6  ;;  %v406_v26 = vunpack.c.l.bf16 %v371_v20  ;;  %v442_v28 = vunpack.c.l.bf16 %v1584_v22  ;;  %v407_v30 = vunpack.c.h.bf16 %v371_v20  ;;  %v375_v57 = vld [vmem:[%s1490_s8 + $0x3c] sm:$0xff]  ;;  %v374_v58 = vld [vmem:[%s1490_s8 + $0x38] sm:$0xf]  ;;  %v376_v59 = vld [vmem:[%s1490_s8 + $0x44] sm:$0xf] }
  0x5d   : > { %728 = vmatpush.bf16.msra.mxu0 %v1221_v42  ;;  %1244 = vmatpush.bf16.msra.mxu3 %v1221_v42  ;;  %v495_v18 = vpack.c.bf16 %v450_v12, %v447_v11  ;;  %v405_v31 = vunpack.c.l.bf16 %v370_v23  ;;  %v408_v32 = vunpack.c.l.bf16 %v372_v24  ;;  %v451_v33 = vmax.f32 %v403_v25, 0.0  ;;  %v377_v12 = vld [vmem:[%s1490_s8 + $0x48] sm:$0xff] }
  0x5e   : > { %777 = vmatpush.bf16.msra.mxu1 %v1522_v43  ;;  %v487_v36 = vmax.f32 %v439_v27, 0.0  ;;  %v490_v39 = vmax.f32 %v442_v28, 0.0  ;;  %v452_v42 = vmax.f32 %v404_v29, 0.0  ;;  %v434_v60 = vunpack.c.h.bf16 %v1543_v52 }
  0x5f   : > { %826 = vmatpush.bf16.msra.mxu2 %v1525_v44  ;;  %v412_v62 = vunpack.c.l.bf16 %v375_v57  ;;  %v413_v0 = vunpack.c.h.bf16 %v375_v57  ;;  %v411_v1 = vunpack.c.l.bf16 %v374_v58  ;;  %v443_v20 = vunpack.c.h.bf16 %v1584_v22 }
  0x60   : > { %v514_v51 = vpack.c.bf16 %v490_v39, %v487_v36  ;;  %v482_v6 = vmax.f32 %v434_v60, 0.0  ;;  %v416_v23 = vunpack.c.h.bf16 %v377_v12  ;;  %v383_v36 = vld [vmem:[%s1490_s8 + $0x6c] sm:$0xff]  ;;  %v390_v39 = vld [vmem:[%s1490_s8 + $0x98] sm:$0xf] }
  0x61   : > { %729 = vmatpush.bf16.msra.mxu0 %v1220_v45  ;;  %1245 = vmatpush.bf16.msra.mxu3 %v1220_v45  ;;  %v453_v45 = vmax.f32 %v405_v31, 0.0  ;;  %v460_v5 = vmax.f32 %v412_v62, 0.0  ;;  %v459_v52 = vmax.f32 %v411_v1, 0.0  ;;  %v491_v29 = vmax.f32 %v443_v20, 0.0 }
  0x62   : > { %778 = vmatpush.bf16.msra.mxu1 %v1531_v46 }
  0x63   : > { %827 = vmatpush.bf16.msra.mxu2 %v1534_v47 }
  0x65   : > { %730 = vmatpush.bf16.msra.mxu0 %v1219_v48  ;;  %1246 = vmatpush.bf16.msra.mxu3 %v1219_v48  ;;  %v456_v48 = vmax.f32 %v408_v32, 0.0 }
  0x66   : > { %779 = vmatpush.bf16.msra.mxu1 %v1538_v49 }
  0x67   : > { %828 = vmatpush.bf16.msra.mxu2 %v1551_v54  ;;  %v498_v56 = vpack.c.bf16 %v456_v48, %v453_v45  ;;  %v384_v45 = vld [vmem:[%s1490_s8 + $0x74] sm:$0xf]  ;;  %v424_v48 = vunpack.c.l.bf16 %v383_v36 }
  0x69   : > { %731 = vmatpush.bf16.msra.mxu0 %v1218_v61  ;;  %1247 = vmatpush.bf16.msra.mxu3 %v1218_v61  ;;  %v472_v58 = vmax.f32 %v424_v48, 0.0 }
  0x6a   : > { %780 = vmatpush.bf16.msra.mxu1 %v1561_v2 }
  0x6b   : > { %829 = vmatpush.bf16.msra.mxu2 %v1564_v3 }
  0x6d   : > { %732 = vmatpush.bf16.msra.mxu0 %v1217_v8  ;;  %1248 = vmatpush.bf16.msra.mxu3 %v1217_v8 }
  0x6e   : > { %781 = vmatpush.bf16.msra.mxu1 %v1570_v13 }
  0x6f   : > { %830 = vmatpush.bf16.msra.mxu2 %v1573_v14 }
  0x70   : > { %733 = vmatmul.bf16.vlgmr.msra.gmra.mxu0 %v493_v15  ;;  %763 = vmatmul.bf16.vlgmr.msra.gmra.mxu3 %v511_v16  ;;  %v379_v15 = vld [vmem:[%s1490_s8 + $0x54] sm:$0xff]  ;;  %v378_v16 = vld [vmem:[%s1490_s8 + $0x50] sm:$0xf] }
  0x71   : > { %1249 = vmatpush.bf16.msrb.mxu3 %v1495_v34  ;;  %782 = vmatmul.bf16.vlgmr.msra.gmra.mxu1 %v494_v17  ;;  %v454_v34 = vmax.f32 %v406_v26, 0.0  ;;  %v380_v17 = vld [vmem:[%s1490_s8 + $0x5c] sm:$0xf]  ;;  %v418_v19 = vunpack.c.l.bf16 %v379_v15  ;;  %v417_v24 = vunpack.c.l.bf16 %v378_v16 }
  0x72   : > { %831 = vmatmul.bf16.vlgmr.msra.gmra.mxu2 %v495_v18  ;;  %v415_v18 = vunpack.c.l.bf16 %v377_v12  ;;  %v420_v25 = vunpack.c.l.bf16 %v380_v17 }
  0x73   : > { %v496_v50 = vpack.c.bf16 %v454_v34, %v451_v33  ;;  %v466_v27 = vmax.f32 %v418_v19, 0.0  ;;  %v465_v31 = vmax.f32 %v417_v24, 0.0  ;;  %v381_v34 = vld [vmem:[%s1490_s8 + $0x60] sm:$0xff] }
  0x74   : > { %v463_v26 = vmax.f32 %v415_v18, 0.0 }
  0x75   : > { %1250 = vmatpush.bf16.msrb.mxu3 %v1504_v37  ;;  %v455_v37 = vmax.f32 %v407_v30, 0.0 }
  0x76   : > { %v502_v22 = vpack.c.bf16 %v466_v27, %v463_v26 }
  0x77   : > { %v497_v55 = vpack.c.bf16 %v455_v37, %v452_v42  ;;  %v392_v42 = vld [vmem:[%s1490_s8 + $0xa4] sm:$0xf]  ;;  %v382_v37 = vld [vmem:[%s1490_s8 + $0x68] sm:$0xf] }
  0x79   : > { %1251 = vmatpush.bf16.msrb.mxu3 %v1513_v40  ;;  %v373_v40 = vld [vmem:[%s1490_s8 + $0x30] sm:$0xff] }
  0x7a   : > { %v409_v61 = vunpack.c.l.bf16 %v373_v40  ;;  %v410_v63 = vunpack.c.h.bf16 %v373_v40  ;;  %v423_v40 = vunpack.c.l.bf16 %v382_v37 }
  0x7c   : > { %v457_v4 = vmax.f32 %v409_v61, 0.0  ;;  %v458_v8 = vmax.f32 %v410_v63, 0.0  ;;  %v471_v61 = vmax.f32 %v423_v40, 0.0 }
  0x7d   : > { %1252 = vmatpush.bf16.msrb.mxu3 %v1522_v43  ;;  %v437_v43 = vunpack.c.h.bf16 %v1546_v53 }
  0x7e   : > { %v499_v9 = vpack.c.bf16 %v460_v5, %v457_v4  ;;  %v387_v4 = vld [vmem:[%s1490_s8 + $0x84] sm:$0xff]  ;;  %v394_v5 = vld [vmem:[%s1490_s8 + $0xb0] sm:$0xf] }
  0x7f   : > { %v485_v7 = vmax.f32 %v437_v43, 0.0 }
  0x80   : > { %738 = vmatmul.bf16.gmra.mxu0 %v496_v50  ;;  %768 = vmatmul.bf16.gmra.mxu3 %v514_v51  ;;  %v435_v50 = vunpack.c.l.bf16 %v390_v39  ;;  %v438_v51 = vunpack.c.l.bf16 %v392_v42 }
  0x81   : > { %1253 = vmatpush.bf16.msrb.mxu3 %v1531_v46  ;;  %787 = vmatmul.bf16.gmra.mxu1 %v497_v55  ;;  %v414_v46 = vunpack.c.l.bf16 %v376_v59  ;;  %v512_v10 = vpack.c.bf16 %v485_v7, %v482_v6  ;;  %v422_v55 = vunpack.c.h.bf16 %v381_v34  ;;  %v396_v6 = vld [vmem:[%s1490_s8 + $0xbc] sm:$0xf]  ;;  %v386_v7 = vld [vmem:[%s1490_s8 + $0x80] sm:$0xf] }
  0x82   : > { %836 = vmatmul.bf16.gmra.mxu2 %v498_v56  ;;  %v425_v56 = vunpack.c.h.bf16 %v383_v36  ;;  %v483_v59 = vmax.f32 %v435_v50, 0.0  ;;  %v486_v60 = vmax.f32 %v438_v51, 0.0  ;;  %v519_v50 = vld [vmem:[#allocation2 + $0x58] sm:$0xff] }
  0x83   : > { %v462_v53 = vmax.f32 %v414_v46, 0.0  ;;  %v385_v46 = vld [vmem:[%s1490_s8 + $0x78] sm:$0xff] }
  0x84   : > { %v473_v43 = vmax.f32 %v425_v56, 0.0 }
  0x85   : > { %1254 = vmatpush.bf16.msrb.mxu3 %v1538_v49  ;;  %v461_v49 = vmax.f32 %v413_v0, 0.0  ;;  %v513_v0 = vpack.c.bf16 %v486_v60, %v483_v59  ;;  %v520_v59 = vld [vmem:[#allocation2 + $0x18] sm:$0xff] }
  0x87   : > { %v500_v11 = vpack.c.bf16 %v461_v49, %v458_v8  ;;  %v388_v8 = vld [vmem:[%s1490_s8 + $0x8c] sm:$0xf]  ;;  %v427_v49 = vunpack.c.l.bf16 %v385_v46 }
  0x89   : > { %1255 = vmatpush.bf16.msrb.mxu3 %v1561_v2  ;;  %v501_v2 = vpack.c.bf16 %v462_v53, %v459_v52  ;;  %v430_v52 = vunpack.c.l.bf16 %v387_v4  ;;  %v441_v53 = vunpack.c.l.bf16 %v394_v5  ;;  %v475_v12 = vmax.f32 %v427_v49, 0.0  ;;  %v522_v49 = vld [vmem:[#allocation2 + $0x68] sm:$0xff] }
  0x8b   : > { %v489_v16 = vmax.f32 %v441_v53, 0.0 }
  0x8d   : > { %1256 = vmatpush.bf16.msrb.mxu3 %v1570_v13  ;;  %v440_v13 = vunpack.c.h.bf16 %v1581_v21  ;;  %v468_v21 = vmax.f32 %v420_v25, 0.0 }
  0x8f   : > { %v488_v28 = vmax.f32 %v440_v13, 0.0 }
  0x90   : > { %743 = vmatmul.bf16.gmra.mxu0 %v499_v9  ;;  %812 = vmatmul.bf16.vlgmr.msrb.gmra.mxu3 %v512_v10  ;;  %v444_v9 = vunpack.c.l.bf16 %v396_v6  ;;  %v428_v10 = vunpack.c.h.bf16 %v385_v46 }
  0x91   : > { %1257 = vmatpush.bf16.msra.mxu3 %v1498_v35  ;;  %792 = vmatmul.bf16.gmra.mxu1 %v500_v11  ;;  %v419_v35 = vunpack.c.h.bf16 %v379_v15  ;;  %v515_v32 = vpack.c.bf16 %v491_v29, %v488_v28  ;;  %v429_v11 = vunpack.c.l.bf16 %v386_v7  ;;  %v478_v15 = vmax.f32 %v430_v52, 0.0 }
  0x92   : > { %841 = vmatmul.bf16.gmra.mxu2 %v501_v2  ;;  %v432_v2 = vunpack.c.l.bf16 %v388_v8  ;;  %v492_v17 = vmax.f32 %v444_v9, 0.0  ;;  %v476_v18 = vmax.f32 %v428_v10, 0.0 }
  0x93   : > { %v467_v30 = vmax.f32 %v419_v35, 0.0  ;;  %v477_v13 = vmax.f32 %v429_v11, 0.0 }
  0x94   : > { %v480_v20 = vmax.f32 %v432_v2, 0.0  ;;  %v516_v35 = vpack.c.bf16 %v492_v17, %v489_v16 }
  0x95   : > { %1258 = vmatpush.bf16.msra.mxu3 %v1507_v38  ;;  %v464_v38 = vmax.f32 %v416_v23, 0.0  ;;  %v508_v23 = vpack.c.bf16 %v478_v15, %v475_v12  ;;  %v523_v12 = vld [vmem:[#allocation2 + $0x8] sm:$0xff] }
  0x96   : > { %v510_v25 = vpack.c.bf16 %v480_v20, %v477_v13 }
  0x97   : > { %v503_v33 = vpack.c.bf16 %v467_v30, %v464_v38  ;;  %v517_v38 = vld [vmem:[#allocation2 + $0x30] sm:$0xff] }
  0x99   : > { %1259 = vmatpush.bf16.msra.mxu3 %v1516_v41  ;;  %v504_v41 = vpack.c.bf16 %v468_v21, %v465_v31 }
  0x9d   : > { %1260 = vmatpush.bf16.msra.mxu3 %v1525_v44  ;;  %v421_v44 = vunpack.c.l.bf16 %v381_v34  ;;  %v518_v34 = vld [vmem:[#allocation2] sm:$0xff] }
  0x9f   : > { %v469_v57 = vmax.f32 %v421_v44, 0.0 }
  0xa0   : > { %748 = vmatmul.bf16.gmra.mxu0 %v502_v22  ;;  %817 = vmatmul.bf16.gmra.mxu3 %v515_v32 }
  0xa1   : > { %1261 = vmatpush.bf16.msra.mxu3 %v1534_v47  ;;  %797 = vmatmul.bf16.gmra.mxu1 %v503_v33  ;;  %v426_v47 = vunpack.c.l.bf16 %v384_v45  ;;  %v505_v63 = vpack.c.bf16 %v472_v58, %v469_v57 }
  0xa2   : > { %846 = vmatmul.bf16.gmra.mxu2 %v504_v41 }
  0xa3   : > { %v474_v62 = vmax.f32 %v426_v47, 0.0 }
  0xa5   : > { %1262 = vmatpush.bf16.msra.mxu3 %v1551_v54  ;;  %v470_v54 = vmax.f32 %v422_v55, 0.0 }
  0xa7   : > { %v506_v1 = vpack.c.bf16 %v473_v43, %v470_v54 }
  0xa9   : > { %1263 = vmatpush.bf16.msra.mxu3 %v1564_v3  ;;  %v507_v3 = vpack.c.bf16 %v474_v62, %v471_v61 }
  0xad   : > { %1264 = vmatpush.bf16.msra.mxu3 %v1573_v14  ;;  %v431_v14 = vunpack.c.h.bf16 %v387_v4 }
  0xaf   : > { %v479_v19 = vmax.f32 %v431_v14, 0.0 }
  0xb0   : > { %753 = vmatmul.bf16.gmra.mxu0 %v505_v63  ;;  %861 = vmatmul.bf16.vlgmr.msra.gmra.mxu3 %v513_v0 }
  0xb1   : > { %802 = vmatmul.bf16.gmra.mxu1 %v506_v1  ;;  %v509_v24 = vpack.c.bf16 %v479_v19, %v476_v18  ;;  %v521_v1 = vld [vmem:[#allocation2 + $0x50] sm:$0xff] }
  0xb2   : > { %851 = vmatmul.bf16.gmra.mxu2 %v507_v3 }
  0xc0   : > { %758 = vmatmul.bf16.gmra.mxu0 %v508_v23  ;;  %866 = vmatmul.bf16.gmra.mxu3 %v516_v35  ;;  %v524_v23 = vld [vmem:[#allocation2 + $0x48] sm:$0xff] }
  0xc1   : > { %807 = vmatmul.bf16.gmra.mxu1 %v509_v24 }
  0xc2   : > { %856 = vmatmul.bf16.gmra.mxu2 %v510_v25 }
  0xed   : > { %v734_v26 = vpop.f32.mrf.mxu0 }
  0xee   : > { %v783_v27 = vpop.f32.mrf.mxu1 }
  0xef   : > { %v784_v28 = vadd.f32 %v783_v27, %v734_v26 }
  0xf3   : > { %v1629_v29 = vpop.f32.mrf.mxu3 }
  0xf5   : > { %v832_v30 = vpop.f32.mrf.mxu2  ;;  %v736_v21 = vpop.f32.mrf.mxu0 }
  0xf6   : > { %v833_v31 = vadd.f32 %v832_v30, %v784_v28  ;;  %v785_v22 = vpop.f32.mrf.mxu1  ;;  %v529_v30 = vld [vmem:[#allocation2 + $0x60] sm:$0xff] }
  0xf7   : > { %v786_v33 = vadd.f32 %v785_v22, %v736_v21  ;;  %v525_v21 = vld [vmem:[#allocation2 + $0x40] sm:$0xff] }
  0xf8   : > { %v872_v32 = vadd.f32 %v833_v31, %v517_v38 }
  0xfa   : > { %888 = vst [vmem:[#allocation2 + $0x30] sm:$0xff] %v872_v32 }
  0xfb   : > { %v1631_v41 = vpop.f32.mrf.mxu3 }
  0xfd   : > { %v834_v36 = vpop.f32.mrf.mxu2  ;;  %v739_v42 = vpop.f32.mrf.mxu0 }
  0xfe   : > { %v835_v39 = vadd.f32 %v834_v36, %v786_v33  ;;  %v788_v37 = vpop.f32.mrf.mxu1 }
  0xff   : > { %v789_v44 = vadd.f32 %v788_v37, %v739_v42 }
 0x100   : > { %v873_v45 = vadd.f32 %v835_v39, %v518_v34 }
 0x102   : > { %889 = vst [vmem:[#allocation2] sm:$0xff] %v873_v45 }
 0x103   : > { %v1633_v48 = vpop.f32.mrf.mxu3 }
 0x105   : > { %v837_v51 = vpop.f32.mrf.mxu2  ;;  %v741_v56 = vpop.f32.mrf.mxu0 }
 0x106   : > { %v838_v55 = vadd.f32 %v837_v51, %v789_v44  ;;  %v790_v40 = vpop.f32.mrf.mxu1  ;;  %v530_v44 = vld [vmem:[#allocation2 + $0x70] sm:$0xff]  ;;  %v526_v51 = vld [vmem:[#allocation2 + $0x20] sm:$0xff] }
 0x107   : > { %v791_v57 = vadd.f32 %v790_v40, %v741_v56 }
 0x108   : > { %v874_v47 = vadd.f32 %v838_v55, %v519_v50 }
 0x10a   : > { %890 = vst [vmem:[#allocation2 + $0x58] sm:$0xff] %v874_v47 }
 0x10b   : > { %v1635_v58 = vpop.f32.mrf.mxu3 }
 0x10d   : > { %v839_v60 = vpop.f32.mrf.mxu2  ;;  %v744_v43 = vpop.f32.mrf.mxu0 }
 0x10e   : > { %v840_v54 = vadd.f32 %v839_v60, %v791_v57  ;;  %v793_v61 = vpop.f32.mrf.mxu1 }
 0x10f   : > { %v794_v63 = vadd.f32 %v793_v61, %v744_v43  ;;  %v531_v43 = vld [vmem:[#allocation2 + $0x78] sm:$0xff] }
 0x110   : > { %v875_v62 = vadd.f32 %v840_v54, %v520_v59 }
 0x112   : > { %891 = vst [vmem:[#allocation2 + $0x18] sm:$0xff] %v875_v62  ;;  %v527_v62 = vld [vmem:[#allocation2 + $0x10] sm:$0xff] }
 0x113   : > { %v813_v0 = vpop.f32.mrf.mxu3 }
 0x114   : > { %v814_v38 = vadd.f32 %v813_v0, %v1629_v29 }
 0x115   : > { %v842_v3 = vpop.f32.mrf.mxu2  ;;  %v746_v4 = vpop.f32.mrf.mxu0 }
 0x116   : > { %v843_v46 = vadd.f32 %v842_v3, %v794_v63  ;;  %v795_v5 = vpop.f32.mrf.mxu1 }
 0x117   : > { %v796_v7 = vadd.f32 %v795_v5, %v746_v4 }
 0x118   : > { %v876_v6 = vadd.f32 %v843_v46, %v521_v1 }
 0x11a   : > { %892 = vst [vmem:[#allocation2 + $0x50] sm:$0xff] %v876_v6 }
 0x11b   : > { %v815_v8 = vpop.f32.mrf.mxu3 }
 0x11c   : > { %v816_v37 = vadd.f32 %v815_v8, %v1631_v41 }
 0x11d   : > { %v844_v52 = vpop.f32.mrf.mxu2  ;;  %v749_v9 = vpop.f32.mrf.mxu0 }
 0x11e   : > { %v845_v53 = vadd.f32 %v844_v52, %v796_v7  ;;  %v798_v10 = vpop.f32.mrf.mxu1  ;;  %v532_v7 = vld [vmem:[#allocation2 + $0x28] sm:$0xff] }
 0x11f   : > { %v799_v11 = vadd.f32 %v798_v10, %v749_v9 }
 0x120   : > { %v877_v14 = vadd.f32 %v845_v53, %v522_v49  ;;  %v528_v49 = vld [vmem:[#allocation2 + $0x38] sm:$0xff] }
 0x122   : > { %893 = vst [vmem:[#allocation2 + $0x68] sm:$0xff] %v877_v14 }
 0x123   : > { %v818_v2 = vpop.f32.mrf.mxu3 }
 0x124   : > { %v819_v54 = vadd.f32 %v818_v2, %v1633_v48 }
 0x125   : > { %v847_v15 = vpop.f32.mrf.mxu2  ;;  %v751_v17 = vpop.f32.mrf.mxu0 }
 0x126   : > { %v848_v16 = vadd.f32 %v847_v15, %v799_v11  ;;  %v800_v18 = vpop.f32.mrf.mxu1 }
 0x127   : > { %v801_v13 = vadd.f32 %v800_v18, %v751_v17 }
 0x128   : > { %v878_v19 = vadd.f32 %v848_v16, %v523_v12 }
 0x12a   : > { %894 = vst [vmem:[#allocation2 + $0x8] sm:$0xff] %v878_v19 }
 0x12b   : > { %v820_v20 = vpop.f32.mrf.mxu3 }
 0x12c   : > { %v821_v5 = vadd.f32 %v820_v20, %v1635_v58 }
 0x12d   : > { %v849_v35 = vpop.f32.mrf.mxu2  ;;  %v754_v25 = vpop.f32.mrf.mxu0 }
 0x12e   : > { %v850_v24 = vadd.f32 %v849_v35, %v801_v13  ;;  %v803_v26 = vpop.f32.mrf.mxu1 }
 0x12f   : > { %v804_v28 = vadd.f32 %v803_v26, %v754_v25 }
 0x130   : > { %v879_v27 = vadd.f32 %v850_v24, %v524_v23 }
 0x132   : > { %895 = vst [vmem:[#allocation2 + $0x48] sm:$0xff] %v879_v27 }
 0x133   : > { %v862_v31 = vpop.f32.mrf.mxu3 }
 0x134   : > { %v863_v32 = vadd.f32 %v862_v31, %v814_v38 }
 0x135   : > { %v852_v22 = vpop.f32.mrf.mxu2  ;;  %v756_v34 = vpop.f32.mrf.mxu0 }
 0x136   : > { %v853_v33 = vadd.f32 %v852_v22, %v804_v28  ;;  %v884_v36 = vadd.f32 %v863_v32, %v529_v30  ;;  %v805_v39 = vpop.f32.mrf.mxu1 }
 0x137   : > { %v806_v45 = vadd.f32 %v805_v39, %v756_v34 }
 0x138   : > { %v880_v42 = vadd.f32 %v853_v33, %v525_v21  ;;  %900 = vst [vmem:[#allocation2 + $0x60] sm:$0xff] %v884_v36 }
 0x13a   : > { %896 = vst [vmem:[#allocation2 + $0x40] sm:$0xff] %v880_v42 }
 0x13b   : > { %v864_v50 = vpop.f32.mrf.mxu3 }
 0x13c   : > { %v865_v29 = vadd.f32 %v864_v50, %v816_v37 }
 0x13d   : > { %v854_v55 = vpop.f32.mrf.mxu2  ;;  %v759_v47 = vpop.f32.mrf.mxu0 }
 0x13e   : > { %v855_v56 = vadd.f32 %v854_v55, %v806_v45  ;;  %v885_v40 = vadd.f32 %v865_v29, %v530_v44  ;;  %v808_v57 = vpop.f32.mrf.mxu1 }
 0x13f   : > { %v809_v60 = vadd.f32 %v808_v57, %v759_v47 }
 0x140   : > { %v881_v59 = vadd.f32 %v855_v56, %v526_v51  ;;  %901 = vst [vmem:[#allocation2 + $0x70] sm:$0xff] %v885_v40 }
 0x142   : > { %897 = vst [vmem:[#allocation2 + $0x20] sm:$0xff] %v881_v59 }
 0x143   : > { %v867_v61 = vpop.f32.mrf.mxu3 }
 0x144   : > { %v868_v63 = vadd.f32 %v867_v61, %v819_v54 }
 0x145   : > { %v857_v41 = vpop.f32.mrf.mxu2  ;;  %v761_v46 = vpop.f32.mrf.mxu0 }
 0x146   : > { %v858_v0 = vadd.f32 %v857_v41, %v809_v60  ;;  %v886_v1 = vadd.f32 %v868_v63, %v531_v43  ;;  %v810_v4 = vpop.f32.mrf.mxu1 }
 0x147   : > { %v811_v6 = vadd.f32 %v810_v4, %v761_v46 }
 0x148   : > { %v882_v3 = vadd.f32 %v858_v0, %v527_v62  ;;  %902 = vst [vmem:[#allocation2 + $0x78] sm:$0xff] %v886_v1 }
 0x14a   : > { %898 = vst [vmem:[#allocation2 + $0x10] sm:$0xff] %v882_v3 }
 0x14b   : > { %v869_v8 = vpop.f32.mrf.mxu3 }
 0x14c   : > { %v870_v48 = vadd.f32 %v869_v8, %v821_v5 }
 0x14d   : > { %v859_v52 = vpop.f32.mrf.mxu2 }
 0x14e   : > { %v860_v53 = vadd.f32 %v859_v52, %v811_v6  ;;  %v887_v9 = vadd.f32 %v870_v48, %v532_v7  ;;  %907 = sbr.rel (%p1211_p11) target bundleno = 358 (0x166), region = 66 }
 0x150   : > { %v883_v10 = vadd.f32 %v860_v53, %v528_v49  ;;  %903 = vst [vmem:[#allocation2 + $0x28] sm:$0xff] %v887_v9 }
 0x152   : > { %899 = vst [vmem:[#allocation2 + $0x38] sm:$0xff] %v883_v10 }
 0x153   : > { %v908_v14 = vld [vmem:[#allocation2 + $0x30] sm:$0xff]  ;;  %v1308_v11 = vld [vmem:[%s1710_s2] ss:$0 sm:$0xff]  ;;  %v910_v2 = vld [vmem:[#allocation2 + $0x58] sm:$0xff] }
 0x154   : > { %v909_v58 = vld [vmem:[#allocation2] sm:$0xff]  ;;  %v911_v12 = vld [vmem:[#allocation2 + $0x18] sm:$0xff]  ;;  %v928_v15 = vadd.f32 %v1308_v11, %v908_v14  ;;  %v930_v17 = vadd.f32 %v1308_v11, %v910_v2  ;;  %v912_v18 = vld [vmem:[#allocation2 + $0x50] sm:$0xff] }
 0x155   : > { %v929_v16 = vadd.f32 %v1308_v11, %v909_v58  ;;  %v913_v19 = vld [vmem:[#allocation2 + $0x68] sm:$0xff]  ;;  %v931_v13 = vadd.f32 %v1308_v11, %v911_v12  ;;  %v932_v23 = vadd.f32 %v1308_v11, %v912_v18  ;;  %v916_v25 = vld [vmem:[#allocation2 + $0x40] sm:$0xff]  ;;  %v918_v38 = vld [vmem:[#allocation2 + $0x10] sm:$0xff] }
 0x156   : > { %v914_v20 = vld [vmem:[#allocation2 + $0x8] sm:$0xff]  ;;  %944 = vst [vmem:[%s1711_s3] sm:$0xff] %v928_v15  ;;  %v933_v24 = vadd.f32 %v1308_v11, %v913_v19  ;;  %v917_v27 = vld [vmem:[#allocation2 + $0x20] sm:$0xff]  ;;  %v936_v30 = vadd.f32 %v1308_v11, %v916_v25  ;;  %v938_v32 = vadd.f32 %v1308_v11, %v918_v38  ;;  %v921_v33 = vld [vmem:[#allocation2 + $0x70] sm:$0xff] }
 0x157   : > { %v915_v35 = vld [vmem:[#allocation2 + $0x48] sm:$0xff]  ;;  %945 = vst [vmem:[%s1711_s3 + $0x8] sm:$0xff] %v929_v16  ;;  %v934_v26 = vadd.f32 %v1308_v11, %v914_v20  ;;  %v937_v21 = vadd.f32 %v1308_v11, %v917_v27  ;;  %v920_v22 = vld [vmem:[#allocation2 + $0x60] sm:$0xff]  ;;  %v922_v36 = vld [vmem:[#allocation2 + $0x78] sm:$0xff]  ;;  %v941_v37 = vadd.f32 %v1308_v11, %v921_v33 }
 0x158   : > { %946 = vst [vmem:[%s1711_s3 + $0x10] sm:$0xff] %v930_v17  ;;  %v935_v28 = vadd.f32 %v1308_v11, %v915_v35  ;;  %v940_v39 = vadd.f32 %v1308_v11, %v920_v22  ;;  %v923_v42 = vld [vmem:[#allocation2 + $0x28] sm:$0xff]  ;;  %v942_v45 = vadd.f32 %v1308_v11, %v922_v36 }
 0x159   : > { %947 = vst [vmem:[%s1711_s3 + $0x18] sm:$0xff] %v931_v13  ;;  %v919_v31 = vld [vmem:[#allocation2 + $0x38] sm:$0xff]  ;;  %v943_v44 = vadd.f32 %v1308_v11, %v923_v42 }
 0x15a   : > { %948 = vst [vmem:[%s1711_s3 + $0x20] sm:$0xff] %v932_v23  ;;  %v939_v34 = vadd.f32 %v1308_v11, %v919_v31 }
 0x15b   : > { %949 = vst [vmem:[%s1711_s3 + $0x28] sm:$0xff] %v933_v24 }
 0x15c   : > { %950 = vst [vmem:[%s1711_s3 + $0x30] sm:$0xff] %v934_v26 }
 0x15d   : > { %951 = vst [vmem:[%s1711_s3 + $0x38] sm:$0xff] %v935_v28 }
 0x15e   : > { %952 = vst [vmem:[%s1711_s3 + $0x40] sm:$0xff] %v936_v30 }
 0x15f   : > { %953 = vst [vmem:[%s1711_s3 + $0x48] sm:$0xff] %v937_v21 }
 0x160   : > { %954 = vst [vmem:[%s1711_s3 + $0x50] sm:$0xff] %v938_v32 }
 0x161   : > { %955 = vst [vmem:[%s1711_s3 + $0x58] sm:$0xff] %v939_v34 }
 0x162   : > { %956 = vst [vmem:[%s1711_s3 + $0x60] sm:$0xff] %v940_v39 }
 0x163   : > { %957 = vst [vmem:[%s1711_s3 + $0x68] sm:$0xff] %v941_v37 }
 0x164   : > { %958 = vst [vmem:[%s1711_s3 + $0x70] sm:$0xff] %v942_v45 }
 0x165   : > { %959 = vst [vmem:[%s1711_s3 + $0x78] sm:$0xff] %v943_v44 }
 0x166 PF: > { %s13_s16 = sadd.s32 1, %s1347_s16   ;;  %s1712_s12 = smov %s1335_s13 }
 0x167   : > { %p10_p12 = scmp.ge.s32.totalorder %s13_s16, 5   ;;  %s1713_s13 = smov %s1405_s20 }
 0x168   : > { %s1714_s14 = smov %s1343_s15  ;;  %s1715_s15 = smov %s1717_s17 }
 0x169   :  { %12 = sbr.rel (!%p10_p12) target bundleno = 3 (0x3), region = 113 }

// kernel: vgg16_forward.21
= control target key start
LH: loop header
LB: loop body
LE: loop exit
PB: predicated region body
PF: predicated region fallthrough
CT: control target
= control target key end

     0   :  { %s1368_s12 = smov 0   ;;  %s1370_s13 = smov 0   ;;  %s1582_s0 = inlined_call_operand.vmem [shape: bf16[32,1152], index: 0, kind: input, shape index: {}]   ;;  %s1583_s1 = inlined_call_operand.vmem [shape: bf16[1152,256], index: 1, kind: input, shape index: {}]   ;;  %s1584_s2 = inlined_call_operand.vmem [shape: f32[1,256], index: 2, kind: input, shape index: {}]   ;;  %s1585_s3 = inlined_call_operand.vmem [shape: f32[32,256], index: 3, kind: output, shape index: {}]  }
   0x1   :  { %s1372_s14 = smov 0   ;;  %s1374_s15 = smov 0  }
   0x2   :  { %s1376_s16 = smov 0  }
   0x3 LB: > { %s25_s17 = sadd.s32 1, %s1341_s15  ;;  %p48_p1 = scmp.ne.s32.totalorder %s1333_s13, %s1329_s12  ;;  %s1345_s16 = sphi %s1376_s16, %s13_s16   ;;  %s1341_s15 = sphi %s1374_s15, %s1589_s15   ;;  %s1337_s14 = sphi %s1372_s14, %s1588_s14   ;;  %s1333_s13 = sphi %s1370_s13, %s1587_s13   ;;  %s1329_s12 = sphi %s1368_s12, %s1586_s12  }
   0x4   : > { %p26_p0 = scmp.ge.s32.totalorder %s25_s17, 3  ;;  %p49_p2 = scmp.eq.s32.totalorder %s1345_s16, 0 }
   0x5   : > { %s41_s19 = sadd.s32 1, %s1333_s13  ;;  %p957_p5 = scmp.ge.s32.totalorder %s1345_s16, 3 }
   0x6   : > { %s1591_s17 = smov (%p26_p0, %s25_s17), 0  ;;  %p50_p3 = por %p49_p2, %p48_p1 }
   0x7   : > { %s37_s18 = ssub.s32 %s1341_s15, %s1591_s17  ;;  %164 = sbr.rel (%p957_p5) target bundleno = 25 (0x19), region = 20 }
   0x8   : > { %p39_p4 = scmp.eq.s32.totalorder %s37_s18, 0 }
   0xa   : > { %s1403_s20 = scalar_select %p39_p4, %s1333_s13, %s41_s19  }
   0xc   : > { %167 = sbr.rel (!%p50_p3) target bundleno = 25 (0x19), region = 24  ;;  %s169_s21 = sand.u32 (%p50_p3), 1, %s1333_s13  }
   0xd   : > { %s1192_s22 = smul.u32 (%p50_p3), 12, %s1341_s15 }
   0xe   : > { %s1264_s23 = smul.u32 (%p50_p3), 48, %s169_s21 }
   0xf   : > { %s177_s26 = scalar_lea.vmem (%p50_p3), %s1582_s0, %s1192_s22 }
  0x10   : > { %v192_v0 = vld [vmem:[%s177_s26] sm:$0xff] (%p50_p3)  ;;  %v196_v2 = vld [vmem:[%s177_s26 + $0x48] sm:$0xff] (%p50_p3)  ;;  %s171_s27 = scalar_lea.vmem (%p50_p3), [#allocation3], %s1264_s23  ;;  %v963_v6 = vld [vmem:[%s177_s26 + $0x50] sm:$0xf] (%p50_p3) }
  0x11   : > { %v194_v1 = vld [vmem:[%s177_s26 + $0x24] sm:$0xff]  ;;  %193 = vst [vmem:[%s171_s27] sm:$0xff] %v192_v0  ;;  %v198_v3 = vld [vmem:[%s177_s26 + $0x6c] sm:$0xff]  ;;  %v965_v7 = vld [vmem:[%s177_s26 + $0x74] sm:$0xf] }
  0x12   : > { %195 = vst [vmem:[%s171_s27 + $0xc] sm:$0xff] %v194_v1  ;;  %v959_v4 = vld [vmem:[%s177_s26 + $0x8] sm:$0xf]  ;;  %v961_v5 = vld [vmem:[%s177_s26 + $0x2c] sm:$0xf] }
  0x13   : > { %197 = vst [vmem:[%s171_s27 + $0x18] sm:$0xff] %v196_v2 }
  0x14   : > { %199 = vst [vmem:[%s171_s27 + $0x24] sm:$0xff] %v198_v3 }
  0x15   : > { %960 = vst [vmem:[%s171_s27 + $0x8] sm:$0xf] %v959_v4 }
  0x16   : > { %962 = vst [vmem:[%s171_s27 + $0x14] sm:$0xf] %v961_v5 }
  0x17   : > { %964 = vst [vmem:[%s171_s27 + $0x20] sm:$0xf] %v963_v6 }
  0x18   : > { %966 = vst [vmem:[%s171_s27 + $0x2c] sm:$0xf] %v965_v7 }
  0x19 PF: > { %p967_p6 = scmp.ge.s32.totalorder %s1345_s16, 1  ;;  %p235_p7 = scmp.lt.s32.totalorder %s1345_s16, 4 }
  0x1b   : > { %p236_p8 = pnand %p967_p6, %p235_p7 }
  0x1c   : > { %s242_s28 = sand.u32 (!%p236_p8), 1, %s1329_s12   ;;  %s286_s29 = smul.u32 (!%p236_p8), 48, %s1337_s14 }
  0x1d   : > { %239 = sbr.rel (%p236_p8) target bundleno = 276 (0x114), region = 54  ;;  %p970_p10 = scmp.ne.s32.totalorder (!%p236_p8), %s1337_s14, 0 }
  0x1e   : > { %s1265_s30 = smul.u32 (!%p236_p8), 48, %s242_s28  ;;  %p288_p9 = scmp.lt.s32.totalorder (!%p236_p8), %s286_s29, 143 }
  0x20   : > { %s1420_s8 = scalar_lea.vmem (!%p236_p8), [#allocation3], %s1265_s30 }
  0x22   : > { %s1593_s29 = smov (!%p288_p9, %s286_s29), 143  ;;  %318 = sbr.rel (%p970_p10) target bundleno = 48 (0x30), region = 62 }
  0x23   : > { %s1193_s4 = sshll.u32 %s1593_s29, 3 }
  0x24   : > { %s1418_s7 = scalar_lea.vmem %s1583_s1, %s1193_s4 }
  0x27   : > { %v1347_v8 = vmov 0.0  }
  0x28   : > { %319 = vst [vmem:[#allocation2 + $0x30] sm:$0xff] %v1347_v8 }
  0x29   : > { %320 = vst [vmem:[#allocation2] sm:$0xff] %v1347_v8 }
  0x2a   : > { %321 = vst [vmem:[#allocation2 + $0x18] sm:$0xff] %v1347_v8 }
  0x2b   : > { %322 = vst [vmem:[#allocation2 + $0x10] sm:$0xff] %v1347_v8 }
  0x2c   : > { %323 = vst [vmem:[#allocation2 + $0x8] sm:$0xff] %v1347_v8 }
  0x2d   : > { %324 = vst [vmem:[#allocation2 + $0x20] sm:$0xff] %v1347_v8 }
  0x2e   : > { %325 = vst [vmem:[#allocation2 + $0x28] sm:$0xff] %v1347_v8 }
  0x2f   : > { %326 = vst [vmem:[#allocation2 + $0x38] sm:$0xff] %v1347_v8 }
  0x30 PF: > { %v1053_v9 = vld [vmem:[%s1418_s7 + $0x70] sm:$0xf]  ;;  %v1215_v10 = vld [vmem:[%s1418_s7 + $0x74] sm:$0xf0]  ;;  %v1214_v18 = vld [vmem:[%s1418_s7 + $0x74] sm:$0xf] }
  0x31   : > { %v1117_v11 = vld [vmem:[%s1418_s7 + $0xf0] sm:$0xf]  ;;  %v1054_v12 = vor.u32 %v1215_v10, %v1053_v9  ;;  %v1231_v13 = vld [vmem:[%s1418_s7 + $0xf4] sm:$0xf0]  ;;  %v1055_v19 = vld [vmem:[%s1418_s7 + $0x78] sm:$0xf0] }
  0x32   : > { %v1181_v14 = vld [vmem:[%s1418_s7 + $0x170] sm:$0xf]  ;;  %v1247_v15 = vld [vmem:[%s1418_s7 + $0x174] sm:$0xf0]  ;;  %v1118_v16 = vor.u32 %v1231_v13, %v1117_v11  ;;  %v1045_v20 = vld [vmem:[%s1418_s7 + $0x60] sm:$0xf]  ;;  %v1058_v21 = vor.u32 %v1214_v18, %v1055_v19 }
  0x33   : > { %v1182_v17 = vor.u32 %v1247_v15, %v1181_v14  ;;  %663 = vmatpush.bf16.msra.mxu0 %v1054_v12  ;;  %v1213_v22 = vld [vmem:[%s1418_s7 + $0x64] sm:$0xf0]  ;;  %v1109_v23 = vld [vmem:[%s1418_s7 + $0xe0] sm:$0xf]  ;;  %v1212_v29 = vld [vmem:[%s1418_s7 + $0x64] sm:$0xf] }
  0x34   : > { %v1229_v24 = vld [vmem:[%s1418_s7 + $0xe4] sm:$0xf0]  ;;  %682 = vmatpush.bf16.msra.mxu1 %v1118_v16  ;;  %v1046_v25 = vor.u32 %v1213_v22, %v1045_v20  ;;  %v1173_v27 = vld [vmem:[%s1418_s7 + $0x160] sm:$0xf]  ;;  %720 = vmatpush.bf16.msra.mxu3 %v1058_v21  ;;  %v1047_v31 = vld [vmem:[%s1418_s7 + $0x68] sm:$0xf0] }
  0x35   : > { %701 = vmatpush.bf16.msra.mxu2 %v1182_v17  ;;  %v1110_v26 = vor.u32 %v1229_v24, %v1109_v23  ;;  %v1245_v28 = vld [vmem:[%s1418_s7 + $0x164] sm:$0xf0]  ;;  %v1037_v32 = vld [vmem:[%s1418_s7 + $0x50] sm:$0xf]  ;;  %v1211_v33 = vld [vmem:[%s1418_s7 + $0x54] sm:$0xf0]  ;;  %v1050_v34 = vor.u32 %v1212_v29, %v1047_v31 }
  0x36   : > { %v1174_v30 = vor.u32 %v1245_v28, %v1173_v27  ;;  %v1101_v35 = vld [vmem:[%s1418_s7 + $0xd0] sm:$0xf]  ;;  %v1227_v36 = vld [vmem:[%s1418_s7 + $0xd4] sm:$0xf0]  ;;  %v1038_v38 = vor.u32 %v1211_v33, %v1037_v32  ;;  %v1210_v40 = vld [vmem:[%s1418_s7 + $0x54] sm:$0xf] }
  0x37   : > { %v1165_v37 = vld [vmem:[%s1418_s7 + $0x150] sm:$0xf]  ;;  %664 = vmatpush.bf16.msra.mxu0 %v1046_v25  ;;  %v1243_v39 = vld [vmem:[%s1418_s7 + $0x154] sm:$0xf0]  ;;  %v1039_v41 = vld [vmem:[%s1418_s7 + $0x58] sm:$0xf0]  ;;  %v1102_v42 = vor.u32 %v1227_v36, %v1101_v35 }
  0x38   : > { %683 = vmatpush.bf16.msra.mxu1 %v1110_v26  ;;  %v1166_v43 = vor.u32 %v1243_v39, %v1165_v37  ;;  %v1029_v44 = vld [vmem:[%s1418_s7 + $0x40] sm:$0xf]  ;;  %v1209_v45 = vld [vmem:[%s1418_s7 + $0x44] sm:$0xf0]  ;;  %721 = vmatpush.bf16.msra.mxu3 %v1050_v34  ;;  %v1042_v47 = vor.u32 %v1210_v40, %v1039_v41  ;;  %v1208_v51 = vld [vmem:[%s1418_s7 + $0x44] sm:$0xf] }
  0x39   : > { %702 = vmatpush.bf16.msra.mxu2 %v1174_v30  ;;  %v1093_v46 = vld [vmem:[%s1418_s7 + $0xc0] sm:$0xf]  ;;  %v1225_v48 = vld [vmem:[%s1418_s7 + $0xc4] sm:$0xf0]  ;;  %v1031_v52 = vld [vmem:[%s1418_s7 + $0x48] sm:$0xf0]  ;;  %v1030_v53 = vor.u32 %v1209_v45, %v1029_v44 }
  0x3a   : > { %v1157_v49 = vld [vmem:[%s1418_s7 + $0x140] sm:$0xf]  ;;  %v1241_v50 = vld [vmem:[%s1418_s7 + $0x144] sm:$0xf0]  ;;  %v1094_v54 = vor.u32 %v1225_v48, %v1093_v46  ;;  %v1021_v56 = vld [vmem:[%s1418_s7 + $0x30] sm:$0xf]  ;;  %v1034_v59 = vor.u32 %v1208_v51, %v1031_v52 }
  0x3b   : > { %665 = vmatpush.bf16.msra.mxu0 %v1038_v38  ;;  %v1158_v55 = vor.u32 %v1241_v50, %v1157_v49  ;;  %v1207_v57 = vld [vmem:[%s1418_s7 + $0x34] sm:$0xf0]  ;;  %v1085_v58 = vld [vmem:[%s1418_s7 + $0xb0] sm:$0xf]  ;;  %v1206_v63 = vld [vmem:[%s1418_s7 + $0x34] sm:$0xf] }
  0x3c   : > { %684 = vmatpush.bf16.msra.mxu1 %v1102_v42  ;;  %722 = vmatpush.bf16.msra.mxu3 %v1042_v47  ;;  %v1223_v60 = vld [vmem:[%s1418_s7 + $0xb4] sm:$0xf0]  ;;  %v1149_v61 = vld [vmem:[%s1418_s7 + $0x130] sm:$0xf]  ;;  %v1023_v0 = vld [vmem:[%s1418_s7 + $0x38] sm:$0xf0]  ;;  %v1022_v1 = vor.u32 %v1207_v57, %v1021_v56 }
  0x3d   : > { %703 = vmatpush.bf16.msra.mxu2 %v1166_v43  ;;  %v1239_v62 = vld [vmem:[%s1418_s7 + $0x134] sm:$0xf0]  ;;  %v1086_v2 = vor.u32 %v1223_v60, %v1085_v58  ;;  %v1013_v4 = vld [vmem:[%s1418_s7 + $0x20] sm:$0xf]  ;;  %v1205_v5 = vld [vmem:[%s1418_s7 + $0x24] sm:$0xf0]  ;;  %v1026_v7 = vor.u32 %v1206_v63, %v1023_v0 }
  0x3e   : > { %v1150_v3 = vor.u32 %v1239_v62, %v1149_v61  ;;  %v1077_v6 = vld [vmem:[%s1418_s7 + $0xa0] sm:$0xf]  ;;  %v1221_v8 = vld [vmem:[%s1418_s7 + $0xa4] sm:$0xf0]  ;;  %v1204_v11 = vld [vmem:[%s1418_s7 + $0x24] sm:$0xf]  ;;  %v1014_v13 = vor.u32 %v1205_v5, %v1013_v4 }
  0x3f   : > { %666 = vmatpush.bf16.msra.mxu0 %v1030_v53  ;;  %v1141_v9 = vld [vmem:[%s1418_s7 + $0x120] sm:$0xf]  ;;  %v1237_v10 = vld [vmem:[%s1418_s7 + $0x124] sm:$0xf0]  ;;  %v1015_v12 = vld [vmem:[%s1418_s7 + $0x28] sm:$0xf0]  ;;  %v1078_v14 = vor.u32 %v1221_v8, %v1077_v6 }
  0x40   : > { %685 = vmatpush.bf16.msra.mxu1 %v1094_v54  ;;  %723 = vmatpush.bf16.msra.mxu3 %v1034_v59  ;;  %v1142_v15 = vor.u32 %v1237_v10, %v1141_v9  ;;  %v1005_v16 = vld [vmem:[%s1418_s7 + $0x10] sm:$0xf]  ;;  %v1203_v17 = vld [vmem:[%s1418_s7 + $0x14] sm:$0xf0]  ;;  %v1018_v19 = vor.u32 %v1204_v11, %v1015_v12  ;;  %v1202_v23 = vld [vmem:[%s1418_s7 + $0x14] sm:$0xf] }
  0x41   : > { %704 = vmatpush.bf16.msra.mxu2 %v1158_v55  ;;  %v1069_v18 = vld [vmem:[%s1418_s7 + $0x90] sm:$0xf]  ;;  %v1219_v20 = vld [vmem:[%s1418_s7 + $0x94] sm:$0xf0]  ;;  %v1007_v24 = vld [vmem:[%s1418_s7 + $0x18] sm:$0xf0]  ;;  %v1006_v25 = vor.u32 %v1203_v17, %v1005_v16 }
  0x42   : > { %v1133_v21 = vld [vmem:[%s1418_s7 + $0x110] sm:$0xf]  ;;  %v1235_v22 = vld [vmem:[%s1418_s7 + $0x114] sm:$0xf0]  ;;  %v997_v26 = vld [vmem:[%s1418_s7] sm:$0xf]  ;;  %v1070_v29 = vor.u32 %v1219_v20, %v1069_v18  ;;  %v1010_v34 = vor.u32 %v1202_v23, %v1007_v24 }
  0x43   : > { %667 = vmatpush.bf16.msra.mxu0 %v1022_v1  ;;  %v1201_v27 = vld [vmem:[%s1418_s7 + $0x4] sm:$0xf0]  ;;  %v1061_v28 = vld [vmem:[%s1418_s7 + $0x80] sm:$0xf]  ;;  %v1134_v30 = vor.u32 %v1235_v22, %v1133_v21  ;;  %v1200_v35 = vld [vmem:[%s1418_s7 + $0x4] sm:$0xf] }
  0x44   : > { %686 = vmatpush.bf16.msra.mxu1 %v1086_v2  ;;  %724 = vmatpush.bf16.msra.mxu3 %v1026_v7  ;;  %v1217_v31 = vld [vmem:[%s1418_s7 + $0x84] sm:$0xf0]  ;;  %v1125_v32 = vld [vmem:[%s1418_s7 + $0x100] sm:$0xf]  ;;  %v999_v36 = vld [vmem:[%s1418_s7 + $0x8] sm:$0xf0]  ;;  %v998_v41 = vor.u32 %v1201_v27, %v997_v26 }
  0x45   : > { %705 = vmatpush.bf16.msra.mxu2 %v1150_v3  ;;  %v1233_v33 = vld [vmem:[%s1418_s7 + $0x104] sm:$0xf0]  ;;  %v973_v37 = vld [vmem:[%s1420_s8] sm:$0xf]  ;;  %v1195_v38 = vld [vmem:[%s1420_s8 + $0x8] sm:$0xf0]  ;;  %v1062_v45 = vor.u32 %v1217_v31, %v1061_v28  ;;  %v1002_v50 = vor.u32 %v1200_v35, %v999_v36 }
  0x46   : > { %v1230_v39 = vld [vmem:[%s1418_s7 + $0xf4] sm:$0xf]  ;;  %v1119_v40 = vld [vmem:[%s1418_s7 + $0xf8] sm:$0xf0]  ;;  %v1126_v46 = vor.u32 %v1233_v33, %v1125_v32  ;;  %v975_v47 = vld [vmem:[%s1420_s8 + $0xc] sm:$0xf0]  ;;  %v974_v52 = vor.u32 %v1195_v38, %v973_v37 }
  0x47   : > { %668 = vmatpush.bf16.msra.mxu0 %v1014_v13  ;;  %v1194_v42 = vld [vmem:[%s1420_s8 + $0x4] sm:$0xf]  ;;  %v1183_v44 = vld [vmem:[%s1418_s7 + $0x178] sm:$0xf0]  ;;  %v981_v48 = vld [vmem:[%s1420_s8 + $0x8] sm:$0xf]  ;;  %v1122_v51 = vor.u32 %v1230_v39, %v1119_v40 }
  0x48   : > { %687 = vmatpush.bf16.msra.mxu1 %v1078_v14  ;;  %725 = vmatpush.bf16.msra.mxu3 %v1018_v19  ;;  %v1246_v43 = vld [vmem:[%s1418_s7 + $0x174] sm:$0xf]  ;;  %v1228_v54 = vld [vmem:[%s1418_s7 + $0xe4] sm:$0xf]  ;;  %v1111_v55 = vld [vmem:[%s1418_s7 + $0xe8] sm:$0xf0]  ;;  %v1499_v56 = vor.u32 %v1194_v42, %v975_v47 }
  0x49   : > { %706 = vmatpush.bf16.msra.mxu2 %v1142_v15  ;;  %v1196_v49 = vld [vmem:[%s1420_s8 + $0x10] sm:$0xf0]  ;;  %v1186_v53 = vor.u32 %v1246_v43, %v1183_v44  ;;  %v1175_v59 = vld [vmem:[%s1418_s7 + $0x168] sm:$0xf0]  ;;  %v1114_v60 = vor.u32 %v1228_v54, %v1111_v55  ;;  %v1103_v63 = vld [vmem:[%s1418_s7 + $0xd8] sm:$0xf0] }
  0x4a   : > { %v1501_v57 = vor.u32 %v1196_v49, %v981_v48  ;;  %v1244_v58 = vld [vmem:[%s1418_s7 + $0x164] sm:$0xf]  ;;  %v1226_v62 = vld [vmem:[%s1418_s7 + $0xd4] sm:$0xf]  ;;  %v1167_v1 = vld [vmem:[%s1418_s7 + $0x158] sm:$0xf0] }
  0x4b   : > { %669 = vmatpush.bf16.msra.mxu0 %v1006_v25  ;;  %v1178_v61 = vor.u32 %v1244_v58, %v1175_v59  ;;  %v1242_v0 = vld [vmem:[%s1418_s7 + $0x154] sm:$0xf]  ;;  %v1106_v2 = vor.u32 %v1226_v62, %v1103_v63  ;;  %v1224_v4 = vld [vmem:[%s1418_s7 + $0xc4] sm:$0xf]  ;;  %v1095_v5 = vld [vmem:[%s1418_s7 + $0xc8] sm:$0xf0] }
  0x4c   : > { %688 = vmatpush.bf16.msra.mxu1 %v1070_v29  ;;  %726 = vmatpush.bf16.msra.mxu3 %v1010_v34  ;;  %v1170_v3 = vor.u32 %v1242_v0, %v1167_v1  ;;  %v1240_v6 = vld [vmem:[%s1418_s7 + $0x144] sm:$0xf]  ;;  %v1159_v7 = vld [vmem:[%s1418_s7 + $0x148] sm:$0xf0]  ;;  %v1098_v8 = vor.u32 %v1224_v4, %v1095_v5  ;;  %v985_v9 = vld [vmem:[%s1420_s8 + $0x18] sm:$0xf] }
  0x4d   : > { %707 = vmatpush.bf16.msra.mxu2 %v1134_v30  ;;  %v1162_v10 = vor.u32 %v1240_v6, %v1159_v7  ;;  %v1198_v11 = vld [vmem:[%s1420_s8 + $0x20] sm:$0xf0]  ;;  %v1087_v13 = vld [vmem:[%s1418_s7 + $0xb8] sm:$0xf0]  ;;  %v987_v17 = vld [vmem:[%s1420_s8 + $0x24] sm:$0xf0] }
  0x4e   : > { %v1222_v12 = vld [vmem:[%s1418_s7 + $0xb4] sm:$0xf]  ;;  %v1197_v14 = vld [vmem:[%s1420_s8 + $0x1c] sm:$0xf]  ;;  %v993_v18 = vld [vmem:[%s1420_s8 + $0x20] sm:$0xf]  ;;  %v986_v21 = vor.u32 %v1198_v11, %v985_v9 }
  0x4f   : > { %670 = vmatpush.bf16.msra.mxu0 %v998_v41  ;;  %v1238_v15 = vld [vmem:[%s1418_s7 + $0x134] sm:$0xf]  ;;  %v1151_v16 = vld [vmem:[%s1418_s7 + $0x138] sm:$0xf0]  ;;  %v1090_v20 = vor.u32 %v1222_v12, %v1087_v13  ;;  %v1220_v23 = vld [vmem:[%s1418_s7 + $0xa4] sm:$0xf]  ;;  %v990_v25 = vor.u32 %v1197_v14, %v987_v17 }
  0x50   : > { %689 = vmatpush.bf16.msra.mxu1 %v1062_v45  ;;  %727 = vmatpush.bf16.msra.mxu3 %v1002_v50  ;;  %v1199_v19 = vld [vmem:[%s1420_s8 + $0x28] sm:$0xf0]  ;;  %v1154_v22 = vor.u32 %v1238_v15, %v1151_v16  ;;  %v1236_v27 = vld [vmem:[%s1418_s7 + $0x124] sm:$0xf]  ;;  %v1218_v31 = vld [vmem:[%s1418_s7 + $0x94] sm:$0xf] }
  0x51   : > { %708 = vmatpush.bf16.msra.mxu2 %v1126_v46  ;;  %v1079_v24 = vld [vmem:[%s1418_s7 + $0xa8] sm:$0xf0]  ;;  %v994_v26 = vor.u32 %v1199_v19, %v993_v18  ;;  %v1071_v32 = vld [vmem:[%s1418_s7 + $0x98] sm:$0xf0]  ;;  %v1234_v33 = vld [vmem:[%s1418_s7 + $0x114] sm:$0xf] }
  0x52   : > { %671 = vmatmul.bf16.vlgmr.msra.gmra.mxu0 %v974_v52  ;;  %v1143_v28 = vld [vmem:[%s1418_s7 + $0x128] sm:$0xf0]  ;;  %v1082_v29 = vor.u32 %v1220_v23, %v1079_v24  ;;  %v1135_v34 = vld [vmem:[%s1418_s7 + $0x118] sm:$0xf0]  ;;  %v1074_v35 = vor.u32 %v1218_v31, %v1071_v32  ;;  %v1216_v37 = vld [vmem:[%s1418_s7 + $0x84] sm:$0xf] }
  0x53   : > { %690 = vmatmul.bf16.vlgmr.msra.gmra.mxu1 %v1499_v56  ;;  %728 = vmatmul.bf16.vlgmr.msra.gmra.mxu3 %v974_v52  ;;  %v1146_v30 = vor.u32 %v1236_v27, %v1143_v28  ;;  %v1138_v36 = vor.u32 %v1234_v33, %v1135_v34  ;;  %v1063_v38 = vld [vmem:[%s1418_s7 + $0x88] sm:$0xf0]  ;;  %v1232_v39 = vld [vmem:[%s1418_s7 + $0x104] sm:$0xf]  ;;  %v335_v46 = vld [vmem:[#allocation2 + $0x30] sm:$0xff]  ;;  %p1187_p11 = scmp.ne.s32.totalorder %s1337_s14, 2 }
  0x54   : > { %758 = vmatpush.bf16.msrb.mxu1 %v1186_v53  ;;  %709 = vmatmul.bf16.vlgmr.msra.gmra.mxu2 %v1501_v57  ;;  %v1127_v40 = vld [vmem:[%s1418_s7 + $0x108] sm:$0xf0]  ;;  %v1066_v41 = vor.u32 %v1216_v37, %v1063_v38  ;;  %v337_v54 = vld [vmem:[#allocation2 + $0x18] sm:$0xff]  ;;  %v336_v14 = vld [vmem:[#allocation2] sm:$0xff] }
  0x55   : > { %1248 = vmatpush.bf16.msrb.mxu2 %v1122_v51  ;;  %739 = vmatpush.bf16.msrb.mxu0 %v1122_v51  ;;  %v1130_v42 = vor.u32 %v1232_v39, %v1127_v40  ;;  %v339_v62 = vld [vmem:[#allocation2 + $0x8] sm:$0xff]  ;;  %v338_v24 = vld [vmem:[#allocation2 + $0x10] sm:$0xff]  ;;  %v342_v31 = vld [vmem:[#allocation2 + $0x38] sm:$0xff] }
  0x56   : > { %1256 = vmatpush.bf16.msrb.mxu3 %v1186_v53  ;;  %v341_v6 = vld [vmem:[#allocation2 + $0x28] sm:$0xff] }
  0x58   : > { %759 = vmatpush.bf16.msrb.mxu1 %v1178_v61 }
  0x59   : > { %1249 = vmatpush.bf16.msrb.mxu2 %v1114_v60  ;;  %740 = vmatpush.bf16.msrb.mxu0 %v1114_v60 }
  0x5a   : > { %1257 = vmatpush.bf16.msrb.mxu3 %v1178_v61 }
  0x5c   : > { %760 = vmatpush.bf16.msrb.mxu1 %v1170_v3 }
  0x5d   : > { %1250 = vmatpush.bf16.msrb.mxu2 %v1106_v2  ;;  %741 = vmatpush.bf16.msrb.mxu0 %v1106_v2 }
  0x5e   : > { %1258 = vmatpush.bf16.msrb.mxu3 %v1170_v3 }
  0x60   : > { %761 = vmatpush.bf16.msrb.mxu1 %v1162_v10 }
  0x61   : > { %1251 = vmatpush.bf16.msrb.mxu2 %v1098_v8  ;;  %742 = vmatpush.bf16.msrb.mxu0 %v1098_v8 }
  0x62   : > { %1259 = vmatpush.bf16.msrb.mxu3 %v1162_v10  ;;  %676 = vmatmul.bf16.gmra.mxu0 %v986_v21 }
  0x63   : > { %695 = vmatmul.bf16.gmra.mxu1 %v990_v25  ;;  %733 = vmatmul.bf16.gmra.mxu3 %v986_v21 }
  0x64   : > { %762 = vmatpush.bf16.msrb.mxu1 %v1154_v22  ;;  %714 = vmatmul.bf16.gmra.mxu2 %v994_v26 }
  0x65   : > { %1252 = vmatpush.bf16.msrb.mxu2 %v1090_v20  ;;  %743 = vmatpush.bf16.msrb.mxu0 %v1090_v20  ;;  %v340_v20 = vld [vmem:[#allocation2 + $0x20] sm:$0xff] }
  0x66   : > { %1260 = vmatpush.bf16.msrb.mxu3 %v1154_v22 }
  0x68   : > { %763 = vmatpush.bf16.msrb.mxu1 %v1146_v30 }
  0x69   : > { %1253 = vmatpush.bf16.msrb.mxu2 %v1082_v29  ;;  %744 = vmatpush.bf16.msrb.mxu0 %v1082_v29 }
  0x6a   : > { %1261 = vmatpush.bf16.msrb.mxu3 %v1146_v30 }
  0x6c   : > { %764 = vmatpush.bf16.msrb.mxu1 %v1138_v36 }
  0x6d   : > { %1254 = vmatpush.bf16.msrb.mxu2 %v1074_v35  ;;  %745 = vmatpush.bf16.msrb.mxu0 %v1074_v35 }
  0x6e   : > { %1262 = vmatpush.bf16.msrb.mxu3 %v1138_v36 }
  0x70   : > { %765 = vmatpush.bf16.msrb.mxu1 %v1130_v42 }
  0x71   : > { %1255 = vmatpush.bf16.msrb.mxu2 %v1066_v41  ;;  %746 = vmatpush.bf16.msrb.mxu0 %v1066_v41 }
  0x72   : > { %1263 = vmatpush.bf16.msrb.mxu3 %v1130_v42 }
  0x73   : > { %766 = vmatmul.bf16.vlgmr.msrb.gmra.mxu1 %v1501_v57 }
  0x74   : > { %747 = vmatmul.bf16.vlgmr.msrb.gmra.mxu0 %v1499_v56  ;;  %752 = vmatmul.bf16.vlgmr.msrb.gmra.mxu2 %v990_v25 }
  0x75   : > { %771 = vmatmul.bf16.vlgmr.msrb.gmra.mxu3 %v994_v26 }
  0xcf   : > { %v672_v43 = vpop.f32.mrf.mxu0 }
  0xd0   : > { %v691_v44 = vpop.f32.mrf.mxu1 }
  0xd1   : > { %v692_v45 = vadd.f32 %v691_v44, %v672_v43 }
  0xd6   : > { %v729_v49 = vpop.f32.mrf.mxu3 }
  0xd7   : > { %v710_v47 = vpop.f32.mrf.mxu2  ;;  %v674_v50 = vpop.f32.mrf.mxu0 }
  0xd8   : > { %v711_v48 = vadd.f32 %v710_v47, %v692_v45  ;;  %v693_v51 = vpop.f32.mrf.mxu1 }
  0xd9   : > { %v694_v53 = vadd.f32 %v693_v51, %v674_v50 }
  0xda   : > { %v777_v52 = vadd.f32 %v711_v48, %v335_v46 }
  0xdc   : > { %785 = vst [vmem:[#allocation2 + $0x30] sm:$0xff] %v777_v52 }
  0xde   : > { %v731_v56 = vpop.f32.mrf.mxu3 }
  0xdf   : > { %v712_v55 = vpop.f32.mrf.mxu2  ;;  %v677_v59 = vpop.f32.mrf.mxu0 }
  0xe0   : > { %v713_v58 = vadd.f32 %v712_v55, %v694_v53  ;;  %v696_v60 = vpop.f32.mrf.mxu1 }
  0xe1   : > { %v697_v61 = vadd.f32 %v696_v60, %v677_v59 }
  0xe2   : > { %v779_v57 = vadd.f32 %v713_v58, %v337_v54 }
  0xe4   : > { %787 = vst [vmem:[#allocation2 + $0x18] sm:$0xff] %v779_v57 }
  0xe6   : > { %v734_v1 = vpop.f32.mrf.mxu3 }
  0xe7   : > { %v715_v63 = vpop.f32.mrf.mxu2  ;;  %v679_v2 = vpop.f32.mrf.mxu0 }
  0xe8   : > { %v716_v0 = vadd.f32 %v715_v63, %v697_v61  ;;  %v698_v3 = vpop.f32.mrf.mxu1 }
  0xe9   : > { %v699_v5 = vadd.f32 %v698_v3, %v679_v2 }
  0xea   : > { %v781_v4 = vadd.f32 %v716_v0, %v339_v62 }
  0xec   : > { %789 = vst [vmem:[#allocation2 + $0x8] sm:$0xff] %v781_v4 }
  0xee   : > { %v736_v9 = vpop.f32.mrf.mxu3 }
  0xef   : > { %v717_v7 = vpop.f32.mrf.mxu2 }
  0xf0   : > { %v718_v8 = vadd.f32 %v717_v7, %v699_v5  ;;  %v767_v13 = vpop.f32.mrf.mxu1 }
  0xf1   : > { %v748_v10 = vpop.f32.mrf.mxu0 }
  0xf2   : > { %v783_v11 = vadd.f32 %v718_v8, %v341_v6  ;;  %v749_v12 = vadd.f32 %v748_v10, %v729_v49 }
  0xf4   : > { %791 = vst [vmem:[#allocation2 + $0x28] sm:$0xff] %v783_v11  ;;  %v768_v15 = vadd.f32 %v767_v13, %v749_v12 }
  0xf6   : > { %v778_v16 = vadd.f32 %v768_v15, %v336_v14 }
  0xf7   : > { %v753_v17 = vpop.f32.mrf.mxu2 }
  0xf8   : > { %786 = vst [vmem:[#allocation2] sm:$0xff] %v778_v16  ;;  %v754_v18 = vadd.f32 %v753_v17, %v734_v1  ;;  %v772_v19 = vpop.f32.mrf.mxu3  ;;  %v769_v25 = vpop.f32.mrf.mxu1 }
  0xf9   : > { %v750_v21 = vpop.f32.mrf.mxu0 }
  0xfa   : > { %v773_v22 = vadd.f32 %v772_v19, %v754_v18  ;;  %v751_v23 = vadd.f32 %v750_v21, %v731_v56 }
  0xfc   : > { %v782_v26 = vadd.f32 %v773_v22, %v340_v20  ;;  %v770_v27 = vadd.f32 %v769_v25, %v751_v23 }
  0xfe   : > { %790 = vst [vmem:[#allocation2 + $0x20] sm:$0xff] %v782_v26  ;;  %v780_v28 = vadd.f32 %v770_v27, %v338_v24 }
  0xff   : > { %v755_v29 = vpop.f32.mrf.mxu2 }
 0x100   : > { %788 = vst [vmem:[#allocation2 + $0x10] sm:$0xff] %v780_v28  ;;  %v756_v30 = vadd.f32 %v755_v29, %v736_v9  ;;  %v774_v32 = vpop.f32.mrf.mxu3 }
 0x102   : > { %v775_v33 = vadd.f32 %v774_v32, %v756_v30  ;;  %796 = sbr.rel (%p1187_p11) target bundleno = 276 (0x114), region = 66 }
 0x104   : > { %v784_v34 = vadd.f32 %v775_v33, %v342_v31 }
 0x106   : > { %792 = vst [vmem:[#allocation2 + $0x38] sm:$0xff] %v784_v34 }
 0x107   : > { %v797_v35 = vld [vmem:[#allocation2 + $0x30] sm:$0xff]  ;;  %v805_v36 = vld [vmem:[%s1584_s2] sm:$0x3]  ;;  %v799_v40 = vld [vmem:[#allocation2 + $0x18] sm:$0xff] }
 0x108   : > { %v798_v37 = vld [vmem:[#allocation2] sm:$0xff]  ;;  %v807_v38 = vperm.slane %v805_v36, 0  ;;  %v808_v39 = vperm.slane %v805_v36, 1  ;;  %v800_v41 = vld [vmem:[#allocation2 + $0x10] sm:$0xff]  ;;  %v801_v42 = vld [vmem:[#allocation2 + $0x8] sm:$0xff] }
 0x109   : > { %v802_v46 = vld [vmem:[#allocation2 + $0x20] sm:$0xff]  ;;  %v803_v48 = vld [vmem:[#allocation2 + $0x28] sm:$0xff] }
 0x10a   : > { %v811_v43 = vadd.f32 %v807_v38, %v797_v35  ;;  %v812_v44 = vadd.f32 %v808_v39, %v798_v37  ;;  %v813_v45 = vadd.f32 %v807_v38, %v799_v40  ;;  %v814_v47 = vadd.f32 %v808_v39, %v800_v41 }
 0x10b   : > { %v815_v49 = vadd.f32 %v807_v38, %v801_v42  ;;  %v816_v51 = vadd.f32 %v808_v39, %v802_v46  ;;  %v817_v52 = vadd.f32 %v807_v38, %v803_v48 }
 0x10c   : > { %819 = vst [vmem:[%s1585_s3] sm:$0xff] %v811_v43 }
 0x10d   : > { %v804_v50 = vld [vmem:[#allocation2 + $0x38] sm:$0xff]  ;;  %820 = vst [vmem:[%s1585_s3 + $0x8] sm:$0xff] %v812_v44 }
 0x10e   : > { %821 = vst [vmem:[%s1585_s3 + $0x10] sm:$0xff] %v813_v45  ;;  %v818_v53 = vadd.f32 %v808_v39, %v804_v50 }
 0x10f   : > { %822 = vst [vmem:[%s1585_s3 + $0x18] sm:$0xff] %v814_v47 }
 0x110   : > { %823 = vst [vmem:[%s1585_s3 + $0x20] sm:$0xff] %v815_v49 }
 0x111   : > { %824 = vst [vmem:[%s1585_s3 + $0x28] sm:$0xff] %v816_v51 }
 0x112   : > { %825 = vst [vmem:[%s1585_s3 + $0x30] sm:$0xff] %v817_v52 }
 0x113   : > { %826 = vst [vmem:[%s1585_s3 + $0x38] sm:$0xff] %v818_v53 }
 0x114 PF: > { %s13_s16 = sadd.s32 1, %s1345_s16   ;;  %s1586_s12 = smov %s1333_s13 }
 0x115   : > { %p10_p12 = scmp.ge.s32.totalorder %s13_s16, 5   ;;  %s1587_s13 = smov %s1403_s20 }
 0x116   : > { %s1588_s14 = smov %s1341_s15  ;;  %s1589_s15 = smov %s1591_s17 }
 0x117   :  { %12 = sbr.rel (!%p10_p12) target bundleno = 3 (0x3), region = 113 }

// kernel: vgg16_forward.22
= control target key start
LH: loop header
LB: loop body
LE: loop exit
PB: predicated region body
PF: predicated region fallthrough
CT: control target
= control target key end

     0   :  { %s1336_s12 = smov 0   ;;  %s1338_s13 = smov 0   ;;  %s1546_s0 = inlined_call_operand.vmem [shape: bf16[32,2304], index: 0, kind: input, shape index: {}]   ;;  %s1547_s1 = inlined_call_operand.vmem [shape: bf16[2304,256], index: 1, kind: input, shape index: {}]   ;;  %s1548_s2 = inlined_call_operand.vmem [shape: f32[1,256], index: 2, kind: input, shape index: {}]   ;;  %s1549_s3 = inlined_call_operand.vmem [shape: f32[32,256], index: 3, kind: output, shape index: {}]  }
   0x1   :  { %s1340_s14 = smov 0   ;;  %s1342_s15 = smov 0  }
   0x2   :  { %s1344_s16 = smov 0  }
   0x3 LB: > { %s25_s17 = sadd.s32 1, %s1309_s15  ;;  %p48_p1 = scmp.ne.s32.totalorder %s1301_s13, %s1297_s12  ;;  %s1313_s16 = sphi %s1344_s16, %s13_s16   ;;  %s1309_s15 = sphi %s1342_s15, %s1553_s15   ;;  %s1305_s14 = sphi %s1340_s14, %s1552_s14   ;;  %s1301_s13 = sphi %s1338_s13, %s1551_s13   ;;  %s1297_s12 = sphi %s1336_s12, %s1550_s12  }
   0x4   : > { %p26_p0 = scmp.ge.s32.totalorder %s25_s17, 6  ;;  %p49_p2 = scmp.eq.s32.totalorder %s1313_s16, 0 }
   0x5   : > { %s41_s19 = sadd.s32 1, %s1301_s13  ;;  %p955_p5 = scmp.ge.s32.totalorder %s1313_s16, 6 }
   0x6   : > { %s1555_s17 = smov (%p26_p0, %s25_s17), 0  ;;  %p50_p3 = por %p49_p2, %p48_p1 }
   0x7   : > { %s37_s18 = ssub.s32 %s1309_s15, %s1555_s17  ;;  %164 = sbr.rel (%p955_p5) target bundleno = 25 (0x19), region = 20 }
   0x8   : > { %p39_p4 = scmp.eq.s32.totalorder %s37_s18, 0 }
   0xa   : > { %s1371_s20 = scalar_select %p39_p4, %s1301_s13, %s41_s19  }
   0xc   : > { %167 = sbr.rel (!%p50_p3) target bundleno = 25 (0x19), region = 24  ;;  %s169_s21 = sand.u32 (%p50_p3), 1, %s1301_s13  }
   0xd   : > { %s1166_s22 = smul.u32 (%p50_p3), 12, %s1309_s15 }
   0xe   : > { %s1232_s23 = smul.u32 (%p50_p3), 48, %s169_s21 }
   0xf   : > { %s177_s26 = scalar_lea.vmem (%p50_p3), %s1546_s0, %s1166_s22 }
  0x10   : > { %v192_v0 = vld [vmem:[%s177_s26] sm:$0xff] (%p50_p3)  ;;  %v194_v1 = vld [vmem:[%s177_s26 + $0x48] sm:$0xff] (%p50_p3)  ;;  %v196_v2 = vld [vmem:[%s177_s26 + $0x90] sm:$0xff] (%p50_p3)  ;;  %s171_s27 = scalar_lea.vmem (%p50_p3), [#allocation3], %s1232_s23 }
  0x11   : > { %193 = vst [vmem:[%s171_s27] sm:$0xff] %v192_v0  ;;  %v198_v3 = vld [vmem:[%s177_s26 + $0xd8] sm:$0xff]  ;;  %v957_v4 = vld [vmem:[%s177_s26 + $0x8] sm:$0xf]  ;;  %v959_v5 = vld [vmem:[%s177_s26 + $0x50] sm:$0xf] }
  0x12   : > { %195 = vst [vmem:[%s171_s27 + $0xc] sm:$0xff] %v194_v1  ;;  %v961_v6 = vld [vmem:[%s177_s26 + $0x98] sm:$0xf]  ;;  %v963_v7 = vld [vmem:[%s177_s26 + $0xe0] sm:$0xf] }
  0x13   : > { %197 = vst [vmem:[%s171_s27 + $0x18] sm:$0xff] %v196_v2 }
  0x14   : > { %199 = vst [vmem:[%s171_s27 + $0x24] sm:$0xff] %v198_v3 }
  0x15   : > { %958 = vst [vmem:[%s171_s27 + $0x8] sm:$0xf] %v957_v4 }
  0x16   : > { %960 = vst [vmem:[%s171_s27 + $0x14] sm:$0xf] %v959_v5 }
  0x17   : > { %962 = vst [vmem:[%s171_s27 + $0x20] sm:$0xf] %v961_v6 }
  0x18   : > { %964 = vst [vmem:[%s171_s27 + $0x2c] sm:$0xf] %v963_v7 }
  0x19 PF: > { %p965_p6 = scmp.ge.s32.totalorder %s1313_s16, 1  ;;  %p235_p7 = scmp.lt.s32.totalorder %s1313_s16, 7 }
  0x1b   : > { %p236_p8 = pnand %p965_p6, %p235_p7 }
  0x1c   : > { %s242_s28 = sand.u32 (!%p236_p8), 1, %s1297_s12   ;;  %s286_s29 = smul.u32 (!%p236_p8), 48, %s1305_s14 }
  0x1d   : > { %239 = sbr.rel (%p236_p8) target bundleno = 276 (0x114), region = 54  ;;  %p968_p10 = scmp.ne.s32.totalorder (!%p236_p8), %s1305_s14, 0 }
  0x1e   : > { %s1233_s30 = smul.u32 (!%p236_p8), 48, %s242_s28  ;;  %p288_p9 = scmp.lt.s32.totalorder (!%p236_p8), %s286_s29, 287 }
  0x20   : > { %s1388_s8 = scalar_lea.vmem (!%p236_p8), [#allocation3], %s1233_s30 }
  0x22   : > { %s1557_s29 = smov (!%p288_p9, %s286_s29), 287  ;;  %318 = sbr.rel (%p968_p10) target bundleno = 48 (0x30), region = 62 }
  0x23   : > { %s1167_s4 = sshll.u32 %s1557_s29, 3 }
  0x24   : > { %s1386_s7 = scalar_lea.vmem %s1547_s1, %s1167_s4 }
  0x27   : > { %v1315_v8 = vmov 0.0  }
  0x28   : > { %319 = vst [vmem:[#allocation2 + $0x30] sm:$0xff] %v1315_v8 }
  0x29   : > { %320 = vst [vmem:[#allocation2] sm:$0xff] %v1315_v8 }
  0x2a   : > { %321 = vst [vmem:[#allocation2 + $0x18] sm:$0xff] %v1315_v8 }
  0x2b   : > { %322 = vst [vmem:[#allocation2 + $0x10] sm:$0xff] %v1315_v8 }
  0x2c   : > { %323 = vst [vmem:[#allocation2 + $0x8] sm:$0xff] %v1315_v8 }
  0x2d   : > { %324 = vst [vmem:[#allocation2 + $0x20] sm:$0xff] %v1315_v8 }
  0x2e   : > { %325 = vst [vmem:[#allocation2 + $0x28] sm:$0xff] %v1315_v8 }
  0x2f   : > { %326 = vst [vmem:[#allocation2 + $0x38] sm:$0xff] %v1315_v8 }
  0x30 PF: > { %v1027_v9 = vld [vmem:[%s1386_s7 + $0x70] sm:$0xf]  ;;  %v1183_v10 = vld [vmem:[%s1386_s7 + $0x74] sm:$0xf0]  ;;  %v1182_v18 = vld [vmem:[%s1386_s7 + $0x74] sm:$0xf] }
  0x31   : > { %v1091_v11 = vld [vmem:[%s1386_s7 + $0xf0] sm:$0xf]  ;;  %v1028_v12 = vor.u32 %v1183_v10, %v1027_v9  ;;  %v1199_v13 = vld [vmem:[%s1386_s7 + $0xf4] sm:$0xf0]  ;;  %v1029_v19 = vld [vmem:[%s1386_s7 + $0x78] sm:$0xf0] }
  0x32   : > { %v1155_v14 = vld [vmem:[%s1386_s7 + $0x170] sm:$0xf]  ;;  %v1215_v15 = vld [vmem:[%s1386_s7 + $0x174] sm:$0xf0]  ;;  %v1092_v16 = vor.u32 %v1199_v13, %v1091_v11  ;;  %v1019_v20 = vld [vmem:[%s1386_s7 + $0x60] sm:$0xf]  ;;  %v1032_v21 = vor.u32 %v1182_v18, %v1029_v19 }
  0x33   : > { %v1156_v17 = vor.u32 %v1215_v15, %v1155_v14  ;;  %661 = vmatpush.bf16.msra.mxu0 %v1028_v12  ;;  %v1181_v22 = vld [vmem:[%s1386_s7 + $0x64] sm:$0xf0]  ;;  %v1083_v23 = vld [vmem:[%s1386_s7 + $0xe0] sm:$0xf]  ;;  %v1180_v29 = vld [vmem:[%s1386_s7 + $0x64] sm:$0xf] }
  0x34   : > { %v1197_v24 = vld [vmem:[%s1386_s7 + $0xe4] sm:$0xf0]  ;;  %680 = vmatpush.bf16.msra.mxu1 %v1092_v16  ;;  %v1020_v25 = vor.u32 %v1181_v22, %v1019_v20  ;;  %v1147_v27 = vld [vmem:[%s1386_s7 + $0x160] sm:$0xf]  ;;  %718 = vmatpush.bf16.msra.mxu3 %v1032_v21  ;;  %v1021_v31 = vld [vmem:[%s1386_s7 + $0x68] sm:$0xf0] }
  0x35   : > { %699 = vmatpush.bf16.msra.mxu2 %v1156_v17  ;;  %v1084_v26 = vor.u32 %v1197_v24, %v1083_v23  ;;  %v1213_v28 = vld [vmem:[%s1386_s7 + $0x164] sm:$0xf0]  ;;  %v1011_v32 = vld [vmem:[%s1386_s7 + $0x50] sm:$0xf]  ;;  %v1179_v33 = vld [vmem:[%s1386_s7 + $0x54] sm:$0xf0]  ;;  %v1024_v34 = vor.u32 %v1180_v29, %v1021_v31 }
  0x36   : > { %v1148_v30 = vor.u32 %v1213_v28, %v1147_v27  ;;  %v1075_v35 = vld [vmem:[%s1386_s7 + $0xd0] sm:$0xf]  ;;  %v1195_v36 = vld [vmem:[%s1386_s7 + $0xd4] sm:$0xf0]  ;;  %v1012_v38 = vor.u32 %v1179_v33, %v1011_v32  ;;  %v1178_v40 = vld [vmem:[%s1386_s7 + $0x54] sm:$0xf] }
  0x37   : > { %v1139_v37 = vld [vmem:[%s1386_s7 + $0x150] sm:$0xf]  ;;  %662 = vmatpush.bf16.msra.mxu0 %v1020_v25  ;;  %v1211_v39 = vld [vmem:[%s1386_s7 + $0x154] sm:$0xf0]  ;;  %v1013_v41 = vld [vmem:[%s1386_s7 + $0x58] sm:$0xf0]  ;;  %v1076_v42 = vor.u32 %v1195_v36, %v1075_v35 }
  0x38   : > { %681 = vmatpush.bf16.msra.mxu1 %v1084_v26  ;;  %v1140_v43 = vor.u32 %v1211_v39, %v1139_v37  ;;  %v1003_v44 = vld [vmem:[%s1386_s7 + $0x40] sm:$0xf]  ;;  %v1177_v45 = vld [vmem:[%s1386_s7 + $0x44] sm:$0xf0]  ;;  %719 = vmatpush.bf16.msra.mxu3 %v1024_v34  ;;  %v1016_v47 = vor.u32 %v1178_v40, %v1013_v41  ;;  %v1176_v51 = vld [vmem:[%s1386_s7 + $0x44] sm:$0xf] }
  0x39   : > { %700 = vmatpush.bf16.msra.mxu2 %v1148_v30  ;;  %v1067_v46 = vld [vmem:[%s1386_s7 + $0xc0] sm:$0xf]  ;;  %v1193_v48 = vld [vmem:[%s1386_s7 + $0xc4] sm:$0xf0]  ;;  %v1005_v52 = vld [vmem:[%s1386_s7 + $0x48] sm:$0xf0]  ;;  %v1004_v53 = vor.u32 %v1177_v45, %v1003_v44 }
  0x3a   : > { %v1131_v49 = vld [vmem:[%s1386_s7 + $0x140] sm:$0xf]  ;;  %v1209_v50 = vld [vmem:[%s1386_s7 + $0x144] sm:$0xf0]  ;;  %v1068_v54 = vor.u32 %v1193_v48, %v1067_v46  ;;  %v995_v56 = vld [vmem:[%s1386_s7 + $0x30] sm:$0xf]  ;;  %v1008_v59 = vor.u32 %v1176_v51, %v1005_v52 }
  0x3b   : > { %663 = vmatpush.bf16.msra.mxu0 %v1012_v38  ;;  %v1132_v55 = vor.u32 %v1209_v50, %v1131_v49  ;;  %v1175_v57 = vld [vmem:[%s1386_s7 + $0x34] sm:$0xf0]  ;;  %v1059_v58 = vld [vmem:[%s1386_s7 + $0xb0] sm:$0xf]  ;;  %v1174_v63 = vld [vmem:[%s1386_s7 + $0x34] sm:$0xf] }
  0x3c   : > { %682 = vmatpush.bf16.msra.mxu1 %v1076_v42  ;;  %720 = vmatpush.bf16.msra.mxu3 %v1016_v47  ;;  %v1191_v60 = vld [vmem:[%s1386_s7 + $0xb4] sm:$0xf0]  ;;  %v1123_v61 = vld [vmem:[%s1386_s7 + $0x130] sm:$0xf]  ;;  %v997_v0 = vld [vmem:[%s1386_s7 + $0x38] sm:$0xf0]  ;;  %v996_v1 = vor.u32 %v1175_v57, %v995_v56 }
  0x3d   : > { %701 = vmatpush.bf16.msra.mxu2 %v1140_v43  ;;  %v1207_v62 = vld [vmem:[%s1386_s7 + $0x134] sm:$0xf0]  ;;  %v1060_v2 = vor.u32 %v1191_v60, %v1059_v58  ;;  %v987_v4 = vld [vmem:[%s1386_s7 + $0x20] sm:$0xf]  ;;  %v1173_v5 = vld [vmem:[%s1386_s7 + $0x24] sm:$0xf0]  ;;  %v1000_v7 = vor.u32 %v1174_v63, %v997_v0 }
  0x3e   : > { %v1124_v3 = vor.u32 %v1207_v62, %v1123_v61  ;;  %v1051_v6 = vld [vmem:[%s1386_s7 + $0xa0] sm:$0xf]  ;;  %v1189_v8 = vld [vmem:[%s1386_s7 + $0xa4] sm:$0xf0]  ;;  %v1172_v11 = vld [vmem:[%s1386_s7 + $0x24] sm:$0xf]  ;;  %v988_v13 = vor.u32 %v1173_v5, %v987_v4 }
  0x3f   : > { %664 = vmatpush.bf16.msra.mxu0 %v1004_v53  ;;  %v1115_v9 = vld [vmem:[%s1386_s7 + $0x120] sm:$0xf]  ;;  %v1205_v10 = vld [vmem:[%s1386_s7 + $0x124] sm:$0xf0]  ;;  %v989_v12 = vld [vmem:[%s1386_s7 + $0x28] sm:$0xf0]  ;;  %v1052_v17 = vor.u32 %v1189_v8, %v1051_v6 }
  0x40   : > { %683 = vmatpush.bf16.msra.mxu1 %v1068_v54  ;;  %721 = vmatpush.bf16.msra.mxu3 %v1008_v59  ;;  %v979_v14 = vld [vmem:[%s1386_s7 + $0x10] sm:$0xf]  ;;  %v1171_v15 = vld [vmem:[%s1386_s7 + $0x14] sm:$0xf0]  ;;  %v1116_v18 = vor.u32 %v1205_v10, %v1115_v9  ;;  %v992_v22 = vor.u32 %v1172_v11, %v989_v12  ;;  %v1170_v23 = vld [vmem:[%s1386_s7 + $0x14] sm:$0xf] }
  0x41   : > { %702 = vmatpush.bf16.msra.mxu2 %v1132_v55  ;;  %v1043_v16 = vld [vmem:[%s1386_s7 + $0x90] sm:$0xf]  ;;  %v1187_v19 = vld [vmem:[%s1386_s7 + $0x94] sm:$0xf0]  ;;  %v980_v26 = vor.u32 %v1171_v15, %v979_v14  ;;  %v981_v27 = vld [vmem:[%s1386_s7 + $0x18] sm:$0xf0] }
  0x42   : > { %v1107_v20 = vld [vmem:[%s1386_s7 + $0x110] sm:$0xf]  ;;  %v1203_v21 = vld [vmem:[%s1386_s7 + $0x114] sm:$0xf0]  ;;  %v330_v31 = vld [vmem:[%s1388_s8 + $0x14] sm:$0xf]  ;;  %v1044_v39 = vor.u32 %v1187_v19, %v1043_v16  ;;  %v984_v44 = vor.u32 %v1170_v23, %v981_v27 }
  0x43   : > { %665 = vmatpush.bf16.msra.mxu0 %v996_v1  ;;  %v327_v24 = vld [vmem:[%s1388_s8] sm:$0xff]  ;;  %v329_v25 = vld [vmem:[%s1388_s8 + $0xc] sm:$0xff]  ;;  %v328_v30 = vld [vmem:[%s1388_s8 + $0x8] sm:$0xf]  ;;  %v340_v38 = vunpack.c.l.bf16 %v330_v31  ;;  %v1108_v40 = vor.u32 %v1203_v21, %v1107_v20  ;;  %p1161_p11 = scmp.ne.s32.totalorder %s1305_s14, 5 }
  0x44   : > { %684 = vmatpush.bf16.msra.mxu1 %v1060_v2  ;;  %722 = vmatpush.bf16.msra.mxu3 %v1000_v7  ;;  %v335_v28 = vunpack.c.l.bf16 %v327_v24  ;;  %v338_v29 = vunpack.c.l.bf16 %v329_v25  ;;  %v971_v32 = vld [vmem:[%s1386_s7] sm:$0xf]  ;;  %v1169_v33 = vld [vmem:[%s1386_s7 + $0x4] sm:$0xf0]  ;;  %v336_v35 = vunpack.c.h.bf16 %v327_v24  ;;  %v339_v36 = vunpack.c.h.bf16 %v329_v25  ;;  %v1168_v45 = vld [vmem:[%s1386_s7 + $0x4] sm:$0xf] }
  0x45   : > { %703 = vmatpush.bf16.msra.mxu2 %v1124_v3  ;;  %v1035_v34 = vld [vmem:[%s1386_s7 + $0x80] sm:$0xf]  ;;  %v337_v37 = vunpack.c.l.bf16 %v328_v30  ;;  %v1185_v41 = vld [vmem:[%s1386_s7 + $0x84] sm:$0xf0]  ;;  %v973_v46 = vld [vmem:[%s1386_s7 + $0x8] sm:$0xf0]  ;;  %v972_v48 = vor.u32 %v1169_v33, %v971_v32 }
  0x46   : > { %v1099_v42 = vld [vmem:[%s1386_s7 + $0x100] sm:$0xf]  ;;  %v1201_v43 = vld [vmem:[%s1386_s7 + $0x104] sm:$0xf0]  ;;  %v1198_v47 = vld [vmem:[%s1386_s7 + $0xf4] sm:$0xf]  ;;  %v1036_v58 = vor.u32 %v1185_v41, %v1035_v34  ;;  %v976_v60 = vor.u32 %v1168_v45, %v973_v46 }
  0x47   : > { %666 = vmatpush.bf16.msra.mxu0 %v988_v13  ;;  %v347_v49 = vmax.f32 %v335_v28, 0.0  ;;  %v350_v50 = vmax.f32 %v338_v29, 0.0  ;;  %v1093_v51 = vld [vmem:[%s1386_s7 + $0xf8] sm:$0xf0]  ;;  %v1214_v52 = vld [vmem:[%s1386_s7 + $0x174] sm:$0xf]  ;;  %v1100_v59 = vor.u32 %v1201_v43, %v1099_v42 }
  0x48   : > { %685 = vmatpush.bf16.msra.mxu1 %v1052_v17  ;;  %723 = vmatpush.bf16.msra.mxu3 %v992_v22  ;;  %v348_v53 = vmax.f32 %v336_v35, 0.0  ;;  %v351_v54 = vmax.f32 %v339_v36, 0.0  ;;  %v349_v55 = vmax.f32 %v337_v37, 0.0  ;;  %v352_v56 = vmax.f32 %v340_v38, 0.0  ;;  %v1157_v57 = vld [vmem:[%s1386_s7 + $0x178] sm:$0xf0] }
  0x49   : > { %704 = vmatpush.bf16.msra.mxu2 %v1116_v18  ;;  %v1096_v61 = vor.u32 %v1198_v47, %v1093_v51  ;;  %v359_v62 = vpack.c.bf16 %v350_v50, %v347_v49  ;;  %v1160_v63 = vor.u32 %v1214_v52, %v1157_v57  ;;  %v1196_v0 = vld [vmem:[%s1386_s7 + $0xe4] sm:$0xf]  ;;  %v1085_v1 = vld [vmem:[%s1386_s7 + $0xe8] sm:$0xf0]  ;;  %v1194_v9 = vld [vmem:[%s1386_s7 + $0xd4] sm:$0xf] }
  0x4a   : > { %v1465_v2 = vpack.c.bf16 %v351_v54, %v348_v53  ;;  %v1467_v3 = vpack.c.bf16 %v352_v56, %v349_v55  ;;  %v1212_v4 = vld [vmem:[%s1386_s7 + $0x164] sm:$0xf]  ;;  %v1149_v5 = vld [vmem:[%s1386_s7 + $0x168] sm:$0xf0]  ;;  %v1088_v6 = vor.u32 %v1196_v0, %v1085_v1  ;;  %v1077_v10 = vld [vmem:[%s1386_s7 + $0xd8] sm:$0xf0] }
  0x4b   : > { %667 = vmatpush.bf16.msra.mxu0 %v980_v26  ;;  %v331_v7 = vld [vmem:[%s1388_s8 + $0x18] sm:$0xff]  ;;  %v1152_v8 = vor.u32 %v1212_v4, %v1149_v5  ;;  %v333_v11 = vld [vmem:[%s1388_s8 + $0x24] sm:$0xff]  ;;  %v332_v14 = vld [vmem:[%s1388_s8 + $0x20] sm:$0xf]  ;;  %v1080_v16 = vor.u32 %v1194_v9, %v1077_v10 }
  0x4c   : > { %686 = vmatpush.bf16.msra.mxu1 %v1044_v39  ;;  %724 = vmatpush.bf16.msra.mxu3 %v984_v44  ;;  %v1210_v12 = vld [vmem:[%s1386_s7 + $0x154] sm:$0xf]  ;;  %v1141_v13 = vld [vmem:[%s1386_s7 + $0x158] sm:$0xf0]  ;;  %v341_v17 = vunpack.c.l.bf16 %v331_v7  ;;  %v344_v18 = vunpack.c.l.bf16 %v333_v11  ;;  %v1192_v20 = vld [vmem:[%s1386_s7 + $0xc4] sm:$0xf]  ;;  %v342_v22 = vunpack.c.h.bf16 %v331_v7  ;;  %v345_v23 = vunpack.c.h.bf16 %v333_v11 }
  0x4d   : > { %705 = vmatpush.bf16.msra.mxu2 %v1108_v40  ;;  %v334_v15 = vld [vmem:[%s1388_s8 + $0x2c] sm:$0xf]  ;;  %v1144_v19 = vor.u32 %v1210_v12, %v1141_v13  ;;  %v1208_v24 = vld [vmem:[%s1386_s7 + $0x144] sm:$0xf]  ;;  %v343_v26 = vunpack.c.l.bf16 %v332_v14  ;;  %v1190_v34 = vld [vmem:[%s1386_s7 + $0xb4] sm:$0xf] }
  0x4e   : > { %v1069_v21 = vld [vmem:[%s1386_s7 + $0xc8] sm:$0xf0]  ;;  %v346_v27 = vunpack.c.l.bf16 %v334_v15  ;;  %v353_v29 = vmax.f32 %v341_v17, 0.0  ;;  %v356_v30 = vmax.f32 %v344_v18, 0.0  ;;  %v354_v32 = vmax.f32 %v342_v22, 0.0  ;;  %v365_v4 = vld [vmem:[#allocation2 + $0x30] sm:$0xff] }
  0x4f   : > { %668 = vmatpush.bf16.msra.mxu0 %v972_v48  ;;  %v1133_v25 = vld [vmem:[%s1386_s7 + $0x148] sm:$0xf0]  ;;  %v1072_v28 = vor.u32 %v1192_v20, %v1069_v21  ;;  %v357_v33 = vmax.f32 %v345_v23, 0.0  ;;  %v1061_v35 = vld [vmem:[%s1386_s7 + $0xb8] sm:$0xf0]  ;;  %v355_v36 = vmax.f32 %v343_v26, 0.0 }
  0x50   : > { %687 = vmatpush.bf16.msra.mxu1 %v1036_v58  ;;  %725 = vmatpush.bf16.msra.mxu3 %v976_v60  ;;  %v1136_v31 = vor.u32 %v1208_v24, %v1133_v25  ;;  %v358_v37 = vmax.f32 %v346_v27, 0.0  ;;  %v1206_v38 = vld [vmem:[%s1386_s7 + $0x134] sm:$0xf]  ;;  %v1125_v39 = vld [vmem:[%s1386_s7 + $0x138] sm:$0xf0]  ;;  %v1064_v40 = vor.u32 %v1190_v34, %v1061_v35  ;;  %v362_v41 = vpack.c.bf16 %v356_v30, %v353_v29  ;;  %v369_v18 = vld [vmem:[#allocation2 + $0x8] sm:$0xff] }
  0x51   : > { %706 = vmatpush.bf16.msra.mxu2 %v1100_v59  ;;  %v1128_v42 = vor.u32 %v1206_v38, %v1125_v39  ;;  %v1188_v43 = vld [vmem:[%s1386_s7 + $0xa4] sm:$0xf]  ;;  %v1053_v44 = vld [vmem:[%s1386_s7 + $0xa8] sm:$0xf0]  ;;  %v363_v45 = vpack.c.bf16 %v357_v33, %v354_v32  ;;  %v1186_v51 = vld [vmem:[%s1386_s7 + $0x94] sm:$0xf] }
  0x52   : > { %669 = vmatmul.bf16.vlgmr.msra.gmra.mxu0 %v359_v62  ;;  %v364_v46 = vpack.c.bf16 %v358_v37, %v355_v36  ;;  %v1204_v47 = vld [vmem:[%s1386_s7 + $0x124] sm:$0xf]  ;;  %v1117_v48 = vld [vmem:[%s1386_s7 + $0x128] sm:$0xf0]  ;;  %v1056_v49 = vor.u32 %v1188_v43, %v1053_v44  ;;  %v1045_v52 = vld [vmem:[%s1386_s7 + $0x98] sm:$0xf0] }
  0x53   : > { %688 = vmatmul.bf16.vlgmr.msra.gmra.mxu1 %v1465_v2  ;;  %726 = vmatmul.bf16.vlgmr.msra.gmra.mxu3 %v359_v62  ;;  %v1120_v50 = vor.u32 %v1204_v47, %v1117_v48  ;;  %v1202_v53 = vld [vmem:[%s1386_s7 + $0x114] sm:$0xf]  ;;  %v1109_v54 = vld [vmem:[%s1386_s7 + $0x118] sm:$0xf0]  ;;  %v1048_v55 = vor.u32 %v1186_v51, %v1045_v52  ;;  %v1184_v57 = vld [vmem:[%s1386_s7 + $0x84] sm:$0xf] }
  0x54   : > { %756 = vmatpush.bf16.msrb.mxu1 %v1160_v63  ;;  %707 = vmatmul.bf16.vlgmr.msra.gmra.mxu2 %v1467_v3  ;;  %v1112_v56 = vor.u32 %v1202_v53, %v1109_v54  ;;  %v1037_v58 = vld [vmem:[%s1386_s7 + $0x88] sm:$0xf0]  ;;  %v1200_v59 = vld [vmem:[%s1386_s7 + $0x104] sm:$0xf]  ;;  %v367_v12 = vld [vmem:[#allocation2 + $0x18] sm:$0xff] }
  0x55   : > { %1216 = vmatpush.bf16.msrb.mxu2 %v1096_v61  ;;  %737 = vmatpush.bf16.msrb.mxu0 %v1096_v61  ;;  %v1101_v60 = vld [vmem:[%s1386_s7 + $0x108] sm:$0xf0]  ;;  %v1040_v61 = vor.u32 %v1184_v57, %v1037_v58  ;;  %v366_v34 = vld [vmem:[#allocation2] sm:$0xff]  ;;  %v368_v44 = vld [vmem:[#allocation2 + $0x10] sm:$0xff] }
  0x56   : > { %1224 = vmatpush.bf16.msrb.mxu3 %v1160_v63  ;;  %v1104_v62 = vor.u32 %v1200_v59, %v1101_v60  ;;  %v371_v26 = vld [vmem:[#allocation2 + $0x28] sm:$0xff]  ;;  %v372_v51 = vld [vmem:[#allocation2 + $0x38] sm:$0xff] }
  0x58   : > { %757 = vmatpush.bf16.msrb.mxu1 %v1152_v8 }
  0x59   : > { %1217 = vmatpush.bf16.msrb.mxu2 %v1088_v6  ;;  %738 = vmatpush.bf16.msrb.mxu0 %v1088_v6 }
  0x5a   : > { %1225 = vmatpush.bf16.msrb.mxu3 %v1152_v8 }
  0x5c   : > { %758 = vmatpush.bf16.msrb.mxu1 %v1144_v19 }
  0x5d   : > { %1218 = vmatpush.bf16.msrb.mxu2 %v1080_v16  ;;  %739 = vmatpush.bf16.msrb.mxu0 %v1080_v16 }
  0x5e   : > { %1226 = vmatpush.bf16.msrb.mxu3 %v1144_v19 }
  0x60   : > { %759 = vmatpush.bf16.msrb.mxu1 %v1136_v31 }
  0x61   : > { %1219 = vmatpush.bf16.msrb.mxu2 %v1072_v28  ;;  %740 = vmatpush.bf16.msrb.mxu0 %v1072_v28 }
  0x62   : > { %1227 = vmatpush.bf16.msrb.mxu3 %v1136_v31  ;;  %674 = vmatmul.bf16.gmra.mxu0 %v362_v41 }
  0x63   : > { %693 = vmatmul.bf16.gmra.mxu1 %v363_v45  ;;  %731 = vmatmul.bf16.gmra.mxu3 %v362_v41 }
  0x64   : > { %760 = vmatpush.bf16.msrb.mxu1 %v1128_v42  ;;  %712 = vmatmul.bf16.gmra.mxu2 %v364_v46 }
  0x65   : > { %1220 = vmatpush.bf16.msrb.mxu2 %v1064_v40  ;;  %741 = vmatpush.bf16.msrb.mxu0 %v1064_v40  ;;  %v370_v40 = vld [vmem:[#allocation2 + $0x20] sm:$0xff] }
  0x66   : > { %1228 = vmatpush.bf16.msrb.mxu3 %v1128_v42 }
  0x68   : > { %761 = vmatpush.bf16.msrb.mxu1 %v1120_v50 }
  0x69   : > { %1221 = vmatpush.bf16.msrb.mxu2 %v1056_v49  ;;  %742 = vmatpush.bf16.msrb.mxu0 %v1056_v49 }
  0x6a   : > { %1229 = vmatpush.bf16.msrb.mxu3 %v1120_v50 }
  0x6c   : > { %762 = vmatpush.bf16.msrb.mxu1 %v1112_v56 }
  0x6d   : > { %1222 = vmatpush.bf16.msrb.mxu2 %v1048_v55  ;;  %743 = vmatpush.bf16.msrb.mxu0 %v1048_v55 }
  0x6e   : > { %1230 = vmatpush.bf16.msrb.mxu3 %v1112_v56 }
  0x70   : > { %763 = vmatpush.bf16.msrb.mxu1 %v1104_v62 }
  0x71   : > { %1223 = vmatpush.bf16.msrb.mxu2 %v1040_v61  ;;  %744 = vmatpush.bf16.msrb.mxu0 %v1040_v61 }
  0x72   : > { %1231 = vmatpush.bf16.msrb.mxu3 %v1104_v62 }
  0x73   : > { %764 = vmatmul.bf16.vlgmr.msrb.gmra.mxu1 %v1467_v3 }
  0x74   : > { %745 = vmatmul.bf16.vlgmr.msrb.gmra.mxu0 %v1465_v2  ;;  %750 = vmatmul.bf16.vlgmr.msrb.gmra.mxu2 %v363_v45 }
  0x75   : > { %769 = vmatmul.bf16.vlgmr.msrb.gmra.mxu3 %v364_v46 }
  0xcf   : > { %v670_v63 = vpop.f32.mrf.mxu0 }
  0xd0   : > { %v689_v0 = vpop.f32.mrf.mxu1 }
  0xd1   : > { %v690_v1 = vadd.f32 %v689_v0, %v670_v63 }
  0xd6   : > { %v727_v7 = vpop.f32.mrf.mxu3 }
  0xd7   : > { %v708_v5 = vpop.f32.mrf.mxu2  ;;  %v672_v8 = vpop.f32.mrf.mxu0 }
  0xd8   : > { %v709_v6 = vadd.f32 %v708_v5, %v690_v1  ;;  %v691_v9 = vpop.f32.mrf.mxu1 }
  0xd9   : > { %v692_v11 = vadd.f32 %v691_v9, %v672_v8 }
  0xda   : > { %v775_v10 = vadd.f32 %v709_v6, %v365_v4 }
  0xdc   : > { %783 = vst [vmem:[#allocation2 + $0x30] sm:$0xff] %v775_v10 }
  0xde   : > { %v729_v2 = vpop.f32.mrf.mxu3 }
  0xdf   : > { %v710_v13 = vpop.f32.mrf.mxu2  ;;  %v675_v15 = vpop.f32.mrf.mxu0 }
  0xe0   : > { %v711_v14 = vadd.f32 %v710_v13, %v692_v11  ;;  %v694_v16 = vpop.f32.mrf.mxu1 }
  0xe1   : > { %v695_v17 = vadd.f32 %v694_v16, %v675_v15 }
  0xe2   : > { %v777_v3 = vadd.f32 %v711_v14, %v367_v12 }
  0xe4   : > { %785 = vst [vmem:[#allocation2 + $0x18] sm:$0xff] %v777_v3 }
  0xe6   : > { %v732_v21 = vpop.f32.mrf.mxu3 }
  0xe7   : > { %v713_v19 = vpop.f32.mrf.mxu2  ;;  %v677_v22 = vpop.f32.mrf.mxu0 }
  0xe8   : > { %v714_v20 = vadd.f32 %v713_v19, %v695_v17  ;;  %v696_v23 = vpop.f32.mrf.mxu1 }
  0xe9   : > { %v697_v25 = vadd.f32 %v696_v23, %v677_v22 }
  0xea   : > { %v779_v24 = vadd.f32 %v714_v20, %v369_v18 }
  0xec   : > { %787 = vst [vmem:[#allocation2 + $0x8] sm:$0xff] %v779_v24 }
  0xee   : > { %v734_v29 = vpop.f32.mrf.mxu3 }
  0xef   : > { %v715_v27 = vpop.f32.mrf.mxu2 }
  0xf0   : > { %v716_v28 = vadd.f32 %v715_v27, %v697_v25  ;;  %v765_v33 = vpop.f32.mrf.mxu1 }
  0xf1   : > { %v746_v30 = vpop.f32.mrf.mxu0 }
  0xf2   : > { %v781_v31 = vadd.f32 %v716_v28, %v371_v26  ;;  %v747_v32 = vadd.f32 %v746_v30, %v727_v7 }
  0xf4   : > { %789 = vst [vmem:[#allocation2 + $0x28] sm:$0xff] %v781_v31  ;;  %v766_v35 = vadd.f32 %v765_v33, %v747_v32 }
  0xf6   : > { %v776_v36 = vadd.f32 %v766_v35, %v366_v34 }
  0xf7   : > { %v751_v37 = vpop.f32.mrf.mxu2 }
  0xf8   : > { %784 = vst [vmem:[#allocation2] sm:$0xff] %v776_v36  ;;  %v752_v38 = vadd.f32 %v751_v37, %v732_v21  ;;  %v770_v39 = vpop.f32.mrf.mxu3  ;;  %v767_v45 = vpop.f32.mrf.mxu1 }
  0xf9   : > { %v748_v41 = vpop.f32.mrf.mxu0 }
  0xfa   : > { %v771_v42 = vadd.f32 %v770_v39, %v752_v38  ;;  %v749_v43 = vadd.f32 %v748_v41, %v729_v2 }
  0xfc   : > { %v780_v46 = vadd.f32 %v771_v42, %v370_v40  ;;  %v768_v47 = vadd.f32 %v767_v45, %v749_v43 }
  0xfe   : > { %788 = vst [vmem:[#allocation2 + $0x20] sm:$0xff] %v780_v46  ;;  %v778_v48 = vadd.f32 %v768_v47, %v368_v44 }
  0xff   : > { %v753_v49 = vpop.f32.mrf.mxu2 }
 0x100   : > { %786 = vst [vmem:[#allocation2 + $0x10] sm:$0xff] %v778_v48  ;;  %v754_v50 = vadd.f32 %v753_v49, %v734_v29  ;;  %v772_v52 = vpop.f32.mrf.mxu3 }
 0x102   : > { %v773_v53 = vadd.f32 %v772_v52, %v754_v50  ;;  %794 = sbr.rel (%p1161_p11) target bundleno = 276 (0x114), region = 66 }
 0x104   : > { %v782_v54 = vadd.f32 %v773_v53, %v372_v51 }
 0x106   : > { %790 = vst [vmem:[#allocation2 + $0x38] sm:$0xff] %v782_v54 }
 0x107   : > { %v795_v55 = vld [vmem:[#allocation2 + $0x30] sm:$0xff]  ;;  %v803_v56 = vld [vmem:[%s1548_s2] sm:$0x3]  ;;  %v797_v60 = vld [vmem:[#allocation2 + $0x18] sm:$0xff] }
 0x108   : > { %v796_v57 = vld [vmem:[#allocation2] sm:$0xff]  ;;  %v805_v58 = vperm.slane %v803_v56, 0  ;;  %v806_v59 = vperm.slane %v803_v56, 1  ;;  %v798_v61 = vld [vmem:[#allocation2 + $0x10] sm:$0xff]  ;;  %v799_v62 = vld [vmem:[#allocation2 + $0x8] sm:$0xff] }
 0x109   : > { %v800_v4 = vld [vmem:[#allocation2 + $0x20] sm:$0xff]  ;;  %v801_v6 = vld [vmem:[#allocation2 + $0x28] sm:$0xff] }
 0x10a   : > { %v809_v63 = vadd.f32 %v805_v58, %v795_v55  ;;  %v810_v0 = vadd.f32 %v806_v59, %v796_v57  ;;  %v811_v1 = vadd.f32 %v805_v58, %v797_v60  ;;  %v812_v5 = vadd.f32 %v806_v59, %v798_v61 }
 0x10b   : > { %v813_v7 = vadd.f32 %v805_v58, %v799_v62  ;;  %v814_v9 = vadd.f32 %v806_v59, %v800_v4  ;;  %v815_v10 = vadd.f32 %v805_v58, %v801_v6 }
 0x10c   : > { %817 = vst [vmem:[%s1549_s3] sm:$0xff] %v809_v63 }
 0x10d   : > { %v802_v8 = vld [vmem:[#allocation2 + $0x38] sm:$0xff]  ;;  %818 = vst [vmem:[%s1549_s3 + $0x8] sm:$0xff] %v810_v0 }
 0x10e   : > { %819 = vst [vmem:[%s1549_s3 + $0x10] sm:$0xff] %v811_v1  ;;  %v816_v11 = vadd.f32 %v806_v59, %v802_v8 }
 0x10f   : > { %820 = vst [vmem:[%s1549_s3 + $0x18] sm:$0xff] %v812_v5 }
 0x110   : > { %821 = vst [vmem:[%s1549_s3 + $0x20] sm:$0xff] %v813_v7 }
 0x111   : > { %822 = vst [vmem:[%s1549_s3 + $0x28] sm:$0xff] %v814_v9 }
 0x112   : > { %823 = vst [vmem:[%s1549_s3 + $0x30] sm:$0xff] %v815_v10 }
 0x113   : > { %824 = vst [vmem:[%s1549_s3 + $0x38] sm:$0xff] %v816_v11 }
 0x114 PF: > { %s13_s16 = sadd.s32 1, %s1313_s16   ;;  %s1550_s12 = smov %s1301_s13 }
 0x115   : > { %p10_p12 = scmp.ge.s32.totalorder %s13_s16, 8   ;;  %s1551_s13 = smov %s1371_s20 }
 0x116   : > { %s1552_s14 = smov %s1309_s15  ;;  %s1553_s15 = smov %s1555_s17 }
 0x117   :  { %12 = sbr.rel (!%p10_p12) target bundleno = 3 (0x3), region = 113 }

// kernel: vgg16_forward.24
= control target key start
LH: loop header
LB: loop body
LE: loop exit
PB: predicated region body
PF: predicated region fallthrough
CT: control target
= control target key end

     0   :  { %vm81_vm0 = vcmask 1041408   ;;  %vm247_vm1 = vcmask 1041409   ;;  %vm249_vm2 = vcmask 1043459   ;;  %vm251_vm3 = vcmask 1045509   ;;  %s398_s0 = inlined_call_operand.vmem [shape: f32[4,2,2,2,256], index: 0, kind: input, shape index: {}]   ;;  %s399_s1 = inlined_call_operand.vmem [shape: f32[4,2,256], index: 1, kind: output, shape index: {}]  }
   0x1   :  { %v8_v0 = vld [vmem:[%s398_s0] sm:$0xf]  ;;  %v10_v1 = vld [vmem:[%s398_s0 + $0x8] sm:$0xf]  ;;  %v9_v2 = vld [vmem:[%s398_s0 + $0x4] sm:$0xf] }
   0x2   :  { %v24_v3 = vmax.f32 %v8_v0, %v10_v1  ;;  %v11_v4 = vld [vmem:[%s398_s0 + $0xc] sm:$0xf]  ;;  %v12_v6 = vld [vmem:[%s398_s0 + $0x10] sm:$0xf]  ;;  %v14_v7 = vld [vmem:[%s398_s0 + $0x18] sm:$0xf] }
   0x3   :  { %v25_v5 = vmax.f32 %v9_v2, %v11_v4  ;;  %v26_v8 = vmax.f32 %v12_v6, %v14_v7  ;;  %v13_v9 = vld [vmem:[%s398_s0 + $0x14] sm:$0xf]  ;;  %v15_v10 = vld [vmem:[%s398_s0 + $0x1c] sm:$0xf]  ;;  %v16_v16 = vld [vmem:[%s398_s0 + $0x20] sm:$0xf] }
   0x4   :  { %40 = vst [vmem:[#allocation1] ss:$4 sm:$0xff] %v24_v3  ;;  %v27_v13 = vmax.f32 %v13_v9, %v15_v10  ;;  %v18_v22 = vld [vmem:[%s398_s0 + $0x28] sm:$0xf]  ;;  %v17_v32 = vld [vmem:[%s398_s0 + $0x24] sm:$0xf] }
   0x5   :  { %44 = vst [vmem:[#allocation1 + $0x20] ss:$4 sm:$0xff] %v25_v5  ;;  %v28_v31 = vmax.f32 %v16_v16, %v18_v22  ;;  %v19_v33 = vld [vmem:[%s398_s0 + $0x2c] sm:$0xf]  ;;  %v20_v35 = vld [vmem:[%s398_s0 + $0x30] sm:$0xf] }
   0x6   :  { %v22_v40 = vld [vmem:[%s398_s0 + $0x38] sm:$0xf]  ;;  %v29_v44 = vmax.f32 %v17_v32, %v19_v33  ;;  %v21_v5 = vld [vmem:[%s398_s0 + $0x34] sm:$0xf]  ;;  %v23_v6 = vld [vmem:[%s398_s0 + $0x3c] sm:$0xf] }
   0x7   :  { %v30_v56 = vmax.f32 %v20_v35, %v22_v40  ;;  %vm253_vm4 = vcmask 1047559  }
   0xb   :  { %v41_v11 = vld.sshfl [vmem:[#allocation1] sm:$0xff pattern:$0x73625140]  ;;  %v42_v12 = vld.sshfl [vmem:[#allocation1 + $0x8] sm:$0xff pattern:$0x73625140] }
   0xc   :  { %47 = vst [vmem:[#allocation1] ss:$4 sm:$0xff] %v26_v8  ;;  %v82_v14 = vsel %vm81_vm0, %v41_v11, -inf  ;;  %v89_v15 = vsel %vm81_vm0, %v42_v12, -inf }
   0xd   :  { %v83_v17 = vrot.slane %v82_v14, 4  ;;  %v90_v18 = vrot.slane %v89_v15, 4  ;;  %v45_v19 = vld.sshfl [vmem:[#allocation1 + $0x20] sm:$0xff pattern:$0x73625140] }
   0xe   :  { %v46_v20 = vld.sshfl [vmem:[#allocation1 + $0x28] sm:$0xff pattern:$0x73625140]  ;;  %v96_v21 = vsel %vm81_vm0, %v45_v19, -inf }
   0xf   :  { %v84_v23 = vmax.f32 %v82_v14, %v83_v17  ;;  %v91_v24 = vmax.f32 %v89_v15, %v90_v18  ;;  %50 = vst [vmem:[#allocation1 + $0x20] ss:$4 sm:$0xff] %v27_v13  ;;  %v97_v25 = vrot.slane %v96_v21, 4  ;;  %v103_v26 = vsel %vm81_vm0, %v46_v20, -inf }
  0x10   :  { %v104_v27 = vrot.slane %v103_v26, 4  ;;  %v31_v18 = vmax.f32 %v21_v5, %v23_v6 }
  0x11   :  { %v85_v28 = vrot.slane %v84_v23, 2  ;;  %v92_v29 = vrot.slane %v91_v24, 2  ;;  %v98_v30 = vmax.f32 %v96_v21, %v97_v25 }
  0x12   :  { %v105_v34 = vmax.f32 %v103_v26, %v104_v27 }
  0x13   :  { %v86_v36 = vmax.f32 %v84_v23, %v85_v28  ;;  %v93_v37 = vmax.f32 %v91_v24, %v92_v29  ;;  %v99_v38 = vrot.slane %v98_v30, 2  ;;  %v48_v39 = vld.sshfl [vmem:[#allocation1] sm:$0xff pattern:$0x73625140] }
  0x14   :  { %v106_v41 = vrot.slane %v105_v34, 2  ;;  %v49_v42 = vld.sshfl [vmem:[#allocation1 + $0x8] sm:$0xff pattern:$0x73625140]  ;;  %v110_v43 = vsel %vm81_vm0, %v48_v39, -inf }
  0x15   :  { %v87_v45 = vrot.slane %v86_v36, 1  ;;  %v94_v46 = vrot.slane %v93_v37, 1  ;;  %v100_v47 = vmax.f32 %v98_v30, %v99_v38  ;;  %53 = vst [vmem:[#allocation1] ss:$4 sm:$0xff] %v28_v31  ;;  %v111_v48 = vrot.slane %v110_v43, 4 }
  0x16   :  { %v107_v49 = vmax.f32 %v105_v34, %v106_v41  ;;  %v117_v50 = vsel %vm81_vm0, %v49_v42, -inf  ;;  %v51_v51 = vld.sshfl [vmem:[#allocation1 + $0x20] sm:$0xff pattern:$0x73625140] }
  0x17   :  { %v95_v52 = vmax.f32 %v93_v37, %v94_v46  ;;  %v101_v53 = vrot.slane %v100_v47, 1  ;;  %v112_v54 = vmax.f32 %v110_v43, %v111_v48  ;;  %v52_v55 = vld.sshfl [vmem:[#allocation1 + $0x28] sm:$0xff pattern:$0x73625140]  ;;  %v118_v58 = vrot.slane %v117_v50, 4 }
  0x18   :  { %v108_v57 = vrot.slane %v107_v49, 1  ;;  %56 = vst [vmem:[#allocation1 + $0x20] ss:$4 sm:$0xff] %v29_v44  ;;  %v124_v59 = vsel %vm81_vm0, %v51_v51, -inf  ;;  %v131_v60 = vsel %vm81_vm0, %v52_v55, -inf  ;;  %v88_v61 = vmax.f32 %v86_v36, %v87_v45 }
  0x19   :  { %v195_v62 = vmax.f32 %v95_v52, 0.0  ;;  %v102_v63 = vmax.f32 %v100_v47, %v101_v53  ;;  %v113_v0 = vrot.slane %v112_v54, 2  ;;  %v119_v2 = vmax.f32 %v117_v50, %v118_v58 }
  0x1a   :  { %v109_v1 = vmax.f32 %v107_v49, %v108_v57  ;;  %v125_v3 = vrot.slane %v124_v59, 4  ;;  %v132_v4 = vrot.slane %v131_v60, 4  ;;  %v194_v14 = vmax.f32 %v88_v61, 0.0 }
  0x1b   :  { %v226_v7 = vrot.slane %v195_v62, 6  ;;  %v114_v8 = vmax.f32 %v112_v54, %v113_v0  ;;  %v120_v10 = vrot.slane %v119_v2, 2  ;;  %v196_v15 = vmax.f32 %v102_v63, 0.0 }
  0x1c   :  { %v197_v9 = vmax.f32 %v109_v1, 0.0  ;;  %v126_v11 = vmax.f32 %v124_v59, %v125_v3  ;;  %v133_v12 = vmax.f32 %v131_v60, %v132_v4  ;;  %v54_v13 = vld.sshfl [vmem:[#allocation1] sm:$0xff pattern:$0x73625140] }
  0x1d   :  { %v55_v16 = vld.sshfl [vmem:[#allocation1 + $0x8] sm:$0xff pattern:$0x73625140]  ;;  %v138_v17 = vsel %vm81_vm0, %v54_v13, -inf  ;;  %v121_v19 = vmax.f32 %v119_v2, %v120_v10  ;;  %v115_v23 = vrot.slane %v114_v8, 1  ;;  %v234_v27 = vsel %vm81_vm0, %v194_v14, %v226_v7 }
  0x1e   :  { %v127_v20 = vrot.slane %v126_v11, 2  ;;  %v134_v21 = vrot.slane %v133_v12, 2  ;;  %59 = vst [vmem:[#allocation1] ss:$4 sm:$0xff] %v30_v56  ;;  %v139_v22 = vrot.slane %v138_v17, 4  ;;  %v145_v24 = vsel %vm81_vm0, %v55_v16, -inf }
  0x1f   :  { %v57_v25 = vld.sshfl [vmem:[#allocation1 + $0x20] sm:$0xff pattern:$0x73625140]  ;;  %v227_v26 = vrot.slane %v197_v9, 6  ;;  %v122_v28 = vrot.slane %v121_v19, 1  ;;  %v146_v33 = vrot.slane %v145_v24, 4  ;;  %v116_v42 = vmax.f32 %v114_v8, %v115_v23 }
  0x20   :  { %v128_v29 = vmax.f32 %v126_v11, %v127_v20  ;;  %v135_v30 = vmax.f32 %v133_v12, %v134_v21  ;;  %v140_v31 = vmax.f32 %v138_v17, %v139_v22  ;;  %v58_v32 = vld.sshfl [vmem:[#allocation1 + $0x28] sm:$0xff pattern:$0x73625140]  ;;  %v152_v34 = vsel %vm81_vm0, %v57_v25, -inf }
  0x21   :  { %62 = vst [vmem:[#allocation1 + $0x20] ss:$4 sm:$0xff] %v31_v18  ;;  %v159_v35 = vsel %vm81_vm0, %v58_v32, -inf  ;;  %v235_v36 = vsel %vm81_vm0, %v196_v15, %v227_v26  ;;  %v153_v38 = vrot.slane %v152_v34, 4  ;;  %v147_v41 = vmax.f32 %v145_v24, %v146_v33 }
  0x22   :  { %v136_v37 = vrot.slane %v135_v30, 1  ;;  %v160_v39 = vrot.slane %v159_v35, 4  ;;  %v246_v40 = vrot.slane %v235_v36, 7  ;;  %v123_v43 = vmax.f32 %v121_v19, %v122_v28 }
  0x23   :  { %v129_v44 = vrot.slane %v128_v29, 1  ;;  %v154_v45 = vmax.f32 %v152_v34, %v153_v38  ;;  %v141_v52 = vrot.slane %v140_v31, 2  ;;  %v148_v56 = vrot.slane %v147_v41, 2 }
  0x24   :  { %v161_v46 = vmax.f32 %v159_v35, %v160_v39  ;;  %v248_v47 = vsel %vm247_vm1, %v246_v40, %v234_v27  ;;  %v137_v48 = vmax.f32 %v135_v30, %v136_v37  ;;  %v199_v51 = vmax.f32 %v123_v43, 0.0 }
  0x25   :  { %v250_v49 = vsel %vm249_vm2, %v246_v40, %v248_v47  ;;  %v130_v50 = vmax.f32 %v128_v29, %v129_v44  ;;  %v60_v53 = vld.sshfl [vmem:[#allocation1] sm:$0xff pattern:$0x73625140]  ;;  %v155_v57 = vrot.slane %v154_v45, 2  ;;  %v142_v62 = vmax.f32 %v140_v31, %v141_v52 }
  0x26   :  { %v252_v54 = vsel %vm251_vm3, %v246_v40, %v250_v49  ;;  %v201_v55 = vmax.f32 %v137_v48, 0.0  ;;  %v61_v58 = vld.sshfl [vmem:[#allocation1 + $0x8] sm:$0xff pattern:$0x73625140]  ;;  %v228_v61 = vrot.slane %v199_v51, 6  ;;  %v149_v0 = vmax.f32 %v147_v41, %v148_v56 }
  0x27   :  { %v254_v59 = vsel %vm253_vm4, %v246_v40, %v252_v54  ;;  %v200_v60 = vmax.f32 %v130_v50, 0.0  ;;  %v156_v1 = vmax.f32 %v154_v45, %v155_v57  ;;  %v162_v2 = vrot.slane %v161_v46, 2 }
  0x28   :  { %280 = vst [vmem:[%s399_s1] sm:$0xf] %v254_v59  ;;  %v229_v63 = vrot.slane %v201_v55, 6  ;;  %v198_v3 = vmax.f32 %v116_v42, 0.0  ;;  %v63_v4 = vld.sshfl [vmem:[#allocation1 + $0x20] sm:$0xff pattern:$0x73625140] }
  0x29   :  { %v166_v5 = vsel %vm81_vm0, %v60_v53, -inf  ;;  %v173_v6 = vsel %vm81_vm0, %v61_v58, -inf  ;;  %v150_v8 = vrot.slane %v149_v0, 1  ;;  %v157_v9 = vrot.slane %v156_v1, 1 }
  0x2a   :  { %v237_v7 = vsel %vm81_vm0, %v200_v60, %v229_v63  ;;  %v163_v10 = vmax.f32 %v161_v46, %v162_v2  ;;  %v236_v11 = vsel %vm81_vm0, %v198_v3, %v228_v61  ;;  %v167_v13 = vrot.slane %v166_v5, 4  ;;  %v64_v21 = vld.sshfl [vmem:[#allocation1 + $0x28] sm:$0xff pattern:$0x73625140] }
  0x2b   :  { %v257_v12 = vrot.slane %v237_v7, 7  ;;  %v174_v14 = vrot.slane %v173_v6, 4  ;;  %v143_v15 = vrot.slane %v142_v62, 1  ;;  %v151_v16 = vmax.f32 %v149_v0, %v150_v8 }
  0x2c   :  { %v164_v17 = vrot.slane %v163_v10, 1  ;;  %v180_v18 = vsel %vm81_vm0, %v63_v4, -inf  ;;  %v158_v20 = vmax.f32 %v156_v1, %v157_v9  ;;  %v168_v26 = vmax.f32 %v166_v5, %v167_v13 }
  0x2d   :  { %v258_v19 = vsel %vm247_vm1, %v257_v12, %v236_v11  ;;  %v175_v22 = vmax.f32 %v173_v6, %v174_v14  ;;  %v203_v25 = vmax.f32 %v151_v16, 0.0  ;;  %v181_v29 = vrot.slane %v180_v18, 4 }
  0x2e   :  { %v259_v23 = vsel %vm249_vm2, %v257_v12, %v258_v19  ;;  %v165_v24 = vmax.f32 %v163_v10, %v164_v17  ;;  %v144_v31 = vmax.f32 %v142_v62, %v143_v15  ;;  %v187_v33 = vsel %vm81_vm0, %v64_v21, -inf }
  0x2f   :  { %v260_v27 = vsel %vm251_vm3, %v257_v12, %v259_v23  ;;  %v176_v28 = vrot.slane %v175_v22, 2  ;;  %v182_v35 = vmax.f32 %v180_v18, %v181_v29  ;;  %v188_v36 = vrot.slane %v187_v33, 4 }
  0x30   :  { %v261_v30 = vsel %vm253_vm4, %v257_v12, %v260_v27  ;;  %v205_v32 = vmax.f32 %v165_v24, 0.0  ;;  %v204_v37 = vmax.f32 %v158_v20, 0.0  ;;  %v230_v38 = vrot.slane %v203_v25, 6 }
  0x31   :  { %281 = vst [vmem:[%s399_s1 + $0x4] sm:$0xf] %v261_v30  ;;  %v177_v34 = vmax.f32 %v175_v22, %v176_v28  ;;  %v169_v40 = vrot.slane %v168_v26, 2  ;;  %v183_v41 = vrot.slane %v182_v35, 2  ;;  %v189_v42 = vmax.f32 %v187_v33, %v188_v36 }
  0x32   :  { %v231_v39 = vrot.slane %v205_v32, 6  ;;  %v202_v43 = vmax.f32 %v144_v31, 0.0 }
  0x33   :  { %v178_v45 = vrot.slane %v177_v34, 1  ;;  %v184_v47 = vmax.f32 %v182_v35, %v183_v41  ;;  %v170_v49 = vmax.f32 %v168_v26, %v169_v40  ;;  %v190_v50 = vrot.slane %v189_v42, 2 }
  0x34   :  { %v239_v44 = vsel %vm81_vm0, %v204_v37, %v231_v39  ;;  %v238_v48 = vsel %vm81_vm0, %v202_v43, %v230_v38 }
  0x35   :  { %v264_v46 = vrot.slane %v239_v44, 7  ;;  %v179_v53 = vmax.f32 %v177_v34, %v178_v45  ;;  %v185_v54 = vrot.slane %v184_v47, 1  ;;  %v191_v55 = vmax.f32 %v189_v42, %v190_v50 }
  0x36   :  { %v171_v58 = vrot.slane %v170_v49, 1 }
  0x37   :  { %v265_v51 = vsel %vm247_vm1, %v264_v46, %v238_v48  ;;  %v192_v59 = vrot.slane %v191_v55, 1  ;;  %v186_v60 = vmax.f32 %v184_v47, %v185_v54  ;;  %v207_v62 = vmax.f32 %v179_v53, 0.0 }
  0x38   :  { %v266_v52 = vsel %vm249_vm2, %v264_v46, %v265_v51  ;;  %v172_v63 = vmax.f32 %v170_v49, %v171_v58 }
  0x39   :  { %v267_v56 = vsel %vm251_vm3, %v264_v46, %v266_v52  ;;  %v193_v61 = vmax.f32 %v191_v55, %v192_v59  ;;  %v208_v1 = vmax.f32 %v186_v60, 0.0  ;;  %v232_v2 = vrot.slane %v207_v62, 6 }
  0x3a   :  { %v268_v57 = vsel %vm253_vm4, %v264_v46, %v267_v56  ;;  %v206_v4 = vmax.f32 %v172_v63, 0.0 }
  0x3b   :  { %282 = vst [vmem:[%s399_s1 + $0x8] sm:$0xf] %v268_v57  ;;  %v209_v0 = vmax.f32 %v193_v61, 0.0 }
  0x3c   :  { %v240_v7 = vsel %vm81_vm0, %v206_v4, %v232_v2 }
  0x3d   :  { %v233_v3 = vrot.slane %v209_v0, 6 }
  0x3f   :  { %v241_v5 = vsel %vm81_vm0, %v208_v1, %v233_v3 }
  0x40   :  { %v271_v6 = vrot.slane %v241_v5, 7 }
  0x42   :  { %v272_v8 = vsel %vm247_vm1, %v271_v6, %v240_v7 }
  0x43   :  { %v273_v9 = vsel %vm249_vm2, %v271_v6, %v272_v8 }
  0x44   :  { %v274_v10 = vsel %vm251_vm3, %v271_v6, %v273_v9 }
  0x45   :  { %v275_v11 = vsel %vm253_vm4, %v271_v6, %v274_v10 }
  0x46   :  { %283 = vst [vmem:[%s399_s1 + $0xc] sm:$0xf] %v275_v11 }

// kernel: vgg16_forward.25
= control target key start
LH: loop header
LB: loop body
LE: loop exit
PB: predicated region body
PF: predicated region fallthrough
CT: control target
= control target key end

     0   :  { %s1410_s12 = smov 0   ;;  %s1412_s13 = smov 0   ;;  %s1726_s0 = inlined_call_operand.vmem [shape: bf16[8,2304], index: 0, kind: input, shape index: {}]   ;;  %s1727_s1 = inlined_call_operand.vmem [shape: bf16[2304,512], index: 1, kind: input, shape index: {}]   ;;  %s1728_s2 = inlined_call_operand.vmem [shape: f32[1,512], index: 2, kind: input, shape index: {}]   ;;  %s1729_s3 = inlined_call_operand.vmem [shape: f32[8,512], index: 3, kind: output, shape index: {}]  }
   0x1   :  { %s1414_s14 = smov 0   ;;  %s1416_s15 = smov 0  }
   0x2   :  { %s1418_s16 = smov 0   ;;  %s1420_s17 = smov 0  }
   0x3   :  { %s1422_s18 = smov 0  }
   0x4 LB: > { %s25_s19 = sadd.s32 1, %s1379_s16  ;;  %s28_s20 = sadd.s32 1, %s1383_s17  ;;  %s1387_s18 = sphi %s1422_s18, %s13_s18   ;;  %s1383_s17 = sphi %s1420_s17, %s1735_s17   ;;  %s1379_s16 = sphi %s1418_s16, %s1734_s16   ;;  %s1375_s15 = sphi %s1416_s15, %s1733_s15   ;;  %s1371_s14 = sphi %s1414_s14, %s1732_s14   ;;  %s1367_s13 = sphi %s1412_s13, %s1731_s13   ;;  %s1363_s12 = sphi %s1410_s12, %s1730_s12  }
   0x5   : > { %p26_p0 = scmp.ge.s32.totalorder %s25_s19, 6  ;;  %p76_p1 = scmp.ne.s32.totalorder %s1367_s13, %s1363_s12 }
   0x6   : > { %p77_p2 = scmp.eq.s32.totalorder %s1387_s18, 0  ;;  %s69_s24 = sadd.s32 1, %s1367_s13 }
   0x7   : > { %s1737_s19 = smov (%p26_p0, %s25_s19), 0  ;;  %s1739_s20 = smov (!%p26_p0, %s28_s20), %s1383_s17 }
   0x8   : > { %p78_p3 = por %p77_p2, %p76_p1  ;;  %p30_p4 = scmp.ge.s32.totalorder %s1739_s20, 2 }
   0x9   : > { %s64_s21 = ssub.s32 %s1379_s16, %s1737_s19  ;;  %p1020_p6 = scmp.ge.s32.totalorder %s1387_s18, 12 }
   0xa   : > { %s1741_s20 = smov (%p30_p4, %s1739_s20), 0 }
   0xb   : > { %s65_s22 = ssub.s32 %s1383_s17, %s1741_s20  ;;  %156 = sbr.rel (%p1020_p6) target bundleno = 72 (0x48), region = 16 }
   0xc   : > { %s66_s23 = sor.u32 %s65_s22, %s64_s21 }
   0xd   : > { %p67_p5 = scmp.eq.s32.totalorder %s66_s23, 0 }
   0xf   : > { %s1461_s25 = scalar_select %p67_p5, %s1367_s13, %s69_s24  }
  0x10   : > { %172 = sbr.rel (!%p78_p3) target bundleno = 72 (0x48), region = 24  ;;  %s174_s26 = sand.u32 (%p78_p3), 1, %s1367_s13  }
  0x11   : > { %s1274_s27 = smul.u32 (%p78_p3), 384, %s174_s26  ;;  %s1021_s28 = sshll.u32 (%p78_p3), %s1383_s17, 1 }
  0x12   : > { %s1225_s29 = smul.u32 (%p78_p3), 192, %s1379_s16 }
  0x13   : > { %s1475_s8 = scalar_lea.vmem (%p78_p3), [#allocation3], %s1274_s27 }
  0x14   : > { %s180_s30 = sadd.s32 (%p78_p3), %s1225_s29, %s1021_s28 }
  0x15   : > { %s1023_s4 = sshll.u32 %s180_s30, 2 }
  0x16   : > { %s1470_s7 = scalar_lea.vmem %s1727_s1, %s1023_s4 }
  0x17   : > { %v305_v0 = vld [vmem:[%s1470_s7] sm:$0xff]  ;;  %v307_v1 = vld [vmem:[%s1470_s7 + $0x10] sm:$0xff] }
  0x18   : > { %v309_v2 = vld [vmem:[%s1470_s7 + $0x20] sm:$0xff]  ;;  %306 = vst [vmem:[%s1475_s8] sm:$0xff] %v305_v0  ;;  %v311_v3 = vld [vmem:[%s1470_s7 + $0x30] sm:$0xff] }
  0x19   : > { %308 = vst [vmem:[%s1475_s8 + $0x8] sm:$0xff] %v307_v1  ;;  %v313_v4 = vld [vmem:[%s1470_s7 + $0x40] sm:$0xff]  ;;  %v315_v5 = vld [vmem:[%s1470_s7 + $0x50] sm:$0xff] }
  0x1a   : > { %310 = vst [vmem:[%s1475_s8 + $0x10] sm:$0xff] %v309_v2  ;;  %v317_v6 = vld [vmem:[%s1470_s7 + $0x60] sm:$0xff]  ;;  %v319_v7 = vld [vmem:[%s1470_s7 + $0x70] sm:$0xff] }
  0x1b   : > { %312 = vst [vmem:[%s1475_s8 + $0x18] sm:$0xff] %v311_v3  ;;  %v321_v8 = vld [vmem:[%s1470_s7 + $0x80] sm:$0xff]  ;;  %v323_v9 = vld [vmem:[%s1470_s7 + $0x90] sm:$0xff] }
  0x1c   : > { %314 = vst [vmem:[%s1475_s8 + $0x20] sm:$0xff] %v313_v4  ;;  %v325_v10 = vld [vmem:[%s1470_s7 + $0xa0] sm:$0xff]  ;;  %v327_v11 = vld [vmem:[%s1470_s7 + $0xb0] sm:$0xff] }
  0x1d   : > { %316 = vst [vmem:[%s1475_s8 + $0x28] sm:$0xff] %v315_v5  ;;  %v329_v12 = vld [vmem:[%s1470_s7 + $0xc0] sm:$0xff]  ;;  %v331_v13 = vld [vmem:[%s1470_s7 + $0xd0] sm:$0xff] }
  0x1e   : > { %318 = vst [vmem:[%s1475_s8 + $0x30] sm:$0xff] %v317_v6  ;;  %v333_v14 = vld [vmem:[%s1470_s7 + $0xe0] sm:$0xff]  ;;  %v335_v15 = vld [vmem:[%s1470_s7 + $0xf0] sm:$0xff] }
  0x1f   : > { %320 = vst [vmem:[%s1475_s8 + $0x38] sm:$0xff] %v319_v7  ;;  %v337_v16 = vld [vmem:[%s1470_s7 + $0x100] sm:$0xff]  ;;  %v339_v17 = vld [vmem:[%s1470_s7 + $0x110] sm:$0xff] }
  0x20   : > { %322 = vst [vmem:[%s1475_s8 + $0x40] sm:$0xff] %v321_v8  ;;  %v341_v18 = vld [vmem:[%s1470_s7 + $0x120] sm:$0xff]  ;;  %v343_v19 = vld [vmem:[%s1470_s7 + $0x130] sm:$0xff] }
  0x21   : > { %324 = vst [vmem:[%s1475_s8 + $0x48] sm:$0xff] %v323_v9  ;;  %v345_v20 = vld [vmem:[%s1470_s7 + $0x140] sm:$0xff]  ;;  %v347_v21 = vld [vmem:[%s1470_s7 + $0x150] sm:$0xff] }
  0x22   : > { %326 = vst [vmem:[%s1475_s8 + $0x50] sm:$0xff] %v325_v10  ;;  %v349_v22 = vld [vmem:[%s1470_s7 + $0x160] sm:$0xff]  ;;  %v351_v23 = vld [vmem:[%s1470_s7 + $0x170] sm:$0xff] }
  0x23   : > { %328 = vst [vmem:[%s1475_s8 + $0x58] sm:$0xff] %v327_v11  ;;  %v353_v24 = vld [vmem:[%s1470_s7 + $0x180] sm:$0xff]  ;;  %v355_v25 = vld [vmem:[%s1470_s7 + $0x190] sm:$0xff] }
  0x24   : > { %330 = vst [vmem:[%s1475_s8 + $0x60] sm:$0xff] %v329_v12  ;;  %v357_v26 = vld [vmem:[%s1470_s7 + $0x1a0] sm:$0xff]  ;;  %v359_v27 = vld [vmem:[%s1470_s7 + $0x1b0] sm:$0xff] }
  0x25   : > { %332 = vst [vmem:[%s1475_s8 + $0x68] sm:$0xff] %v331_v13  ;;  %v361_v28 = vld [vmem:[%s1470_s7 + $0x1c0] sm:$0xff]  ;;  %v363_v29 = vld [vmem:[%s1470_s7 + $0x1d0] sm:$0xff] }
  0x26   : > { %334 = vst [vmem:[%s1475_s8 + $0x70] sm:$0xff] %v333_v14  ;;  %v365_v30 = vld [vmem:[%s1470_s7 + $0x1e0] sm:$0xff]  ;;  %v367_v31 = vld [vmem:[%s1470_s7 + $0x1f0] sm:$0xff] }
  0x27   : > { %336 = vst [vmem:[%s1475_s8 + $0x78] sm:$0xff] %v335_v15  ;;  %v369_v32 = vld [vmem:[%s1470_s7 + $0x200] sm:$0xff]  ;;  %v371_v33 = vld [vmem:[%s1470_s7 + $0x210] sm:$0xff] }
  0x28   : > { %338 = vst [vmem:[%s1475_s8 + $0x80] sm:$0xff] %v337_v16  ;;  %v373_v34 = vld [vmem:[%s1470_s7 + $0x220] sm:$0xff]  ;;  %v375_v35 = vld [vmem:[%s1470_s7 + $0x230] sm:$0xff] }
  0x29   : > { %340 = vst [vmem:[%s1475_s8 + $0x88] sm:$0xff] %v339_v17  ;;  %v377_v36 = vld [vmem:[%s1470_s7 + $0x240] sm:$0xff]  ;;  %v379_v37 = vld [vmem:[%s1470_s7 + $0x250] sm:$0xff] }
  0x2a   : > { %342 = vst [vmem:[%s1475_s8 + $0x90] sm:$0xff] %v341_v18  ;;  %v381_v38 = vld [vmem:[%s1470_s7 + $0x260] sm:$0xff]  ;;  %v383_v39 = vld [vmem:[%s1470_s7 + $0x270] sm:$0xff] }
  0x2b   : > { %344 = vst [vmem:[%s1475_s8 + $0x98] sm:$0xff] %v343_v19  ;;  %v385_v40 = vld [vmem:[%s1470_s7 + $0x280] sm:$0xff]  ;;  %v387_v41 = vld [vmem:[%s1470_s7 + $0x290] sm:$0xff] }
  0x2c   : > { %346 = vst [vmem:[%s1475_s8 + $0xa0] sm:$0xff] %v345_v20  ;;  %v389_v42 = vld [vmem:[%s1470_s7 + $0x2a0] sm:$0xff]  ;;  %v391_v43 = vld [vmem:[%s1470_s7 + $0x2b0] sm:$0xff] }
  0x2d   : > { %348 = vst [vmem:[%s1475_s8 + $0xa8] sm:$0xff] %v347_v21  ;;  %v393_v44 = vld [vmem:[%s1470_s7 + $0x2c0] sm:$0xff]  ;;  %v395_v45 = vld [vmem:[%s1470_s7 + $0x2d0] sm:$0xff] }
  0x2e   : > { %350 = vst [vmem:[%s1475_s8 + $0xb0] sm:$0xff] %v349_v22  ;;  %v397_v46 = vld [vmem:[%s1470_s7 + $0x2e0] sm:$0xff]  ;;  %v399_v47 = vld [vmem:[%s1470_s7 + $0x2f0] sm:$0xff] }
  0x2f   : > { %352 = vst [vmem:[%s1475_s8 + $0xb8] sm:$0xff] %v351_v23 }
  0x30   : > { %354 = vst [vmem:[%s1475_s8 + $0xc0] sm:$0xff] %v353_v24 }
  0x31   : > { %356 = vst [vmem:[%s1475_s8 + $0xc8] sm:$0xff] %v355_v25 }
  0x32   : > { %358 = vst [vmem:[%s1475_s8 + $0xd0] sm:$0xff] %v357_v26 }
  0x33   : > { %360 = vst [vmem:[%s1475_s8 + $0xd8] sm:$0xff] %v359_v27 }
  0x34   : > { %362 = vst [vmem:[%s1475_s8 + $0xe0] sm:$0xff] %v361_v28 }
  0x35   : > { %364 = vst [vmem:[%s1475_s8 + $0xe8] sm:$0xff] %v363_v29 }
  0x36   : > { %366 = vst [vmem:[%s1475_s8 + $0xf0] sm:$0xff] %v365_v30 }
  0x37   : > { %368 = vst [vmem:[%s1475_s8 + $0xf8] sm:$0xff] %v367_v31 }
  0x38   : > { %370 = vst [vmem:[%s1475_s8 + $0x100] sm:$0xff] %v369_v32 }
  0x39   : > { %372 = vst [vmem:[%s1475_s8 + $0x108] sm:$0xff] %v371_v33 }
  0x3a   : > { %374 = vst [vmem:[%s1475_s8 + $0x110] sm:$0xff] %v373_v34 }
  0x3b   : > { %376 = vst [vmem:[%s1475_s8 + $0x118] sm:$0xff] %v375_v35 }
  0x3c   : > { %378 = vst [vmem:[%s1475_s8 + $0x120] sm:$0xff] %v377_v36 }
  0x3d   : > { %380 = vst [vmem:[%s1475_s8 + $0x128] sm:$0xff] %v379_v37 }
  0x3e   : > { %382 = vst [vmem:[%s1475_s8 + $0x130] sm:$0xff] %v381_v38 }
  0x3f   : > { %384 = vst [vmem:[%s1475_s8 + $0x138] sm:$0xff] %v383_v39 }
  0x40   : > { %386 = vst [vmem:[%s1475_s8 + $0x140] sm:$0xff] %v385_v40 }
  0x41   : > { %388 = vst [vmem:[%s1475_s8 + $0x148] sm:$0xff] %v387_v41 }
  0x42   : > { %390 = vst [vmem:[%s1475_s8 + $0x150] sm:$0xff] %v389_v42 }
  0x43   : > { %392 = vst [vmem:[%s1475_s8 + $0x158] sm:$0xff] %v391_v43 }
  0x44   : > { %394 = vst [vmem:[%s1475_s8 + $0x160] sm:$0xff] %v393_v44 }
  0x45   : > { %396 = vst [vmem:[%s1475_s8 + $0x168] sm:$0xff] %v395_v45 }
  0x46   : > { %398 = vst [vmem:[%s1475_s8 + $0x170] sm:$0xff] %v397_v46 }
  0x47   : > { %400 = vst [vmem:[%s1475_s8 + $0x178] sm:$0xff] %v399_v47 }
  0x48 PF: > { %p1024_p7 = scmp.ge.s32.totalorder %s1387_s18, 1  ;;  %p413_p8 = scmp.lt.s32.totalorder %s1387_s18, 13 }
  0x4a   : > { %p414_p9 = pnand %p1024_p7, %p413_p8 }
  0x4b   : > { %s420_s9 = sand.u32 (!%p414_p9), 1, %s1363_s12   ;;  %s460_s10 = smul.u32 (!%p414_p9), 3, %s1371_s14 }
  0x4c   : > { %417 = sbr.rel (%p414_p9) target bundleno = 301 (0x12d), region = 66  ;;  %s1026_s21 = sshll.u32 (!%p414_p9), %s1375_s15, 1 }
  0x4d   : > { %s1275_s11 = smul.u32 (!%p414_p9), 384, %s420_s9  ;;  %p463_p10 = scmp.lt.s32.totalorder (!%p414_p9), %s460_s10, 17 }
  0x4e   : > { %p473_p11 = scmp.lt.s32.totalorder (!%p414_p9), %s1026_s21, 3  ;;  %p1029_p12 = scmp.ne.s32.totalorder (!%p414_p9), %s1371_s14, 0 }
  0x4f   : > { %s1592_s5 = scalar_lea.vmem (!%p414_p9), [#allocation3], %s1275_s11 }
  0x51   : > { %s1743_s10 = smov (!%p463_p10, %s460_s10), 17  ;;  %s1745_s21 = smov (!%p473_p11, %s1026_s21), 3 }
  0x52   : > { %s1025_s22 = sshll.u32 %s1743_s10, 2  ;;  %s475_s12 = scalar_lea.vmem %s1728_s2, %s1745_s21 }
  0x53   : > { %s1580_s26 = scalar_lea.vmem %s1726_s0, %s1025_s22  ;;  %s1028_s29 = sshll.u32 %s1745_s21, 3 }
  0x54   : > { %s1590_s4 = scalar_lea.vmem %s1729_s3, %s1028_s29  ;;  %490 = sbr.rel (%p1029_p12) target bundleno = 92 (0x5c), region = 74 }
  0x59   : > { %v1389_v48 = vmov 0.0  }
  0x5a   : > { %491 = vst [vmem:[#allocation2] sm:$0xff] %v1389_v48 }
  0x5b   : > { %492 = vst [vmem:[#allocation2 + $0x8] sm:$0xff] %v1389_v48 }
  0x5c PF: > { %v1088_v49 = vld [vmem:[%s1592_s5 + $0x70] sm:$0xf]  ;;  %v1241_v50 = vld [vmem:[%s1592_s5 + $0x74] sm:$0xf0]  ;;  %v1080_v54 = vld [vmem:[%s1592_s5 + $0x60] sm:$0xf] }
  0x5d   : > { %v1152_v51 = vld [vmem:[%s1592_s5 + $0xf0] sm:$0xf]  ;;  %v1089_v52 = vor.u32 %v1241_v50, %v1088_v49  ;;  %v1257_v53 = vld [vmem:[%s1592_s5 + $0xf4] sm:$0xf0]  ;;  %v1239_v55 = vld [vmem:[%s1592_s5 + $0x64] sm:$0xf0] }
  0x5e   : > { %v1153_v56 = vor.u32 %v1257_v53, %v1152_v51  ;;  %v1144_v57 = vld [vmem:[%s1592_s5 + $0xe0] sm:$0xf]  ;;  %v1255_v58 = vld [vmem:[%s1592_s5 + $0xe4] sm:$0xf0]  ;;  %v1081_v59 = vor.u32 %v1239_v55, %v1080_v54  ;;  %v1072_v60 = vld [vmem:[%s1592_s5 + $0x50] sm:$0xf] }
  0x5f   : > { %796 = vmatpush.bf16.msra.mxu0 %v1089_v52  ;;  %v1145_v61 = vor.u32 %v1255_v58, %v1144_v57  ;;  %v1237_v62 = vld [vmem:[%s1592_s5 + $0x54] sm:$0xf0]  ;;  %v1216_v63 = vld [vmem:[%s1592_s5 + $0x170] sm:$0xf]  ;;  %v1208_v4 = vld [vmem:[%s1592_s5 + $0x160] sm:$0xf] }
  0x60   : > { %809 = vmatpush.bf16.msra.mxu1 %v1153_v56  ;;  %v1273_v0 = vld [vmem:[%s1592_s5 + $0x174] sm:$0xf0]  ;;  %v1136_v1 = vld [vmem:[%s1592_s5 + $0xd0] sm:$0xf]  ;;  %v1271_v5 = vld [vmem:[%s1592_s5 + $0x164] sm:$0xf0]  ;;  %v1073_v7 = vor.u32 %v1237_v62, %v1072_v60 }
  0x61   : > { %v1253_v2 = vld [vmem:[%s1592_s5 + $0xd4] sm:$0xf0]  ;;  %v1217_v3 = vor.u32 %v1273_v0, %v1216_v63  ;;  %v1240_v6 = vld [vmem:[%s1592_s5 + $0x74] sm:$0xf]  ;;  %v1064_v8 = vld [vmem:[%s1592_s5 + $0x40] sm:$0xf]  ;;  %v1209_v10 = vor.u32 %v1271_v5, %v1208_v4 }
  0x62   : > { %v1235_v9 = vld [vmem:[%s1592_s5 + $0x44] sm:$0xf0]  ;;  %v1090_v11 = vld [vmem:[%s1592_s5 + $0x78] sm:$0xf0]  ;;  %v1137_v12 = vor.u32 %v1253_v2, %v1136_v1  ;;  %v1128_v13 = vld [vmem:[%s1592_s5 + $0xc0] sm:$0xf] }
  0x63   : > { %797 = vmatpush.bf16.msra.mxu0 %v1081_v59  ;;  %822 = vmatpush.bf16.msra.mxu2 %v1217_v3  ;;  %v1251_v14 = vld [vmem:[%s1592_s5 + $0xc4] sm:$0xf0]  ;;  %v1093_v15 = vor.u32 %v1240_v6, %v1090_v11  ;;  %v1200_v16 = vld [vmem:[%s1592_s5 + $0x150] sm:$0xf]  ;;  %v1269_v17 = vld [vmem:[%s1592_s5 + $0x154] sm:$0xf0]  ;;  %v1065_v21 = vor.u32 %v1235_v9, %v1064_v8 }
  0x64   : > { %810 = vmatpush.bf16.msra.mxu1 %v1145_v61  ;;  %v1238_v18 = vld [vmem:[%s1592_s5 + $0x64] sm:$0xf]  ;;  %v1082_v19 = vld [vmem:[%s1592_s5 + $0x68] sm:$0xf0]  ;;  %v1056_v22 = vld [vmem:[%s1592_s5 + $0x30] sm:$0xf]  ;;  %v1201_v24 = vor.u32 %v1269_v17, %v1200_v16  ;;  %v1129_v26 = vor.u32 %v1251_v14, %v1128_v13 }
  0x65   : > { %835 = vmatpush.bf16.msra.mxu3 %v1093_v15  ;;  %v1085_v20 = vor.u32 %v1238_v18, %v1082_v19  ;;  %v1233_v23 = vld [vmem:[%s1592_s5 + $0x34] sm:$0xf0]  ;;  %v1192_v25 = vld [vmem:[%s1592_s5 + $0x140] sm:$0xf]  ;;  %v1267_v27 = vld [vmem:[%s1592_s5 + $0x144] sm:$0xf0] }
  0x66   : > { %v1236_v28 = vld [vmem:[%s1592_s5 + $0x54] sm:$0xf]  ;;  %v1074_v29 = vld [vmem:[%s1592_s5 + $0x58] sm:$0xf0]  ;;  %v1120_v30 = vld [vmem:[%s1592_s5 + $0xb0] sm:$0xf]  ;;  %v1057_v33 = vor.u32 %v1233_v23, %v1056_v22  ;;  %v1193_v35 = vor.u32 %v1267_v27, %v1192_v25 }
  0x67   : > { %798 = vmatpush.bf16.msra.mxu0 %v1073_v7  ;;  %823 = vmatpush.bf16.msra.mxu2 %v1209_v10  ;;  %v1249_v31 = vld [vmem:[%s1592_s5 + $0xb4] sm:$0xf0]  ;;  %v1077_v32 = vor.u32 %v1236_v28, %v1074_v29  ;;  %v1048_v34 = vld [vmem:[%s1592_s5 + $0x20] sm:$0xf]  ;;  %v1234_v36 = vld [vmem:[%s1592_s5 + $0x44] sm:$0xf] }
  0x68   : > { %811 = vmatpush.bf16.msra.mxu1 %v1137_v12  ;;  %v1066_v37 = vld [vmem:[%s1592_s5 + $0x48] sm:$0xf0]  ;;  %v1121_v38 = vor.u32 %v1249_v31, %v1120_v30  ;;  %v1231_v39 = vld [vmem:[%s1592_s5 + $0x24] sm:$0xf0]  ;;  %v1184_v40 = vld [vmem:[%s1592_s5 + $0x130] sm:$0xf] }
  0x69   : > { %836 = vmatpush.bf16.msra.mxu3 %v1085_v20  ;;  %v1265_v41 = vld [vmem:[%s1592_s5 + $0x134] sm:$0xf0]  ;;  %v1112_v42 = vld [vmem:[%s1592_s5 + $0xa0] sm:$0xf]  ;;  %v1247_v43 = vld [vmem:[%s1592_s5 + $0xa4] sm:$0xf0]  ;;  %v1069_v44 = vor.u32 %v1234_v36, %v1066_v37  ;;  %v1049_v45 = vor.u32 %v1231_v39, %v1048_v34 }
  0x6a   : > { %v1040_v46 = vld [vmem:[%s1592_s5 + $0x10] sm:$0xf]  ;;  %v1185_v47 = vor.u32 %v1265_v41, %v1184_v40  ;;  %v1232_v48 = vld [vmem:[%s1592_s5 + $0x34] sm:$0xf]  ;;  %v1058_v49 = vld [vmem:[%s1592_s5 + $0x38] sm:$0xf0]  ;;  %v1113_v50 = vor.u32 %v1247_v43, %v1112_v42 }
  0x6b   : > { %799 = vmatpush.bf16.msra.mxu0 %v1065_v21  ;;  %824 = vmatpush.bf16.msra.mxu2 %v1201_v24  ;;  %v1229_v51 = vld [vmem:[%s1592_s5 + $0x14] sm:$0xf0]  ;;  %v1176_v52 = vld [vmem:[%s1592_s5 + $0x120] sm:$0xf]  ;;  %v1263_v53 = vld [vmem:[%s1592_s5 + $0x124] sm:$0xf0]  ;;  %v1061_v58 = vor.u32 %v1232_v48, %v1058_v49 }
  0x6c   : > { %812 = vmatpush.bf16.msra.mxu1 %v1129_v26  ;;  %v1104_v54 = vld [vmem:[%s1592_s5 + $0x90] sm:$0xf]  ;;  %v1245_v55 = vld [vmem:[%s1592_s5 + $0x94] sm:$0xf0]  ;;  %v1032_v56 = vld [vmem:[%s1592_s5] sm:$0xf]  ;;  %v1041_v59 = vor.u32 %v1229_v51, %v1040_v46  ;;  %v1177_v60 = vor.u32 %v1263_v53, %v1176_v52 }
  0x6d   : > { %837 = vmatpush.bf16.msra.mxu3 %v1077_v32  ;;  %v1227_v57 = vld [vmem:[%s1592_s5 + $0x4] sm:$0xf0]  ;;  %v1230_v61 = vld [vmem:[%s1592_s5 + $0x24] sm:$0xf]  ;;  %v1050_v62 = vld [vmem:[%s1592_s5 + $0x28] sm:$0xf0]  ;;  %v1105_v0 = vor.u32 %v1245_v55, %v1104_v54 }
  0x6e   : > { %v493_v63 = vld [vmem:[%s1580_s26] sm:$0xff]  ;;  %v1096_v1 = vld [vmem:[%s1592_s5 + $0x80] sm:$0xf]  ;;  %v1261_v3 = vld [vmem:[%s1592_s5 + $0x114] sm:$0xf0]  ;;  %v1053_v9 = vor.u32 %v1230_v61, %v1050_v62  ;;  %v1033_v11 = vor.u32 %v1227_v57, %v1032_v56  ;;  %p1222_p13 = scmp.ne.s32.totalorder %s1371_s14, 5 }
  0x6f   : > { %800 = vmatpush.bf16.msra.mxu0 %v1057_v33  ;;  %825 = vmatpush.bf16.msra.mxu2 %v1193_v35  ;;  %v1168_v2 = vld [vmem:[%s1592_s5 + $0x110] sm:$0xf]  ;;  %v1243_v4 = vld [vmem:[%s1592_s5 + $0x84] sm:$0xf0]  ;;  %v1256_v5 = vld [vmem:[%s1592_s5 + $0xf4] sm:$0xf]  ;;  %v547_v10 = vunpack.c.l.b16 %v493_v63  ;;  %v548_v13 = vunpack.c.h.b16 %v493_v63 }
  0x70   : > { %813 = vmatpush.bf16.msra.mxu1 %v1121_v38  ;;  %v1154_v6 = vld [vmem:[%s1592_s5 + $0xf8] sm:$0xf0]  ;;  %v1272_v7 = vld [vmem:[%s1592_s5 + $0x174] sm:$0xf]  ;;  %v1169_v12 = vor.u32 %v1261_v3, %v1168_v2  ;;  %v494_v16 = vld [vmem:[%s1580_s26 + $0x8] sm:$0xf]  ;;  %v1097_v17 = vor.u32 %v1243_v4, %v1096_v1 }
  0x71   : > { %838 = vmatpush.bf16.msra.mxu3 %v1069_v44  ;;  %v1218_v8 = vld [vmem:[%s1592_s5 + $0x178] sm:$0xf0]  ;;  %v1228_v14 = vld [vmem:[%s1592_s5 + $0x14] sm:$0xf]  ;;  %v1157_v18 = vor.u32 %v1256_v5, %v1154_v6  ;;  %v1160_v19 = vld [vmem:[%s1592_s5 + $0x100] sm:$0xf]  ;;  %v550_v26 = vpack.c.b16 %v547_v10, %v547_v10  ;;  %v549_v28 = vunpack.c.l.b16 %v494_v16  ;;  %v1667_v29 = vpack.c.b16 %v548_v13, %v548_v13 }
  0x72   : > { %v1042_v15 = vld [vmem:[%s1592_s5 + $0x18] sm:$0xf0]  ;;  %v1259_v20 = vld [vmem:[%s1592_s5 + $0x104] sm:$0xf0]  ;;  %v1221_v21 = vor.u32 %v1272_v7, %v1218_v8  ;;  %v1254_v22 = vld [vmem:[%s1592_s5 + $0xe4] sm:$0xf] }
  0x73   : > { %801 = vmatpush.bf16.msra.mxu0 %v1049_v45  ;;  %826 = vmatpush.bf16.msra.mxu2 %v1185_v47  ;;  %v1146_v23 = vld [vmem:[%s1592_s5 + $0xe8] sm:$0xf0]  ;;  %v1270_v24 = vld [vmem:[%s1592_s5 + $0x164] sm:$0xf]  ;;  %v1045_v27 = vor.u32 %v1228_v14, %v1042_v15  ;;  %v1161_v30 = vor.u32 %v1259_v20, %v1160_v19  ;;  %v1252_v35 = vld [vmem:[%s1592_s5 + $0xd4] sm:$0xf]  ;;  %v552_v39 = vpack.c.b16 %v549_v28, %v549_v28 }
  0x74   : > { %814 = vmatpush.bf16.msra.mxu1 %v1113_v50  ;;  %v1210_v25 = vld [vmem:[%s1592_s5 + $0x168] sm:$0xf0]  ;;  %v1226_v31 = vld [vmem:[%s1592_s5 + $0x4] sm:$0xf]  ;;  %v1149_v33 = vor.u32 %v1254_v22, %v1146_v23  ;;  %v1138_v36 = vld [vmem:[%s1592_s5 + $0xd8] sm:$0xf0] }
  0x75   : > { %839 = vmatpush.bf16.msra.mxu3 %v1061_v58  ;;  %v1034_v32 = vld [vmem:[%s1592_s5 + $0x8] sm:$0xf0]  ;;  %v1213_v34 = vor.u32 %v1270_v24, %v1210_v25  ;;  %v1268_v37 = vld [vmem:[%s1592_s5 + $0x154] sm:$0xf]  ;;  %v1202_v38 = vld [vmem:[%s1592_s5 + $0x158] sm:$0xf0]  ;;  %v1141_v41 = vor.u32 %v1252_v35, %v1138_v36 }
  0x76   : > { %v1037_v40 = vor.u32 %v1226_v31, %v1034_v32  ;;  %v1205_v42 = vor.u32 %v1268_v37, %v1202_v38  ;;  %v1250_v43 = vld [vmem:[%s1592_s5 + $0xc4] sm:$0xf]  ;;  %v1130_v44 = vld [vmem:[%s1592_s5 + $0xc8] sm:$0xf0]  ;;  %v1248_v49 = vld [vmem:[%s1592_s5 + $0xb4] sm:$0xf] }
  0x77   : > { %802 = vmatpush.bf16.msra.mxu0 %v1041_v59  ;;  %827 = vmatpush.bf16.msra.mxu2 %v1177_v60  ;;  %v1266_v45 = vld [vmem:[%s1592_s5 + $0x144] sm:$0xf]  ;;  %v1194_v46 = vld [vmem:[%s1592_s5 + $0x148] sm:$0xf0]  ;;  %v1133_v47 = vor.u32 %v1250_v43, %v1130_v44  ;;  %v1122_v50 = vld [vmem:[%s1592_s5 + $0xb8] sm:$0xf0] }
  0x78   : > { %815 = vmatpush.bf16.msra.mxu1 %v1105_v0  ;;  %v1197_v48 = vor.u32 %v1266_v45, %v1194_v46  ;;  %v1264_v51 = vld [vmem:[%s1592_s5 + $0x134] sm:$0xf]  ;;  %v1186_v52 = vld [vmem:[%s1592_s5 + $0x138] sm:$0xf0]  ;;  %v1125_v53 = vor.u32 %v1248_v49, %v1122_v50  ;;  %v1246_v55 = vld [vmem:[%s1592_s5 + $0xa4] sm:$0xf] }
  0x79   : > { %840 = vmatpush.bf16.msra.mxu3 %v1053_v9  ;;  %v1189_v54 = vor.u32 %v1264_v51, %v1186_v52  ;;  %v1114_v56 = vld [vmem:[%s1592_s5 + $0xa8] sm:$0xf0]  ;;  %v1262_v57 = vld [vmem:[%s1592_s5 + $0x124] sm:$0xf]  ;;  %v1244_v61 = vld [vmem:[%s1592_s5 + $0x94] sm:$0xf] }
  0x7a   : > { %v1178_v58 = vld [vmem:[%s1592_s5 + $0x128] sm:$0xf0]  ;;  %v1117_v59 = vor.u32 %v1246_v55, %v1114_v56  ;;  %v1106_v62 = vld [vmem:[%s1592_s5 + $0x98] sm:$0xf0]  ;;  %v1260_v63 = vld [vmem:[%s1592_s5 + $0x114] sm:$0xf] }
  0x7b   : > { %803 = vmatpush.bf16.msra.mxu0 %v1033_v11  ;;  %828 = vmatpush.bf16.msra.mxu2 %v1169_v12  ;;  %v1181_v60 = vor.u32 %v1262_v57, %v1178_v58  ;;  %v1170_v0 = vld [vmem:[%s1592_s5 + $0x118] sm:$0xf0]  ;;  %v1109_v1 = vor.u32 %v1244_v61, %v1106_v62  ;;  %v1242_v3 = vld [vmem:[%s1592_s5 + $0x84] sm:$0xf]  ;;  %v1098_v4 = vld [vmem:[%s1592_s5 + $0x88] sm:$0xf0] }
  0x7c   : > { %816 = vmatpush.bf16.msra.mxu1 %v1097_v17  ;;  %v1173_v2 = vor.u32 %v1260_v63, %v1170_v0  ;;  %v1258_v5 = vld [vmem:[%s1592_s5 + $0x104] sm:$0xf]  ;;  %v1162_v6 = vld [vmem:[%s1592_s5 + $0x108] sm:$0xf0]  ;;  %v1101_v7 = vor.u32 %v1242_v3, %v1098_v4  ;;  %v495_v14 = vld [vmem:[#allocation2] sm:$0xff] }
  0x7d   : > { %841 = vmatpush.bf16.msra.mxu3 %v1045_v27  ;;  %v1165_v8 = vor.u32 %v1258_v5, %v1162_v6  ;;  %v496_v24 = vld [vmem:[#allocation2 + $0x8] sm:$0xff] }
  0x7e   : > { %804 = vmatmul.bf16.vlgmr.msra.gmra.mxu0 %v550_v26 }
  0x7f   : > { %848 = vmatpush.bf16.msrb.mxu0 %v1157_v18  ;;  %817 = vmatmul.bf16.vlgmr.msra.gmra.mxu1 %v1667_v29 }
  0x80   : > { %861 = vmatpush.bf16.msrb.mxu1 %v1221_v21  ;;  %829 = vmatpush.bf16.msra.mxu2 %v1161_v30 }
  0x81   : > { %842 = vmatpush.bf16.msra.mxu3 %v1037_v40 }
  0x83   : > { %849 = vmatpush.bf16.msrb.mxu0 %v1149_v33  ;;  %830 = vmatmul.bf16.vlgmr.msra.gmra.mxu2 %v552_v39 }
  0x84   : > { %862 = vmatpush.bf16.msrb.mxu1 %v1213_v34  ;;  %843 = vmatmul.bf16.vlgmr.msra.gmra.mxu3 %v550_v26 }
  0x87   : > { %850 = vmatpush.bf16.msrb.mxu0 %v1141_v41 }
  0x88   : > { %863 = vmatpush.bf16.msrb.mxu1 %v1205_v42 }
  0x8b   : > { %851 = vmatpush.bf16.msrb.mxu0 %v1133_v47 }
  0x8c   : > { %864 = vmatpush.bf16.msrb.mxu1 %v1197_v48 }
  0x8f   : > { %852 = vmatpush.bf16.msrb.mxu0 %v1125_v53 }
  0x90   : > { %865 = vmatpush.bf16.msrb.mxu1 %v1189_v54 }
  0x93   : > { %853 = vmatpush.bf16.msrb.mxu0 %v1117_v59 }
  0x94   : > { %866 = vmatpush.bf16.msrb.mxu1 %v1181_v60 }
  0x97   : > { %854 = vmatpush.bf16.msrb.mxu0 %v1109_v1 }
  0x98   : > { %867 = vmatpush.bf16.msrb.mxu1 %v1173_v2 }
  0x9b   : > { %855 = vmatpush.bf16.msrb.mxu0 %v1101_v7 }
  0x9c   : > { %868 = vmatpush.bf16.msrb.mxu1 %v1165_v8 }
  0x9e   : > { %856 = vmatmul.bf16.vlgmr.msrb.gmra.mxu0 %v1667_v29 }
  0x9f   : > { %869 = vmatmul.bf16.vlgmr.msrb.gmra.mxu1 %v552_v39 }
  0xfb   : > { %v805_v9 = vpop.f32.mrf.mxu0 }
  0xfc   : > { %v818_v10 = vpop.f32.mrf.mxu1 }
  0xfd   : > { %v819_v11 = vadd.f32 %v818_v10, %v805_v9 }
 0x103   : > { %v807_v12 = vpop.f32.mrf.mxu0 }
 0x104   : > { %v820_v13 = vpop.f32.mrf.mxu1 }
 0x106   : > { %v831_v15 = vpop.f32.mrf.mxu2 }
 0x107   : > { %v832_v16 = vadd.f32 %v831_v15, %v819_v11  ;;  %v844_v18 = vpop.f32.mrf.mxu3 }
 0x109   : > { %v874_v17 = vadd.f32 %v832_v16, %v495_v14 }
 0x10b   : > { %876 = vst [vmem:[#allocation2] sm:$0xff] %v874_v17 }
 0x10e   : > { %v833_v19 = vpop.f32.mrf.mxu2 }
 0x10f   : > { %v846_v20 = vpop.f32.mrf.mxu3 }
 0x11b   : > { %v857_v21 = vpop.f32.mrf.mxu0 }
 0x11c   : > { %v858_v22 = vadd.f32 %v857_v21, %v844_v18  ;;  %v870_v23 = vpop.f32.mrf.mxu1 }
 0x11e   : > { %v871_v25 = vadd.f32 %v870_v23, %v858_v22 }
 0x120   : > { %v875_v26 = vadd.f32 %v871_v25, %v496_v24  ;;  %881 = sbr.rel (%p1222_p13) target bundleno = 301 (0x12d), region = 78 }
 0x122   : > { %877 = vst [vmem:[#allocation2 + $0x8] sm:$0xff] %v875_v26 }
 0x123   : > { %v859_v27 = vpop.f32.mrf.mxu0 }
 0x124   : > { %v872_v28 = vpop.f32.mrf.mxu1 }
 0x125   : > { %v882_v29 = vld [vmem:[#allocation2] sm:$0xff] }
 0x126   : > { %v884_v30 = vld [vmem:[%s475_s12] sm:$0x3] }
 0x127   : > { %v886_v32 = vperm.slane %v884_v30, 0  ;;  %v887_v33 = vperm.slane %v884_v30, 1 }
 0x129   : > { %v883_v31 = vld [vmem:[#allocation2 + $0x8] sm:$0xff]  ;;  %v890_v34 = vadd.f32 %v886_v32, %v882_v29 }
 0x12a   : > { %v891_v35 = vadd.f32 %v887_v33, %v883_v31 }
 0x12b   : > { %892 = vst [vmem:[%s1590_s4] sm:$0xff] %v890_v34 }
 0x12c   : > { %893 = vst [vmem:[%s1590_s4 + $0x8] sm:$0xff] %v891_v35 }
 0x12d PF: > { %s13_s18 = sadd.s32 1, %s1387_s18   ;;  %s1730_s12 = smov %s1367_s13 }
 0x12e   : > { %p10_p0 = scmp.ge.s32.totalorder %s13_s18, 14   ;;  %s1731_s13 = smov %s1461_s25 }
 0x12f   : > { %s1732_s14 = smov %s1379_s16  ;;  %s1733_s15 = smov %s1383_s17 }
 0x130   : > { %s1734_s16 = smov %s1737_s19  ;;  %s1735_s17 = smov %s1741_s20 }
 0x131   :  { %12 = sbr.rel (!%p10_p0) target bundleno = 4 (0x4), region = 119 }

// kernel: vgg16_forward.28
= control target key start
LH: loop header
LB: loop body
LE: loop exit
PB: predicated region body
PF: predicated region fallthrough
CT: control target
= control target key end

     0   :  { %vm35_vm0 = vcmask 1041408   ;;  %v124_v18 = vlaneseq  ;;  %vm114_vm1 = vcmask 1040384   ;;  %vm116_vm2 = vcmask 1042434   ;;  %s184_s0 = inlined_call_operand.vmem [shape: f32[2,2,1,2,512], index: 0, kind: input, shape index: {}]   ;;  %s185_s1 = inlined_call_operand.vmem [shape: f32[2,1,512], index: 1, kind: output, shape index: {}]  }
   0x1   :  { %v8_v0 = vld [vmem:[%s184_s0] sm:$0xff]  ;;  %v9_v1 = vld [vmem:[%s184_s0 + $0x8] sm:$0xff]  ;;  %v10_v2 = vld [vmem:[%s184_s0 + $0x10] sm:$0xff] }
   0x2   :  { %v12_v3 = vmax.f32 %v8_v0, %v9_v1  ;;  %v11_v4 = vld [vmem:[%s184_s0 + $0x18] sm:$0xff]  ;;  %vm164_vm3 = vcmp.lt.s32.totalorder %v124_v18, 512 }
   0x3   :  { %v13_v5 = vmax.f32 %v10_v2, %v11_v4 }
   0x4   :  { %16 = vst [vmem:[#allocation1] ss:$4 sm:$0xff] %v12_v3 }
   0x5   :  { %22 = vst [vmem:[#allocation1 + $0x20] ss:$4 sm:$0xff] %v13_v5 }
   0xb   :  { %v17_v6 = vld.sshfl [vmem:[#allocation1] sm:$0xff pattern:$0x73625140]  ;;  %v18_v7 = vld.sshfl [vmem:[#allocation1 + $0x8] sm:$0xff pattern:$0x73625140] }
   0xc   :  { %v19_v8 = vld.sshfl [vmem:[#allocation1 + $0x10] sm:$0xff pattern:$0x73625140]  ;;  %v20_v9 = vld.sshfl [vmem:[#allocation1 + $0x18] sm:$0xff pattern:$0x73625140] }
   0xd   :  { %v36_v10 = vsel %vm35_vm0, %v17_v6, -inf  ;;  %v43_v11 = vsel %vm35_vm0, %v18_v7, -inf  ;;  %v50_v12 = vsel %vm35_vm0, %v19_v8, -inf  ;;  %v57_v13 = vsel %vm35_vm0, %v20_v9, -inf }
   0xe   :  { %v37_v14 = vrot.slane %v36_v10, 4  ;;  %v44_v15 = vrot.slane %v43_v11, 4  ;;  %v51_v16 = vrot.slane %v50_v12, 4  ;;  %v58_v17 = vrot.slane %v57_v13, 4 }
   0xf   :  { %v23_v19 = vld.sshfl [vmem:[#allocation1 + $0x20] sm:$0xff pattern:$0x73625140]  ;;  %v24_v20 = vld.sshfl [vmem:[#allocation1 + $0x28] sm:$0xff pattern:$0x73625140] }
  0x10   :  { %v38_v21 = vmax.f32 %v36_v10, %v37_v14  ;;  %v45_v22 = vmax.f32 %v43_v11, %v44_v15  ;;  %v52_v23 = vmax.f32 %v50_v12, %v51_v16  ;;  %v59_v24 = vmax.f32 %v57_v13, %v58_v17  ;;  %v25_v25 = vld.sshfl [vmem:[#allocation1 + $0x30] sm:$0xff pattern:$0x73625140]  ;;  %v26_v26 = vld.sshfl [vmem:[#allocation1 + $0x38] sm:$0xff pattern:$0x73625140] }
  0x11   :  { %v64_v27 = vsel %vm35_vm0, %v23_v19, -inf  ;;  %v71_v28 = vsel %vm35_vm0, %v24_v20, -inf  ;;  %v78_v29 = vsel %vm35_vm0, %v25_v25, -inf  ;;  %v85_v30 = vsel %vm35_vm0, %v26_v26, -inf }
  0x12   :  { %v39_v31 = vrot.slane %v38_v21, 2  ;;  %v46_v32 = vrot.slane %v45_v22, 2  ;;  %v53_v33 = vrot.slane %v52_v23, 2  ;;  %v60_v34 = vrot.slane %v59_v24, 2 }
  0x13   :  { %v65_v35 = vrot.slane %v64_v27, 4  ;;  %v72_v36 = vrot.slane %v71_v28, 4  ;;  %v79_v37 = vrot.slane %v78_v29, 4  ;;  %v86_v38 = vrot.slane %v85_v30, 4 }
  0x14   :  { %v40_v39 = vmax.f32 %v38_v21, %v39_v31  ;;  %v47_v40 = vmax.f32 %v45_v22, %v46_v32  ;;  %v54_v41 = vmax.f32 %v52_v23, %v53_v33  ;;  %v61_v42 = vmax.f32 %v59_v24, %v60_v34 }
  0x15   :  { %v66_v43 = vmax.f32 %v64_v27, %v65_v35  ;;  %v73_v44 = vmax.f32 %v71_v28, %v72_v36  ;;  %v80_v45 = vmax.f32 %v78_v29, %v79_v37  ;;  %v87_v46 = vmax.f32 %v85_v30, %v86_v38 }
  0x16   :  { %v41_v47 = vrot.slane %v40_v39, 1  ;;  %v48_v48 = vrot.slane %v47_v40, 1  ;;  %v55_v49 = vrot.slane %v54_v41, 1  ;;  %v62_v50 = vrot.slane %v61_v42, 1 }
  0x17   :  { %v67_v51 = vrot.slane %v66_v43, 2  ;;  %v74_v52 = vrot.slane %v73_v44, 2  ;;  %v81_v53 = vrot.slane %v80_v45, 2  ;;  %v88_v54 = vrot.slane %v87_v46, 2 }
  0x18   :  { %v42_v55 = vmax.f32 %v40_v39, %v41_v47  ;;  %v49_v56 = vmax.f32 %v47_v40, %v48_v48  ;;  %v56_v57 = vmax.f32 %v54_v41, %v55_v49  ;;  %v63_v58 = vmax.f32 %v61_v42, %v62_v50 }
  0x19   :  { %v68_v59 = vmax.f32 %v66_v43, %v67_v51  ;;  %v75_v60 = vmax.f32 %v73_v44, %v74_v52  ;;  %v82_v61 = vmax.f32 %v80_v45, %v81_v53  ;;  %v89_v62 = vmax.f32 %v87_v46, %v88_v54 }
  0x1a   :  { %v93_v63 = vmax.f32 %v49_v56, 0.0  ;;  %v94_v0 = vmax.f32 %v56_v57, 0.0  ;;  %v95_v1 = vmax.f32 %v63_v58, 0.0  ;;  %v92_v7 = vmax.f32 %v42_v55, 0.0 }
  0x1b   :  { %v69_v3 = vrot.slane %v68_v59, 1  ;;  %v76_v4 = vrot.slane %v75_v60, 1  ;;  %v83_v5 = vrot.slane %v82_v61, 1  ;;  %v90_v6 = vrot.slane %v89_v62, 1 }
  0x1c   :  { %v108_v8 = vrot.slane %v93_v63, 7  ;;  %v109_v9 = vrot.slane %v94_v0, 6  ;;  %v110_v10 = vrot.slane %v95_v1, 5 }
  0x1d   :  { %v70_v11 = vmax.f32 %v68_v59, %v69_v3  ;;  %v77_v12 = vmax.f32 %v75_v60, %v76_v4  ;;  %v84_v13 = vmax.f32 %v82_v61, %v83_v5  ;;  %v91_v14 = vmax.f32 %v89_v62, %v90_v6 }
  0x1e   :  { %v115_v15 = vsel %vm114_vm1, %v92_v7, %v108_v8  ;;  %v117_v16 = vsel %vm116_vm2, %v109_v9, %v110_v10 }
  0x1f   :  { %v118_v17 = vsel %vm35_vm0, %v115_v15, %v117_v16  ;;  %v97_v18 = vmax.f32 %v77_v12, 0.0  ;;  %v98_v19 = vmax.f32 %v84_v13, 0.0  ;;  %v99_v20 = vmax.f32 %v91_v14, 0.0 }
  0x20   :  { %128 = vst.msk [vmem:[%s185_s1] sm:$0xf] %vm164_vm3, %v118_v17  ;;  %v96_v21 = vmax.f32 %v70_v11, 0.0 }
  0x21   :  { %v111_v22 = vrot.slane %v97_v18, 7  ;;  %v112_v23 = vrot.slane %v98_v19, 6  ;;  %v113_v24 = vrot.slane %v99_v20, 5 }
  0x23   :  { %v119_v25 = vsel %vm114_vm1, %v96_v21, %v111_v22  ;;  %v120_v26 = vsel %vm116_vm2, %v112_v23, %v113_v24 }
  0x24   :  { %v121_v27 = vsel %vm35_vm0, %v119_v25, %v120_v26 }
  0x25   :  { %129 = vst.msk [vmem:[%s185_s1 + $0x4] sm:$0xf] %vm164_vm3, %v121_v27 }

// kernel: vgg16_forward.26
= control target key start
LH: loop header
LB: loop body
LE: loop exit
PB: predicated region body
PF: predicated region fallthrough
CT: control target
= control target key end

     0   :  { %s1679_s12 = smov 0   ;;  %s1681_s13 = smov 0   ;;  %s2071_s0 = inlined_call_operand.vmem [shape: bf16[8,4608], index: 0, kind: input, shape index: {}]   ;;  %s2072_s1 = inlined_call_operand.vmem [shape: bf16[4608,512], index: 1, kind: input, shape index: {}]   ;;  %s2073_s2 = inlined_call_operand.vmem [shape: f32[1,512], index: 2, kind: input, shape index: {}]   ;;  %s2074_s3 = inlined_call_operand.vmem [shape: f32[8,512], index: 3, kind: output, shape index: {}]  }
   0x1   :  { %s1683_s14 = smov 0   ;;  %s1685_s15 = smov 0  }
   0x2   :  { %s1687_s16 = smov 0   ;;  %s1689_s17 = smov 0  }
   0x3   :  { %s1691_s18 = smov 0  }
   0x4 LB: > { %s25_s19 = sadd.s32 1, %s1648_s16  ;;  %s28_s20 = sadd.s32 1, %s1652_s17  ;;  %s1656_s18 = sphi %s1691_s18, %s13_s18   ;;  %s1652_s17 = sphi %s1689_s17, %s2080_s17   ;;  %s1648_s16 = sphi %s1687_s16, %s2079_s16   ;;  %s1644_s15 = sphi %s1685_s15, %s2078_s15   ;;  %s1640_s14 = sphi %s1683_s14, %s2077_s14   ;;  %s1636_s13 = sphi %s1681_s13, %s2076_s13   ;;  %s1632_s12 = sphi %s1679_s12, %s2075_s12  }
   0x5   : > { %p26_p0 = scmp.ge.s32.totalorder %s25_s19, 9  ;;  %p76_p1 = scmp.ne.s32.totalorder %s1636_s13, %s1632_s12 }
   0x6   : > { %p77_p2 = scmp.eq.s32.totalorder %s1656_s18, 0  ;;  %s69_s24 = sadd.s32 1, %s1636_s13 }
   0x7   : > { %s2082_s19 = smov (%p26_p0, %s25_s19), 0  ;;  %s2084_s20 = smov (!%p26_p0, %s28_s20), %s1652_s17 }
   0x8   : > { %p78_p3 = por %p77_p2, %p76_p1  ;;  %p30_p4 = scmp.ge.s32.totalorder %s2084_s20, 2 }
   0x9   : > { %s64_s21 = ssub.s32 %s1648_s16, %s2082_s19  ;;  %p1207_p6 = scmp.ge.s32.totalorder %s1656_s18, 18 }
   0xa   : > { %s2086_s20 = smov (%p30_p4, %s2084_s20), 0 }
   0xb   : > { %s65_s22 = ssub.s32 %s1652_s17, %s2086_s20  ;;  %156 = sbr.rel (%p1207_p6) target bundleno = 87 (0x57), region = 16 }
   0xc   : > { %s66_s23 = sor.u32 %s65_s22, %s64_s21 }
   0xd   : > { %p67_p5 = scmp.eq.s32.totalorder %s66_s23, 0 }
   0xf   : > { %s1730_s25 = scalar_select %p67_p5, %s1636_s13, %s69_s24  }
  0x10   : > { %172 = sbr.rel (!%p78_p3) target bundleno = 87 (0x57), region = 24  ;;  %s174_s26 = sand.u32 (%p78_p3), 1, %s1636_s13  }
  0x11   : > { %s1210_s27 = sshll.u32 (%p78_p3), %s1652_s17, 1  ;;  %s1208_s28 = sshll.u32 (%p78_p3), %s174_s26, 9 }
  0x12   : > { %s1480_s29 = sshll.u32 (%p78_p3), %s1648_s16, 8  ;;  %s1744_s8 = scalar_lea.vmem (%p78_p3), [#allocation3], %s1208_s28 }
  0x13   : > { %s180_s30 = sadd.s32 (%p78_p3), %s1480_s29, %s1210_s27 }
  0x14   : > { %s1212_s4 = sshll.u32 (%p78_p3), %s180_s30, 2 }
  0x15   : > { %s1739_s7 = scalar_lea.vmem %s2072_s1, %s1212_s4 }
  0x16   : > { %v337_v0 = vld [vmem:[%s1739_s7] sm:$0xff]  ;;  %v339_v1 = vld [vmem:[%s1739_s7 + $0x10] sm:$0xff] }
  0x17   : > { %v341_v2 = vld [vmem:[%s1739_s7 + $0x20] sm:$0xff]  ;;  %338 = vst [vmem:[%s1744_s8] sm:$0xff] %v337_v0  ;;  %v343_v3 = vld [vmem:[%s1739_s7 + $0x30] sm:$0xff] }
  0x18   : > { %340 = vst [vmem:[%s1744_s8 + $0x8] sm:$0xff] %v339_v1  ;;  %v345_v4 = vld [vmem:[%s1739_s7 + $0x40] sm:$0xff]  ;;  %v347_v5 = vld [vmem:[%s1739_s7 + $0x50] sm:$0xff] }
  0x19   : > { %342 = vst [vmem:[%s1744_s8 + $0x10] sm:$0xff] %v341_v2  ;;  %v349_v6 = vld [vmem:[%s1739_s7 + $0x60] sm:$0xff]  ;;  %v351_v7 = vld [vmem:[%s1739_s7 + $0x70] sm:$0xff] }
  0x1a   : > { %344 = vst [vmem:[%s1744_s8 + $0x18] sm:$0xff] %v343_v3  ;;  %v353_v8 = vld [vmem:[%s1739_s7 + $0x80] sm:$0xff]  ;;  %v355_v9 = vld [vmem:[%s1739_s7 + $0x90] sm:$0xff] }
  0x1b   : > { %346 = vst [vmem:[%s1744_s8 + $0x20] sm:$0xff] %v345_v4  ;;  %v357_v10 = vld [vmem:[%s1739_s7 + $0xa0] sm:$0xff]  ;;  %v359_v11 = vld [vmem:[%s1739_s7 + $0xb0] sm:$0xff] }
  0x1c   : > { %348 = vst [vmem:[%s1744_s8 + $0x28] sm:$0xff] %v347_v5  ;;  %v361_v12 = vld [vmem:[%s1739_s7 + $0xc0] sm:$0xff]  ;;  %v363_v13 = vld [vmem:[%s1739_s7 + $0xd0] sm:$0xff] }
  0x1d   : > { %350 = vst [vmem:[%s1744_s8 + $0x30] sm:$0xff] %v349_v6  ;;  %v365_v14 = vld [vmem:[%s1739_s7 + $0xe0] sm:$0xff]  ;;  %v367_v15 = vld [vmem:[%s1739_s7 + $0xf0] sm:$0xff] }
  0x1e   : > { %352 = vst [vmem:[%s1744_s8 + $0x38] sm:$0xff] %v351_v7  ;;  %v369_v16 = vld [vmem:[%s1739_s7 + $0x100] sm:$0xff]  ;;  %v371_v17 = vld [vmem:[%s1739_s7 + $0x110] sm:$0xff] }
  0x1f   : > { %354 = vst [vmem:[%s1744_s8 + $0x40] sm:$0xff] %v353_v8  ;;  %v373_v18 = vld [vmem:[%s1739_s7 + $0x120] sm:$0xff]  ;;  %v375_v19 = vld [vmem:[%s1739_s7 + $0x130] sm:$0xff] }
  0x20   : > { %356 = vst [vmem:[%s1744_s8 + $0x48] sm:$0xff] %v355_v9  ;;  %v377_v20 = vld [vmem:[%s1739_s7 + $0x140] sm:$0xff]  ;;  %v379_v21 = vld [vmem:[%s1739_s7 + $0x150] sm:$0xff] }
  0x21   : > { %358 = vst [vmem:[%s1744_s8 + $0x50] sm:$0xff] %v357_v10  ;;  %v381_v22 = vld [vmem:[%s1739_s7 + $0x160] sm:$0xff]  ;;  %v383_v23 = vld [vmem:[%s1739_s7 + $0x170] sm:$0xff] }
  0x22   : > { %360 = vst [vmem:[%s1744_s8 + $0x58] sm:$0xff] %v359_v11  ;;  %v385_v24 = vld [vmem:[%s1739_s7 + $0x180] sm:$0xff]  ;;  %v387_v25 = vld [vmem:[%s1739_s7 + $0x190] sm:$0xff] }
  0x23   : > { %362 = vst [vmem:[%s1744_s8 + $0x60] sm:$0xff] %v361_v12  ;;  %v389_v26 = vld [vmem:[%s1739_s7 + $0x1a0] sm:$0xff]  ;;  %v391_v27 = vld [vmem:[%s1739_s7 + $0x1b0] sm:$0xff] }
  0x24   : > { %364 = vst [vmem:[%s1744_s8 + $0x68] sm:$0xff] %v363_v13  ;;  %v393_v28 = vld [vmem:[%s1739_s7 + $0x1c0] sm:$0xff]  ;;  %v395_v29 = vld [vmem:[%s1739_s7 + $0x1d0] sm:$0xff] }
  0x25   : > { %366 = vst [vmem:[%s1744_s8 + $0x70] sm:$0xff] %v365_v14  ;;  %v397_v30 = vld [vmem:[%s1739_s7 + $0x1e0] sm:$0xff]  ;;  %v399_v31 = vld [vmem:[%s1739_s7 + $0x1f0] sm:$0xff] }
  0x26   : > { %368 = vst [vmem:[%s1744_s8 + $0x78] sm:$0xff] %v367_v15  ;;  %v401_v32 = vld [vmem:[%s1739_s7 + $0x200] sm:$0xff]  ;;  %v403_v33 = vld [vmem:[%s1739_s7 + $0x210] sm:$0xff] }
  0x27   : > { %370 = vst [vmem:[%s1744_s8 + $0x80] sm:$0xff] %v369_v16  ;;  %v405_v34 = vld [vmem:[%s1739_s7 + $0x220] sm:$0xff]  ;;  %v407_v35 = vld [vmem:[%s1739_s7 + $0x230] sm:$0xff] }
  0x28   : > { %372 = vst [vmem:[%s1744_s8 + $0x88] sm:$0xff] %v371_v17  ;;  %v409_v36 = vld [vmem:[%s1739_s7 + $0x240] sm:$0xff]  ;;  %v411_v37 = vld [vmem:[%s1739_s7 + $0x250] sm:$0xff] }
  0x29   : > { %374 = vst [vmem:[%s1744_s8 + $0x90] sm:$0xff] %v373_v18  ;;  %v413_v38 = vld [vmem:[%s1739_s7 + $0x260] sm:$0xff]  ;;  %v415_v39 = vld [vmem:[%s1739_s7 + $0x270] sm:$0xff] }
  0x2a   : > { %376 = vst [vmem:[%s1744_s8 + $0x98] sm:$0xff] %v375_v19  ;;  %v417_v40 = vld [vmem:[%s1739_s7 + $0x280] sm:$0xff]  ;;  %v419_v41 = vld [vmem:[%s1739_s7 + $0x290] sm:$0xff] }
  0x2b   : > { %378 = vst [vmem:[%s1744_s8 + $0xa0] sm:$0xff] %v377_v20  ;;  %v421_v42 = vld [vmem:[%s1739_s7 + $0x2a0] sm:$0xff]  ;;  %v423_v43 = vld [vmem:[%s1739_s7 + $0x2b0] sm:$0xff] }
  0x2c   : > { %380 = vst [vmem:[%s1744_s8 + $0xa8] sm:$0xff] %v379_v21  ;;  %v425_v44 = vld [vmem:[%s1739_s7 + $0x2c0] sm:$0xff]  ;;  %v427_v45 = vld [vmem:[%s1739_s7 + $0x2d0] sm:$0xff] }
  0x2d   : > { %382 = vst [vmem:[%s1744_s8 + $0xb0] sm:$0xff] %v381_v22  ;;  %v429_v46 = vld [vmem:[%s1739_s7 + $0x2e0] sm:$0xff]  ;;  %v431_v47 = vld [vmem:[%s1739_s7 + $0x2f0] sm:$0xff] }
  0x2e   : > { %384 = vst [vmem:[%s1744_s8 + $0xb8] sm:$0xff] %v383_v23  ;;  %v433_v48 = vld [vmem:[%s1739_s7 + $0x300] sm:$0xff]  ;;  %v435_v49 = vld [vmem:[%s1739_s7 + $0x310] sm:$0xff] }
  0x2f   : > { %386 = vst [vmem:[%s1744_s8 + $0xc0] sm:$0xff] %v385_v24  ;;  %v437_v50 = vld [vmem:[%s1739_s7 + $0x320] sm:$0xff]  ;;  %v439_v51 = vld [vmem:[%s1739_s7 + $0x330] sm:$0xff] }
  0x30   : > { %388 = vst [vmem:[%s1744_s8 + $0xc8] sm:$0xff] %v387_v25  ;;  %v441_v52 = vld [vmem:[%s1739_s7 + $0x340] sm:$0xff]  ;;  %v443_v53 = vld [vmem:[%s1739_s7 + $0x350] sm:$0xff] }
  0x31   : > { %390 = vst [vmem:[%s1744_s8 + $0xd0] sm:$0xff] %v389_v26  ;;  %v445_v54 = vld [vmem:[%s1739_s7 + $0x360] sm:$0xff]  ;;  %v447_v55 = vld [vmem:[%s1739_s7 + $0x370] sm:$0xff] }
  0x32   : > { %392 = vst [vmem:[%s1744_s8 + $0xd8] sm:$0xff] %v391_v27  ;;  %v449_v56 = vld [vmem:[%s1739_s7 + $0x380] sm:$0xff]  ;;  %v451_v57 = vld [vmem:[%s1739_s7 + $0x390] sm:$0xff] }
  0x33   : > { %394 = vst [vmem:[%s1744_s8 + $0xe0] sm:$0xff] %v393_v28  ;;  %v453_v58 = vld [vmem:[%s1739_s7 + $0x3a0] sm:$0xff]  ;;  %v455_v59 = vld [vmem:[%s1739_s7 + $0x3b0] sm:$0xff] }
  0x34   : > { %396 = vst [vmem:[%s1744_s8 + $0xe8] sm:$0xff] %v395_v29  ;;  %v457_v60 = vld [vmem:[%s1739_s7 + $0x3c0] sm:$0xff]  ;;  %v459_v61 = vld [vmem:[%s1739_s7 + $0x3d0] sm:$0xff] }
  0x35   : > { %398 = vst [vmem:[%s1744_s8 + $0xf0] sm:$0xff] %v397_v30  ;;  %v461_v62 = vld [vmem:[%s1739_s7 + $0x3e0] sm:$0xff]  ;;  %v463_v63 = vld [vmem:[%s1739_s7 + $0x3f0] sm:$0xff] }
  0x36   : > { %400 = vst [vmem:[%s1744_s8 + $0xf8] sm:$0xff] %v399_v31 }
  0x37   : > { %402 = vst [vmem:[%s1744_s8 + $0x100] sm:$0xff] %v401_v32 }
  0x38   : > { %404 = vst [vmem:[%s1744_s8 + $0x108] sm:$0xff] %v403_v33 }
  0x39   : > { %406 = vst [vmem:[%s1744_s8 + $0x110] sm:$0xff] %v405_v34 }
  0x3a   : > { %408 = vst [vmem:[%s1744_s8 + $0x118] sm:$0xff] %v407_v35 }
  0x3b   : > { %410 = vst [vmem:[%s1744_s8 + $0x120] sm:$0xff] %v409_v36 }
  0x3c   : > { %412 = vst [vmem:[%s1744_s8 + $0x128] sm:$0xff] %v411_v37 }
  0x3d   : > { %414 = vst [vmem:[%s1744_s8 + $0x130] sm:$0xff] %v413_v38 }
  0x3e   : > { %416 = vst [vmem:[%s1744_s8 + $0x138] sm:$0xff] %v415_v39 }
  0x3f   : > { %418 = vst [vmem:[%s1744_s8 + $0x140] sm:$0xff] %v417_v40 }
  0x40   : > { %420 = vst [vmem:[%s1744_s8 + $0x148] sm:$0xff] %v419_v41 }
  0x41   : > { %422 = vst [vmem:[%s1744_s8 + $0x150] sm:$0xff] %v421_v42 }
  0x42   : > { %424 = vst [vmem:[%s1744_s8 + $0x158] sm:$0xff] %v423_v43 }
  0x43   : > { %426 = vst [vmem:[%s1744_s8 + $0x160] sm:$0xff] %v425_v44 }
  0x44   : > { %428 = vst [vmem:[%s1744_s8 + $0x168] sm:$0xff] %v427_v45 }
  0x45   : > { %430 = vst [vmem:[%s1744_s8 + $0x170] sm:$0xff] %v429_v46 }
  0x46   : > { %432 = vst [vmem:[%s1744_s8 + $0x178] sm:$0xff] %v431_v47 }
  0x47   : > { %434 = vst [vmem:[%s1744_s8 + $0x180] sm:$0xff] %v433_v48 }
  0x48   : > { %436 = vst [vmem:[%s1744_s8 + $0x188] sm:$0xff] %v435_v49 }
  0x49   : > { %438 = vst [vmem:[%s1744_s8 + $0x190] sm:$0xff] %v437_v50 }
  0x4a   : > { %440 = vst [vmem:[%s1744_s8 + $0x198] sm:$0xff] %v439_v51 }
  0x4b   : > { %442 = vst [vmem:[%s1744_s8 + $0x1a0] sm:$0xff] %v441_v52 }
  0x4c   : > { %444 = vst [vmem:[%s1744_s8 + $0x1a8] sm:$0xff] %v443_v53 }
  0x4d   : > { %446 = vst [vmem:[%s1744_s8 + $0x1b0] sm:$0xff] %v445_v54 }
  0x4e   : > { %448 = vst [vmem:[%s1744_s8 + $0x1b8] sm:$0xff] %v447_v55 }
  0x4f   : > { %450 = vst [vmem:[%s1744_s8 + $0x1c0] sm:$0xff] %v449_v56 }
  0x50   : > { %452 = vst [vmem:[%s1744_s8 + $0x1c8] sm:$0xff] %v451_v57 }
  0x51   : > { %454 = vst [vmem:[%s1744_s8 + $0x1d0] sm:$0xff] %v453_v58 }
  0x52   : > { %456 = vst [vmem:[%s1744_s8 + $0x1d8] sm:$0xff] %v455_v59 }
  0x53   : > { %458 = vst [vmem:[%s1744_s8 + $0x1e0] sm:$0xff] %v457_v60 }
  0x54   : > { %460 = vst [vmem:[%s1744_s8 + $0x1e8] sm:$0xff] %v459_v61 }
  0x55   : > { %462 = vst [vmem:[%s1744_s8 + $0x1f0] sm:$0xff] %v461_v62 }
  0x56   : > { %464 = vst [vmem:[%s1744_s8 + $0x1f8] sm:$0xff] %v463_v63 }
  0x57 PF: > { %p1213_p7 = scmp.ge.s32.totalorder %s1656_s18, 1  ;;  %p477_p8 = scmp.lt.s32.totalorder %s1656_s18, 19 }
  0x59   : > { %p478_p9 = pnand %p1213_p7, %p477_p8 }
  0x5a   : > { %s484_s9 = sand.u32 (!%p478_p9), 1, %s1632_s12   ;;  %s1215_s10 = sshll.u32 (!%p478_p9), %s1640_s14, 2 }
  0x5b   : > { %481 = sbr.rel (%p478_p9) target bundleno = 324 (0x144), region = 66  ;;  %s1214_s11 = sshll.u32 (!%p478_p9), %s484_s9, 9 }
  0x5c   : > { %p527_p10 = scmp.lt.s32.totalorder (!%p478_p9), %s1215_s10, 35  ;;  %s1217_s21 = sshll.u32 (!%p478_p9), %s1644_s15, 1 }
  0x5d   : > { %p537_p11 = scmp.lt.s32.totalorder (!%p478_p9), %s1217_s21, 3  ;;  %s1893_s5 = scalar_lea.vmem (!%p478_p9), [#allocation3], %s1214_s11 }
  0x5e   : > { %p1220_p12 = scmp.ne.s32.totalorder (!%p478_p9), %s1640_s14, 0 }
  0x60   : > { %s2088_s10 = smov (!%p527_p10, %s1215_s10), 35  ;;  %s2090_s21 = smov (!%p537_p11, %s1217_s21), 3 }
  0x61   : > { %s1216_s22 = sshll.u32 %s2088_s10, 2  ;;  %s539_s12 = scalar_lea.vmem %s2073_s2, %s2090_s21 }
  0x62   : > { %s1879_s26 = scalar_lea.vmem %s2071_s0, %s1216_s22  ;;  %s1219_s29 = sshll.u32 %s2090_s21, 3 }
  0x63   : > { %s1891_s15 = scalar_lea.vmem %s2074_s3, %s1219_s29  ;;  %554 = sbr.rel (%p1220_p12) target bundleno = 107 (0x6b), region = 74 }
  0x68   : > { %v1658_v0 = vmov 0.0  }
  0x69   : > { %555 = vst [vmem:[#allocation2] sm:$0xff] %v1658_v0 }
  0x6a   : > { %556 = vst [vmem:[#allocation2 + $0x8] sm:$0xff] %v1658_v0 }
  0x6b PF: > { %v1279_v1 = vld [vmem:[%s1893_s5 + $0x70] sm:$0xf]  ;;  %v1496_v2 = vld [vmem:[%s1893_s5 + $0x74] sm:$0xf0]  ;;  %v1271_v12 = vld [vmem:[%s1893_s5 + $0x60] sm:$0xf] }
  0x6c   : > { %v1343_v3 = vld [vmem:[%s1893_s5 + $0xf0] sm:$0xf]  ;;  %v1280_v4 = vor.u32 %v1496_v2, %v1279_v1  ;;  %v1512_v5 = vld [vmem:[%s1893_s5 + $0xf4] sm:$0xf0]  ;;  %v1494_v14 = vld [vmem:[%s1893_s5 + $0x64] sm:$0xf0] }
  0x6d   : > { %v1407_v6 = vld [vmem:[%s1893_s5 + $0x170] sm:$0xf]  ;;  %v1528_v7 = vld [vmem:[%s1893_s5 + $0x174] sm:$0xf0]  ;;  %v1344_v8 = vor.u32 %v1512_v5, %v1343_v3  ;;  %v1335_v15 = vld [vmem:[%s1893_s5 + $0xe0] sm:$0xf]  ;;  %v1272_v17 = vor.u32 %v1494_v14, %v1271_v12 }
  0x6e   : > { %v1408_v9 = vor.u32 %v1528_v7, %v1407_v6  ;;  %v1471_v10 = vld [vmem:[%s1893_s5 + $0x1f0] sm:$0xf]  ;;  %v1544_v11 = vld [vmem:[%s1893_s5 + $0x1f4] sm:$0xf0]  ;;  %957 = vmatpush.bf16.msra.mxu0 %v1280_v4  ;;  %v1510_v16 = vld [vmem:[%s1893_s5 + $0xe4] sm:$0xf0] }
  0x6f   : > { %v1472_v13 = vor.u32 %v1544_v11, %v1471_v10  ;;  %970 = vmatpush.bf16.msra.mxu1 %v1344_v8  ;;  %v1336_v18 = vor.u32 %v1510_v16, %v1335_v15  ;;  %v1399_v19 = vld [vmem:[%s1893_s5 + $0x160] sm:$0xf]  ;;  %v1526_v20 = vld [vmem:[%s1893_s5 + $0x164] sm:$0xf0]  ;;  %v1263_v24 = vld [vmem:[%s1893_s5 + $0x50] sm:$0xf] }
  0x70   : > { %983 = vmatpush.bf16.msra.mxu2 %v1408_v9  ;;  %v1463_v21 = vld [vmem:[%s1893_s5 + $0x1e0] sm:$0xf]  ;;  %v1400_v22 = vor.u32 %v1526_v20, %v1399_v19  ;;  %v1542_v23 = vld [vmem:[%s1893_s5 + $0x1e4] sm:$0xf0]  ;;  %v1492_v25 = vld [vmem:[%s1893_s5 + $0x54] sm:$0xf0] }
  0x71   : > { %996 = vmatpush.bf16.msra.mxu3 %v1472_v13  ;;  %v1464_v26 = vor.u32 %v1542_v23, %v1463_v21  ;;  %v1327_v27 = vld [vmem:[%s1893_s5 + $0xd0] sm:$0xf]  ;;  %v1508_v28 = vld [vmem:[%s1893_s5 + $0xd4] sm:$0xf0]  ;;  %v1264_v30 = vor.u32 %v1492_v25, %v1263_v24  ;;  %v1255_v36 = vld [vmem:[%s1893_s5 + $0x40] sm:$0xf] }
  0x72   : > { %v1391_v29 = vld [vmem:[%s1893_s5 + $0x150] sm:$0xf]  ;;  %958 = vmatpush.bf16.msra.mxu0 %v1272_v17  ;;  %v1524_v31 = vld [vmem:[%s1893_s5 + $0x154] sm:$0xf0]  ;;  %v1328_v34 = vor.u32 %v1508_v28, %v1327_v27  ;;  %v1490_v37 = vld [vmem:[%s1893_s5 + $0x44] sm:$0xf0] }
  0x73   : > { %v1455_v32 = vld [vmem:[%s1893_s5 + $0x1d0] sm:$0xf]  ;;  %v1540_v33 = vld [vmem:[%s1893_s5 + $0x1d4] sm:$0xf0]  ;;  %971 = vmatpush.bf16.msra.mxu1 %v1336_v18  ;;  %v1392_v35 = vor.u32 %v1524_v31, %v1391_v29  ;;  %v1319_v38 = vld [vmem:[%s1893_s5 + $0xc0] sm:$0xf]  ;;  %v1256_v45 = vor.u32 %v1490_v37, %v1255_v36 }
  0x74   : > { %984 = vmatpush.bf16.msra.mxu2 %v1400_v22  ;;  %v1456_v39 = vor.u32 %v1540_v33, %v1455_v32  ;;  %v1506_v40 = vld [vmem:[%s1893_s5 + $0xc4] sm:$0xf0]  ;;  %v1383_v41 = vld [vmem:[%s1893_s5 + $0x140] sm:$0xf]  ;;  %v1247_v48 = vld [vmem:[%s1893_s5 + $0x30] sm:$0xf] }
  0x75   : > { %997 = vmatpush.bf16.msra.mxu3 %v1464_v26  ;;  %v1522_v42 = vld [vmem:[%s1893_s5 + $0x144] sm:$0xf0]  ;;  %v1447_v43 = vld [vmem:[%s1893_s5 + $0x1c0] sm:$0xf]  ;;  %v1320_v46 = vor.u32 %v1506_v40, %v1319_v38  ;;  %v1488_v49 = vld [vmem:[%s1893_s5 + $0x34] sm:$0xf0] }
  0x76   : > { %v1538_v44 = vld [vmem:[%s1893_s5 + $0x1c4] sm:$0xf0]  ;;  %959 = vmatpush.bf16.msra.mxu0 %v1264_v30  ;;  %v1384_v47 = vor.u32 %v1522_v42, %v1383_v41  ;;  %v1311_v50 = vld [vmem:[%s1893_s5 + $0xb0] sm:$0xf]  ;;  %v1504_v52 = vld [vmem:[%s1893_s5 + $0xb4] sm:$0xf0]  ;;  %v1248_v57 = vor.u32 %v1488_v49, %v1247_v48 }
  0x77   : > { %972 = vmatpush.bf16.msra.mxu1 %v1328_v34  ;;  %v1448_v51 = vor.u32 %v1538_v44, %v1447_v43  ;;  %v1375_v53 = vld [vmem:[%s1893_s5 + $0x130] sm:$0xf]  ;;  %v1520_v54 = vld [vmem:[%s1893_s5 + $0x134] sm:$0xf0]  ;;  %v1312_v58 = vor.u32 %v1504_v52, %v1311_v50  ;;  %v1239_v60 = vld [vmem:[%s1893_s5 + $0x20] sm:$0xf] }
  0x78   : > { %985 = vmatpush.bf16.msra.mxu2 %v1392_v35  ;;  %v1439_v55 = vld [vmem:[%s1893_s5 + $0x1b0] sm:$0xf]  ;;  %v1536_v56 = vld [vmem:[%s1893_s5 + $0x1b4] sm:$0xf0]  ;;  %v1376_v59 = vor.u32 %v1520_v54, %v1375_v53  ;;  %v1486_v61 = vld [vmem:[%s1893_s5 + $0x24] sm:$0xf0] }
  0x79   : > { %998 = vmatpush.bf16.msra.mxu3 %v1456_v39  ;;  %v1303_v62 = vld [vmem:[%s1893_s5 + $0xa0] sm:$0xf]  ;;  %v1440_v63 = vor.u32 %v1536_v56, %v1439_v55  ;;  %v1502_v0 = vld [vmem:[%s1893_s5 + $0xa4] sm:$0xf0]  ;;  %v1240_v5 = vor.u32 %v1486_v61, %v1239_v60  ;;  %v1231_v8 = vld [vmem:[%s1893_s5 + $0x10] sm:$0xf] }
  0x7a   : > { %960 = vmatpush.bf16.msra.mxu0 %v1256_v45  ;;  %v1367_v1 = vld [vmem:[%s1893_s5 + $0x120] sm:$0xf]  ;;  %v1518_v2 = vld [vmem:[%s1893_s5 + $0x124] sm:$0xf0]  ;;  %v1304_v6 = vor.u32 %v1502_v0, %v1303_v62  ;;  %v1484_v9 = vld [vmem:[%s1893_s5 + $0x14] sm:$0xf0] }
  0x7b   : > { %973 = vmatpush.bf16.msra.mxu1 %v1320_v46  ;;  %v1431_v3 = vld [vmem:[%s1893_s5 + $0x1a0] sm:$0xf]  ;;  %v1534_v4 = vld [vmem:[%s1893_s5 + $0x1a4] sm:$0xf0]  ;;  %v1368_v7 = vor.u32 %v1518_v2, %v1367_v1  ;;  %v1295_v10 = vld [vmem:[%s1893_s5 + $0x90] sm:$0xf]  ;;  %v1232_v17 = vor.u32 %v1484_v9, %v1231_v8 }
  0x7c   : > { %986 = vmatpush.bf16.msra.mxu2 %v1384_v47  ;;  %v1432_v11 = vor.u32 %v1534_v4, %v1431_v3  ;;  %v1500_v12 = vld [vmem:[%s1893_s5 + $0x94] sm:$0xf0]  ;;  %v1359_v13 = vld [vmem:[%s1893_s5 + $0x110] sm:$0xf]  ;;  %v1223_v18 = vld [vmem:[%s1893_s5] sm:$0xf] }
  0x7d   : > { %999 = vmatpush.bf16.msra.mxu3 %v1448_v51  ;;  %v1516_v14 = vld [vmem:[%s1893_s5 + $0x114] sm:$0xf0]  ;;  %v1423_v15 = vld [vmem:[%s1893_s5 + $0x190] sm:$0xf]  ;;  %v1482_v19 = vld [vmem:[%s1893_s5 + $0x4] sm:$0xf0]  ;;  %v1296_v21 = vor.u32 %v1500_v12, %v1295_v10 }
  0x7e   : > { %961 = vmatpush.bf16.msra.mxu0 %v1248_v57  ;;  %v1532_v16 = vld [vmem:[%s1893_s5 + $0x194] sm:$0xf0]  ;;  %v1287_v20 = vld [vmem:[%s1893_s5 + $0x80] sm:$0xf]  ;;  %v1360_v22 = vor.u32 %v1516_v14, %v1359_v13  ;;  %v1498_v23 = vld [vmem:[%s1893_s5 + $0x84] sm:$0xf0]  ;;  %v1224_v33 = vor.u32 %v1482_v19, %v1223_v18 }
  0x7f   : > { %974 = vmatpush.bf16.msra.mxu1 %v1312_v58  ;;  %v1351_v24 = vld [vmem:[%s1893_s5 + $0x100] sm:$0xf]  ;;  %v1514_v25 = vld [vmem:[%s1893_s5 + $0x104] sm:$0xf0]  ;;  %v1424_v26 = vor.u32 %v1532_v16, %v1423_v15  ;;  %v1495_v29 = vld [vmem:[%s1893_s5 + $0x74] sm:$0xf]  ;;  %v1288_v39 = vor.u32 %v1498_v23, %v1287_v20 }
  0x80   : > { %987 = vmatpush.bf16.msra.mxu2 %v1376_v59  ;;  %v1415_v27 = vld [vmem:[%s1893_s5 + $0x180] sm:$0xf]  ;;  %v1530_v28 = vld [vmem:[%s1893_s5 + $0x184] sm:$0xf0]  ;;  %v1281_v30 = vld [vmem:[%s1893_s5 + $0x78] sm:$0xf0]  ;;  %v1352_v40 = vor.u32 %v1514_v25, %v1351_v24 }
  0x81   : > { %1000 = vmatpush.bf16.msra.mxu3 %v1440_v63  ;;  %v1511_v31 = vld [vmem:[%s1893_s5 + $0xf4] sm:$0xf]  ;;  %v558_v32 = vld [vmem:[%s1879_s26 + $0x8] sm:$0xff]  ;;  %v1416_v43 = vor.u32 %v1530_v28, %v1415_v27  ;;  %v1284_v44 = vor.u32 %v1495_v29, %v1281_v30  ;;  %v1493_v45 = vld [vmem:[%s1893_s5 + $0x64] sm:$0xf]  ;;  %p1477_p13 = scmp.ne.s32.totalorder %s1640_s14, 8 }
  0x82   : > { %962 = vmatpush.bf16.msra.mxu0 %v1240_v5  ;;  %v1345_v34 = vld [vmem:[%s1893_s5 + $0xf8] sm:$0xf0]  ;;  %v1527_v35 = vld [vmem:[%s1893_s5 + $0x174] sm:$0xf]  ;;  %v561_v37 = vunpack.c.l.bf16 %v558_v32  ;;  %v562_v38 = vunpack.c.h.bf16 %v558_v32  ;;  %v1273_v50 = vld [vmem:[%s1893_s5 + $0x68] sm:$0xf0] }
  0x83   : > { %975 = vmatpush.bf16.msra.mxu1 %v1304_v6  ;;  %v1409_v36 = vld [vmem:[%s1893_s5 + $0x178] sm:$0xf0]  ;;  %v1543_v41 = vld [vmem:[%s1893_s5 + $0x1f4] sm:$0xf]  ;;  %v1348_v48 = vor.u32 %v1511_v31, %v1345_v34  ;;  %v1509_v51 = vld [vmem:[%s1893_s5 + $0xe4] sm:$0xf]  ;;  %v1276_v63 = vor.u32 %v1493_v45, %v1273_v50 }
  0x84   : > { %988 = vmatpush.bf16.msra.mxu2 %v1368_v7  ;;  %v1473_v42 = vld [vmem:[%s1893_s5 + $0x1f8] sm:$0xf0]  ;;  %v565_v46 = vmax.f32 %v561_v37, 0.0  ;;  %v566_v47 = vmax.f32 %v562_v38, 0.0  ;;  %v1412_v49 = vor.u32 %v1527_v35, %v1409_v36  ;;  %v557_v52 = vld [vmem:[%s1879_s26] sm:$0xff] }
  0x85   : > { %1001 = vmatpush.bf16.msra.mxu3 %v1432_v11  ;;  %v1476_v53 = vor.u32 %v1543_v41, %v1473_v42  ;;  %v1337_v54 = vld [vmem:[%s1893_s5 + $0xe8] sm:$0xf0]  ;;  %v1525_v55 = vld [vmem:[%s1893_s5 + $0x164] sm:$0xf]  ;;  %v559_v58 = vunpack.c.l.bf16 %v557_v52  ;;  %v560_v59 = vunpack.c.h.bf16 %v557_v52  ;;  %v1491_v4 = vld [vmem:[%s1893_s5 + $0x54] sm:$0xf] }
  0x86   : > { %963 = vmatpush.bf16.msra.mxu0 %v1232_v17  ;;  %v1401_v56 = vld [vmem:[%s1893_s5 + $0x168] sm:$0xf0]  ;;  %v1976_v57 = vpack.c.bf16 %v565_v46, %v565_v46  ;;  %v1541_v60 = vld [vmem:[%s1893_s5 + $0x1e4] sm:$0xf]  ;;  %v1980_v62 = vpack.c.bf16 %v566_v47, %v566_v47  ;;  %v1340_v2 = vor.u32 %v1509_v51, %v1337_v54  ;;  %v1265_v5 = vld [vmem:[%s1893_s5 + $0x58] sm:$0xf0] }
  0x87   : > { %976 = vmatpush.bf16.msra.mxu1 %v1296_v21  ;;  %v1465_v61 = vld [vmem:[%s1893_s5 + $0x1e8] sm:$0xf0]  ;;  %v563_v0 = vmax.f32 %v559_v58, 0.0  ;;  %v564_v1 = vmax.f32 %v560_v59, 0.0  ;;  %v1404_v3 = vor.u32 %v1525_v55, %v1401_v56  ;;  %v1507_v6 = vld [vmem:[%s1893_s5 + $0xd4] sm:$0xf]  ;;  %v1268_v15 = vor.u32 %v1491_v4, %v1265_v5 }
  0x88   : > { %989 = vmatpush.bf16.msra.mxu2 %v1360_v22  ;;  %v1468_v7 = vor.u32 %v1541_v60, %v1465_v61  ;;  %v1329_v8 = vld [vmem:[%s1893_s5 + $0xd8] sm:$0xf0]  ;;  %v1523_v9 = vld [vmem:[%s1893_s5 + $0x154] sm:$0xf]  ;;  %v1489_v18 = vld [vmem:[%s1893_s5 + $0x44] sm:$0xf] }
  0x89   : > { %1002 = vmatpush.bf16.msra.mxu3 %v1424_v26  ;;  %v1393_v10 = vld [vmem:[%s1893_s5 + $0x158] sm:$0xf0]  ;;  %v1989_v11 = vpack.c.bf16 %v563_v0, %v563_v0  ;;  %v1991_v12 = vpack.c.bf16 %v564_v1, %v564_v1  ;;  %v1539_v13 = vld [vmem:[%s1893_s5 + $0x1d4] sm:$0xf]  ;;  %v1332_v16 = vor.u32 %v1507_v6, %v1329_v8  ;;  %v1257_v19 = vld [vmem:[%s1893_s5 + $0x48] sm:$0xf0] }
  0x8a   : > { %964 = vmatpush.bf16.msra.mxu0 %v1224_v33  ;;  %v1457_v14 = vld [vmem:[%s1893_s5 + $0x1d8] sm:$0xf0]  ;;  %v1396_v17 = vor.u32 %v1523_v9, %v1393_v10  ;;  %v1505_v20 = vld [vmem:[%s1893_s5 + $0xc4] sm:$0xf]  ;;  %v1321_v22 = vld [vmem:[%s1893_s5 + $0xc8] sm:$0xf0]  ;;  %v1260_v27 = vor.u32 %v1489_v18, %v1257_v19 }
  0x8b   : > { %977 = vmatpush.bf16.msra.mxu1 %v1288_v39  ;;  %v1460_v21 = vor.u32 %v1539_v13, %v1457_v14  ;;  %v1521_v23 = vld [vmem:[%s1893_s5 + $0x144] sm:$0xf]  ;;  %v1385_v24 = vld [vmem:[%s1893_s5 + $0x148] sm:$0xf0]  ;;  %v1324_v28 = vor.u32 %v1505_v20, %v1321_v22  ;;  %v1487_v30 = vld [vmem:[%s1893_s5 + $0x34] sm:$0xf] }
  0x8c   : > { %990 = vmatpush.bf16.msra.mxu2 %v1352_v40  ;;  %v1537_v25 = vld [vmem:[%s1893_s5 + $0x1c4] sm:$0xf]  ;;  %v1449_v26 = vld [vmem:[%s1893_s5 + $0x1c8] sm:$0xf0]  ;;  %v1388_v29 = vor.u32 %v1521_v23, %v1385_v24  ;;  %v1249_v31 = vld [vmem:[%s1893_s5 + $0x38] sm:$0xf0] }
  0x8d   : > { %1003 = vmatpush.bf16.msra.mxu3 %v1416_v43  ;;  %965 = vmatmul.bf16.vlgmr.msra.gmra.mxu0 %v1989_v11  ;;  %v1503_v32 = vld [vmem:[%s1893_s5 + $0xb4] sm:$0xf]  ;;  %v1452_v33 = vor.u32 %v1537_v25, %v1449_v26  ;;  %v1313_v34 = vld [vmem:[%s1893_s5 + $0xb8] sm:$0xf0]  ;;  %v1252_v39 = vor.u32 %v1487_v30, %v1249_v31  ;;  %v1485_v42 = vld [vmem:[%s1893_s5 + $0x24] sm:$0xf] }
  0x8e   : > { %1009 = vmatpush.bf16.msrb.mxu0 %v1284_v44  ;;  %978 = vmatmul.bf16.vlgmr.msra.gmra.mxu1 %v1991_v12  ;;  %v1519_v35 = vld [vmem:[%s1893_s5 + $0x134] sm:$0xf]  ;;  %v1377_v36 = vld [vmem:[%s1893_s5 + $0x138] sm:$0xf0]  ;;  %v1316_v40 = vor.u32 %v1503_v32, %v1313_v34  ;;  %v1241_v43 = vld [vmem:[%s1893_s5 + $0x28] sm:$0xf0] }
  0x8f   : > { %1022 = vmatpush.bf16.msrb.mxu1 %v1348_v48  ;;  %991 = vmatmul.bf16.vlgmr.msra.gmra.mxu2 %v1976_v57  ;;  %v1535_v37 = vld [vmem:[%s1893_s5 + $0x1b4] sm:$0xf]  ;;  %v1441_v38 = vld [vmem:[%s1893_s5 + $0x1b8] sm:$0xf0]  ;;  %v1380_v41 = vor.u32 %v1519_v35, %v1377_v36  ;;  %v1501_v44 = vld [vmem:[%s1893_s5 + $0xa4] sm:$0xf]  ;;  %v1244_v51 = vor.u32 %v1485_v42, %v1241_v43 }
  0x90   : > { %1035 = vmatpush.bf16.msrb.mxu2 %v1412_v49  ;;  %1004 = vmatmul.bf16.vlgmr.msra.gmra.mxu3 %v1980_v62  ;;  %v1444_v45 = vor.u32 %v1535_v37, %v1441_v38  ;;  %v1305_v46 = vld [vmem:[%s1893_s5 + $0xa8] sm:$0xf0]  ;;  %v1517_v47 = vld [vmem:[%s1893_s5 + $0x124] sm:$0xf]  ;;  %v1483_v54 = vld [vmem:[%s1893_s5 + $0x14] sm:$0xf] }
  0x91   : > { %1048 = vmatpush.bf16.msrb.mxu3 %v1476_v53  ;;  %v1369_v48 = vld [vmem:[%s1893_s5 + $0x128] sm:$0xf0]  ;;  %v1533_v49 = vld [vmem:[%s1893_s5 + $0x1a4] sm:$0xf]  ;;  %v1308_v52 = vor.u32 %v1501_v44, %v1305_v46  ;;  %v1233_v55 = vld [vmem:[%s1893_s5 + $0x18] sm:$0xf0] }
  0x92   : > { %1010 = vmatpush.bf16.msrb.mxu0 %v1276_v63  ;;  %v1433_v50 = vld [vmem:[%s1893_s5 + $0x1a8] sm:$0xf0]  ;;  %v1372_v53 = vor.u32 %v1517_v47, %v1369_v48  ;;  %v1499_v56 = vld [vmem:[%s1893_s5 + $0x94] sm:$0xf]  ;;  %v1297_v59 = vld [vmem:[%s1893_s5 + $0x98] sm:$0xf0]  ;;  %v1236_v1 = vor.u32 %v1483_v54, %v1233_v55 }
  0x93   : > { %1023 = vmatpush.bf16.msrb.mxu1 %v1340_v2  ;;  %v1436_v58 = vor.u32 %v1533_v49, %v1433_v50  ;;  %v1515_v60 = vld [vmem:[%s1893_s5 + $0x114] sm:$0xf]  ;;  %v1361_v61 = vld [vmem:[%s1893_s5 + $0x118] sm:$0xf0]  ;;  %v1300_v2 = vor.u32 %v1499_v56, %v1297_v59  ;;  %v1481_v4 = vld [vmem:[%s1893_s5 + $0x4] sm:$0xf] }
  0x94   : > { %1036 = vmatpush.bf16.msrb.mxu2 %v1404_v3  ;;  %v1531_v63 = vld [vmem:[%s1893_s5 + $0x194] sm:$0xf]  ;;  %v1425_v0 = vld [vmem:[%s1893_s5 + $0x198] sm:$0xf0]  ;;  %v1364_v3 = vor.u32 %v1515_v60, %v1361_v61  ;;  %v1225_v5 = vld [vmem:[%s1893_s5 + $0x8] sm:$0xf0] }
  0x95   : > { %1049 = vmatpush.bf16.msrb.mxu3 %v1468_v7  ;;  %v1497_v6 = vld [vmem:[%s1893_s5 + $0x84] sm:$0xf]  ;;  %v1428_v7 = vor.u32 %v1531_v63, %v1425_v0  ;;  %v1289_v8 = vld [vmem:[%s1893_s5 + $0x88] sm:$0xf0]  ;;  %v571_v25 = vld [vmem:[#allocation2] sm:$0xff] }
  0x96   : > { %1011 = vmatpush.bf16.msrb.mxu0 %v1268_v15  ;;  %v1513_v9 = vld [vmem:[%s1893_s5 + $0x104] sm:$0xf]  ;;  %v1353_v10 = vld [vmem:[%s1893_s5 + $0x108] sm:$0xf0]  ;;  %v1228_v15 = vor.u32 %v1481_v4, %v1225_v5  ;;  %v572_v35 = vld [vmem:[#allocation2 + $0x8] sm:$0xff] }
  0x97   : > { %1024 = vmatpush.bf16.msrb.mxu1 %v1332_v16  ;;  %v1529_v13 = vld [vmem:[%s1893_s5 + $0x184] sm:$0xf]  ;;  %v1417_v14 = vld [vmem:[%s1893_s5 + $0x188] sm:$0xf0]  ;;  %v1292_v16 = vor.u32 %v1497_v6, %v1289_v8 }
  0x98   : > { %1037 = vmatpush.bf16.msrb.mxu2 %v1396_v17  ;;  %v1356_v17 = vor.u32 %v1513_v9, %v1353_v10  ;;  %v1420_v18 = vor.u32 %v1529_v13, %v1417_v14 }
  0x99   : > { %1050 = vmatpush.bf16.msrb.mxu3 %v1460_v21 }
  0x9a   : > { %1012 = vmatpush.bf16.msrb.mxu0 %v1260_v27 }
  0x9b   : > { %1025 = vmatpush.bf16.msrb.mxu1 %v1324_v28 }
  0x9c   : > { %1038 = vmatpush.bf16.msrb.mxu2 %v1388_v29 }
  0x9d   : > { %1051 = vmatpush.bf16.msrb.mxu3 %v1452_v33 }
  0x9e   : > { %1013 = vmatpush.bf16.msrb.mxu0 %v1252_v39 }
  0x9f   : > { %1026 = vmatpush.bf16.msrb.mxu1 %v1316_v40 }
  0xa0   : > { %1039 = vmatpush.bf16.msrb.mxu2 %v1380_v41 }
  0xa1   : > { %1052 = vmatpush.bf16.msrb.mxu3 %v1444_v45 }
  0xa2   : > { %1014 = vmatpush.bf16.msrb.mxu0 %v1244_v51 }
  0xa3   : > { %1027 = vmatpush.bf16.msrb.mxu1 %v1308_v52 }
  0xa4   : > { %1040 = vmatpush.bf16.msrb.mxu2 %v1372_v53 }
  0xa5   : > { %1053 = vmatpush.bf16.msrb.mxu3 %v1436_v58 }
  0xa6   : > { %1015 = vmatpush.bf16.msrb.mxu0 %v1236_v1 }
  0xa7   : > { %1028 = vmatpush.bf16.msrb.mxu1 %v1300_v2 }
  0xa8   : > { %1041 = vmatpush.bf16.msrb.mxu2 %v1364_v3 }
  0xa9   : > { %1054 = vmatpush.bf16.msrb.mxu3 %v1428_v7 }
  0xaa   : > { %1016 = vmatpush.bf16.msrb.mxu0 %v1228_v15 }
  0xab   : > { %1029 = vmatpush.bf16.msrb.mxu1 %v1292_v16 }
  0xac   : > { %1042 = vmatpush.bf16.msrb.mxu2 %v1356_v17 }
  0xad   : > { %1055 = vmatpush.bf16.msrb.mxu3 %v1420_v18  ;;  %1017 = vmatmul.bf16.vlgmr.msrb.gmra.mxu0 %v1989_v11 }
  0xae   : > { %1030 = vmatmul.bf16.vlgmr.msrb.gmra.mxu1 %v1991_v12 }
  0xaf   : > { %1043 = vmatmul.bf16.vlgmr.msrb.gmra.mxu2 %v1976_v57 }
  0xb0   : > { %1056 = vmatmul.bf16.vlgmr.msrb.gmra.mxu3 %v1980_v62 }
 0x10a   : > { %v966_v20 = vpop.f32.mrf.mxu0 }
 0x10b   : > { %v979_v19 = vpop.f32.mrf.mxu1 }
 0x10c   : > { %v980_v21 = vadd.f32 %v979_v19, %v966_v20 }
 0x112   : > { %v992_v22 = vpop.f32.mrf.mxu2  ;;  %v968_v29 = vpop.f32.mrf.mxu0 }
 0x113   : > { %v993_v23 = vadd.f32 %v992_v22, %v980_v21  ;;  %v1005_v24 = vpop.f32.mrf.mxu3  ;;  %v981_v27 = vpop.f32.mrf.mxu1 }
 0x115   : > { %v1006_v26 = vadd.f32 %v1005_v24, %v993_v23 }
 0x117   : > { %v1061_v28 = vadd.f32 %v1006_v26, %v571_v25 }
 0x119   : > { %1063 = vst [vmem:[#allocation2] sm:$0xff] %v1061_v28 }
 0x11a   : > { %v994_v30 = vpop.f32.mrf.mxu2 }
 0x11b   : > { %v1007_v11 = vpop.f32.mrf.mxu3 }
 0x12a   : > { %v1018_v31 = vpop.f32.mrf.mxu0 }
 0x12b   : > { %v1031_v12 = vpop.f32.mrf.mxu1 }
 0x12c   : > { %v1032_v32 = vadd.f32 %v1031_v12, %v1018_v31 }
 0x132   : > { %v1044_v57 = vpop.f32.mrf.mxu2  ;;  %v1020_v34 = vpop.f32.mrf.mxu0 }
 0x133   : > { %v1045_v33 = vadd.f32 %v1044_v57, %v1032_v32  ;;  %v1057_v62 = vpop.f32.mrf.mxu3  ;;  %v1033_v36 = vpop.f32.mrf.mxu1 }
 0x135   : > { %v1058_v37 = vadd.f32 %v1057_v62, %v1045_v33 }
 0x137   : > { %v1062_v38 = vadd.f32 %v1058_v37, %v572_v35  ;;  %1068 = sbr.rel (%p1477_p13) target bundleno = 324 (0x144), region = 78 }
 0x139   : > { %1064 = vst [vmem:[#allocation2 + $0x8] sm:$0xff] %v1062_v38 }
 0x13a   : > { %v1046_v39 = vpop.f32.mrf.mxu2 }
 0x13b   : > { %v1059_v40 = vpop.f32.mrf.mxu3 }
 0x13c   : > { %v1069_v41 = vld [vmem:[#allocation2] sm:$0xff] }
 0x13d   : > { %v1071_v42 = vld [vmem:[%s539_s12] sm:$0x3] }
 0x13e   : > { %v1073_v44 = vperm.slane %v1071_v42, 0  ;;  %v1074_v45 = vperm.slane %v1071_v42, 1 }
 0x140   : > { %v1070_v43 = vld [vmem:[#allocation2 + $0x8] sm:$0xff]  ;;  %v1077_v46 = vadd.f32 %v1073_v44, %v1069_v41 }
 0x141   : > { %v1078_v47 = vadd.f32 %v1074_v45, %v1070_v43 }
 0x142   : > { %1079 = vst [vmem:[%s1891_s15] sm:$0xff] %v1077_v46 }
 0x143   : > { %1080 = vst [vmem:[%s1891_s15 + $0x8] sm:$0xff] %v1078_v47 }
 0x144 PF: > { %s13_s18 = sadd.s32 1, %s1656_s18   ;;  %s2075_s12 = smov %s1636_s13 }
 0x145   : > { %p10_p0 = scmp.ge.s32.totalorder %s13_s18, 20   ;;  %s2076_s13 = smov %s1730_s25 }
 0x146   : > { %s2077_s14 = smov %s1648_s16  ;;  %s2078_s15 = smov %s1652_s17 }
 0x147   : > { %s2079_s16 = smov %s2082_s19  ;;  %s2080_s17 = smov %s2086_s20 }
 0x148   :  { %12 = sbr.rel (!%p10_p0) target bundleno = 4 (0x4), region = 119 }

// kernel: vgg16_forward.29
= control target key start
LH: loop header
LB: loop body
LE: loop exit
PB: predicated region body
PF: predicated region fallthrough
CT: control target
= control target key end

     0   :  { %s1681_s12 = smov 0   ;;  %s1683_s13 = smov 0   ;;  %s2073_s0 = inlined_call_operand.vmem [shape: bf16[8,4608], index: 0, kind: input, shape index: {}]   ;;  %s2074_s1 = inlined_call_operand.vmem [shape: bf16[4608,512], index: 1, kind: input, shape index: {}]   ;;  %s2075_s2 = inlined_call_operand.vmem [shape: f32[1,512], index: 2, kind: input, shape index: {}]   ;;  %s2076_s3 = inlined_call_operand.vmem [shape: f32[8,512], index: 3, kind: output, shape index: {}]  }
   0x1   :  { %s1685_s14 = smov 0   ;;  %s1687_s15 = smov 0  }
   0x2   :  { %s1689_s16 = smov 0   ;;  %s1691_s17 = smov 0  }
   0x3   :  { %s1693_s18 = smov 0  }
   0x4 LB: > { %s25_s19 = sadd.s32 1, %s1650_s16  ;;  %s28_s20 = sadd.s32 1, %s1654_s17  ;;  %s1658_s18 = sphi %s1693_s18, %s13_s18   ;;  %s1654_s17 = sphi %s1691_s17, %s2082_s17   ;;  %s1650_s16 = sphi %s1689_s16, %s2081_s16   ;;  %s1646_s15 = sphi %s1687_s15, %s2080_s15   ;;  %s1642_s14 = sphi %s1685_s14, %s2079_s14   ;;  %s1638_s13 = sphi %s1683_s13, %s2078_s13   ;;  %s1634_s12 = sphi %s1681_s12, %s2077_s12  }
   0x5   : > { %p26_p0 = scmp.ge.s32.totalorder %s25_s19, 9  ;;  %p76_p1 = scmp.ne.s32.totalorder %s1638_s13, %s1634_s12 }
   0x6   : > { %p77_p2 = scmp.eq.s32.totalorder %s1658_s18, 0  ;;  %s69_s24 = sadd.s32 1, %s1638_s13 }
   0x7   : > { %s2084_s19 = smov (%p26_p0, %s25_s19), 0  ;;  %s2086_s20 = smov (!%p26_p0, %s28_s20), %s1654_s17 }
   0x8   : > { %p78_p3 = por %p77_p2, %p76_p1  ;;  %p30_p4 = scmp.ge.s32.totalorder %s2086_s20, 2 }
   0x9   : > { %s64_s21 = ssub.s32 %s1650_s16, %s2084_s19  ;;  %p1209_p6 = scmp.ge.s32.totalorder %s1658_s18, 18 }
   0xa   : > { %s2088_s20 = smov (%p30_p4, %s2086_s20), 0 }
   0xb   : > { %s65_s22 = ssub.s32 %s1654_s17, %s2088_s20  ;;  %156 = sbr.rel (%p1209_p6) target bundleno = 87 (0x57), region = 16 }
   0xc   : > { %s66_s23 = sor.u32 %s65_s22, %s64_s21 }
   0xd   : > { %p67_p5 = scmp.eq.s32.totalorder %s66_s23, 0 }
   0xf   : > { %s1732_s25 = scalar_select %p67_p5, %s1638_s13, %s69_s24  }
  0x10   : > { %172 = sbr.rel (!%p78_p3) target bundleno = 87 (0x57), region = 24  ;;  %s174_s26 = sand.u32 (%p78_p3), 1, %s1638_s13  }
  0x11   : > { %s1212_s27 = sshll.u32 (%p78_p3), %s1654_s17, 1  ;;  %s1210_s28 = sshll.u32 (%p78_p3), %s174_s26, 9 }
  0x12   : > { %s1482_s29 = sshll.u32 (%p78_p3), %s1650_s16, 8  ;;  %s1746_s8 = scalar_lea.vmem (%p78_p3), [#allocation3], %s1210_s28 }
  0x13   : > { %s180_s30 = sadd.s32 (%p78_p3), %s1482_s29, %s1212_s27 }
  0x14   : > { %s1214_s4 = sshll.u32 (%p78_p3), %s180_s30, 2 }
  0x15   : > { %s1741_s7 = scalar_lea.vmem %s2074_s1, %s1214_s4 }
  0x16   : > { %v337_v0 = vld [vmem:[%s1741_s7] sm:$0xff]  ;;  %v339_v1 = vld [vmem:[%s1741_s7 + $0x10] sm:$0xff] }
  0x17   : > { %v341_v2 = vld [vmem:[%s1741_s7 + $0x20] sm:$0xff]  ;;  %338 = vst [vmem:[%s1746_s8] sm:$0xff] %v337_v0  ;;  %v343_v3 = vld [vmem:[%s1741_s7 + $0x30] sm:$0xff] }
  0x18   : > { %340 = vst [vmem:[%s1746_s8 + $0x8] sm:$0xff] %v339_v1  ;;  %v345_v4 = vld [vmem:[%s1741_s7 + $0x40] sm:$0xff]  ;;  %v347_v5 = vld [vmem:[%s1741_s7 + $0x50] sm:$0xff] }
  0x19   : > { %342 = vst [vmem:[%s1746_s8 + $0x10] sm:$0xff] %v341_v2  ;;  %v349_v6 = vld [vmem:[%s1741_s7 + $0x60] sm:$0xff]  ;;  %v351_v7 = vld [vmem:[%s1741_s7 + $0x70] sm:$0xff] }
  0x1a   : > { %344 = vst [vmem:[%s1746_s8 + $0x18] sm:$0xff] %v343_v3  ;;  %v353_v8 = vld [vmem:[%s1741_s7 + $0x80] sm:$0xff]  ;;  %v355_v9 = vld [vmem:[%s1741_s7 + $0x90] sm:$0xff] }
  0x1b   : > { %346 = vst [vmem:[%s1746_s8 + $0x20] sm:$0xff] %v345_v4  ;;  %v357_v10 = vld [vmem:[%s1741_s7 + $0xa0] sm:$0xff]  ;;  %v359_v11 = vld [vmem:[%s1741_s7 + $0xb0] sm:$0xff] }
  0x1c   : > { %348 = vst [vmem:[%s1746_s8 + $0x28] sm:$0xff] %v347_v5  ;;  %v361_v12 = vld [vmem:[%s1741_s7 + $0xc0] sm:$0xff]  ;;  %v363_v13 = vld [vmem:[%s1741_s7 + $0xd0] sm:$0xff] }
  0x1d   : > { %350 = vst [vmem:[%s1746_s8 + $0x30] sm:$0xff] %v349_v6  ;;  %v365_v14 = vld [vmem:[%s1741_s7 + $0xe0] sm:$0xff]  ;;  %v367_v15 = vld [vmem:[%s1741_s7 + $0xf0] sm:$0xff] }
  0x1e   : > { %352 = vst [vmem:[%s1746_s8 + $0x38] sm:$0xff] %v351_v7  ;;  %v369_v16 = vld [vmem:[%s1741_s7 + $0x100] sm:$0xff]  ;;  %v371_v17 = vld [vmem:[%s1741_s7 + $0x110] sm:$0xff] }
  0x1f   : > { %354 = vst [vmem:[%s1746_s8 + $0x40] sm:$0xff] %v353_v8  ;;  %v373_v18 = vld [vmem:[%s1741_s7 + $0x120] sm:$0xff]  ;;  %v375_v19 = vld [vmem:[%s1741_s7 + $0x130] sm:$0xff] }
  0x20   : > { %356 = vst [vmem:[%s1746_s8 + $0x48] sm:$0xff] %v355_v9  ;;  %v377_v20 = vld [vmem:[%s1741_s7 + $0x140] sm:$0xff]  ;;  %v379_v21 = vld [vmem:[%s1741_s7 + $0x150] sm:$0xff] }
  0x21   : > { %358 = vst [vmem:[%s1746_s8 + $0x50] sm:$0xff] %v357_v10  ;;  %v381_v22 = vld [vmem:[%s1741_s7 + $0x160] sm:$0xff]  ;;  %v383_v23 = vld [vmem:[%s1741_s7 + $0x170] sm:$0xff] }
  0x22   : > { %360 = vst [vmem:[%s1746_s8 + $0x58] sm:$0xff] %v359_v11  ;;  %v385_v24 = vld [vmem:[%s1741_s7 + $0x180] sm:$0xff]  ;;  %v387_v25 = vld [vmem:[%s1741_s7 + $0x190] sm:$0xff] }
  0x23   : > { %362 = vst [vmem:[%s1746_s8 + $0x60] sm:$0xff] %v361_v12  ;;  %v389_v26 = vld [vmem:[%s1741_s7 + $0x1a0] sm:$0xff]  ;;  %v391_v27 = vld [vmem:[%s1741_s7 + $0x1b0] sm:$0xff] }
  0x24   : > { %364 = vst [vmem:[%s1746_s8 + $0x68] sm:$0xff] %v363_v13  ;;  %v393_v28 = vld [vmem:[%s1741_s7 + $0x1c0] sm:$0xff]  ;;  %v395_v29 = vld [vmem:[%s1741_s7 + $0x1d0] sm:$0xff] }
  0x25   : > { %366 = vst [vmem:[%s1746_s8 + $0x70] sm:$0xff] %v365_v14  ;;  %v397_v30 = vld [vmem:[%s1741_s7 + $0x1e0] sm:$0xff]  ;;  %v399_v31 = vld [vmem:[%s1741_s7 + $0x1f0] sm:$0xff] }
  0x26   : > { %368 = vst [vmem:[%s1746_s8 + $0x78] sm:$0xff] %v367_v15  ;;  %v401_v32 = vld [vmem:[%s1741_s7 + $0x200] sm:$0xff]  ;;  %v403_v33 = vld [vmem:[%s1741_s7 + $0x210] sm:$0xff] }
  0x27   : > { %370 = vst [vmem:[%s1746_s8 + $0x80] sm:$0xff] %v369_v16  ;;  %v405_v34 = vld [vmem:[%s1741_s7 + $0x220] sm:$0xff]  ;;  %v407_v35 = vld [vmem:[%s1741_s7 + $0x230] sm:$0xff] }
  0x28   : > { %372 = vst [vmem:[%s1746_s8 + $0x88] sm:$0xff] %v371_v17  ;;  %v409_v36 = vld [vmem:[%s1741_s7 + $0x240] sm:$0xff]  ;;  %v411_v37 = vld [vmem:[%s1741_s7 + $0x250] sm:$0xff] }
  0x29   : > { %374 = vst [vmem:[%s1746_s8 + $0x90] sm:$0xff] %v373_v18  ;;  %v413_v38 = vld [vmem:[%s1741_s7 + $0x260] sm:$0xff]  ;;  %v415_v39 = vld [vmem:[%s1741_s7 + $0x270] sm:$0xff] }
  0x2a   : > { %376 = vst [vmem:[%s1746_s8 + $0x98] sm:$0xff] %v375_v19  ;;  %v417_v40 = vld [vmem:[%s1741_s7 + $0x280] sm:$0xff]  ;;  %v419_v41 = vld [vmem:[%s1741_s7 + $0x290] sm:$0xff] }
  0x2b   : > { %378 = vst [vmem:[%s1746_s8 + $0xa0] sm:$0xff] %v377_v20  ;;  %v421_v42 = vld [vmem:[%s1741_s7 + $0x2a0] sm:$0xff]  ;;  %v423_v43 = vld [vmem:[%s1741_s7 + $0x2b0] sm:$0xff] }
  0x2c   : > { %380 = vst [vmem:[%s1746_s8 + $0xa8] sm:$0xff] %v379_v21  ;;  %v425_v44 = vld [vmem:[%s1741_s7 + $0x2c0] sm:$0xff]  ;;  %v427_v45 = vld [vmem:[%s1741_s7 + $0x2d0] sm:$0xff] }
  0x2d   : > { %382 = vst [vmem:[%s1746_s8 + $0xb0] sm:$0xff] %v381_v22  ;;  %v429_v46 = vld [vmem:[%s1741_s7 + $0x2e0] sm:$0xff]  ;;  %v431_v47 = vld [vmem:[%s1741_s7 + $0x2f0] sm:$0xff] }
  0x2e   : > { %384 = vst [vmem:[%s1746_s8 + $0xb8] sm:$0xff] %v383_v23  ;;  %v433_v48 = vld [vmem:[%s1741_s7 + $0x300] sm:$0xff]  ;;  %v435_v49 = vld [vmem:[%s1741_s7 + $0x310] sm:$0xff] }
  0x2f   : > { %386 = vst [vmem:[%s1746_s8 + $0xc0] sm:$0xff] %v385_v24  ;;  %v437_v50 = vld [vmem:[%s1741_s7 + $0x320] sm:$0xff]  ;;  %v439_v51 = vld [vmem:[%s1741_s7 + $0x330] sm:$0xff] }
  0x30   : > { %388 = vst [vmem:[%s1746_s8 + $0xc8] sm:$0xff] %v387_v25  ;;  %v441_v52 = vld [vmem:[%s1741_s7 + $0x340] sm:$0xff]  ;;  %v443_v53 = vld [vmem:[%s1741_s7 + $0x350] sm:$0xff] }
  0x31   : > { %390 = vst [vmem:[%s1746_s8 + $0xd0] sm:$0xff] %v389_v26  ;;  %v445_v54 = vld [vmem:[%s1741_s7 + $0x360] sm:$0xff]  ;;  %v447_v55 = vld [vmem:[%s1741_s7 + $0x370] sm:$0xff] }
  0x32   : > { %392 = vst [vmem:[%s1746_s8 + $0xd8] sm:$0xff] %v391_v27  ;;  %v449_v56 = vld [vmem:[%s1741_s7 + $0x380] sm:$0xff]  ;;  %v451_v57 = vld [vmem:[%s1741_s7 + $0x390] sm:$0xff] }
  0x33   : > { %394 = vst [vmem:[%s1746_s8 + $0xe0] sm:$0xff] %v393_v28  ;;  %v453_v58 = vld [vmem:[%s1741_s7 + $0x3a0] sm:$0xff]  ;;  %v455_v59 = vld [vmem:[%s1741_s7 + $0x3b0] sm:$0xff] }
  0x34   : > { %396 = vst [vmem:[%s1746_s8 + $0xe8] sm:$0xff] %v395_v29  ;;  %v457_v60 = vld [vmem:[%s1741_s7 + $0x3c0] sm:$0xff]  ;;  %v459_v61 = vld [vmem:[%s1741_s7 + $0x3d0] sm:$0xff] }
  0x35   : > { %398 = vst [vmem:[%s1746_s8 + $0xf0] sm:$0xff] %v397_v30  ;;  %v461_v62 = vld [vmem:[%s1741_s7 + $0x3e0] sm:$0xff]  ;;  %v463_v63 = vld [vmem:[%s1741_s7 + $0x3f0] sm:$0xff] }
  0x36   : > { %400 = vst [vmem:[%s1746_s8 + $0xf8] sm:$0xff] %v399_v31 }
  0x37   : > { %402 = vst [vmem:[%s1746_s8 + $0x100] sm:$0xff] %v401_v32 }
  0x38   : > { %404 = vst [vmem:[%s1746_s8 + $0x108] sm:$0xff] %v403_v33 }
  0x39   : > { %406 = vst [vmem:[%s1746_s8 + $0x110] sm:$0xff] %v405_v34 }
  0x3a   : > { %408 = vst [vmem:[%s1746_s8 + $0x118] sm:$0xff] %v407_v35 }
  0x3b   : > { %410 = vst [vmem:[%s1746_s8 + $0x120] sm:$0xff] %v409_v36 }
  0x3c   : > { %412 = vst [vmem:[%s1746_s8 + $0x128] sm:$0xff] %v411_v37 }
  0x3d   : > { %414 = vst [vmem:[%s1746_s8 + $0x130] sm:$0xff] %v413_v38 }
  0x3e   : > { %416 = vst [vmem:[%s1746_s8 + $0x138] sm:$0xff] %v415_v39 }
  0x3f   : > { %418 = vst [vmem:[%s1746_s8 + $0x140] sm:$0xff] %v417_v40 }
  0x40   : > { %420 = vst [vmem:[%s1746_s8 + $0x148] sm:$0xff] %v419_v41 }
  0x41   : > { %422 = vst [vmem:[%s1746_s8 + $0x150] sm:$0xff] %v421_v42 }
  0x42   : > { %424 = vst [vmem:[%s1746_s8 + $0x158] sm:$0xff] %v423_v43 }
  0x43   : > { %426 = vst [vmem:[%s1746_s8 + $0x160] sm:$0xff] %v425_v44 }
  0x44   : > { %428 = vst [vmem:[%s1746_s8 + $0x168] sm:$0xff] %v427_v45 }
  0x45   : > { %430 = vst [vmem:[%s1746_s8 + $0x170] sm:$0xff] %v429_v46 }
  0x46   : > { %432 = vst [vmem:[%s1746_s8 + $0x178] sm:$0xff] %v431_v47 }
  0x47   : > { %434 = vst [vmem:[%s1746_s8 + $0x180] sm:$0xff] %v433_v48 }
  0x48   : > { %436 = vst [vmem:[%s1746_s8 + $0x188] sm:$0xff] %v435_v49 }
  0x49   : > { %438 = vst [vmem:[%s1746_s8 + $0x190] sm:$0xff] %v437_v50 }
  0x4a   : > { %440 = vst [vmem:[%s1746_s8 + $0x198] sm:$0xff] %v439_v51 }
  0x4b   : > { %442 = vst [vmem:[%s1746_s8 + $0x1a0] sm:$0xff] %v441_v52 }
  0x4c   : > { %444 = vst [vmem:[%s1746_s8 + $0x1a8] sm:$0xff] %v443_v53 }
  0x4d   : > { %446 = vst [vmem:[%s1746_s8 + $0x1b0] sm:$0xff] %v445_v54 }
  0x4e   : > { %448 = vst [vmem:[%s1746_s8 + $0x1b8] sm:$0xff] %v447_v55 }
  0x4f   : > { %450 = vst [vmem:[%s1746_s8 + $0x1c0] sm:$0xff] %v449_v56 }
  0x50   : > { %452 = vst [vmem:[%s1746_s8 + $0x1c8] sm:$0xff] %v451_v57 }
  0x51   : > { %454 = vst [vmem:[%s1746_s8 + $0x1d0] sm:$0xff] %v453_v58 }
  0x52   : > { %456 = vst [vmem:[%s1746_s8 + $0x1d8] sm:$0xff] %v455_v59 }
  0x53   : > { %458 = vst [vmem:[%s1746_s8 + $0x1e0] sm:$0xff] %v457_v60 }
  0x54   : > { %460 = vst [vmem:[%s1746_s8 + $0x1e8] sm:$0xff] %v459_v61 }
  0x55   : > { %462 = vst [vmem:[%s1746_s8 + $0x1f0] sm:$0xff] %v461_v62 }
  0x56   : > { %464 = vst [vmem:[%s1746_s8 + $0x1f8] sm:$0xff] %v463_v63 }
  0x57 PF: > { %p1215_p7 = scmp.ge.s32.totalorder %s1658_s18, 1  ;;  %p477_p8 = scmp.lt.s32.totalorder %s1658_s18, 19 }
  0x59   : > { %p478_p9 = pnand %p1215_p7, %p477_p8 }
  0x5a   : > { %s484_s9 = sand.u32 (!%p478_p9), 1, %s1634_s12   ;;  %s1217_s10 = sshll.u32 (!%p478_p9), %s1642_s14, 2 }
  0x5b   : > { %481 = sbr.rel (%p478_p9) target bundleno = 324 (0x144), region = 66  ;;  %s1216_s11 = sshll.u32 (!%p478_p9), %s484_s9, 9 }
  0x5c   : > { %p527_p10 = scmp.lt.s32.totalorder (!%p478_p9), %s1217_s10, 35  ;;  %s1219_s21 = sshll.u32 (!%p478_p9), %s1646_s15, 1 }
  0x5d   : > { %p537_p11 = scmp.lt.s32.totalorder (!%p478_p9), %s1219_s21, 3  ;;  %s1895_s5 = scalar_lea.vmem (!%p478_p9), [#allocation3], %s1216_s11 }
  0x5e   : > { %p1222_p12 = scmp.ne.s32.totalorder (!%p478_p9), %s1642_s14, 0 }
  0x60   : > { %s2090_s10 = smov (!%p527_p10, %s1217_s10), 35  ;;  %s2092_s21 = smov (!%p537_p11, %s1219_s21), 3 }
  0x61   : > { %s1218_s22 = sshll.u32 %s2090_s10, 2  ;;  %s539_s12 = scalar_lea.vmem %s2075_s2, %s2092_s21 }
  0x62   : > { %s1881_s26 = scalar_lea.vmem %s2073_s0, %s1218_s22  ;;  %s1221_s29 = sshll.u32 %s2092_s21, 3 }
  0x63   : > { %s1893_s15 = scalar_lea.vmem %s2076_s3, %s1221_s29  ;;  %554 = sbr.rel (%p1222_p12) target bundleno = 107 (0x6b), region = 74 }
  0x68   : > { %v1660_v0 = vmov 0.0  }
  0x69   : > { %555 = vst [vmem:[#allocation2] sm:$0xff] %v1660_v0 }
  0x6a   : > { %556 = vst [vmem:[#allocation2 + $0x8] sm:$0xff] %v1660_v0 }
  0x6b PF: > { %v1281_v1 = vld [vmem:[%s1895_s5 + $0x70] sm:$0xf]  ;;  %v1498_v2 = vld [vmem:[%s1895_s5 + $0x74] sm:$0xf0]  ;;  %v1273_v12 = vld [vmem:[%s1895_s5 + $0x60] sm:$0xf] }
  0x6c   : > { %v1345_v3 = vld [vmem:[%s1895_s5 + $0xf0] sm:$0xf]  ;;  %v1282_v4 = vor.u32 %v1498_v2, %v1281_v1  ;;  %v1514_v5 = vld [vmem:[%s1895_s5 + $0xf4] sm:$0xf0]  ;;  %v1496_v14 = vld [vmem:[%s1895_s5 + $0x64] sm:$0xf0] }
  0x6d   : > { %v1409_v6 = vld [vmem:[%s1895_s5 + $0x170] sm:$0xf]  ;;  %v1530_v7 = vld [vmem:[%s1895_s5 + $0x174] sm:$0xf0]  ;;  %v1346_v8 = vor.u32 %v1514_v5, %v1345_v3  ;;  %v1337_v15 = vld [vmem:[%s1895_s5 + $0xe0] sm:$0xf]  ;;  %v1274_v17 = vor.u32 %v1496_v14, %v1273_v12 }
  0x6e   : > { %v1410_v9 = vor.u32 %v1530_v7, %v1409_v6  ;;  %v1473_v10 = vld [vmem:[%s1895_s5 + $0x1f0] sm:$0xf]  ;;  %v1546_v11 = vld [vmem:[%s1895_s5 + $0x1f4] sm:$0xf0]  ;;  %959 = vmatpush.bf16.msra.mxu0 %v1282_v4  ;;  %v1512_v16 = vld [vmem:[%s1895_s5 + $0xe4] sm:$0xf0] }
  0x6f   : > { %v1474_v13 = vor.u32 %v1546_v11, %v1473_v10  ;;  %972 = vmatpush.bf16.msra.mxu1 %v1346_v8  ;;  %v1338_v18 = vor.u32 %v1512_v16, %v1337_v15  ;;  %v1401_v19 = vld [vmem:[%s1895_s5 + $0x160] sm:$0xf]  ;;  %v1528_v20 = vld [vmem:[%s1895_s5 + $0x164] sm:$0xf0]  ;;  %v1265_v24 = vld [vmem:[%s1895_s5 + $0x50] sm:$0xf] }
  0x70   : > { %985 = vmatpush.bf16.msra.mxu2 %v1410_v9  ;;  %v1465_v21 = vld [vmem:[%s1895_s5 + $0x1e0] sm:$0xf]  ;;  %v1402_v22 = vor.u32 %v1528_v20, %v1401_v19  ;;  %v1544_v23 = vld [vmem:[%s1895_s5 + $0x1e4] sm:$0xf0]  ;;  %v1494_v25 = vld [vmem:[%s1895_s5 + $0x54] sm:$0xf0] }
  0x71   : > { %998 = vmatpush.bf16.msra.mxu3 %v1474_v13  ;;  %v1466_v26 = vor.u32 %v1544_v23, %v1465_v21  ;;  %v1329_v27 = vld [vmem:[%s1895_s5 + $0xd0] sm:$0xf]  ;;  %v1510_v28 = vld [vmem:[%s1895_s5 + $0xd4] sm:$0xf0]  ;;  %v1266_v30 = vor.u32 %v1494_v25, %v1265_v24  ;;  %v1257_v36 = vld [vmem:[%s1895_s5 + $0x40] sm:$0xf] }
  0x72   : > { %v1393_v29 = vld [vmem:[%s1895_s5 + $0x150] sm:$0xf]  ;;  %960 = vmatpush.bf16.msra.mxu0 %v1274_v17  ;;  %v1526_v31 = vld [vmem:[%s1895_s5 + $0x154] sm:$0xf0]  ;;  %v1330_v34 = vor.u32 %v1510_v28, %v1329_v27  ;;  %v1492_v37 = vld [vmem:[%s1895_s5 + $0x44] sm:$0xf0] }
  0x73   : > { %v1457_v32 = vld [vmem:[%s1895_s5 + $0x1d0] sm:$0xf]  ;;  %v1542_v33 = vld [vmem:[%s1895_s5 + $0x1d4] sm:$0xf0]  ;;  %973 = vmatpush.bf16.msra.mxu1 %v1338_v18  ;;  %v1394_v35 = vor.u32 %v1526_v31, %v1393_v29  ;;  %v1321_v38 = vld [vmem:[%s1895_s5 + $0xc0] sm:$0xf]  ;;  %v1258_v45 = vor.u32 %v1492_v37, %v1257_v36 }
  0x74   : > { %986 = vmatpush.bf16.msra.mxu2 %v1402_v22  ;;  %v1458_v39 = vor.u32 %v1542_v33, %v1457_v32  ;;  %v1508_v40 = vld [vmem:[%s1895_s5 + $0xc4] sm:$0xf0]  ;;  %v1385_v41 = vld [vmem:[%s1895_s5 + $0x140] sm:$0xf]  ;;  %v1249_v48 = vld [vmem:[%s1895_s5 + $0x30] sm:$0xf] }
  0x75   : > { %999 = vmatpush.bf16.msra.mxu3 %v1466_v26  ;;  %v1524_v42 = vld [vmem:[%s1895_s5 + $0x144] sm:$0xf0]  ;;  %v1449_v43 = vld [vmem:[%s1895_s5 + $0x1c0] sm:$0xf]  ;;  %v1322_v46 = vor.u32 %v1508_v40, %v1321_v38  ;;  %v1490_v49 = vld [vmem:[%s1895_s5 + $0x34] sm:$0xf0] }
  0x76   : > { %v1540_v44 = vld [vmem:[%s1895_s5 + $0x1c4] sm:$0xf0]  ;;  %961 = vmatpush.bf16.msra.mxu0 %v1266_v30  ;;  %v1386_v47 = vor.u32 %v1524_v42, %v1385_v41  ;;  %v1313_v50 = vld [vmem:[%s1895_s5 + $0xb0] sm:$0xf]  ;;  %v1506_v52 = vld [vmem:[%s1895_s5 + $0xb4] sm:$0xf0]  ;;  %v1250_v57 = vor.u32 %v1490_v49, %v1249_v48 }
  0x77   : > { %974 = vmatpush.bf16.msra.mxu1 %v1330_v34  ;;  %v1450_v51 = vor.u32 %v1540_v44, %v1449_v43  ;;  %v1377_v53 = vld [vmem:[%s1895_s5 + $0x130] sm:$0xf]  ;;  %v1522_v54 = vld [vmem:[%s1895_s5 + $0x134] sm:$0xf0]  ;;  %v1314_v58 = vor.u32 %v1506_v52, %v1313_v50  ;;  %v1241_v60 = vld [vmem:[%s1895_s5 + $0x20] sm:$0xf] }
  0x78   : > { %987 = vmatpush.bf16.msra.mxu2 %v1394_v35  ;;  %v1441_v55 = vld [vmem:[%s1895_s5 + $0x1b0] sm:$0xf]  ;;  %v1538_v56 = vld [vmem:[%s1895_s5 + $0x1b4] sm:$0xf0]  ;;  %v1378_v59 = vor.u32 %v1522_v54, %v1377_v53  ;;  %v1488_v61 = vld [vmem:[%s1895_s5 + $0x24] sm:$0xf0] }
  0x79   : > { %1000 = vmatpush.bf16.msra.mxu3 %v1458_v39  ;;  %v1305_v62 = vld [vmem:[%s1895_s5 + $0xa0] sm:$0xf]  ;;  %v1442_v63 = vor.u32 %v1538_v56, %v1441_v55  ;;  %v1504_v0 = vld [vmem:[%s1895_s5 + $0xa4] sm:$0xf0]  ;;  %v1242_v5 = vor.u32 %v1488_v61, %v1241_v60  ;;  %v1233_v8 = vld [vmem:[%s1895_s5 + $0x10] sm:$0xf] }
  0x7a   : > { %962 = vmatpush.bf16.msra.mxu0 %v1258_v45  ;;  %v1369_v1 = vld [vmem:[%s1895_s5 + $0x120] sm:$0xf]  ;;  %v1520_v2 = vld [vmem:[%s1895_s5 + $0x124] sm:$0xf0]  ;;  %v1306_v6 = vor.u32 %v1504_v0, %v1305_v62  ;;  %v1486_v9 = vld [vmem:[%s1895_s5 + $0x14] sm:$0xf0] }
  0x7b   : > { %975 = vmatpush.bf16.msra.mxu1 %v1322_v46  ;;  %v1433_v3 = vld [vmem:[%s1895_s5 + $0x1a0] sm:$0xf]  ;;  %v1536_v4 = vld [vmem:[%s1895_s5 + $0x1a4] sm:$0xf0]  ;;  %v1370_v7 = vor.u32 %v1520_v2, %v1369_v1  ;;  %v1297_v10 = vld [vmem:[%s1895_s5 + $0x90] sm:$0xf]  ;;  %v1234_v17 = vor.u32 %v1486_v9, %v1233_v8 }
  0x7c   : > { %988 = vmatpush.bf16.msra.mxu2 %v1386_v47  ;;  %v1434_v11 = vor.u32 %v1536_v4, %v1433_v3  ;;  %v1502_v12 = vld [vmem:[%s1895_s5 + $0x94] sm:$0xf0]  ;;  %v1361_v13 = vld [vmem:[%s1895_s5 + $0x110] sm:$0xf]  ;;  %v1225_v18 = vld [vmem:[%s1895_s5] sm:$0xf] }
  0x7d   : > { %1001 = vmatpush.bf16.msra.mxu3 %v1450_v51  ;;  %v1518_v14 = vld [vmem:[%s1895_s5 + $0x114] sm:$0xf0]  ;;  %v1425_v15 = vld [vmem:[%s1895_s5 + $0x190] sm:$0xf]  ;;  %v1484_v19 = vld [vmem:[%s1895_s5 + $0x4] sm:$0xf0]  ;;  %v1298_v21 = vor.u32 %v1502_v12, %v1297_v10 }
  0x7e   : > { %963 = vmatpush.bf16.msra.mxu0 %v1250_v57  ;;  %v1534_v16 = vld [vmem:[%s1895_s5 + $0x194] sm:$0xf0]  ;;  %v1289_v20 = vld [vmem:[%s1895_s5 + $0x80] sm:$0xf]  ;;  %v1362_v22 = vor.u32 %v1518_v14, %v1361_v13  ;;  %v1500_v23 = vld [vmem:[%s1895_s5 + $0x84] sm:$0xf0]  ;;  %v1226_v33 = vor.u32 %v1484_v19, %v1225_v18 }
  0x7f   : > { %976 = vmatpush.bf16.msra.mxu1 %v1314_v58  ;;  %v1353_v24 = vld [vmem:[%s1895_s5 + $0x100] sm:$0xf]  ;;  %v1516_v25 = vld [vmem:[%s1895_s5 + $0x104] sm:$0xf0]  ;;  %v1426_v26 = vor.u32 %v1534_v16, %v1425_v15  ;;  %v1497_v29 = vld [vmem:[%s1895_s5 + $0x74] sm:$0xf]  ;;  %v1290_v38 = vor.u32 %v1500_v23, %v1289_v20 }
  0x80   : > { %989 = vmatpush.bf16.msra.mxu2 %v1378_v59  ;;  %v1417_v27 = vld [vmem:[%s1895_s5 + $0x180] sm:$0xf]  ;;  %v1532_v28 = vld [vmem:[%s1895_s5 + $0x184] sm:$0xf0]  ;;  %v1283_v30 = vld [vmem:[%s1895_s5 + $0x78] sm:$0xf0]  ;;  %v1354_v39 = vor.u32 %v1516_v25, %v1353_v24 }
  0x81   : > { %1002 = vmatpush.bf16.msra.mxu3 %v1442_v63  ;;  %v1513_v31 = vld [vmem:[%s1895_s5 + $0xf4] sm:$0xf]  ;;  %v558_v32 = vld [vmem:[%s1881_s26 + $0x8] sm:$0xff]  ;;  %v1418_v43 = vor.u32 %v1532_v28, %v1417_v27  ;;  %v1286_v44 = vor.u32 %v1497_v29, %v1283_v30  ;;  %v1495_v48 = vld [vmem:[%s1895_s5 + $0x64] sm:$0xf]  ;;  %p1479_p13 = scmp.ne.s32.totalorder %s1642_s14, 8 }
  0x82   : > { %964 = vmatpush.bf16.msra.mxu0 %v1242_v5  ;;  %v1347_v34 = vld [vmem:[%s1895_s5 + $0xf8] sm:$0xf0]  ;;  %v1529_v35 = vld [vmem:[%s1895_s5 + $0x174] sm:$0xf]  ;;  %v629_v37 = vunpack.c.l.b16 %v558_v32  ;;  %v630_v42 = vunpack.c.h.b16 %v558_v32  ;;  %v1275_v49 = vld [vmem:[%s1895_s5 + $0x68] sm:$0xf0] }
  0x83   : > { %977 = vmatpush.bf16.msra.mxu1 %v1306_v6  ;;  %v1411_v36 = vld [vmem:[%s1895_s5 + $0x178] sm:$0xf0]  ;;  %v1545_v40 = vld [vmem:[%s1895_s5 + $0x1f4] sm:$0xf]  ;;  %v1350_v46 = vor.u32 %v1513_v31, %v1347_v34  ;;  %v1511_v50 = vld [vmem:[%s1895_s5 + $0xe4] sm:$0xf]  ;;  %v1278_v62 = vor.u32 %v1495_v48, %v1275_v49 }
  0x84   : > { %990 = vmatpush.bf16.msra.mxu2 %v1370_v7  ;;  %v1475_v41 = vld [vmem:[%s1895_s5 + $0x1f8] sm:$0xf0]  ;;  %v557_v45 = vld [vmem:[%s1881_s26] sm:$0xff]  ;;  %v1414_v47 = vor.u32 %v1529_v35, %v1411_v36  ;;  %v1339_v54 = vld [vmem:[%s1895_s5 + $0xe8] sm:$0xf0]  ;;  %v1978_v57 = vpack.c.b16 %v629_v37, %v629_v37  ;;  %v1982_v60 = vpack.c.b16 %v630_v42, %v630_v42 }
  0x85   : > { %1003 = vmatpush.bf16.msra.mxu3 %v1434_v11  ;;  %v627_v51 = vunpack.c.l.b16 %v557_v45  ;;  %v628_v52 = vunpack.c.h.b16 %v557_v45  ;;  %v1478_v53 = vor.u32 %v1545_v40, %v1475_v41  ;;  %v1527_v55 = vld [vmem:[%s1895_s5 + $0x164] sm:$0xf]  ;;  %v1403_v56 = vld [vmem:[%s1895_s5 + $0x168] sm:$0xf0]  ;;  %v1342_v0 = vor.u32 %v1511_v50, %v1339_v54  ;;  %v1493_v2 = vld [vmem:[%s1895_s5 + $0x54] sm:$0xf] }
  0x86   : > { %965 = vmatpush.bf16.msra.mxu0 %v1234_v17  ;;  %v1543_v58 = vld [vmem:[%s1895_s5 + $0x1e4] sm:$0xf]  ;;  %v1467_v59 = vld [vmem:[%s1895_s5 + $0x1e8] sm:$0xf0]  ;;  %v1406_v1 = vor.u32 %v1527_v55, %v1403_v56  ;;  %v1267_v3 = vld [vmem:[%s1895_s5 + $0x58] sm:$0xf0] }
  0x87   : > { %978 = vmatpush.bf16.msra.mxu1 %v1298_v21  ;;  %v1984_v61 = vpack.c.b16 %v627_v51, %v627_v51  ;;  %v1986_v63 = vpack.c.b16 %v628_v52, %v628_v52  ;;  %v1509_v4 = vld [vmem:[%s1895_s5 + $0xd4] sm:$0xf]  ;;  %v1470_v5 = vor.u32 %v1543_v58, %v1467_v59  ;;  %v1331_v6 = vld [vmem:[%s1895_s5 + $0xd8] sm:$0xf0]  ;;  %v1270_v11 = vor.u32 %v1493_v2, %v1267_v3  ;;  %v1491_v14 = vld [vmem:[%s1895_s5 + $0x44] sm:$0xf] }
  0x88   : > { %991 = vmatpush.bf16.msra.mxu2 %v1362_v22  ;;  %v1525_v7 = vld [vmem:[%s1895_s5 + $0x154] sm:$0xf]  ;;  %v1395_v8 = vld [vmem:[%s1895_s5 + $0x158] sm:$0xf0]  ;;  %v1334_v12 = vor.u32 %v1509_v4, %v1331_v6  ;;  %v1259_v15 = vld [vmem:[%s1895_s5 + $0x48] sm:$0xf0] }
  0x89   : > { %1004 = vmatpush.bf16.msra.mxu3 %v1426_v26  ;;  %v1541_v9 = vld [vmem:[%s1895_s5 + $0x1d4] sm:$0xf]  ;;  %v1459_v10 = vld [vmem:[%s1895_s5 + $0x1d8] sm:$0xf0]  ;;  %v1398_v13 = vor.u32 %v1525_v7, %v1395_v8  ;;  %v1507_v16 = vld [vmem:[%s1895_s5 + $0xc4] sm:$0xf]  ;;  %v1262_v23 = vor.u32 %v1491_v14, %v1259_v15 }
  0x8a   : > { %966 = vmatpush.bf16.msra.mxu0 %v1226_v33  ;;  %v1462_v17 = vor.u32 %v1541_v9, %v1459_v10  ;;  %v1323_v18 = vld [vmem:[%s1895_s5 + $0xc8] sm:$0xf0]  ;;  %v1523_v19 = vld [vmem:[%s1895_s5 + $0x144] sm:$0xf]  ;;  %v1489_v26 = vld [vmem:[%s1895_s5 + $0x34] sm:$0xf] }
  0x8b   : > { %979 = vmatpush.bf16.msra.mxu1 %v1290_v38  ;;  %v1387_v20 = vld [vmem:[%s1895_s5 + $0x148] sm:$0xf0]  ;;  %v1539_v21 = vld [vmem:[%s1895_s5 + $0x1c4] sm:$0xf]  ;;  %v1326_v24 = vor.u32 %v1507_v16, %v1323_v18  ;;  %v1251_v27 = vld [vmem:[%s1895_s5 + $0x38] sm:$0xf0] }
  0x8c   : > { %992 = vmatpush.bf16.msra.mxu2 %v1354_v39  ;;  %v1451_v22 = vld [vmem:[%s1895_s5 + $0x1c8] sm:$0xf0]  ;;  %v1390_v25 = vor.u32 %v1523_v19, %v1387_v20  ;;  %v1505_v28 = vld [vmem:[%s1895_s5 + $0xb4] sm:$0xf]  ;;  %v1315_v30 = vld [vmem:[%s1895_s5 + $0xb8] sm:$0xf0]  ;;  %v1254_v35 = vor.u32 %v1489_v26, %v1251_v27 }
  0x8d   : > { %1005 = vmatpush.bf16.msra.mxu3 %v1418_v43  ;;  %967 = vmatmul.bf16.vlgmr.msra.gmra.mxu0 %v1984_v61  ;;  %v1454_v29 = vor.u32 %v1539_v21, %v1451_v22  ;;  %v1521_v31 = vld [vmem:[%s1895_s5 + $0x134] sm:$0xf]  ;;  %v1379_v32 = vld [vmem:[%s1895_s5 + $0x138] sm:$0xf0]  ;;  %v1318_v36 = vor.u32 %v1505_v28, %v1315_v30  ;;  %v1487_v38 = vld [vmem:[%s1895_s5 + $0x24] sm:$0xf] }
  0x8e   : > { %1011 = vmatpush.bf16.msrb.mxu0 %v1286_v44  ;;  %980 = vmatmul.bf16.vlgmr.msra.gmra.mxu1 %v1986_v63  ;;  %v1537_v33 = vld [vmem:[%s1895_s5 + $0x1b4] sm:$0xf]  ;;  %v1443_v34 = vld [vmem:[%s1895_s5 + $0x1b8] sm:$0xf0]  ;;  %v1382_v37 = vor.u32 %v1521_v31, %v1379_v32  ;;  %v1243_v39 = vld [vmem:[%s1895_s5 + $0x28] sm:$0xf0] }
  0x8f   : > { %1024 = vmatpush.bf16.msrb.mxu1 %v1350_v46  ;;  %993 = vmatmul.bf16.vlgmr.msra.gmra.mxu2 %v1978_v57  ;;  %v1503_v40 = vld [vmem:[%s1895_s5 + $0xa4] sm:$0xf]  ;;  %v1446_v41 = vor.u32 %v1537_v33, %v1443_v34  ;;  %v1307_v42 = vld [vmem:[%s1895_s5 + $0xa8] sm:$0xf0]  ;;  %v1485_v50 = vld [vmem:[%s1895_s5 + $0x14] sm:$0xf] }
  0x90   : > { %1037 = vmatpush.bf16.msrb.mxu2 %v1414_v47  ;;  %1006 = vmatmul.bf16.vlgmr.msra.gmra.mxu3 %v1982_v60  ;;  %v1519_v43 = vld [vmem:[%s1895_s5 + $0x124] sm:$0xf]  ;;  %v1371_v44 = vld [vmem:[%s1895_s5 + $0x128] sm:$0xf0]  ;;  %v1246_v47 = vor.u32 %v1487_v38, %v1243_v39  ;;  %v1310_v48 = vor.u32 %v1503_v40, %v1307_v42  ;;  %v1235_v51 = vld [vmem:[%s1895_s5 + $0x18] sm:$0xf0] }
  0x91   : > { %1050 = vmatpush.bf16.msrb.mxu3 %v1478_v53  ;;  %v1535_v45 = vld [vmem:[%s1895_s5 + $0x1a4] sm:$0xf]  ;;  %v1435_v46 = vld [vmem:[%s1895_s5 + $0x1a8] sm:$0xf0]  ;;  %v1374_v49 = vor.u32 %v1519_v43, %v1371_v44  ;;  %v1501_v52 = vld [vmem:[%s1895_s5 + $0x94] sm:$0xf] }
  0x92   : > { %1012 = vmatpush.bf16.msrb.mxu0 %v1278_v62  ;;  %v1438_v53 = vor.u32 %v1535_v45, %v1435_v46  ;;  %v1299_v54 = vld [vmem:[%s1895_s5 + $0x98] sm:$0xf0]  ;;  %v1517_v55 = vld [vmem:[%s1895_s5 + $0x114] sm:$0xf]  ;;  %v1238_v62 = vor.u32 %v1485_v50, %v1235_v51  ;;  %v1483_v2 = vld [vmem:[%s1895_s5 + $0x4] sm:$0xf] }
  0x93   : > { %1025 = vmatpush.bf16.msrb.mxu1 %v1342_v0  ;;  %v1363_v56 = vld [vmem:[%s1895_s5 + $0x118] sm:$0xf0]  ;;  %v1533_v58 = vld [vmem:[%s1895_s5 + $0x194] sm:$0xf]  ;;  %v1302_v0 = vor.u32 %v1501_v52, %v1299_v54  ;;  %v1227_v3 = vld [vmem:[%s1895_s5 + $0x8] sm:$0xf0] }
  0x94   : > { %1038 = vmatpush.bf16.msrb.mxu2 %v1406_v1  ;;  %v1427_v59 = vld [vmem:[%s1895_s5 + $0x198] sm:$0xf0]  ;;  %v1366_v1 = vor.u32 %v1517_v55, %v1363_v56  ;;  %v1499_v4 = vld [vmem:[%s1895_s5 + $0x84] sm:$0xf]  ;;  %v1291_v6 = vld [vmem:[%s1895_s5 + $0x88] sm:$0xf0] }
  0x95   : > { %1051 = vmatpush.bf16.msrb.mxu3 %v1470_v5  ;;  %v1430_v5 = vor.u32 %v1533_v58, %v1427_v59  ;;  %v1515_v7 = vld [vmem:[%s1895_s5 + $0x104] sm:$0xf]  ;;  %v1355_v8 = vld [vmem:[%s1895_s5 + $0x108] sm:$0xf0]  ;;  %v559_v21 = vld [vmem:[#allocation2] sm:$0xff] }
  0x96   : > { %1013 = vmatpush.bf16.msrb.mxu0 %v1270_v11  ;;  %v1531_v9 = vld [vmem:[%s1895_s5 + $0x184] sm:$0xf]  ;;  %v1419_v10 = vld [vmem:[%s1895_s5 + $0x188] sm:$0xf0]  ;;  %v1230_v11 = vor.u32 %v1483_v2, %v1227_v3  ;;  %v560_v31 = vld [vmem:[#allocation2 + $0x8] sm:$0xff] }
  0x97   : > { %1026 = vmatpush.bf16.msrb.mxu1 %v1334_v12  ;;  %v1294_v12 = vor.u32 %v1499_v4, %v1291_v6  ;;  %v1422_v14 = vor.u32 %v1531_v9, %v1419_v10 }
  0x98   : > { %1039 = vmatpush.bf16.msrb.mxu2 %v1398_v13  ;;  %v1358_v13 = vor.u32 %v1515_v7, %v1355_v8 }
  0x99   : > { %1052 = vmatpush.bf16.msrb.mxu3 %v1462_v17 }
  0x9a   : > { %1014 = vmatpush.bf16.msrb.mxu0 %v1262_v23 }
  0x9b   : > { %1027 = vmatpush.bf16.msrb.mxu1 %v1326_v24 }
  0x9c   : > { %1040 = vmatpush.bf16.msrb.mxu2 %v1390_v25 }
  0x9d   : > { %1053 = vmatpush.bf16.msrb.mxu3 %v1454_v29 }
  0x9e   : > { %1015 = vmatpush.bf16.msrb.mxu0 %v1254_v35 }
  0x9f   : > { %1028 = vmatpush.bf16.msrb.mxu1 %v1318_v36 }
  0xa0   : > { %1041 = vmatpush.bf16.msrb.mxu2 %v1382_v37 }
  0xa1   : > { %1054 = vmatpush.bf16.msrb.mxu3 %v1446_v41 }
  0xa2   : > { %1016 = vmatpush.bf16.msrb.mxu0 %v1246_v47 }
  0xa3   : > { %1029 = vmatpush.bf16.msrb.mxu1 %v1310_v48 }
  0xa4   : > { %1042 = vmatpush.bf16.msrb.mxu2 %v1374_v49 }
  0xa5   : > { %1055 = vmatpush.bf16.msrb.mxu3 %v1438_v53 }
  0xa6   : > { %1017 = vmatpush.bf16.msrb.mxu0 %v1238_v62 }
  0xa7   : > { %1030 = vmatpush.bf16.msrb.mxu1 %v1302_v0 }
  0xa8   : > { %1043 = vmatpush.bf16.msrb.mxu2 %v1366_v1 }
  0xa9   : > { %1056 = vmatpush.bf16.msrb.mxu3 %v1430_v5 }
  0xaa   : > { %1018 = vmatpush.bf16.msrb.mxu0 %v1230_v11 }
  0xab   : > { %1031 = vmatpush.bf16.msrb.mxu1 %v1294_v12 }
  0xac   : > { %1044 = vmatpush.bf16.msrb.mxu2 %v1358_v13 }
  0xad   : > { %1057 = vmatpush.bf16.msrb.mxu3 %v1422_v14  ;;  %1019 = vmatmul.bf16.vlgmr.msrb.gmra.mxu0 %v1984_v61 }
  0xae   : > { %1032 = vmatmul.bf16.vlgmr.msrb.gmra.mxu1 %v1986_v63 }
  0xaf   : > { %1045 = vmatmul.bf16.vlgmr.msrb.gmra.mxu2 %v1978_v57 }
  0xb0   : > { %1058 = vmatmul.bf16.vlgmr.msrb.gmra.mxu3 %v1982_v60 }
 0x10a   : > { %v968_v15 = vpop.f32.mrf.mxu0 }
 0x10b   : > { %v981_v16 = vpop.f32.mrf.mxu1 }
 0x10c   : > { %v982_v17 = vadd.f32 %v981_v16, %v968_v15 }
 0x112   : > { %v994_v18 = vpop.f32.mrf.mxu2  ;;  %v970_v23 = vpop.f32.mrf.mxu0 }
 0x113   : > { %v995_v19 = vadd.f32 %v994_v18, %v982_v17  ;;  %v1007_v20 = vpop.f32.mrf.mxu3  ;;  %v983_v24 = vpop.f32.mrf.mxu1 }
 0x115   : > { %v1008_v22 = vadd.f32 %v1007_v20, %v995_v19 }
 0x117   : > { %v1063_v25 = vadd.f32 %v1008_v22, %v559_v21 }
 0x119   : > { %1065 = vst [vmem:[#allocation2] sm:$0xff] %v1063_v25 }
 0x11a   : > { %v996_v26 = vpop.f32.mrf.mxu2 }
 0x11b   : > { %v1009_v61 = vpop.f32.mrf.mxu3 }
 0x12a   : > { %v1020_v27 = vpop.f32.mrf.mxu0 }
 0x12b   : > { %v1033_v63 = vpop.f32.mrf.mxu1 }
 0x12c   : > { %v1034_v28 = vadd.f32 %v1033_v63, %v1020_v27 }
 0x132   : > { %v1046_v57 = vpop.f32.mrf.mxu2  ;;  %v1022_v30 = vpop.f32.mrf.mxu0 }
 0x133   : > { %v1047_v29 = vadd.f32 %v1046_v57, %v1034_v28  ;;  %v1059_v60 = vpop.f32.mrf.mxu3  ;;  %v1035_v32 = vpop.f32.mrf.mxu1 }
 0x135   : > { %v1060_v33 = vadd.f32 %v1059_v60, %v1047_v29 }
 0x137   : > { %v1064_v34 = vadd.f32 %v1060_v33, %v560_v31  ;;  %1070 = sbr.rel (%p1479_p13) target bundleno = 324 (0x144), region = 78 }
 0x139   : > { %1066 = vst [vmem:[#allocation2 + $0x8] sm:$0xff] %v1064_v34 }
 0x13a   : > { %v1048_v35 = vpop.f32.mrf.mxu2 }
 0x13b   : > { %v1061_v36 = vpop.f32.mrf.mxu3 }
 0x13c   : > { %v1071_v37 = vld [vmem:[#allocation2] sm:$0xff] }
 0x13d   : > { %v1073_v38 = vld [vmem:[%s539_s12] sm:$0x3] }
 0x13e   : > { %v1075_v40 = vperm.slane %v1073_v38, 0  ;;  %v1076_v41 = vperm.slane %v1073_v38, 1 }
 0x140   : > { %v1072_v39 = vld [vmem:[#allocation2 + $0x8] sm:$0xff]  ;;  %v1079_v42 = vadd.f32 %v1075_v40, %v1071_v37 }
 0x141   : > { %v1080_v43 = vadd.f32 %v1076_v41, %v1072_v39 }
 0x142   : > { %1081 = vst [vmem:[%s1893_s15] sm:$0xff] %v1079_v42 }
 0x143   : > { %1082 = vst [vmem:[%s1893_s15 + $0x8] sm:$0xff] %v1080_v43 }
 0x144 PF: > { %s13_s18 = sadd.s32 1, %s1658_s18   ;;  %s2077_s12 = smov %s1638_s13 }
 0x145   : > { %p10_p0 = scmp.ge.s32.totalorder %s13_s18, 20   ;;  %s2078_s13 = smov %s1732_s25 }
 0x146   : > { %s2079_s14 = smov %s1650_s16  ;;  %s2080_s15 = smov %s1654_s17 }
 0x147   : > { %s2081_s16 = smov %s2084_s19  ;;  %s2082_s17 = smov %s2088_s20 }
 0x148   :  { %12 = sbr.rel (!%p10_p0) target bundleno = 4 (0x4), region = 119 }

</bundles_post_ra>
